<compile_context>
chip_gen: v5e
topology: v5e:2x2
jax: 0.10.0
libtpu: 0.0.40
codegen_flags: <defaults>
</compile_context>

<pallas_src>
import functools

import jax
import jax.numpy as jnp
from jax.experimental import pallas as pl
from jax.experimental.pallas import tpu as pltpu

# ---------------- synthetic configuration (small shapes) ----------------
VBATCH = 1
N_CAM = 2
IMG_H = IMG_W = 16
IMG_C = 1                 # image[:, :, None, ...] -> single input channel
LATENT = 32               # backbone latent_size (per camera, per point)
HIDDEN_XYZ = 64           # MLPWithInputSkips hidden width (output width 64)
N_HARM = 2                # feature_encoder.n_harm -> factor (1 + 2*2) = 5
N_QUERY = 64              # n_query points (Vbatch == 1)
DEC_HIDDEN = 64
DEC_OUT = 3               # microphysics head: (lwc, reff, veff)

D_CAT = LATENT + 2 * HIDDEN_XYZ              # 160 per-camera concatenated width
CF = N_CAM * D_CAT                           # 320 flattened over cameras
CFP = ((CF + 127) // 128) * 128              # 384: lane-aligned padded width
N_BANDS = 1 + 2 * N_HARM                     # 5 harmonic bands (incl. identity)
DEC_IN = CF * N_BANDS                        # 1600 == logical decoder_input_size
DEC_IN_P = CFP * N_BANDS                     # 1920 == padded (kernel) width

XYZ_PAD = 8                                  # 3 -> 8 padded point/cam-center width
CC_ROWS = 8                                  # camera-center rows padded 2 -> 8
OUT_PAD = 128                                # decoder output lanes padded 3 -> 128

GROUP = 4                                    # conv: pixels per lane-dense output row
KPAD = 16                                    # conv: 9*C_in padded to 16


# ======================= Pallas kernels =======================

def _encoder_kernel(p_ref, w_ref, b_ref, o_ref):
    """im2col 3x3 conv + ReLU, block-diagonal over GROUP pixels per row.

    p_ref: (tile, GROUP*KPAD) bf16, w_ref: (GROUP*KPAD, GROUP*LATENT) bf16
    (block-diagonal), b_ref: (1, GROUP*LATENT) f32.  Output rows are 128 lanes
    wide -> unmasked (lane-dense) stores.
    """
    y = jnp.dot(p_ref[...], w_ref[...], preferred_element_type=jnp.float32)
    o_ref[...] = jnp.maximum(y + b_ref[...], 0.0).astype(o_ref.dtype)


def _fused_point_kernel(lat_ref, xyz_ref, cc_ref,
                        mw0, mb0, mw1, mb1, mw2h, mw2x, mb2, mw3, mb3,
                        dw1, db1, dw2, db2, dw3, db3,
                        o_ref, xs_ref, xb_ref):
    """Fused: mlp_cam_center + mlp_xyz + latent concat + FeatureEncoding + decoder.

    Stacked skip-MLP weights: index 0 == mlp_xyz, index 1 == mlp_cam_center.
    The input-skip layer Linear(cat(h, x)) is computed as h@w2h + x@w2x.
    Concatenated-latent layout per point (permutation of the PyTorch cat order,
    zero padded CF=320 -> CFP=384):
        [lat_cam0 | lat_cam1 | xyz | xyz | cc_cam0 | cc_cam1 | 0-pad]
    Harmonic band order: [x, sin(2^0 x), cos(2^0 x), sin(2^1 x), cos(2^1 x)];
    porting a trained checkpoint requires permuting dw1 rows accordingly.
    """
    f32 = jnp.float32
    bf16 = jnp.bfloat16

    def bdot(a, w):                    # bf16 MXU matmul, f32 accumulation
        return jnp.dot(a.astype(bf16), w, preferred_element_type=f32)

    def skip_mlp(x, idx):              # MLPWithInputSkips(4, 3, 3, 64, skips=(2,))
        h = jnp.maximum(bdot(x, mw0[idx]) + mb0[idx], 0.0)
        h = jnp.maximum(bdot(h, mw1[idx]) + mb1[idx], 0.0)
        h = jnp.maximum(bdot(h, mw2h[idx]) + bdot(x, mw2x[idx]) + mb2[idx], 0.0)
        h = jnp.maximum(bdot(h, mw3[idx]) + mb3[idx], 0.0)
        return h

    lat = lat_ref[...]                                   # (tile, N_CAM*LATENT) f32
    tile = lat.shape[0]

    # camera-center embedding (few rows; recomputed per grid step, negligible)
    hc = skip_mlp(cc_ref[...], 1)                        # (CC_ROWS, 64)
    # xyz embedding
    hx = skip_mlp(xyz_ref[...], 0)                       # (tile, 64)

    # build the concatenated per-point latent in an f32 VMEM scratch
    lat_w = N_CAM * LATENT
    xs_ref[:, 0:lat_w] = lat
    for c in range(N_CAM):                               # xyz embed, once per cam
        off = lat_w + c * HIDDEN_XYZ
        xs_ref[:, off:off + HIDDEN_XYZ] = hx
    for c in range(N_CAM):                               # cam-center embeds
        off = lat_w + N_CAM * HIDDEN_XYZ + c * HIDDEN_XYZ
        xs_ref[:, off:off + HIDDEN_XYZ] = jnp.broadcast_to(
            hc[c:c + 1, :], (tile, HIDDEN_XYZ))
    xs_ref[:, CF:CFP] = jnp.zeros((tile, CFP - CF), f32)
    xcat = xs_ref[...]                                   # (tile, CFP)

    # harmonic FeatureEncoding -> lane-aligned bf16 bands in VMEM scratch
    xb_ref[:, 0:CFP] = xcat.astype(bf16)
    col = CFP
    for k in range(N_HARM):
        f = float(2 ** k)
        xb_ref[:, col:col + CFP] = jnp.sin(xcat * f).astype(bf16); col += CFP
        xb_ref[:, col:col + CFP] = jnp.cos(xcat * f).astype(bf16); col += CFP

    # decoder MLP: one long-K matmul for layer 1, then two small layers
    h = jnp.maximum(
        jnp.dot(xb_ref[...], dw1[...], preferred_element_type=f32) + db1[...], 0.0)
    h = jnp.maximum(bdot(h, dw2[...]) + db2[...], 0.0)
    o_ref[...] = (bdot(h, dw3[...]) + db3[...]).astype(o_ref.dtype)


# ======================= Pallas wrappers =======================

def encoder_matmul(pg, w_bd, b_bd):
    """Single-step (grid may grow with image size) lane-dense conv matmul."""
    Pg, Kg = pg.shape
    Mg = w_bd.shape[1]
    tile = min(512, Pg)
    pg_pad = pl.cdiv(Pg, tile) * tile
    if pg_pad != Pg:
        pg = jnp.pad(pg, ((0, pg_pad - Pg), (0, 0)))
    out = pl.pallas_call(
        _encoder_kernel,
        out_shape=jax.ShapeDtypeStruct((pg_pad, Mg), jnp.float32),
        grid=(pg_pad // tile,),
        in_specs=[
            pl.BlockSpec((tile, Kg), lambda i: (i, 0)),
            pl.BlockSpec((Kg, Mg), lambda i: (0, 0)),
            pl.BlockSpec((1, Mg), lambda i: (0, 0)),
        ],
        out_specs=pl.BlockSpec((tile, Mg), lambda i: (i, 0)),
        compiler_params=pltpu.CompilerParams(dimension_semantics=("parallel",)),
    )(pg, w_bd, b_bd)
    return out[:Pg]


def _point_tile(n):
    """>=2 grid steps at small n (keeps both v7x TensorCores busy); big tiles at scale."""
    if n >= 1024:
        return 512
    if n >= 512:
        return 256
    return int(max(8, pl.next_power_of_2(pl.cdiv(n, 2))))


def fused_point_decoder(lat, xyz, cc, p):
    """lat: (n, N_CAM*LATENT), xyz: (n, XYZ_PAD), cc: (CC_ROWS, XYZ_PAD) -> (n, DEC_OUT)."""
    n = lat.shape[0]
    tile = _point_tile(n)
    n_pad = pl.cdiv(n, tile) * tile
    if n_pad != n:
        lat = jnp.pad(lat, ((0, n_pad - n), (0, 0)))
        xyz = jnp.pad(xyz, ((0, n_pad - n), (0, 0)))

    full2 = lambda a: pl.BlockSpec(a.shape, lambda i: (0, 0))
    full3 = lambda a: pl.BlockSpec(a.shape, lambda i: (0, 0, 0))

    out = pl.pallas_call(
        _fused_point_kernel,
        out_shape=jax.ShapeDtypeStruct((n_pad, OUT_PAD), jnp.float32),
        grid=(n_pad // tile,),
        in_specs=[
            pl.BlockSpec((tile, N_CAM * LATENT), lambda i: (i, 0)),
            pl.BlockSpec((tile, XYZ_PAD), lambda i: (i, 0)),
            full2(cc),
            full3(p['mw0']), full3(p['mb0']), full3(p['mw1']), full3(p['mb1']),
            full3(p['mw2h']), full3(p['mw2x']), full3(p['mb2']),
            full3(p['mw3']), full3(p['mb3']),
            full2(p['dw1']), full2(p['db1']), full2(p['dw2']), full2(p['db2']),
            full2(p['dw3']), full2(p['db3']),
        ],
        out_specs=pl.BlockSpec((tile, OUT_PAD), lambda i: (i, 0)),
        scratch_shapes=[
            pltpu.VMEM((tile, CFP), jnp.float32),            # concatenated latent
            pltpu.VMEM((tile, DEC_IN_P), jnp.bfloat16),      # harmonic band tensor
        ],
        compiler_params=pltpu.CompilerParams(dimension_semantics=("parallel",)),
    )(lat, xyz, cc,
      p['mw0'], p['mb0'], p['mw1'], p['mb1'], p['mw2h'], p['mw2x'], p['mb2'],
      p['mw3'], p['mb3'],
      p['dw1'], p['db1'], p['dw2'], p['db2'], p['dw3'], p['db3'])
    return out[:n, :DEC_OUT]


# ======================= JAX glue (geometry / gathers) =======================

def im2col_3x3(img_nhwc):
    """(B, H, W, C) -> (B*H*W, 9*C), SAME zero padding, 3x3 window."""
    B, H, W, C = img_nhwc.shape
    p = jnp.pad(img_nhwc, ((0, 0), (1, 1), (1, 1), (0, 0)))
    cols = [p[:, di:di + H, dj:dj + W, :] for di in range(3) for dj in range(3)]
    return jnp.concatenate(cols, axis=-1).reshape(B * H * W, 9 * C)


def image_encoder(image_ncHW, enc):
    """Synthetic Backbone: one 3x3 conv (C_in -> LATENT) + ReLU via Pallas matmul."""
    B, C, H, W = image_ncHW.shape
    nhwc = jnp.transpose(image_ncHW, (0, 2, 3, 1))
    patches = im2col_3x3(nhwc)                                  # (B*H*W, 9*C)
    patches = jnp.pad(patches, ((0, 0), (0, KPAD - 9 * C)))     # K 9 -> 16
    pg = patches.reshape(B * H * W // GROUP, GROUP * KPAD).astype(jnp.bfloat16)
    out = encoder_matmul(pg, enc['w'], enc['b'])                # (P/4, 128)
    return out.reshape(B, H, W, LATENT)


def project_points(points, cam_offsets):
    """Simplified cameras.project_points(..., screen=True): deterministic pinhole."""
    u = points[:, 0] * (IMG_W - 1)
    v = points[:, 1] * (IMG_H - 1)
    uv = jnp.stack([u, v], axis=-1)                             # (N, 2)
    uv = uv[None, :, :] + cam_offsets[:, None, :]               # (n_cam, N, 2)
    return uv[None]                                             # (Vbatch=1, n_cam, N, 2)


def sample_roi(feat_maps, uv):
    """Sample per-camera features at projected uv.

    TODO(synk): real Backbone.sample_roi does multi-scale bilinear ROI sampling;
    approximated here with a nearest-neighbour gather (plain JAX glue).
    """
    iu = jnp.clip(jnp.round(uv[..., 0]).astype(jnp.int32), 0, IMG_W - 1)
    iv = jnp.clip(jnp.round(uv[..., 1]).astype(jnp.int32), 0, IMG_H - 1)
    b = jnp.arange(VBATCH)[:, None, None]
    c = jnp.arange(N_CAM)[None, :, None]
    return feat_maps[b, c, iv, iu]                              # (V, n_cam, N, LATENT)


def ctnet_microphysics_forward(image, query_points, volume_vals,
                               cam_centers, cam_offsets, params):
    """Training-branch forward of CTnetMicrophysics (Vbatch == 1)."""
    if image.ndim == 4:                              # image[:, :, None, ...]
        image = image[:, :, None, ...]               # (V, n_cam, 1, H, W)
    Vbatch = image.shape[0]
    flat_img = image.reshape(-1, *image.shape[2:])   # (V*n_cam, 1, H, W)

    feat = image_encoder(flat_img, params['encoder'])            # (V*n_cam, H, W, L)
    feat = feat.reshape(Vbatch, N_CAM, IMG_H, IMG_W, LATENT)

    uv = project_points(query_points, cam_offsets)               # (V, n_cam, N, 2)

    # latent = vstack(sample_roi(...)).transpose(0, 1)
    latent = sample_roi(feat, uv)                                # (V, n_cam, N, L)
    latent = jnp.transpose(latent[0], (1, 0, 2))                 # (N, n_cam, L)
    n = latent.shape[0]
    lat_flat = latent.reshape(n, N_CAM * LATENT)

    # pad 3-wide inputs to XYZ_PAD lanes (zero-padded weight rows in params)
    cc = jnp.pad(cam_centers.reshape(-1, 3),
                 ((0, CC_ROWS - Vbatch * N_CAM), (0, XYZ_PAD - 3)))
    xyz = jnp.pad(query_points, ((0, 0), (0, XYZ_PAD - 3)))

    # fused mlp_cam_center + mlp_xyz + concat + FeatureEncoding + Decoder
    output = fused_point_decoder(lat_flat, xyz, cc, params['point'])

    # torch.split(output, n_query) with a single batch element -> tuple of 1
    return {'output': (output,), 'volume': (volume_vals,)}


# ======================= deterministic parameter init =======================

def init_params(key):
    ks = iter(jax.random.split(key, 64))

    def dense(shape, scale=0.1):
        return jax.random.normal(next(ks), shape, jnp.float32) * scale

    # ---- logical (PyTorch-shaped) weights ----
    enc_w = dense((9 * IMG_C, LATENT))
    enc_b = dense((LATENT,))

    def skip_logical():
        return {'w0': dense((3, HIDDEN_XYZ)), 'b0': dense((HIDDEN_XYZ,)),
                'w1': dense((HIDDEN_XYZ, HIDDEN_XYZ)), 'b1': dense((HIDDEN_XYZ,)),
                'w2': dense((HIDDEN_XYZ + 3, HIDDEN_XYZ)), 'b2': dense((HIDDEN_XYZ,)),
                'w3': dense((HIDDEN_XYZ, HIDDEN_XYZ)), 'b3': dense((HIDDEN_XYZ,))}
    xyz_l, cam_l = skip_logical(), skip_logical()

    dec_w1 = dense((N_BANDS, CF, DEC_HIDDEN), 0.05)
    dec_b1 = dense((DEC_HIDDEN,))
    dec_w2 = dense((DEC_HIDDEN, DEC_HIDDEN))
    dec_b2 = dense((DEC_HIDDEN,))
    dec_w3 = dense((DEC_HIDDEN, DEC_OUT))
    dec_b3 = dense((DEC_OUT,))

    bf16 = jnp.bfloat16

    # ---- kernel-layout params: encoder (zero-pad K, block-diag over GROUP pixels) ----
    wpad = jnp.zeros((KPAD, LATENT), jnp.float32).at[:9 * IMG_C].set(enc_w)
    w_bd = jnp.zeros((GROUP * KPAD, GROUP * LATENT), jnp.float32)
    for g in range(GROUP):
        w_bd = w_bd.at[g * KPAD:(g + 1) * KPAD,
                       g * LATENT:(g + 1) * LATENT].set(wpad)
    encoder = {'w': w_bd.astype(bf16), 'b': jnp.tile(enc_b, GROUP)[None, :]}

    # ---- kernel-layout params: fused point kernel ----
    def pad_rows(w, rows):
        return jnp.zeros((rows, w.shape[1]), jnp.float32).at[:w.shape[0]].set(w)

    def stack(fn):
        return jnp.stack([fn(xyz_l), fn(cam_l)])      # index 0 = xyz, 1 = cam

    point = {
        'mw0':  stack(lambda p: pad_rows(p['w0'], XYZ_PAD)).astype(bf16),
        'mb0':  stack(lambda p: p['b0'][None, :]),
        'mw1':  stack(lambda p: p['w1']).astype(bf16),
        'mb1':  stack(lambda p: p['b1'][None, :]),
        'mw2h': stack(lambda p: p['w2'][:HIDDEN_XYZ]).astype(bf16),
        'mw2x': stack(lambda p: pad_rows(p['w2'][HIDDEN_XYZ:], XYZ_PAD)).astype(bf16),
        'mb2':  stack(lambda p: p['b2'][None, :]),
        'mw3':  stack(lambda p: p['w3']).astype(bf16),
        'mb3':  stack(lambda p: p['b3'][None, :]),
        # decoder layer 1: per-band zero pad CF -> CFP, then flatten to one long-K matrix
        'dw1': jnp.zeros((N_BANDS, CFP, DEC_HIDDEN), jnp.float32)
                  .at[:, :CF, :].set(dec_w1)
                  .reshape(N_BANDS * CFP, DEC_HIDDEN).astype(bf16),
        'db1': dec_b1[None, :],
        'dw2': dec_w2.astype(bf16),
        'db2': dec_b2[None, :],
        # decoder output padded to 128 lanes (lane-dense stores); cols >= DEC_OUT are zero
        'dw3': jnp.zeros((DEC_HIDDEN, OUT_PAD), jnp.float32)
                  .at[:, :DEC_OUT].set(dec_w3).astype(bf16),
        'db3': jnp.zeros((1, OUT_PAD), jnp.float32).at[0, :DEC_OUT].set(dec_b3),
    }
    return {'encoder': encoder, 'point': point}


if __name__ == "__main__":
    key = jax.random.PRNGKey(0)
    k_img, k_pts, k_vol, k_cc, k_par = jax.random.split(key, 5)

    # synthetic inputs (Volumes.get_query_points_microphysics & cameras are glue)
    image = jax.random.uniform(k_img, (VBATCH, N_CAM, IMG_H, IMG_W), jnp.float32)
    query_points = jax.random.uniform(k_pts, (N_QUERY, 3), jnp.float32)   # in [0,1]^3
    volume_vals = jax.random.uniform(k_vol, (N_QUERY, 3), jnp.float32)    # gt microphysics
    cam_centers = jax.random.normal(k_cc, (VBATCH, N_CAM, 3), jnp.float32)
    cam_offsets = jnp.array([[0.0, 0.0], [1.0, -1.0]], jnp.float32)

    params = init_params(k_par)

    fwd = jax.jit(ctnet_microphysics_forward)
    out = fwd(image, query_points, volume_vals, cam_centers, cam_offsets, params)
    jax.block_until_ready(out)

    assert out['output'][0].shape == (N_QUERY, DEC_OUT)
    assert out['volume'][0].shape == (N_QUERY, 3)
    print("KERNEL_OK")
</pallas_src>

<mosaic_0001>
module attributes {stable_mosaic.version = 11 : i64} {
  func.func @_encoder_kernel(%arg0: i32, %arg1: memref<128x64xbf16, #tpu.memory_space<vmem>>, %arg2: memref<64x128xbf16, #tpu.memory_space<vmem>>, %arg3: memref<1x128xf32, #tpu.memory_space<vmem>>, %arg4: memref<128x128xf32, #tpu.memory_space<vmem>>) attributes {dimension_semantics = [#tpu.dimension_semantics<parallel>], iteration_bounds = array<i64: 1>, scalar_prefetch = 0 : i64, scratch_operands = 0 : i64, tpu.core_type = #tpu.core_type<tc>, window_params = [{transform_indices = @transform_0, window_bounds = array<i64: 128, 64>}, {pipeline_mode = #tpu.pipeline_mode<synchronous>, transform_indices = @transform_1, window_bounds = array<i64: 64, 128>}, {pipeline_mode = #tpu.pipeline_mode<synchronous>, transform_indices = @transform_2, window_bounds = array<i64: 1, 128>}, {transform_indices = @transform_3, window_bounds = array<i64: 128, 128>}]} {
    %c0 = arith.constant 0 : index
    %c0_0 = arith.constant 0 : index
    %0 = vector.load %arg1[%c0, %c0_0] : memref<128x64xbf16, #tpu.memory_space<vmem>>, vector<128x64xbf16>
    %c0_1 = arith.constant 0 : index
    %c0_2 = arith.constant 0 : index
    %1 = vector.load %arg2[%c0_1, %c0_2] : memref<64x128xbf16, #tpu.memory_space<vmem>>, vector<64x128xbf16>
    %cst = arith.constant dense<0.000000e+00> : vector<128x128xf32>
    %2 = tpu.matmul %0, %1, %cst {dimension_numbers = #tpu.dot_dimension_numbers<[1], [0], [0], [1], [0, 0, 1, 1], [], []>} : vector<128x64xbf16>, vector<64x128xbf16>, vector<128x128xf32> -> vector<128x128xf32>
    %c0_3 = arith.constant 0 : index
    %c0_4 = arith.constant 0 : index
    %3 = vector.load %arg3[%c0_3, %c0_4] : memref<1x128xf32, #tpu.memory_space<vmem>>, vector<1x128xf32>
    %4 = vector.broadcast %3 : vector<1x128xf32> to vector<128x128xf32>
    %5 = arith.addf %2, %4 : vector<128x128xf32>
    %cst_5 = arith.constant 0.000000e+00 : f32
    %6 = vector.broadcast %cst_5 : f32 to vector<128x128xf32>
    %7 = arith.maximumf %5, %6 : vector<128x128xf32>
    %c0_6 = arith.constant 0 : index
    %c0_7 = arith.constant 0 : index
    %8 = vector.load %arg4[%c0_6, %c0_7] : memref<128x128xf32, #tpu.memory_space<vmem>>, vector<128x128xf32>
    tpu.vector_store %arg4[%c0_6, %c0_7], %7 {strides = array<i32>} : memref<128x128xf32, #tpu.memory_space<vmem>>, vector<128x128xf32>,
    return
  }
  func.func @transform_0(%arg0: i32) -> (i32, i32) {
    %c0_i32 = arith.constant 0 : i32
    %c0_i32_0 = arith.constant 0 : i32
    return %arg0, %c0_i32 : i32, i32
  }
  func.func @transform_1(%arg0: i32) -> (i32, i32) {
    %c0_i32 = arith.constant 0 : i32
    %c0_i32_0 = arith.constant 0 : i32
    %c0_i32_1 = arith.constant 0 : i32
    return %c0_i32, %c0_i32_0 : i32, i32
  }
  func.func @transform_2(%arg0: i32) -> (i32, i32) {
    %c0_i32 = arith.constant 0 : i32
    %c0_i32_0 = arith.constant 0 : i32
    %c0_i32_1 = arith.constant 0 : i32
    return %c0_i32, %c0_i32_0 : i32, i32
  }
  func.func @transform_3(%arg0: i32) -> (i32, i32) {
    %c0_i32 = arith.constant 0 : i32
    %c0_i32_0 = arith.constant 0 : i32
    return %arg0, %c0_i32 : i32, i32
  }
}

module attributes {stable_mosaic.version = 11 : i64} {
  func.func @_fused_point_kernel(%arg0: i32, %arg1: memref<32x64xf32, #tpu.memory_space<vmem>>, %arg2: memref<32x8xf32, #tpu.memory_space<vmem>>, %arg3: memref<8x8xf32, #tpu.memory_space<vmem>>, %arg4: memref<2x8x64xbf16, #tpu.memory_space<vmem>>, %arg5: memref<2x1x64xf32, #tpu.memory_space<vmem>>, %arg6: memref<2x64x64xbf16, #tpu.memory_space<vmem>>, %arg7: memref<2x1x64xf32, #tpu.memory_space<vmem>>, %arg8: memref<2x64x64xbf16, #tpu.memory_space<vmem>>, %arg9: memref<2x8x64xbf16, #tpu.memory_space<vmem>>, %arg10: memref<2x1x64xf32, #tpu.memory_space<vmem>>, %arg11: memref<2x64x64xbf16, #tpu.memory_space<vmem>>, %arg12: memref<2x1x64xf32, #tpu.memory_space<vmem>>, %arg13: memref<1920x64xbf16, #tpu.memory_space<vmem>>, %arg14: memref<1x64xf32, #tpu.memory_space<vmem>>, %arg15: memref<64x64xbf16, #tpu.memory_space<vmem>>, %arg16: memref<1x64xf32, #tpu.memory_space<vmem>>, %arg17: memref<64x128xbf16, #tpu.memory_space<vmem>>, %arg18: memref<1x128xf32, #tpu.memory_space<vmem>>, %arg19: memref<32x128xf32, #tpu.memory_space<vmem>>, %arg20: memref<32x384xf32, #tpu.memory_space<vmem>>, %arg21: memref<32x1920xbf16, #tpu.memory_space<vmem>>) attributes {dimension_semantics = [#tpu.dimension_semantics<parallel>], iteration_bounds = array<i64: 2>, scalar_prefetch = 0 : i64, scratch_operands = 2 : i64, tpu.core_type = #tpu.core_type<tc>, window_params = [{transform_indices = @transform_0, window_bounds = array<i64: 32, 64>}, {transform_indices = @transform_1, window_bounds = array<i64: 32, 8>}, {pipeline_mode = #tpu.pipeline_mode<synchronous>, transform_indices = @transform_2, window_bounds = array<i64: 8, 8>}, {pipeline_mode = #tpu.pipeline_mode<synchronous>, transform_indices = @transform_3, window_bounds = array<i64: 2, 8, 64>}, {pipeline_mode = #tpu.pipeline_mode<synchronous>, transform_indices = @transform_4, window_bounds = array<i64: 2, 1, 64>}, {pipeline_mode = #tpu.pipeline_mode<synchronous>, transform_indices = @transform_5, window_bounds = array<i64: 2, 64, 64>}, {pipeline_mode = #tpu.pipeline_mode<synchronous>, transform_indices = @transform_6, window_bounds = array<i64: 2, 1, 64>}, {pipeline_mode = #tpu.pipeline_mode<synchronous>, transform_indices = @transform_7, window_bounds = array<i64: 2, 64, 64>}, {pipeline_mode = #tpu.pipeline_mode<synchronous>, transform_indices = @transform_8, window_bounds = array<i64: 2, 8, 64>}, {pipeline_mode = #tpu.pipeline_mode<synchronous>, transform_indices = @transform_9, window_bounds = array<i64: 2, 1, 64>}, {pipeline_mode = #tpu.pipeline_mode<synchronous>, transform_indices = @transform_10, window_bounds = array<i64: 2, 64, 64>}, {pipeline_mode = #tpu.pipeline_mode<synchronous>, transform_indices = @transform_11, window_bounds = array<i64: 2, 1, 64>}, {pipeline_mode = #tpu.pipeline_mode<synchronous>, transform_indices = @transform_12, window_bounds = array<i64: 1920, 64>}, {pipeline_mode = #tpu.pipeline_mode<synchronous>, transform_indices = @transform_13, window_bounds = array<i64: 1, 64>}, {pipeline_mode = #tpu.pipeline_mode<synchronous>, transform_indices = @transform_14, window_bounds = array<i64: 64, 64>}, {pipeline_mode = #tpu.pipeline_mode<synchronous>, transform_indices = @transform_15, window_bounds = array<i64: 1, 64>}, {pipeline_mode = #tpu.pipeline_mode<synchronous>, transform_indices = @transform_16, window_bounds = array<i64: 64, 128>}, {pipeline_mode = #tpu.pipeline_mode<synchronous>, transform_indices = @transform_17, window_bounds = array<i64: 1, 128>}, {transform_indices = @transform_18, window_bounds = array<i64: 32, 128>}]} {
    %c0 = arith.constant 0 : index
    %c0_0 = arith.constant 0 : index
    %0 = vector.load %arg1[%c0, %c0_0] : memref<32x64xf32, #tpu.memory_space<vmem>>, vector<32x64xf32>
    %c0_1 = arith.constant 0 : index
    %c0_2 = arith.constant 0 : index
    %1 = vector.load %arg3[%c0_1, %c0_2] : memref<8x8xf32, #tpu.memory_space<vmem>>, vector<8x8xf32>
    %c1 = arith.constant 1 : index
    %c0_3 = arith.constant 0 : index
    %c0_4 = arith.constant 0 : index
    %2 = vector.load %arg4[%c1, %c0_3, %c0_4] : memref<2x8x64xbf16, #tpu.memory_space<vmem>>, vector<1x8x64xbf16>
    %3 = vector.shape_cast %2 : vector<1x8x64xbf16> to vector<8x64xbf16>
    %4 = arith.truncf %1 : vector<8x8xf32> to vector<8x8xbf16>
    %cst = arith.constant dense<0.000000e+00> : vector<8x64xf32>
    %5 = tpu.matmul %4, %3, %cst {dimension_numbers = #tpu.dot_dimension_numbers<[1], [0], [0], [1], [0, 0, 1, 1], [], []>} : vector<8x8xbf16>, vector<8x64xbf16>, vector<8x64xf32> -> vector<8x64xf32>
    %c1_5 = arith.constant 1 : index
    %c0_6 = arith.constant 0 : index
    %c0_7 = arith.constant 0 : index
    %6 = vector.load %arg5[%c1_5, %c0_6, %c0_7] : memref<2x1x64xf32, #tpu.memory_space<vmem>>, vector<1x1x64xf32>
    %7 = vector.shape_cast %6 : vector<1x1x64xf32> to vector<1x64xf32>
    %8 = vector.broadcast %7 : vector<1x64xf32> to vector<8x64xf32>
    %9 = arith.addf %5, %8 : vector<8x64xf32>
    %cst_8 = arith.constant 0.000000e+00 : f32
    %10 = vector.broadcast %cst_8 : f32 to vector<8x64xf32>
    %11 = arith.maximumf %9, %10 : vector<8x64xf32>
    %c1_9 = arith.constant 1 : index
    %c0_10 = arith.constant 0 : index
    %c0_11 = arith.constant 0 : index
    %12 = vector.load %arg6[%c1_9, %c0_10, %c0_11] : memref<2x64x64xbf16, #tpu.memory_space<vmem>>, vector<1x64x64xbf16>
    %13 = vector.shape_cast %12 : vector<1x64x64xbf16> to vector<64x64xbf16>
    %14 = arith.truncf %11 : vector<8x64xf32> to vector<8x64xbf16>
    %cst_12 = arith.constant dense<0.000000e+00> : vector<8x64xf32>
    %15 = tpu.matmul %14, %13, %cst_12 {dimension_numbers = #tpu.dot_dimension_numbers<[1], [0], [0], [1], [0, 0, 1, 1], [], []>} : vector<8x64xbf16>, vector<64x64xbf16>, vector<8x64xf32> -> vector<8x64xf32>
    %c1_13 = arith.constant 1 : index
    %c0_14 = arith.constant 0 : index
    %c0_15 = arith.constant 0 : index
    %16 = vector.load %arg7[%c1_13, %c0_14, %c0_15] : memref<2x1x64xf32, #tpu.memory_space<vmem>>, vector<1x1x64xf32>
    %17 = vector.shape_cast %16 : vector<1x1x64xf32> to vector<1x64xf32>
    %18 = vector.broadcast %17 : vector<1x64xf32> to vector<8x64xf32>
    %19 = arith.addf %15, %18 : vector<8x64xf32>
    %cst_16 = arith.constant 0.000000e+00 : f32
    %20 = vector.broadcast %cst_16 : f32 to vector<8x64xf32>
    %21 = arith.maximumf %19, %20 : vector<8x64xf32>
    %c1_17 = arith.constant 1 : index
    %c0_18 = arith.constant 0 : index
    %c0_19 = arith.constant 0 : index
    %22 = vector.load %arg8[%c1_17, %c0_18, %c0_19] : memref<2x64x64xbf16, #tpu.memory_space<vmem>>, vector<1x64x64xbf16>
    %23 = vector.shape_cast %22 : vector<1x64x64xbf16> to vector<64x64xbf16>
    %24 = arith.truncf %21 : vector<8x64xf32> to vector<8x64xbf16>
    %cst_20 = arith.constant dense<0.000000e+00> : vector<8x64xf32>
    %25 = tpu.matmul %24, %23, %cst_20 {dimension_numbers = #tpu.dot_dimension_numbers<[1], [0], [0], [1], [0, 0, 1, 1], [], []>} : vector<8x64xbf16>, vector<64x64xbf16>, vector<8x64xf32> -> vector<8x64xf32>
    %c1_21 = arith.constant 1 : index
    %c0_22 = arith.constant 0 : index
    %c0_23 = arith.constant 0 : index
    %26 = vector.load %arg9[%c1_21, %c0_22, %c0_23] : memref<2x8x64xbf16, #tpu.memory_space<vmem>>, vector<1x8x64xbf16>
    %27 = vector.shape_cast %26 : vector<1x8x64xbf16> to vector<8x64xbf16>
    %28 = arith.truncf %1 : vector<8x8xf32> to vector<8x8xbf16>
    %cst_24 = arith.constant dense<0.000000e+00> : vector<8x64xf32>
    %29 = tpu.matmul %28, %27, %cst_24 {dimension_numbers = #tpu.dot_dimension_numbers<[1], [0], [0], [1], [0, 0, 1, 1], [], []>} : vector<8x8xbf16>, vector<8x64xbf16>, vector<8x64xf32> -> vector<8x64xf32>
    %30 = arith.addf %25, %29 : vector<8x64xf32>
    %c1_25 = arith.constant 1 : index
    %c0_26 = arith.constant 0 : index
    %c0_27 = arith.constant 0 : index
    %31 = vector.load %arg10[%c1_25, %c0_26, %c0_27] : memref<2x1x64xf32, #tpu.memory_space<vmem>>, vector<1x1x64xf32>
    %32 = vector.shape_cast %31 : vector<1x1x64xf32> to vector<1x64xf32>
    %33 = vector.broadcast %32 : vector<1x64xf32> to vector<8x64xf32>
    %34 = arith.addf %30, %33 : vector<8x64xf32>
    %cst_28 = arith.constant 0.000000e+00 : f32
    %35 = vector.broadcast %cst_28 : f32 to vector<8x64xf32>
    %36 = arith.maximumf %34, %35 : vector<8x64xf32>
    %c1_29 = arith.constant 1 : index
    %c0_30 = arith.constant 0 : index
    %c0_31 = arith.constant 0 : index
    %37 = vector.load %arg11[%c1_29, %c0_30, %c0_31] : memref<2x64x64xbf16, #tpu.memory_space<vmem>>, vector<1x64x64xbf16>
    %38 = vector.shape_cast %37 : vector<1x64x64xbf16> to vector<64x64xbf16>
    %39 = arith.truncf %36 : vector<8x64xf32> to vector<8x64xbf16>
    %cst_32 = arith.constant dense<0.000000e+00> : vector<8x64xf32>
    %40 = tpu.matmul %39, %38, %cst_32 {dimension_numbers = #tpu.dot_dimension_numbers<[1], [0], [0], [1], [0, 0, 1, 1], [], []>} : vector<8x64xbf16>, vector<64x64xbf16>, vector<8x64xf32> -> vector<8x64xf32>
    %c1_33 = arith.constant 1 : index
    %c0_34 = arith.constant 0 : index
    %c0_35 = arith.constant 0 : index
    %41 = vector.load %arg12[%c1_33, %c0_34, %c0_35] : memref<2x1x64xf32, #tpu.memory_space<vmem>>, vector<1x1x64xf32>
    %42 = vector.shape_cast %41 : vector<1x1x64xf32> to vector<1x64xf32>
    %43 = vector.broadcast %42 : vector<1x64xf32> to vector<8x64xf32>
    %44 = arith.addf %40, %43 : vector<8x64xf32>
    %cst_36 = arith.constant 0.000000e+00 : f32
    %45 = vector.broadcast %cst_36 : f32 to vector<8x64xf32>
    %46 = arith.maximumf %44, %45 : vector<8x64xf32>
    %c0_37 = arith.constant 0 : index
    %c0_38 = arith.constant 0 : index
    %47 = vector.load %arg2[%c0_37, %c0_38] : memref<32x8xf32, #tpu.memory_space<vmem>>, vector<32x8xf32>
    %c0_39 = arith.constant 0 : index
    %c0_40 = arith.constant 0 : index
    %c0_41 = arith.constant 0 : index
    %48 = vector.load %arg4[%c0_39, %c0_40, %c0_41] : memref<2x8x64xbf16, #tpu.memory_space<vmem>>, vector<1x8x64xbf16>
    %49 = vector.shape_cast %48 : vector<1x8x64xbf16> to vector<8x64xbf16>
    %50 = arith.truncf %47 : vector<32x8xf32> to vector<32x8xbf16>
    %cst_42 = arith.constant dense<0.000000e+00> : vector<32x64xf32>
    %51 = tpu.matmul %50, %49, %cst_42 {dimension_numbers = #tpu.dot_dimension_numbers<[1], [0], [0], [1], [0, 0, 1, 1], [], []>} : vector<32x8xbf16>, vector<8x64xbf16>, vector<32x64xf32> -> vector<32x64xf32>
    %c0_43 = arith.constant 0 : index
    %c0_44 = arith.constant 0 : index
    %c0_45 = arith.constant 0 : index
    %52 = vector.load %arg5[%c0_43, %c0_44, %c0_45] : memref<2x1x64xf32, #tpu.memory_space<vmem>>, vector<1x1x64xf32>
    %53 = vector.shape_cast %52 : vector<1x1x64xf32> to vector<1x64xf32>
    %54 = vector.broadcast %53 : vector<1x64xf32> to vector<32x64xf32>
    %55 = arith.addf %51, %54 : vector<32x64xf32>
    %cst_46 = arith.constant 0.000000e+00 : f32
    %56 = vector.broadcast %cst_46 : f32 to vector<32x64xf32>
    %57 = arith.maximumf %55, %56 : vector<32x64xf32>
    %c0_47 = arith.constant 0 : index
    %c0_48 = arith.constant 0 : index
    %c0_49 = arith.constant 0 : index
    %58 = vector.load %arg6[%c0_47, %c0_48, %c0_49] : memref<2x64x64xbf16, #tpu.memory_space<vmem>>, vector<1x64x64xbf16>
    %59 = vector.shape_cast %58 : vector<1x64x64xbf16> to vector<64x64xbf16>
    %60 = arith.truncf %57 : vector<32x64xf32> to vector<32x64xbf16>
    %cst_50 = arith.constant dense<0.000000e+00> : vector<32x64xf32>
    %61 = tpu.matmul %60, %59, %cst_50 {dimension_numbers = #tpu.dot_dimension_numbers<[1], [0], [0], [1], [0, 0, 1, 1], [], []>} : vector<32x64xbf16>, vector<64x64xbf16>, vector<32x64xf32> -> vector<32x64xf32>
    %c0_51 = arith.constant 0 : index
    %c0_52 = arith.constant 0 : index
    %c0_53 = arith.constant 0 : index
    %62 = vector.load %arg7[%c0_51, %c0_52, %c0_53] : memref<2x1x64xf32, #tpu.memory_space<vmem>>, vector<1x1x64xf32>
    %63 = vector.shape_cast %62 : vector<1x1x64xf32> to vector<1x64xf32>
    %64 = vector.broadcast %63 : vector<1x64xf32> to vector<32x64xf32>
    %65 = arith.addf %61, %64 : vector<32x64xf32>
    %cst_54 = arith.constant 0.000000e+00 : f32
    %66 = vector.broadcast %cst_54 : f32 to vector<32x64xf32>
    %67 = arith.maximumf %65, %66 : vector<32x64xf32>
    %c0_55 = arith.constant 0 : index
    %c0_56 = arith.constant 0 : index
    %c0_57 = arith.constant 0 : index
    %68 = vector.load %arg8[%c0_55, %c0_56, %c0_57] : memref<2x64x64xbf16, #tpu.memory_space<vmem>>, vector<1x64x64xbf16>
    %69 = vector.shape_cast %68 : vector<1x64x64xbf16> to vector<64x64xbf16>
    %70 = arith.truncf %67 : vector<32x64xf32> to vector<32x64xbf16>
    %cst_58 = arith.constant dense<0.000000e+00> : vector<32x64xf32>
    %71 = tpu.matmul %70, %69, %cst_58 {dimension_numbers = #tpu.dot_dimension_numbers<[1], [0], [0], [1], [0, 0, 1, 1], [], []>} : vector<32x64xbf16>, vector<64x64xbf16>, vector<32x64xf32> -> vector<32x64xf32>
    %c0_59 = arith.constant 0 : index
    %c0_60 = arith.constant 0 : index
    %c0_61 = arith.constant 0 : index
    %72 = vector.load %arg9[%c0_59, %c0_60, %c0_61] : memref<2x8x64xbf16, #tpu.memory_space<vmem>>, vector<1x8x64xbf16>
    %73 = vector.shape_cast %72 : vector<1x8x64xbf16> to vector<8x64xbf16>
    %74 = arith.truncf %47 : vector<32x8xf32> to vector<32x8xbf16>
    %cst_62 = arith.constant dense<0.000000e+00> : vector<32x64xf32>
    %75 = tpu.matmul %74, %73, %cst_62 {dimension_numbers = #tpu.dot_dimension_numbers<[1], [0], [0], [1], [0, 0, 1, 1], [], []>} : vector<32x8xbf16>, vector<8x64xbf16>, vector<32x64xf32> -> vector<32x64xf32>
    %76 = arith.addf %71, %75 : vector<32x64xf32>
    %c0_63 = arith.constant 0 : index
    %c0_64 = arith.constant 0 : index
    %c0_65 = arith.constant 0 : index
    %77 = vector.load %arg10[%c0_63, %c0_64, %c0_65] : memref<2x1x64xf32, #tpu.memory_space<vmem>>, vector<1x1x64xf32>
    %78 = vector.shape_cast %77 : vector<1x1x64xf32> to vector<1x64xf32>
    %79 = vector.broadcast %78 : vector<1x64xf32> to vector<32x64xf32>
    %80 = arith.addf %76, %79 : vector<32x64xf32>
    %cst_66 = arith.constant 0.000000e+00 : f32
    %81 = vector.broadcast %cst_66 : f32 to vector<32x64xf32>
    %82 = arith.maximumf %80, %81 : vector<32x64xf32>
    %c0_67 = arith.constant 0 : index
    %c0_68 = arith.constant 0 : index
    %c0_69 = arith.constant 0 : index
    %83 = vector.load %arg11[%c0_67, %c0_68, %c0_69] : memref<2x64x64xbf16, #tpu.memory_space<vmem>>, vector<1x64x64xbf16>
    %84 = vector.shape_cast %83 : vector<1x64x64xbf16> to vector<64x64xbf16>
    %85 = arith.truncf %82 : vector<32x64xf32> to vector<32x64xbf16>
    %cst_70 = arith.constant dense<0.000000e+00> : vector<32x64xf32>
    %86 = tpu.matmul %85, %84, %cst_70 {dimension_numbers = #tpu.dot_dimension_numbers<[1], [0], [0], [1], [0, 0, 1, 1], [], []>} : vector<32x64xbf16>, vector<64x64xbf16>, vector<32x64xf32> -> vector<32x64xf32>
    %c0_71 = arith.constant 0 : index
    %c0_72 = arith.constant 0 : index
    %c0_73 = arith.constant 0 : index
    %87 = vector.load %arg12[%c0_71, %c0_72, %c0_73] : memref<2x1x64xf32, #tpu.memory_space<vmem>>, vector<1x1x64xf32>
    %88 = vector.shape_cast %87 : vector<1x1x64xf32> to vector<1x64xf32>
    %89 = vector.broadcast %88 : vector<1x64xf32> to vector<32x64xf32>
    %90 = arith.addf %86, %89 : vector<32x64xf32>
    %cst_74 = arith.constant 0.000000e+00 : f32
    %91 = vector.broadcast %cst_74 : f32 to vector<32x64xf32>
    %92 = arith.maximumf %90, %91 : vector<32x64xf32>
    %c0_75 = arith.constant 0 : index
    %c0_76 = arith.constant 0 : index
    %93 = vector.load %arg20[%c0_75, %c0_76] : memref<32x384xf32, #tpu.memory_space<vmem>>, vector<32x64xf32>
    tpu.vector_store %arg20[%c0_75, %c0_76], %0 {strides = array<i32>} : memref<32x384xf32, #tpu.memory_space<vmem>>, vector<32x64xf32>,
    %c0_77 = arith.constant 0 : index
    %c64 = arith.constant 64 : index
    %94 = vector.load %arg20[%c0_77, %c64] : memref<32x384xf32, #tpu.memory_space<vmem>>, vector<32x64xf32>
    tpu.vector_store %arg20[%c0_77, %c64], %92 {strides = array<i32>} : memref<32x384xf32, #tpu.memory_space<vmem>>, vector<32x64xf32>,
    %c0_78 = arith.constant 0 : index
    %c128 = arith.constant 128 : index
    %95 = vector.load %arg20[%c0_78, %c128] : memref<32x384xf32, #tpu.memory_space<vmem>>, vector<32x64xf32>
    tpu.vector_store %arg20[%c0_78, %c128], %92 {strides = array<i32>} : memref<32x384xf32, #tpu.memory_space<vmem>>, vector<32x64xf32>,
    %96 = vector.extract_strided_slice %46 {offsets = [0, 0], sizes = [1, 64], strides = [1, 1]} : vector<8x64xf32> to vector<1x64xf32>
    %97 = vector.shape_cast %96 : vector<1x64xf32> to vector<1x64xf32>
    %98 = vector.broadcast %97 : vector<1x64xf32> to vector<32x64xf32>
    %c0_79 = arith.constant 0 : index
    %c192 = arith.constant 192 : index
    %99 = vector.load %arg20[%c0_79, %c192] : memref<32x384xf32, #tpu.memory_space<vmem>>, vector<32x64xf32>
    tpu.vector_store %arg20[%c0_79, %c192], %98 {strides = array<i32>} : memref<32x384xf32, #tpu.memory_space<vmem>>, vector<32x64xf32>,
    %100 = vector.extract_strided_slice %46 {offsets = [1, 0], sizes = [1, 64], strides = [1, 1]} : vector<8x64xf32> to vector<1x64xf32>
    %101 = vector.shape_cast %100 : vector<1x64xf32> to vector<1x64xf32>
    %102 = vector.broadcast %101 : vector<1x64xf32> to vector<32x64xf32>
    %c0_80 = arith.constant 0 : index
    %c256 = arith.constant 256 : index
    %103 = vector.load %arg20[%c0_80, %c256] : memref<32x384xf32, #tpu.memory_space<vmem>>, vector<32x64xf32>
    tpu.vector_store %arg20[%c0_80, %c256], %102 {strides = array<i32>} : memref<32x384xf32, #tpu.memory_space<vmem>>, vector<32x64xf32>,
    %cst_81 = arith.constant 0.000000e+00 : f32
    %104 = vector.broadcast %cst_81 : f32 to vector<32x64xf32>
    %c0_82 = arith.constant 0 : index
    %c320 = arith.constant 320 : index
    %105 = vector.load %arg20[%c0_82, %c320] : memref<32x384xf32, #tpu.memory_space<vmem>>, vector<32x64xf32>
    tpu.vector_store %arg20[%c0_82, %c320], %104 {strides = array<i32>} : memref<32x384xf32, #tpu.memory_space<vmem>>, vector<32x64xf32>,
    %c0_83 = arith.constant 0 : index
    %c0_84 = arith.constant 0 : index
    %106 = vector.load %arg20[%c0_83, %c0_84] : memref<32x384xf32, #tpu.memory_space<vmem>>, vector<32x384xf32>
    %107 = arith.truncf %106 : vector<32x384xf32> to vector<32x384xbf16>
    %c0_85 = arith.constant 0 : index
    %c0_86 = arith.constant 0 : index
    %108 = vector.load %arg21[%c0_85, %c0_86] : memref<32x1920xbf16, #tpu.memory_space<vmem>>, vector<32x384xbf16>
    tpu.vector_store %arg21[%c0_85, %c0_86], %107 {strides = array<i32>} : memref<32x1920xbf16, #tpu.memory_space<vmem>>, vector<32x384xbf16>,
    %cst_87 = arith.constant 1.000000e+00 : f32
    %109 = vector.broadcast %cst_87 : f32 to vector<32x384xf32>
    %110 = arith.mulf %106, %109 : vector<32x384xf32>
    %111 = math.sin %110 : vector<32x384xf32>
    %112 = arith.truncf %111 : vector<32x384xf32> to vector<32x384xbf16>
    %c0_88 = arith.constant 0 : index
    %c384 = arith.constant 384 : index
    %113 = vector.load %arg21[%c0_88, %c384] : memref<32x1920xbf16, #tpu.memory_space<vmem>>, vector<32x384xbf16>
    tpu.vector_store %arg21[%c0_88, %c384], %112 {strides = array<i32>} : memref<32x1920xbf16, #tpu.memory_space<vmem>>, vector<32x384xbf16>,
    %cst_89 = arith.constant 1.000000e+00 : f32
    %114 = vector.broadcast %cst_89 : f32 to vector<32x384xf32>
    %115 = arith.mulf %106, %114 : vector<32x384xf32>
    %116 = math.cos %115 : vector<32x384xf32>
    %117 = arith.truncf %116 : vector<32x384xf32> to vector<32x384xbf16>
    %c0_90 = arith.constant 0 : index
    %c768 = arith.constant 768 : index
    %118 = vector.load %arg21[%c0_90, %c768] : memref<32x1920xbf16, #tpu.memory_space<vmem>>, vector<32x384xbf16>
    tpu.vector_store %arg21[%c0_90, %c768], %117 {strides = array<i32>} : memref<32x1920xbf16, #tpu.memory_space<vmem>>, vector<32x384xbf16>,
    %cst_91 = arith.constant 2.000000e+00 : f32
    %119 = vector.broadcast %cst_91 : f32 to vector<32x384xf32>
    %120 = arith.mulf %106, %119 : vector<32x384xf32>
    %121 = math.sin %120 : vector<32x384xf32>
    %122 = arith.truncf %121 : vector<32x384xf32> to vector<32x384xbf16>
    %c0_92 = arith.constant 0 : index
    %c1152 = arith.constant 1152 : index
    %123 = vector.load %arg21[%c0_92, %c1152] : memref<32x1920xbf16, #tpu.memory_space<vmem>>, vector<32x384xbf16>
    tpu.vector_store %arg21[%c0_92, %c1152], %122 {strides = array<i32>} : memref<32x1920xbf16, #tpu.memory_space<vmem>>, vector<32x384xbf16>,
    %cst_93 = arith.constant 2.000000e+00 : f32
    %124 = vector.broadcast %cst_93 : f32 to vector<32x384xf32>
    %125 = arith.mulf %106, %124 : vector<32x384xf32>
    %126 = math.cos %125 : vector<32x384xf32>
    %127 = arith.truncf %126 : vector<32x384xf32> to vector<32x384xbf16>
    %c0_94 = arith.constant 0 : index
    %c1536 = arith.constant 1536 : index
    %128 = vector.load %arg21[%c0_94, %c1536] : memref<32x1920xbf16, #tpu.memory_space<vmem>>, vector<32x384xbf16>
    tpu.vector_store %arg21[%c0_94, %c1536], %127 {strides = array<i32>} : memref<32x1920xbf16, #tpu.memory_space<vmem>>, vector<32x384xbf16>,
    %c0_95 = arith.constant 0 : index
    %c0_96 = arith.constant 0 : index
    %129 = vector.load %arg21[%c0_95, %c0_96] : memref<32x1920xbf16, #tpu.memory_space<vmem>>, vector<32x1920xbf16>
    %c0_97 = arith.constant 0 : index
    %c0_98 = arith.constant 0 : index
    %130 = vector.load %arg13[%c0_97, %c0_98] : memref<1920x64xbf16, #tpu.memory_space<vmem>>, vector<1920x64xbf16>
    %cst_99 = arith.constant dense<0.000000e+00> : vector<32x64xf32>
    %131 = tpu.matmul %129, %130, %cst_99 {dimension_numbers = #tpu.dot_dimension_numbers<[1], [0], [0], [1], [0, 0, 1, 1], [], []>} : vector<32x1920xbf16>, vector<1920x64xbf16>, vector<32x64xf32> -> vector<32x64xf32>
    %c0_100 = arith.constant 0 : index
    %c0_101 = arith.constant 0 : index
    %132 = vector.load %arg14[%c0_100, %c0_101] : memref<1x64xf32, #tpu.memory_space<vmem>>, vector<1x64xf32>
    %133 = vector.broadcast %132 : vector<1x64xf32> to vector<32x64xf32>
    %134 = arith.addf %131, %133 : vector<32x64xf32>
    %cst_102 = arith.constant 0.000000e+00 : f32
    %135 = vector.broadcast %cst_102 : f32 to vector<32x64xf32>
    %136 = arith.maximumf %134, %135 : vector<32x64xf32>
    %c0_103 = arith.constant 0 : index
    %c0_104 = arith.constant 0 : index
    %137 = vector.load %arg15[%c0_103, %c0_104] : memref<64x64xbf16, #tpu.memory_space<vmem>>, vector<64x64xbf16>
    %138 = arith.truncf %136 : vector<32x64xf32> to vector<32x64xbf16>
    %cst_105 = arith.constant dense<0.000000e+00> : vector<32x64xf32>
    %139 = tpu.matmul %138, %137, %cst_105 {dimension_numbers = #tpu.dot_dimension_numbers<[1], [0], [0], [1], [0, 0, 1, 1], [], []>} : vector<32x64xbf16>, vector<64x64xbf16>, vector<32x64xf32> -> vector<32x64xf32>
    %c0_106 = arith.constant 0 : index
    %c0_107 = arith.constant 0 : index
    %140 = vector.load %arg16[%c0_106, %c0_107] : memref<1x64xf32, #tpu.memory_space<vmem>>, vector<1x64xf32>
    %141 = vector.broadcast %140 : vector<1x64xf32> to vector<32x64xf32>
    %142 = arith.addf %139, %141 : vector<32x64xf32>
    %cst_108 = arith.constant 0.000000e+00 : f32
    %143 = vector.broadcast %cst_108 : f32 to vector<32x64xf32>
    %144 = arith.maximumf %142, %143 : vector<32x64xf32>
    %c0_109 = arith.constant 0 : index
    %c0_110 = arith.constant 0 : index
    %145 = vector.load %arg17[%c0_109, %c0_110] : memref<64x128xbf16, #tpu.memory_space<vmem>>, vector<64x128xbf16>
    %146 = arith.truncf %144 : vector<32x64xf32> to vector<32x64xbf16>
    %cst_111 = arith.constant dense<0.000000e+00> : vector<32x128xf32>
    %147 = tpu.matmul %146, %145, %cst_111 {dimension_numbers = #tpu.dot_dimension_numbers<[1], [0], [0], [1], [0, 0, 1, 1], [], []>} : vector<32x64xbf16>, vector<64x128xbf16>, vector<32x128xf32> -> vector<32x128xf32>
    %c0_112 = arith.constant 0 : index
    %c0_113 = arith.constant 0 : index
    %148 = vector.load %arg18[%c0_112, %c0_113] : memref<1x128xf32, #tpu.memory_space<vmem>>, vector<1x128xf32>
    %149 = vector.broadcast %148 : vector<1x128xf32> to vector<32x128xf32>
    %150 = arith.addf %147, %149 : vector<32x128xf32>
    %c0_114 = arith.constant 0 : index
    %c0_115 = arith.constant 0 : index
    %151 = vector.load %arg19[%c0_114, %c0_115] : memref<32x128xf32, #tpu.memory_space<vmem>>, vector<32x128xf32>
    tpu.vector_store %arg19[%c0_114, %c0_115], %150 {strides = array<i32>} : memref<32x128xf32, #tpu.memory_space<vmem>>, vector<32x128xf32>,
    return
  }
  func.func @transform_0(%arg0: i32) -> (i32, i32) {
    %c0_i32 = arith.constant 0 : i32
    %c0_i32_0 = arith.constant 0 : i32
    return %arg0, %c0_i32 : i32, i32
  }
  func.func @transform_1(%arg0: i32) -> (i32, i32) {
    %c0_i32 = arith.constant 0 : i32
    %c0_i32_0 = arith.constant 0 : i32
    return %arg0, %c0_i32 : i32, i32
  }
  func.func @transform_2(%arg0: i32) -> (i32, i32) {
    %c0_i32 = arith.constant 0 : i32
    %c0_i32_0 = arith.constant 0 : i32
    %c0_i32_1 = arith.constant 0 : i32
    return %c0_i32, %c0_i32_0 : i32, i32
  }
  func.func @transform_3(%arg0: i32) -> (i32, i32, i32) {
    %c0_i32 = arith.constant 0 : i32
    %c0_i32_0 = arith.constant 0 : i32
    %c0_i32_1 = arith.constant 0 : i32
    %c0_i32_2 = arith.constant 0 : i32
    return %c0_i32, %c0_i32_0, %c0_i32_1 : i32, i32, i32
  }
  func.func @transform_4(%arg0: i32) -> (i32, i32, i32) {
    %c0_i32 = arith.constant 0 : i32
    %c0_i32_0 = arith.constant 0 : i32
    %c0_i32_1 = arith.constant 0 : i32
    %c0_i32_2 = arith.constant 0 : i32
    return %c0_i32, %c0_i32_0, %c0_i32_1 : i32, i32, i32
  }
  func.func @transform_5(%arg0: i32) -> (i32, i32, i32) {
    %c0_i32 = arith.constant 0 : i32
    %c0_i32_0 = arith.constant 0 : i32
    %c0_i32_1 = arith.constant 0 : i32
    %c0_i32_2 = arith.constant 0 : i32
    return %c0_i32, %c0_i32_0, %c0_i32_1 : i32, i32, i32
  }
  func.func @transform_6(%arg0: i32) -> (i32, i32, i32) {
    %c0_i32 = arith.constant 0 : i32
    %c0_i32_0 = arith.constant 0 : i32
    %c0_i32_1 = arith.constant 0 : i32
    %c0_i32_2 = arith.constant 0 : i32
    return %c0_i32, %c0_i32_0, %c0_i32_1 : i32, i32, i32
  }
  func.func @transform_7(%arg0: i32) -> (i32, i32, i32) {
    %c0_i32 = arith.constant 0 : i32
    %c0_i32_0 = arith.constant 0 : i32
    %c0_i32_1 = arith.constant 0 : i32
    %c0_i32_2 = arith.constant 0 : i32
    return %c0_i32, %c0_i32_0, %c0_i32_1 : i32, i32, i32
  }
  func.func @transform_8(%arg0: i32) -> (i32, i32, i32) {
    %c0_i32 = arith.constant 0 : i32
    %c0_i32_0 = arith.constant 0 : i32
    %c0_i32_1 = arith.constant 0 : i32
    %c0_i32_2 = arith.constant 0 : i32
    return %c0_i32, %c0_i32_0, %c0_i32_1 : i32, i32, i32
  }
  func.func @transform_9(%arg0: i32) -> (i32, i32, i32) {
    %c0_i32 = arith.constant 0 : i32
    %c0_i32_0 = arith.constant 0 : i32
    %c0_i32_1 = arith.constant 0 : i32
    %c0_i32_2 = arith.constant 0 : i32
    return %c0_i32, %c0_i32_0, %c0_i32_1 : i32, i32, i32
  }
  func.func @transform_10(%arg0: i32) -> (i32, i32, i32) {
    %c0_i32 = arith.constant 0 : i32
    %c0_i32_0 = arith.constant 0 : i32
    %c0_i32_1 = arith.constant 0 : i32
    %c0_i32_2 = arith.constant 0 : i32
    return %c0_i32, %c0_i32_0, %c0_i32_1 : i32, i32, i32
  }
  func.func @transform_11(%arg0: i32) -> (i32, i32, i32) {
    %c0_i32 = arith.constant 0 : i32
    %c0_i32_0 = arith.constant 0 : i32
    %c0_i32_1 = arith.constant 0 : i32
    %c0_i32_2 = arith.constant 0 : i32
    return %c0_i32, %c0_i32_0, %c0_i32_1 : i32, i32, i32
  }
  func.func @transform_12(%arg0: i32) -> (i32, i32) {
    %c0_i32 = arith.constant 0 : i32
    %c0_i32_0 = arith.constant 0 : i32
    %c0_i32_1 = arith.constant 0 : i32
    return %c0_i32, %c0_i32_0 : i32, i32
  }
  func.func @transform_13(%arg0: i32) -> (i32, i32) {
    %c0_i32 = arith.constant 0 : i32
    %c0_i32_0 = arith.constant 0 : i32
    %c0_i32_1 = arith.constant 0 : i32
    return %c0_i32, %c0_i32_0 : i32, i32
  }
  func.func @transform_14(%arg0: i32) -> (i32, i32) {
    %c0_i32 = arith.constant 0 : i32
    %c0_i32_0 = arith.constant 0 : i32
    %c0_i32_1 = arith.constant 0 : i32
    return %c0_i32, %c0_i32_0 : i32, i32
  }
  func.func @transform_15(%arg0: i32) -> (i32, i32) {
    %c0_i32 = arith.constant 0 : i32
    %c0_i32_0 = arith.constant 0 : i32
    %c0_i32_1 = arith.constant 0 : i32
    return %c0_i32, %c0_i32_0 : i32, i32
  }
  func.func @transform_16(%arg0: i32) -> (i32, i32) {
    %c0_i32 = arith.constant 0 : i32
    %c0_i32_0 = arith.constant 0 : i32
    %c0_i32_1 = arith.constant 0 : i32
    return %c0_i32, %c0_i32_0 : i32, i32
  }
  func.func @transform_17(%arg0: i32) -> (i32, i32) {
    %c0_i32 = arith.constant 0 : i32
    %c0_i32_0 = arith.constant 0 : i32
    %c0_i32_1 = arith.constant 0 : i32
    return %c0_i32, %c0_i32_0 : i32, i32
  }
  func.func @transform_18(%arg0: i32) -> (i32, i32) {
    %c0_i32 = arith.constant 0 : i32
    %c0_i32_0 = arith.constant 0 : i32
    return %arg0, %c0_i32 : i32, i32
  }
}

</mosaic_0001>

<bundles_post_ra>
// kernel: ctnet_microphysics_forward.2
= control target key start
LH: loop header
LB: loop body
LE: loop exit
PB: predicated region body
PF: predicated region fallthrough
CT: control target
= control target key end

     0   :  { %vm107_vm0 = vcmask 523264   ;;  %s413_s1 = inlined_call_operand.vmem [shape: bf16[64,128], index: 1, kind: input, shape index: {}]   ;;  %s414_s2 = inlined_call_operand.vmem [shape: f32[1,128], index: 2, kind: input, shape index: {}]   ;;  %s415_s0 = inlined_call_operand.vmem [shape: bf16[128,64], index: 0, kind: input, shape index: {}]   ;;  %s416_s3 = inlined_call_operand.vmem [shape: f32[128,128], index: 3, kind: output, shape index: {}]  }
   0x1   :  { %v284_v0 = vld [vmem:[%s413_s1 + $0x18] sm:$0xff]  ;;  %v283_v1 = vld [vmem:[%s413_s1 + $0x10] sm:$0xff]  ;;  %v282_v2 = vld [vmem:[%s413_s1 + $0x8] sm:$0xff] }
   0x2   :  { %136 = vmatpush.bf16.msra.mxu0 %v284_v0  ;;  %285 = vmatpush.bf16.msra.mxu1 %v284_v0  ;;  %v281_v3 = vld [vmem:[%s413_s1] sm:$0xff]  ;;  %v275_v5 = vld [vmem:[%s415_s0 + $0x10] sm:$0xff]  ;;  %v274_v8 = vld [vmem:[%s415_s0 + $0x8] sm:$0xff] }
   0x3   :  { %286 = vmatpush.bf16.msra.mxu2 %v284_v0  ;;  %287 = vmatpush.bf16.msra.mxu3 %v284_v0  ;;  %v273_v4 = vld [vmem:[%s415_s0] sm:$0xff]  ;;  %v279_v7 = vld [vmem:[%s415_s0 + $0x30] sm:$0xff]  ;;  %v276_v9 = vld [vmem:[%s415_s0 + $0x18] sm:$0xff] }
   0x4   :  { %v277_v6 = vld [vmem:[%s415_s0 + $0x20] sm:$0xff]  ;;  %v278_v10 = vld [vmem:[%s415_s0 + $0x28] sm:$0xff]  ;;  %v280_v11 = vld [vmem:[%s415_s0 + $0x38] sm:$0xff] }
   0x5   :  { %v297_v12 = vld [vmem:[%s414_s2] ss:$0 sm:$0xff] }
   0x6   :  { %137 = vmatpush.bf16.msra.mxu0 %v283_v1  ;;  %288 = vmatpush.bf16.msra.mxu1 %v283_v1 }
   0x7   :  { %289 = vmatpush.bf16.msra.mxu2 %v283_v1  ;;  %290 = vmatpush.bf16.msra.mxu3 %v283_v1 }
   0xa   :  { %138 = vmatpush.bf16.msra.mxu0 %v282_v2  ;;  %291 = vmatpush.bf16.msra.mxu1 %v282_v2 }
   0xb   :  { %292 = vmatpush.bf16.msra.mxu2 %v282_v2  ;;  %293 = vmatpush.bf16.msra.mxu3 %v282_v2 }
   0xe   :  { %139 = vmatpush.bf16.msra.mxu0 %v281_v3  ;;  %294 = vmatpush.bf16.msra.mxu1 %v281_v3 }
   0xf   :  { %295 = vmatpush.bf16.msra.mxu2 %v281_v3  ;;  %296 = vmatpush.bf16.msra.mxu3 %v281_v3 }
  0x11   :  { %265 = vmatmul.msk.bf16.vlgmr.msra.gmra.mxu0 %vm107_vm0, %v273_v4  ;;  %267 = vmatmul.msk.bf16.vlgmr.msra.gmra.mxu1 %vm107_vm0, %v275_v5 }
  0x12   :  { %269 = vmatmul.msk.bf16.vlgmr.msra.gmra.mxu2 %vm107_vm0, %v277_v6  ;;  %271 = vmatmul.msk.bf16.vlgmr.msra.gmra.mxu3 %vm107_vm0, %v279_v7 }
  0x21   :  { %266 = vmatmul.msk.bf16.gmra.mxu0 %vm107_vm0, %v274_v8  ;;  %268 = vmatmul.msk.bf16.gmra.mxu1 %vm107_vm0, %v276_v9 }
  0x22   :  { %270 = vmatmul.msk.bf16.gmra.mxu2 %vm107_vm0, %v278_v10  ;;  %272 = vmatmul.msk.bf16.gmra.mxu3 %vm107_vm0, %v280_v11 }
  0x8e   :  { %v141_v13 = vpop.f32.mrf.mxu0  ;;  %v151_v14 = vpop.f32.mrf.mxu1 }
  0x8f   :  { %v142_v15 = vadd.f32 %v297_v12, %v141_v13  ;;  %v152_v16 = vadd.f32 %v297_v12, %v151_v14 }
  0x91   :  { %v181_v17 = vmax.f32 %v142_v15, 0.0  ;;  %v185_v18 = vmax.f32 %v152_v16, 0.0 }
  0x93   :  { %197 = vst [vmem:[%s416_s3] sm:$0xff] %v181_v17 }
  0x94   :  { %201 = vst [vmem:[%s416_s3 + $0x20] sm:$0xff] %v185_v18 }
  0x95   :  { %v161_v19 = vpop.f32.mrf.mxu2  ;;  %v171_v20 = vpop.f32.mrf.mxu3 }
  0x96   :  { %v162_v21 = vadd.f32 %v297_v12, %v161_v19  ;;  %v172_v22 = vadd.f32 %v297_v12, %v171_v20  ;;  %v143_v23 = vpop.f32.mrf.mxu0  ;;  %v153_v24 = vpop.f32.mrf.mxu1 }
  0x97   :  { %v144_v25 = vadd.f32 %v297_v12, %v143_v23  ;;  %v154_v26 = vadd.f32 %v297_v12, %v153_v24 }
  0x98   :  { %v189_v27 = vmax.f32 %v162_v21, 0.0  ;;  %v193_v28 = vmax.f32 %v172_v22, 0.0 }
  0x99   :  { %v182_v29 = vmax.f32 %v144_v25, 0.0  ;;  %v186_v30 = vmax.f32 %v154_v26, 0.0 }
  0x9a   :  { %205 = vst [vmem:[%s416_s3 + $0x40] sm:$0xff] %v189_v27 }
  0x9b   :  { %209 = vst [vmem:[%s416_s3 + $0x60] sm:$0xff] %v193_v28 }
  0x9c   :  { %198 = vst [vmem:[%s416_s3 + $0x8] sm:$0xff] %v182_v29 }
  0x9d   :  { %202 = vst [vmem:[%s416_s3 + $0x28] sm:$0xff] %v186_v30  ;;  %v163_v31 = vpop.f32.mrf.mxu2  ;;  %v173_v32 = vpop.f32.mrf.mxu3 }
  0x9e   :  { %v164_v33 = vadd.f32 %v297_v12, %v163_v31  ;;  %v174_v34 = vadd.f32 %v297_v12, %v173_v32  ;;  %v146_v35 = vpop.f32.mrf.mxu0  ;;  %v156_v36 = vpop.f32.mrf.mxu1 }
  0x9f   :  { %v147_v37 = vadd.f32 %v297_v12, %v146_v35  ;;  %v157_v38 = vadd.f32 %v297_v12, %v156_v36 }
  0xa0   :  { %v190_v39 = vmax.f32 %v164_v33, 0.0  ;;  %v194_v40 = vmax.f32 %v174_v34, 0.0 }
  0xa1   :  { %v183_v41 = vmax.f32 %v147_v37, 0.0  ;;  %v187_v42 = vmax.f32 %v157_v38, 0.0 }
  0xa2   :  { %206 = vst [vmem:[%s416_s3 + $0x48] sm:$0xff] %v190_v39 }
  0xa3   :  { %210 = vst [vmem:[%s416_s3 + $0x68] sm:$0xff] %v194_v40 }
  0xa4   :  { %199 = vst [vmem:[%s416_s3 + $0x10] sm:$0xff] %v183_v41 }
  0xa5   :  { %203 = vst [vmem:[%s416_s3 + $0x30] sm:$0xff] %v187_v42  ;;  %v166_v43 = vpop.f32.mrf.mxu2  ;;  %v176_v44 = vpop.f32.mrf.mxu3 }
  0xa6   :  { %v167_v45 = vadd.f32 %v297_v12, %v166_v43  ;;  %v177_v46 = vadd.f32 %v297_v12, %v176_v44  ;;  %v148_v47 = vpop.f32.mrf.mxu0  ;;  %v158_v48 = vpop.f32.mrf.mxu1 }
  0xa7   :  { %v149_v49 = vadd.f32 %v297_v12, %v148_v47  ;;  %v159_v50 = vadd.f32 %v297_v12, %v158_v48 }
  0xa8   :  { %v191_v51 = vmax.f32 %v167_v45, 0.0  ;;  %v195_v52 = vmax.f32 %v177_v46, 0.0 }
  0xa9   :  { %v184_v53 = vmax.f32 %v149_v49, 0.0  ;;  %v188_v54 = vmax.f32 %v159_v50, 0.0 }
  0xaa   :  { %207 = vst [vmem:[%s416_s3 + $0x50] sm:$0xff] %v191_v51 }
  0xab   :  { %211 = vst [vmem:[%s416_s3 + $0x70] sm:$0xff] %v195_v52 }
  0xac   :  { %200 = vst [vmem:[%s416_s3 + $0x18] sm:$0xff] %v184_v53 }
  0xad   :  { %204 = vst [vmem:[%s416_s3 + $0x38] sm:$0xff] %v188_v54  ;;  %v168_v55 = vpop.f32.mrf.mxu2  ;;  %v178_v56 = vpop.f32.mrf.mxu3 }
  0xae   :  { %v169_v57 = vadd.f32 %v297_v12, %v168_v55  ;;  %v179_v58 = vadd.f32 %v297_v12, %v178_v56 }
  0xb0   :  { %v192_v59 = vmax.f32 %v169_v57, 0.0  ;;  %v196_v60 = vmax.f32 %v179_v58, 0.0 }
  0xb2   :  { %208 = vst [vmem:[%s416_s3 + $0x58] sm:$0xff] %v192_v59 }
  0xb3   :  { %212 = vst [vmem:[%s416_s3 + $0x78] sm:$0xff] %v196_v60 }

// kernel: ctnet_microphysics_forward.3
= control target key start
LH: loop header
LB: loop body
LE: loop exit
PB: predicated region body
PF: predicated region fallthrough
CT: control target
= control target key end

     0   :  { %s11581_s27 = smov 0   ;;  %s16510_s0 = inlined_call_operand.vmem [shape: f32[64,64], index: 0, kind: input, shape index: {}]   ;;  %s16511_s1 = inlined_call_operand.vmem [shape: f32[64,8], index: 1, kind: input, shape index: {}]   ;;  %s16512_s2 = inlined_call_operand.vmem [shape: f32[8,8], index: 2, kind: input, shape index: {}]   ;;  %s16513_s3 = inlined_call_operand.vmem [shape: bf16[2,8,64], index: 3, kind: input, shape index: {}]   ;;  %s16514_s4 = inlined_call_operand.vmem [shape: f32[2,1,64], index: 4, kind: input, shape index: {}]   ;;  %s16515_s5 = inlined_call_operand.vmem [shape: bf16[2,64,64], index: 5, kind: input, shape index: {}]   ;;  %s16516_s6 = inlined_call_operand.vmem [shape: f32[2,1,64], index: 6, kind: input, shape index: {}]   ;;  %s16517_s7 = inlined_call_operand.vmem [shape: bf16[2,64,64], index: 7, kind: input, shape index: {}]   ;;  %s16518_s8 = inlined_call_operand.vmem [shape: bf16[2,8,64], index: 8, kind: input, shape index: {}]   ;;  %s16519_s9 = inlined_call_operand.vmem [shape: f32[2,1,64], index: 9, kind: input, shape index: {}]   ;;  %s16520_s10 = inlined_call_operand.vmem [shape: bf16[2,64,64], index: 10, kind: input, shape index: {}]   ;;  %s16521_s11 = inlined_call_operand.vmem [shape: f32[2,1,64], index: 11, kind: input, shape index: {}]   ;;  %s16522_s12 = inlined_call_operand.vmem [shape: bf16[1920,64], index: 12, kind: input, shape index: {}]   ;;  %s16523_s13 = inlined_call_operand.vmem [shape: f32[1,64], index: 13, kind: input, shape index: {}]   ;;  %s16524_s14 = inlined_call_operand.vmem [shape: bf16[64,64], index: 14, kind: input, shape index: {}]   ;;  %s16525_s15 = inlined_call_operand.vmem [shape: f32[1,64], index: 15, kind: input, shape index: {}]   ;;  %s16526_s16 = inlined_call_operand.vmem [shape: bf16[64,128], index: 16, kind: input, shape index: {}]   ;;  %s16527_s17 = inlined_call_operand.vmem [shape: f32[1,128], index: 17, kind: input, shape index: {}]   ;;  %s16528_s18 = inlined_call_operand.vmem [shape: f32[64,128], index: 18, kind: output, shape index: {}]  }
   0x1   :  { %16715 = sst [smem:[#allocation68_spill]] %s16510_s0 }
   0x2   :  { %16716 = sst [smem:[#allocation69_spill]] %s16511_s1 }
   0x3   :  { %16717 = sst [smem:[#allocation70_spill]] %s16512_s2 }
   0x4 LB: > { %s10302_s28 = sadd.s32 4294967295, %s11475_s27   ;;  %p10306_p0 = scmp.ge.s32.totalorder %s11475_s27, 1  ;;  %s11475_s27 = sphi %s11581_s27, %s28_s27  }
   0x5   : > { %p524_p1 = scmp.lt.s32.totalorder %s11475_s27, 3 }
   0x7   : > { %p525_p2 = pnand %p10306_p0, %p524_p1 }
   0x9   : > { %528 = sbr.rel (%p525_p2) target bundleno = 2270 (0x8de), region = 92 }
   0xe   : > { %v10313_v0 = vld [vmem:[%s16513_s3 + $0x4] sm:$0xf]  ;;  %vm619_vm0 = vcmask 1043456   ;;  %s16718_s1 = sld [smem:[#allocation70_spill]]  ;;  %v11239_v2 = vld [vmem:[%s16515_s5 + $0x38] sm:$0xff]  ;;  %vm615_vm1 = vcmask 64512  }
   0xf   : > { %v621_v3 = vsel %vm619_vm0, %v10313_v0, 0  ;;  %v10350_v5 = vld [vmem:[%s16518_s8 + $0x4] sm:$0xf]  ;;  %v829_v6 = vld [vmem:[%s16513_s3] sm:$0xf]  ;;  %684 = vmatpush.bf16.msra.mxu3 %v11239_v2  ;;  %v11238_v8 = vld [vmem:[%s16515_s5 + $0x30] sm:$0xff] }
  0x10   : > { %630 = vmatpush.bf16.msra.mxu0 %v621_v3  ;;  %v707_v7 = vsel %vm619_vm0, %v10350_v5, 0  ;;  %v843_v9 = vsel %vm619_vm0, %v829_v6, 0  ;;  %s10307_s29 = sshll.u32 %s10302_s28, 2  ;;  %v11237_v13 = vld [vmem:[%s16515_s5 + $0x28] sm:$0xff]  ;;  %v11236_v14 = vld [vmem:[%s16515_s5 + $0x20] sm:$0xff]  ;;  %v11243_v18 = vld [vmem:[%s16517_s7 + $0x38] sm:$0xff] }
  0x11   : > { %716 = vmatpush.bf16.msra.mxu2 %v707_v7  ;;  %p584_p3 = scmp.lt.s32.totalorder %s10307_s29, 7  ;;  %v11251_v19 = vld [vmem:[%s16515_s5 + $0x18] sm:$0xff]  ;;  %v11242_v20 = vld [vmem:[%s16517_s7 + $0x30] sm:$0xff]  ;;  %v11241_v22 = vld [vmem:[%s16517_s7 + $0x28] sm:$0xff]  ;;  %vm16626_vm2 = vcmask 523264   ;;  %s11477_s25 = smov 64  }
  0x12   : > { %916 = vmatpush.bf16.msra.mxu1 %v11251_v19  ;;  %v11250_v21 = vld [vmem:[%s16515_s5 + $0x10] sm:$0xff]  ;;  %v11435_v23 = vld [vmem:[%s16514_s4 + $0x1] ss:$0 sm:$0xff]  ;;  %v11436_v32 = vld [vmem:[%s16514_s4] ss:$0 sm:$0xff]  ;;  %vm1116_vm3 = vcmask 1048064  }
  0x13   : > { %s17050_s29 = smov (!%p584_p3, %s10307_s29), 7  ;;  %685 = vmatpush.bf16.msra.mxu3 %v11238_v8  ;;  %v11249_v34 = vld [vmem:[%s16515_s5 + $0x8] sm:$0xff]  ;;  %v11240_v38 = vld [vmem:[%s16517_s7 + $0x20] sm:$0xff]  ;;  %v11247_v43 = vld [vmem:[%s16520_s10 + $0x38] sm:$0xff]  ;;  %s16720_s23 = sld [smem:[#allocation68_spill]] }
  0x14   : > { %v606_v1 = vld [vmem:[%s16718_s1] sm:$0xff]  ;;  %s11612_s30 = sshll.u32 %s17050_s29, 3  ;;  %s16719_s1 = sld [smem:[#allocation69_spill]]  ;;  %815 = vmatpush.bf16.msrb.mxu0 %v11247_v43  ;;  %v11246_v56 = vld [vmem:[%s16520_s10 + $0x30] sm:$0xff]  ;;  %v11245_v57 = vld [vmem:[%s16520_s10 + $0x28] sm:$0xff] }
  0x15   : > { %v609_v4 = vpack.c.bf16 %v606_v1, %v606_v1  ;;  %852 = vmatpush.bf16.msrb.mxu2 %v843_v9  ;;  %v11248_v39 = vld [vmem:[%s16515_s5] sm:$0xff]  ;;  %v11255_v61 = vld [vmem:[%s16517_s7 + $0x18] sm:$0xff]  ;;  %v11254_v62 = vld [vmem:[%s16517_s7 + $0x10] sm:$0xff]  ;;  %s599_s0 = scalar_lea.vmem %s16528_s18, %s11612_s30 }
  0x16   : > { %917 = vmatpush.bf16.msra.mxu1 %v11250_v21  ;;  %v11437_v50 = vld [vmem:[%s16516_s6 + $0x1] ss:$0 sm:$0xff]  ;;  %v11253_v63 = vld [vmem:[%s16517_s7 + $0x8] sm:$0xff] }
  0x17   : > { %10315 = vmatmul.msk.bf16.vlgmr.msra.gmra.mxu0 %vm615_vm1, %v609_v4  ;;  %10351 = vmatmul.msk.bf16.vlgmr.msra.gmra.mxu2 %vm615_vm1, %v609_v4  ;;  %v11244_v58 = vld [vmem:[%s16520_s10 + $0x20] sm:$0xff] }
  0x18   : > { %686 = vmatpush.bf16.msra.mxu3 %v11237_v13  ;;  %816 = vmatpush.bf16.msrb.mxu0 %v11246_v56  ;;  %v945_v59 = vld [vmem:[%s16518_s8] sm:$0xf] }
  0x19   : > { %v947_v60 = vsel %vm619_vm0, %v945_v59, 0  ;;  %v11252_v0 = vld [vmem:[%s16517_s7] sm:$0xff]  ;;  %s11958_s24 = scalar_lea.vmem %s16720_s23, %s11612_s30 }
  0x1a   : > { %s593_s20 = scalar_lea.vmem %s16719_s1, %s11612_s30  ;;  %918 = vmatpush.bf16.msra.mxu1 %v11249_v34  ;;  %v11439_v1 = vld [vmem:[%s16519_s9 + $0x1] ss:$0 sm:$0xff] }
  0x1b   : > { %v825_v10 = vld [vmem:[%s593_s20] sm:$0xff]  ;;  %v826_v11 = vld [vmem:[%s593_s20 + $0x8] sm:$0xff]  ;;  %v827_v15 = vld [vmem:[%s593_s20 + $0x10] sm:$0xff] }
  0x1c   : > { %v11618_v12 = vpack.c.bf16 %v826_v11, %v825_v10  ;;  %687 = vmatpush.bf16.msra.mxu3 %v11236_v14  ;;  %v828_v16 = vld [vmem:[%s593_s20 + $0x18] sm:$0xff]  ;;  %817 = vmatpush.bf16.msrb.mxu0 %v11245_v57  ;;  %v11438_v10 = vld [vmem:[%s16516_s6] ss:$0 sm:$0xff] }
  0x1d   : > { %v11628_v17 = vpack.c.bf16 %v828_v16, %v827_v15 }
  0x1e   : > { %919 = vmatpush.bf16.msra.mxu1 %v11248_v39  ;;  %v11441_v39 = vld [vmem:[%s16519_s9] ss:$0 sm:$0xff] }
  0x20   : > { %753 = vmatpush.bf16.msrb.mxu3 %v11243_v18  ;;  %818 = vmatpush.bf16.msrb.mxu0 %v11244_v58  ;;  %v11742_v58 = vld [vmem:[%s16521_s11] ss:$0 sm:$0xff] }
  0x24   : > { %754 = vmatpush.bf16.msrb.mxu3 %v11242_v20  ;;  %1002 = vmatpush.bf16.msra.mxu0 %v11255_v61 }
  0x27   : > { %10396 = vmatmul.msk.bf16.vlgmr.msrb.gmra.mxu2 %vm615_vm1, %v11618_v12 }
  0x28   : > { %755 = vmatpush.bf16.msrb.mxu3 %v11241_v22  ;;  %1003 = vmatpush.bf16.msra.mxu0 %v11254_v62 }
  0x2c   : > { %756 = vmatpush.bf16.msrb.mxu3 %v11240_v38  ;;  %1004 = vmatpush.bf16.msra.mxu0 %v11253_v63 }
  0x30   : > { %1005 = vmatpush.bf16.msra.mxu0 %v11252_v0 }
  0x37   : > { %10397 = vmatmul.msk.bf16.gmra.mxu2 %vm615_vm1, %v11628_v17 }
  0x94   : > { %v632_v24 = vpop.f32.mrf.mxu0 }
  0x95   : > { %v633_v25 = vadd.f32 %v11435_v23, %v632_v24  ;;  %v11259_v23 = vld [vmem:[%s16520_s10 + $0x18] sm:$0xff]  ;;  %v11258_v24 = vld [vmem:[%s16520_s10 + $0x10] sm:$0xff] }
  0x96   : > { %1077 = vmatpush.bf16.msra.mxu2 %v11259_v23 }
  0x97   : > { %v636_v26 = vmax.f32 %v633_v25, 0.0  ;;  %v11257_v25 = vld [vmem:[%s16520_s10 + $0x8] sm:$0xff] }
  0x99   : > { %v646_v27 = vpack.c.bf16 %v636_v26, %v636_v26  ;;  %v11440_v26 = vld [vmem:[%s16521_s11 + $0x1] ss:$0 sm:$0xff] }
  0x9a   : > { %v718_v28 = vpop.f32.mrf.mxu2  ;;  %1078 = vmatpush.bf16.msra.mxu2 %v11258_v24 }
  0x9b   : > { %10341 = vmatmul.msk.bf16.vlgmr.msra.gmra.mxu3 %vm16626_vm2, %v646_v27  ;;  %v11256_v27 = vld [vmem:[%s16520_s10] sm:$0xff] }
  0x9c   : > { %v634_v29 = vpop.f32.mrf.mxu0  ;;  %956 = vmatpush.bf16.msra.mxu3 %v947_v60 }
  0x9e   : > { %1079 = vmatpush.bf16.msra.mxu2 %v11257_v25 }
  0xa2   : > { %v720_v30 = vpop.f32.mrf.mxu2  ;;  %1080 = vmatpush.bf16.msra.mxu2 %v11256_v27 }
  0xaa   : > { %v854_v31 = vpop.f32.mrf.mxu2 }
  0xab   : > { %v855_v33 = vadd.f32 %v11436_v32, %v854_v31 }
  0xad   : > { %v864_v36 = vmax.f32 %v855_v33, 0.0 }
  0xb2   : > { %v856_v35 = vpop.f32.mrf.mxu2 }
  0xb3   : > { %v857_v37 = vadd.f32 %v11436_v32, %v856_v35  ;;  %v11478_v35 = vmov 0.0  }
  0xb5   : > { %v865_v40 = vmax.f32 %v857_v37, 0.0 }
  0xb7   : > { %v876_v41 = vpack.c.bf16 %v865_v40, %v864_v36 }
  0xb9   : > { %10414 = vmatmul.msk.bf16.vlgmr.msra.gmra.mxu1 %vm16626_vm2, %v876_v41 }
  0xba   : > { %v859_v42 = vpop.f32.mrf.mxu2 }
  0xbb   : > { %v860_v44 = vadd.f32 %v11436_v32, %v859_v42 }
  0xbd   : > { %v866_v46 = vmax.f32 %v860_v44, 0.0 }
  0xc2   : > { %v861_v45 = vpop.f32.mrf.mxu2 }
  0xc3   : > { %v862_v47 = vadd.f32 %v11436_v32, %v861_v45 }
  0xc5   : > { %v867_v48 = vmax.f32 %v862_v47, 0.0 }
  0xc7   : > { %v877_v49 = vpack.c.bf16 %v867_v48, %v866_v46 }
  0xc9   : > { %10415 = vmatmul.msk.bf16.gmra.mxu1 %vm16626_vm2, %v877_v49 }
 0x11e   : > { %v689_v51 = vpop.f32.mrf.mxu3 }
 0x11f   : > { %v690_v52 = vadd.f32 %v11437_v50, %v689_v51 }
 0x121   : > { %v693_v53 = vmax.f32 %v690_v52, 0.0 }
 0x123   : > { %v703_v54 = vpack.c.bf16 %v693_v53, %v693_v53 }
 0x125   : > { %10368 = vmatmul.msk.bf16.vlgmr.msrb.gmra.mxu3 %vm16626_vm2, %v703_v54 }
 0x126   : > { %v691_v55 = vpop.f32.mrf.mxu3 }
 0x135   : > { %10416 = vmatmul.msk.bf16.vlgmr.msra.gmra.mxu3 %vm615_vm1, %v11618_v12 }
 0x136   : > { %v921_v2 = vpop.f32.mrf.mxu1 }
 0x137   : > { %v922_v11 = vadd.f32 %v11438_v10, %v921_v2 }
 0x139   : > { %v931_v14 = vmax.f32 %v922_v11, 0.0 }
 0x13e   : > { %v923_v9 = vpop.f32.mrf.mxu1 }
 0x13f   : > { %v924_v12 = vadd.f32 %v11438_v10, %v923_v9 }
 0x141   : > { %v932_v15 = vmax.f32 %v924_v12, 0.0  ;;  %v16539_v12 = vmov 1326507024  }
 0x143   : > { %v943_v16 = vpack.c.bf16 %v932_v15, %v931_v14 }
 0x145   : > { %10417 = vmatmul.msk.bf16.gmra.mxu3 %vm615_vm1, %v11628_v17 }
 0x146   : > { %v926_v13 = vpop.f32.mrf.mxu1 }
 0x147   : > { %v927_v18 = vadd.f32 %v11438_v10, %v926_v13 }
 0x149   : > { %v933_v20 = vmax.f32 %v927_v18, 0.0 }
 0x14e   : > { %v928_v17 = vpop.f32.mrf.mxu1 }
 0x14f   : > { %v929_v19 = vadd.f32 %v11438_v10, %v928_v17  ;;  %v16541_v10 = vmov 920167782  }
 0x151   : > { %v934_v21 = vmax.f32 %v929_v19, 0.0 }
 0x153   : > { %v944_v22 = vpack.c.bf16 %v934_v21, %v933_v20  ;;  %v16533_v20 = vmov 2475754826  }
 0x1a8   : > { %v758_v3 = vpop.f32.mrf.mxu3 }
 0x1a9   : > { %v759_v4 = vadd.f32 %v758_v3, %v718_v28 }
 0x1ab   : > { %v767_v5 = vadd.f32 %v11439_v1, %v759_v4 }
 0x1ad   : > { %v768_v6 = vmax.f32 %v767_v5, 0.0 }
 0x1af   : > { %v778_v7 = vpack.c.bf16 %v768_v6, %v768_v6 }
 0x1b0   : > { %v760_v8 = vpop.f32.mrf.mxu3 }
 0x1b1   : > { %10395 = vmatmul.msk.bf16.vlgmr.msrb.gmra.mxu0 %vm16626_vm2, %v778_v7 }
 0x1b8   : > { %v958_v34 = vpop.f32.mrf.mxu3 }
 0x1c0   : > { %v960_v37 = vpop.f32.mrf.mxu3 }
 0x1c1   : > { %10434 = vmatmul.msk.bf16.vlgmr.msra.gmra.mxu0 %vm16626_vm2, %v943_v16  ;;  %v16535_v16 = vmov 2102212464  }
 0x1c8   : > { %v963_v44 = vpop.f32.mrf.mxu3 }
 0x1d0   : > { %v965_v50 = vpop.f32.mrf.mxu3 }
 0x1d1   : > { %10435 = vmatmul.msk.bf16.gmra.mxu0 %vm16626_vm2, %v944_v22  ;;  %v16531_v22 = vmov 2131351028  }
 0x22e   : > { %v820_v28 = vpop.f32.mrf.mxu0 }
 0x22f   : > { %v821_v29 = vadd.f32 %v11440_v26, %v820_v28  ;;  %v16537_v28 = vmov 683565275  }
 0x231   : > { %v824_v30 = vmax.f32 %v821_v29, 0.0 }
 0x233   : > { %v1134_v31 = vperm.slane %v824_v30, 1  ;;  %v1125_v32 = vperm.slane %v824_v30, 0 }
 0x235   : > { %1135 = vst.msk [vmem:[#allocation2 + $0x10] sm:$0xff] %vm16626_vm2, %v1134_v31  ;;  %1127 = vrot.lane.b32.xlu1 %v1125_v32, %s11477_s25 }
 0x236   : > { %1136 = vst.msk [vmem:[#allocation2 + $0x28] sm:$0xff] %vm16626_vm2, %v1134_v31  ;;  %v822_v33 = vpop.f32.mrf.mxu0 }
 0x237   : > { %1137 = vst.msk [vmem:[#allocation2 + $0x40] sm:$0xff] %vm16626_vm2, %v1134_v31 }
 0x238   : > { %1138 = vst.msk [vmem:[#allocation2 + $0x58] sm:$0xff] %vm16626_vm2, %v1134_v31 }
 0x239   : > { %1139 = vst.msk [vmem:[#allocation2 + $0x10] sm:$0xff] %vm1116_vm3, %v11478_v35 }
 0x23a   : > { %1140 = vst.msk [vmem:[#allocation2 + $0x28] sm:$0xff] %vm1116_vm3, %v11478_v35 }
 0x23b   : > { %1141 = vst.msk [vmem:[#allocation2 + $0x40] sm:$0xff] %vm1116_vm3, %v11478_v35 }
 0x23c   : > { %1142 = vst.msk [vmem:[#allocation2 + $0x58] sm:$0xff] %vm1116_vm3, %v11478_v35 }
 0x23e   : > { %v1007_v36 = vpop.f32.mrf.mxu0 }
 0x23f   : > { %v1008_v38 = vadd.f32 %v1007_v36, %v958_v34 }
 0x241   : > { %v1021_v42 = vadd.f32 %v11441_v39, %v1008_v38 }
 0x243   : > { %v1025_v45 = vmax.f32 %v1021_v42, 0.0 }
 0x246   : > { %v1009_v40 = vpop.f32.mrf.mxu0 }
 0x247   : > { %v1010_v41 = vadd.f32 %v1009_v40, %v960_v37 }
 0x249   : > { %v1022_v43 = vadd.f32 %v11441_v39, %v1010_v41 }
 0x24b   : > { %v1026_v46 = vmax.f32 %v1022_v43, 0.0 }
 0x24d   : > { %v1037_v48 = vpack.c.bf16 %v1026_v46, %v1025_v45 }
 0x24e   : > { %v1012_v47 = vpop.f32.mrf.mxu0 }
 0x24f   : > { %10452 = vmatmul.msk.bf16.vlgmr.msra.gmra.mxu2 %vm16626_vm2, %v1037_v48  ;;  %v1013_v49 = vadd.f32 %v1012_v47, %v963_v44 }
 0x251   : > { %v1023_v53 = vadd.f32 %v11441_v39, %v1013_v49 }
 0x253   : > { %v1027_v56 = vmax.f32 %v1023_v53, 0.0 }
 0x256   : > { %v1014_v51 = vpop.f32.mrf.mxu0 }
 0x257   : > { %v1015_v52 = vadd.f32 %v1014_v51, %v965_v50 }
 0x259   : > { %v1024_v54 = vadd.f32 %v11441_v39, %v1015_v52 }
 0x25b   : > { %v1028_v55 = vmax.f32 %v1024_v54, 0.0 }
 0x25d   : > { %v1038_v57 = vpack.c.bf16 %v1028_v55, %v1027_v56 }
 0x25f   : > { %10453 = vmatmul.msk.bf16.gmra.mxu2 %vm16626_vm2, %v1038_v57 }
 0x2a7   : > { %v11745_v62 = vpop.permute.xlu1 %1127 }
 0x2d2   : > { %v1082_v59 = vpop.f32.mrf.mxu2 }
 0x2d3   : > { %v1083_v60 = vadd.f32 %v11742_v58, %v1082_v59 }
 0x2d5   : > { %v1092_v61 = vmax.f32 %v1083_v60, 0.0 }
 0x2d7   : > { %1121 = vst.msk [vmem:[#allocation2 + $0x8] sm:$0xff] %vm16626_vm2, %v1092_v61  ;;  %1104 = vrot.lane.b32.xlu0 %v1092_v61, %s11477_s25 }
 0x2d8   : > { %1130 = vst.msk [vmem:[#allocation2 + $0x8] sm:$0xff] %vm1116_vm3, %v11745_v62 }
 0x2da   : > { %v1084_v63 = vpop.f32.mrf.mxu2 }
 0x2db   : > { %v1085_v0 = vadd.f32 %v11742_v58, %v1084_v63 }
 0x2dd   : > { %v1093_v1 = vmax.f32 %v1085_v0, 0.0 }
 0x2df   : > { %1122 = vst.msk [vmem:[#allocation2 + $0x20] sm:$0xff] %vm16626_vm2, %v1093_v1  ;;  %1106 = vrot.lane.b32.xlu0 %v1093_v1, %s11477_s25  ;;  %v11756_v2 = vld [vmem:[#allocation2 + $0x8] sm:$0xff] }
 0x2e0   : > { %1131 = vst.msk [vmem:[#allocation2 + $0x20] sm:$0xff] %vm1116_vm3, %v11745_v62  ;;  %v1329_v3 = vand.u32 2139095040, %v11756_v2  ;;  %v16543_v15 = vand.u32 2147483647, %v11756_v2 }
 0x2e2   : > { %v1330_v4 = vshrl.u32 %v1329_v3, 23  ;;  %v1333_v32 = vand.u32 8388607, %v16543_v15  ;;  %v1087_v33 = vpop.f32.mrf.mxu2 }
 0x2e3   : > { %v1088_v49 = vadd.f32 %v11742_v58, %v1087_v33 }
 0x2e4   : > { %v10457_v5 = vadd.s32 4294967169, %v1330_v4  ;;  %v1334_v40 = vor.u32 8388608, %v1333_v32 }
 0x2e5   : > { %v1094_v55 = vmax.f32 %v1088_v49, 0.0 }
 0x2e6   : > { %v1336_v6 = vadd.s32 1, %v10457_v5  ;;  %v11815_v48 = vshll.u32 %v1334_v40, 8 }
 0x2e7   : > { %v11765_v14 = vld [vmem:[#allocation2 + $0x20] sm:$0xff]  ;;  %1123 = vst.msk [vmem:[#allocation2 + $0x38] sm:$0xff] %vm16626_vm2, %v1094_v55  ;;  %1108 = vrot.lane.b32.xlu1 %v1094_v55, %s11477_s25 }
 0x2e8   : > { %vm1337_vm4 = vcmp.gt.s32.totalorder %v1336_v6, 0  ;;  %v1794_v27 = vand.u32 2139095040, %v11765_v14  ;;  %v1375_v54 = vand.u32 65535, %v11815_v48  ;;  %1132 = vst.msk [vmem:[#allocation2 + $0x38] sm:$0xff] %vm1116_vm3, %v11745_v62  ;;  %v16530_v32 = vand.u32 2147483647, %v11765_v14 }
 0x2e9   : > { %v1338_v7 = vsel %vm1337_vm4, %v1336_v6, 0 }
 0x2ea   : > { %v1340_v8 = vand.u32 31, %v1338_v7  ;;  %v11770_v19 = vshrl.u32 %v1338_v7, 5  ;;  %v1795_v39 = vshrl.u32 %v1794_v27, 23  ;;  %v1089_v51 = vpop.f32.mrf.mxu2 }
 0x2eb   : > { %v1090_v56 = vadd.f32 %v11742_v58, %v1089_v51  ;;  %v1376_v58 = vshrl.u32 %v11815_v48, 16 }
 0x2ec   : > { %v11759_v9 = vsub.s32 32, %v1340_v8  ;;  %v1352_v17 = vshll.u32 %v16535_v16, %v1340_v8  ;;  %v1355_v18 = vshll.u32 %v16541_v10, %v1340_v8  ;;  %v1343_v29 = vshll.u32 %v16537_v28, %v1340_v8 }
 0x2ed   : > { %v1346_v30 = vshll.u32 %v16533_v20, %v1340_v8  ;;  %v1349_v31 = vshll.u32 %v16531_v22, %v1340_v8  ;;  %vm1361_vm5 = vcmp.lt.s32.totalorder %v11770_v19, 4  ;;  %vm1358_vm6 = vcmp.lt.s32.totalorder %v11770_v19, 1 }
 0x2ee   : > { %v1353_v11 = vshrl.u32 %v16541_v10, %v11759_v9  ;;  %v1356_v13 = vshrl.u32 %v16539_v12, %v11759_v9  ;;  %v1344_v21 = vshrl.u32 %v16533_v20, %v11759_v9  ;;  %v1347_v23 = vshrl.u32 %v16531_v22, %v11759_v9 }
 0x2ef   : > { %v1350_v24 = vshrl.u32 %v16535_v16, %v11759_v9  ;;  %vm1360_vm7 = vcmp.lt.s32.totalorder %v11770_v19, 3  ;;  %v10466_v45 = vadd.s32 4294967169, %v1795_v39  ;;  %vm1359_vm8 = vcmp.lt.s32.totalorder %v11770_v19, 2 }
 0x2f0   : > { %v1354_v25 = vor.u32 %v1353_v11, %v1352_v17  ;;  %v1357_v26 = vor.u32 %v1356_v13, %v1355_v18  ;;  %v11784_v34 = vor.u32 %v1344_v21, %v1343_v29  ;;  %v11786_v35 = vor.u32 %v1347_v23, %v1346_v30  ;;  %v11297_v21 = vld [vmem:[%s16522_s12 + $0x38] sm:$0xff] }
 0x2f1   : > { %v11788_v36 = vor.u32 %v1350_v24, %v1349_v31  ;;  %v1801_v50 = vadd.s32 1, %v10466_v45  ;;  %v1095_v60 = vmax.f32 %v1090_v56, 0.0  ;;  %v11305_v23 = vld [vmem:[%s16522_s12 + $0x78] sm:$0xff]  ;;  %v16544_v24 = vmov 0   ;;  %9811 = vmatpush.bf16.msrb.mxu1 %v11297_v21 }
 0x2f2   : > { %v1367_v37 = vsel %vm1361_vm5, %v1354_v25, 920167782  ;;  %v1371_v38 = vsel %vm1361_vm5, %v1357_v26, 1326507024  ;;  %v1366_v41 = vsel %vm1358_vm6, %v11784_v34, %v11786_v35  ;;  %9830 = vmatpush.bf16.msrb.mxu3 %v11305_v23 }
 0x2f3   : > { %v1368_v42 = vsel %vm1360_vm7, %v11788_v36, %v1367_v37  ;;  %v1370_v43 = vsel %vm1358_vm6, %v11786_v35, %v11788_v36  ;;  %v1372_v44 = vsel %vm1360_vm7, %v1354_v25, %v1371_v38  ;;  %vm1802_vm9 = vcmp.gt.s32.totalorder %v1801_v50, 0  ;;  %1124 = vst.msk [vmem:[#allocation2 + $0x50] sm:$0xff] %vm16626_vm2, %v1095_v60  ;;  %1110 = vrot.lane.b32.xlu2 %v1095_v60, %s11477_s25 }
 0x2f4   : > { %v1369_v46 = vsel %vm1359_vm8, %v1366_v41, %v1368_v42  ;;  %v1373_v47 = vsel %vm1359_vm8, %v1370_v43, %v1372_v44  ;;  %v1803_v0 = vsel %vm1802_vm9, %v1801_v50, 0  ;;  %1133 = vst.msk [vmem:[#allocation2 + $0x50] sm:$0xff] %vm1116_vm3, %v11745_v62  ;;  %v1363_v21 = vsel %vm1361_vm5, %v11788_v36, 2102212464 }
 0x2f5   : > { %v1378_v52 = vshrl.u32 %v1373_v47, 16  ;;  %v1400_v53 = vshrl.u32 %v1369_v46, 16  ;;  %v1377_v61 = vand.u32 65535, %v1373_v47  ;;  %v1399_v63 = vand.u32 65535, %v1369_v46 }
 0x2f6   : > { %v1805_v4 = vand.u32 31, %v1803_v0  ;;  %v11859_v33 = vshrl.u32 %v1803_v0, 5  ;;  %v1364_v36 = vsel %vm1360_vm7, %v11786_v35, %v1363_v21 }
 0x2f7   : > { %v11820_v57 = vmul.u32 %v1378_v52, %v1375_v54  ;;  %v11822_v59 = vmul.u32 %v1400_v53, %v1375_v54  ;;  %v1379_v5 = vmul.u32 %v1377_v61, %v1375_v54  ;;  %v11835_v6 = vmul.u32 %v1377_v61, %v1376_v58 }
 0x2f8   : > { %v1401_v7 = vmul.u32 %v1399_v63, %v1375_v54  ;;  %v11837_v8 = vmul.u32 %v1399_v63, %v1376_v58  ;;  %v11841_v17 = vsub.s32 32, %v1805_v4  ;;  %v1382_v26 = vmul.u32 %v1378_v52, %v1376_v58 }
 0x2f9   : > { %v1383_v1 = vshll.u32 %v11820_v57, 16  ;;  %v1405_v3 = vshll.u32 %v11822_v59, 16  ;;  %v1385_v62 = vshll.u32 %v11835_v6, 16  ;;  %v1404_v29 = vmul.u32 %v1400_v53, %v1376_v58 }
 0x2fa   : > { %v1407_v18 = vshll.u32 %v11837_v8, 16  ;;  %v1818_v30 = vshrl.u32 %v16541_v10, %v11841_v17  ;;  %v1821_v37 = vshrl.u32 %v16539_v12, %v11841_v17  ;;  %v1817_v41 = vshll.u32 %v16535_v16, %v1805_v4 }
 0x2fb   : > { %vm1387_vm10 = vc.u32 %v1379_v5, %v1383_v1  ;;  %v1389_v11 = vadd.s32 %v1383_v1, %v1379_v5  ;;  %v11839_v13 = vadd.s32 %v1405_v3, %v1401_v7  ;;  %vm1409_vm11 = vc.u32 %v1401_v7, %v1405_v3 }
 0x2fc   : > { %v1388_v25 = vsel %vm1387_vm10, 1, %v16544_v24  ;;  %v1410_v27 = vsel %vm1409_vm11, 1, %v16544_v24  ;;  %v1809_v42 = vshrl.u32 %v16533_v20, %v11841_v17  ;;  %v1812_v43 = vshrl.u32 %v16531_v22, %v11841_v17 }
 0x2fd   : > { %vm1391_vm12 = vc.u32 %v1389_v11, %v1385_v62  ;;  %vm1413_vm13 = vc.u32 %v11839_v13, %v1407_v18  ;;  %v1390_v31 = vadd.s32 %v1388_v25, %v1382_v26  ;;  %v1412_v39 = vadd.s32 %v1410_v27, %v1404_v29 }
 0x2fe   : > { %v1392_v38 = vsel %vm1391_vm12, 1, %v16544_v24  ;;  %v1414_v40 = vsel %vm1413_vm13, 1, %v16544_v24  ;;  %v1815_v44 = vshrl.u32 %v16535_v16, %v11841_v17  ;;  %v1820_v45 = vshll.u32 %v16541_v10, %v1805_v4 }
 0x2ff   : > { %v1819_v46 = vor.u32 %v1818_v30, %v1817_v41  ;;  %v1808_v47 = vshll.u32 %v16537_v28, %v1805_v4  ;;  %v1811_v49 = vshll.u32 %v16533_v20, %v1805_v4  ;;  %v1814_v50 = vshll.u32 %v16531_v22, %v1805_v4 }
 0x300   : > { %v1822_v51 = vor.u32 %v1821_v37, %v1820_v45  ;;  %v1394_v52 = vadd.s32 %v1392_v38, %v1390_v31  ;;  %v1416_v53 = vadd.s32 %v1414_v40, %v1412_v39  ;;  %v1798_v54 = vand.u32 8388607, %v16530_v32 }
 0x301   : > { %v11878_v55 = vor.u32 %v1809_v42, %v1808_v47  ;;  %v11880_v56 = vor.u32 %v1812_v43, %v1811_v49  ;;  %v11882_v60 = vor.u32 %v1815_v44, %v1814_v50  ;;  %vm1826_vm14 = vcmp.lt.s32.totalorder %v11859_v33, 4 }
 0x302   : > { %v1406_v61 = vshrl.u32 %v11822_v59, 16  ;;  %v1832_v63 = vsel %vm1826_vm14, %v1819_v46, 920167782  ;;  %v1384_v0 = vshrl.u32 %v11820_v57, 16  ;;  %v1836_v58 = vsel %vm1826_vm14, %v1822_v51, 1326507024 }
 0x303   : > { %vm1823_vm15 = vcmp.lt.s32.totalorder %v11859_v33, 1  ;;  %vm1825_vm0 = vcmp.lt.s32.totalorder %v11859_v33, 3  ;;  %v1799_v4 = vor.u32 8388608, %v1798_v54  ;;  %v1408_v57 = vshrl.u32 %v11837_v8, 16 }
 0x304   : > { %v1417_v1 = vadd.s32 %v1416_v53, %v1406_v61  ;;  %v1395_v3 = vadd.s32 %v1394_v52, %v1384_v0  ;;  %v1831_v59 = vsel %vm1823_vm15, %v11878_v55, %v11880_v56  ;;  %v1833_v5 = vsel %vm1825_vm0, %v11882_v60, %v1832_v63 }
 0x305   : > { %v1835_v7 = vsel %vm1823_vm15, %v11880_v56, %v11882_v60  ;;  %v1837_v11 = vsel %vm1825_vm0, %v1819_v46, %v1836_v58  ;;  %v1386_v62 = vshrl.u32 %v11835_v6, 16  ;;  %vm1824_vm1 = vcmp.lt.s32.totalorder %v11859_v33, 2 }
 0x306   : > { %v1418_v23 = vadd.s32 %v1417_v1, %v1408_v57  ;;  %v1834_v25 = vsel %vm1824_vm1, %v1831_v59, %v1833_v5  ;;  %v1342_v26 = vshrl.u32 %v16537_v28, %v11759_v9  ;;  %v1838_v29 = vsel %vm1824_vm1, %v1835_v7, %v1837_v11  ;;  %v11947_v57 = vld [vmem:[#allocation2 + $0x10] sm:$0xff] }
 0x307   : > { %v11916_v27 = vadd.s32 %v1395_v3, %v1386_v62  ;;  %v11920_v30 = vshll.u32 %v1799_v4, 8  ;;  %v11931_v31 = vadd.s32 %v11839_v13, %v1407_v18  ;;  %v1865_v9 = vshrl.u32 %v1834_v25, 16 }
 0x308   : > { %v1362_v6 = vsel %vm1358_vm6, %v1342_v26, %v11784_v34  ;;  %v1422_v37 = vadd.s32 1, %v1418_v23  ;;  %v1843_v38 = vshrl.u32 %v1838_v29, 16  ;;  %v1864_v8 = vand.u32 65535, %v1834_v25  ;;  %v11952_v25 = vld [vmem:[#allocation2 + $0x28] sm:$0xff] }
 0x309   : > { %vm1421_vm4 = vc.u32 %v11916_v27, %v11931_v31  ;;  %v1840_v39 = vand.u32 65535, %v11920_v30  ;;  %v1365_v34 = vsel %vm1359_vm8, %v1362_v6, %v1364_v36  ;;  %v1842_v43 = vand.u32 65535, %v1838_v29  ;;  %v1151_v29 = vld [vmem:[#allocation2 + $0x40] sm:$0xff] }
 0x30a   : > { %v1423_v41 = vsel %vm1421_vm4, %v1422_v37, %v1418_v23  ;;  %v1419_v35 = vmul.u32 %v11815_v48, %v1365_v34  ;;  %v1841_v18 = vshrl.u32 %v11920_v30, 16  ;;  %v1484_v62 = vand.u32 2139095040, %v11947_v57  ;;  %v1154_v34 = vld [vmem:[#allocation2 + $0x58] sm:$0xff] }
 0x30b   : > { %v1867_v40 = vmul.u32 %v1865_v9, %v1840_v39  ;;  %v1845_v42 = vmul.u32 %v1843_v38, %v1840_v39  ;;  %v1866_v46 = vmul.u32 %v1864_v8, %v1840_v39  ;;  %v1844_v49 = vmul.u32 %v1842_v43, %v1840_v39 }
 0x30c   : > { %v1424_v13 = vadd.s32 %v1423_v41, %v1419_v35  ;;  %v1868_v47 = vmul.u32 %v1864_v8, %v1841_v18  ;;  %v1846_v50 = vmul.u32 %v1842_v43, %v1841_v18  ;;  %v1869_v0 = vmul.u32 %v1865_v9, %v1841_v18  ;;  %v605_v8 = vld [vmem:[%s11958_s24 + $0x18] sm:$0xff] }
 0x30d   : > { %v1870_v44 = vshll.u32 %v1867_v40, 16  ;;  %v1848_v45 = vshll.u32 %v1845_v42, 16  ;;  %v1847_v58 = vmul.u32 %v1843_v38, %v1841_v18  ;;  %v1871_v23 = vshrl.u32 %v1867_v40, 16  ;;  %1099 = vst.msk [vmem:[#allocation2 + $0x48] sm:$0xff] %vm16626_vm2, %v605_v8 }
 0x30e   : > { %v1425_v51 = vadd.s32 536870912, %v1424_v13  ;;  %v1872_v53 = vshll.u32 %v1868_v47, 16  ;;  %v1850_v54 = vshll.u32 %v1846_v50, 16  ;;  %v1849_v26 = vshrl.u32 %v1845_v42, 16 }
 0x30f   : > { %vm1874_vm5 = vc.u32 %v1866_v46, %v1870_v44  ;;  %v1876_v19 = vadd.s32 %v1870_v44, %v1866_v46  ;;  %vm1852_vm6 = vc.u32 %v1844_v49, %v1848_v45  ;;  %v1854_v52 = vadd.s32 %v1848_v45, %v1844_v49 }
 0x310   : > { %v1875_v48 = vsel %vm1874_vm5, 1, %v16544_v24  ;;  %v11941_v61 = vshrl.u32 %v1425_v51, 30  ;;  %v1853_v63 = vsel %vm1852_vm6, 1, %v16544_v24  ;;  %v1485_v9 = vshrl.u32 %v1484_v62, 23 }
 0x311   : > { %vm1878_vm7 = vc.u32 %v1876_v19, %v1872_v53  ;;  %vm1856_vm8 = vc.u32 %v1854_v52, %v1850_v54  ;;  %v1877_v1 = vadd.s32 %v1875_v48, %v1869_v0  ;;  %v1855_v3 = vadd.s32 %v1853_v63, %v1847_v58  ;;  %v602_v52 = vld [vmem:[%s11958_s24] sm:$0xff] }
 0x312   : > { %v1879_v4 = vsel %vm1878_vm7, 1, %v16544_v24  ;;  %v1427_v59 = vshll.u32 %v11941_v61, 30  ;;  %v1857_v5 = vsel %vm1856_vm8, 1, %v16544_v24  ;;  %v1949_v37 = vand.u32 2139095040, %v11952_v25  ;;  %1096 = vst.msk [vmem:[#allocation2] sm:$0xff] %vm16626_vm2, %v602_v52 }
 0x313   : > { %v1881_v7 = vadd.s32 %v1879_v4, %v1877_v1  ;;  %v1859_v11 = vadd.s32 %v1857_v5, %v1855_v3  ;;  %v1873_v39 = vshrl.u32 %v1868_v47, 16  ;;  %v2414_v40 = vand.u32 2139095040, %v1151_v29  ;;  %v11295_v5 = vld [vmem:[%s16522_s12 + $0x28] sm:$0xff] }
 0x314   : > { %v11950_v21 = vsub.s32 %v1424_v13, %v1427_v59  ;;  %v1851_v41 = vshrl.u32 %v1846_v50, 16  ;;  %v1828_v42 = vsel %vm1826_vm14, %v11882_v60, 2102212464  ;;  %v1807_v43 = vshrl.u32 %v16537_v28, %v11841_v17 }
 0x315   : > { %v1882_v6 = vadd.s32 %v1881_v7, %v1871_v23  ;;  %v1860_v36 = vadd.s32 %v1859_v11, %v1849_v26  ;;  %v10460_v18 = vadd.s32 4294967169, %v1485_v9  ;;  %v1950_v44 = vshrl.u32 %v1949_v37, 23  ;;  %v11303_v7 = vld [vmem:[%s16522_s12 + $0x68] sm:$0xff]  ;;  %v11313_v11 = vld [vmem:[%s16522_s12 + $0xb8] sm:$0xff] }
 0x316   : > { %v1430_v38 = vsub.s32 0, %v11950_v21  ;;  %vm1429_vm9 = vcmp.lt.s32.totalorder %v11950_v21, 0  ;;  %v2879_v45 = vand.u32 2139095040, %v1154_v34  ;;  %v2415_v47 = vshrl.u32 %v2414_v40, 23  ;;  %9849 = vmatpush.bf16.msrb.mxu0 %v11313_v11  ;;  %v603_v26 = vld [vmem:[%s11958_s24 + $0x8] sm:$0xff] }
 0x317   : > { %v1883_v35 = vadd.s32 %v1882_v6, %v1873_v39  ;;  %v11969_v13 = vadd.s32 %v1860_v36, %v1851_v41  ;;  %v1827_v60 = vsel %vm1823_vm15, %v1807_v43, %v11878_v55  ;;  %v1829_v49 = vsel %vm1825_vm0, %v11880_v56, %v1828_v42  ;;  %v11296_v55 = vld [vmem:[%s16522_s12 + $0x30] sm:$0xff]  ;;  %1097 = vst.msk [vmem:[#allocation2 + $0x18] sm:$0xff] %vm16626_vm2, %v603_v26 }
 0x318   : > { %v1431_v46 = vsel %vm1429_vm9, %v1430_v38, %v11950_v21  ;;  %v11979_v50 = vadd.s32 %v1876_v19, %v1872_v53  ;;  %v10469_v54 = vadd.s32 4294967169, %v1950_v44  ;;  %v1830_v48 = vsel %vm1824_vm1, %v1827_v60, %v1829_v49  ;;  %v11304_v56 = vld [vmem:[%s16522_s12 + $0x70] sm:$0xff]  ;;  %9812 = vmatpush.bf16.msrb.mxu1 %v11296_v55  ;;  %v12027_v60 = vld [vmem:[#allocation2 + $0x38] sm:$0xff] }
 0x319   : > { %v1887_v17 = vadd.s32 1, %v1883_v35  ;;  %v1432_v51 = vclz %v1431_v46  ;;  %v1491_v19 = vadd.s32 1, %v10460_v18  ;;  %v10478_v53 = vadd.s32 4294967169, %v2415_v47  ;;  %9831 = vmatpush.bf16.msrb.mxu3 %v11304_v56 }
 0x31a   : > { %vm1886_vm10 = vc.u32 %v11969_v13, %v11979_v50  ;;  %v2880_v0 = vshrl.u32 %v2879_v45, 23  ;;  %v1884_v1 = vmul.u32 %v11920_v30, %v1830_v48  ;;  %v1956_v3 = vadd.s32 1, %v10469_v54 }
 0x31b   : > { %v1888_v58 = vsel %vm1886_vm10, %v1887_v17, %v1883_v35  ;;  %v10458_v33 = vadd.s32 4294967294, %v1432_v51  ;;  %v11996_v4 = vmul.f32 2.0, %v11756_v2  ;;  %v11999_v59 = vmul.f32 2.0, %v11765_v14 }
 0x31c   : > { %vm1492_vm11 = vcmp.gt.s32.totalorder %v1491_v19, 0  ;;  %v2421_v30 = vadd.s32 1, %v10478_v53  ;;  %v10487_v62 = vadd.s32 4294967169, %v2880_v0  ;;  %v1889_v23 = vadd.s32 %v1888_v58, %v1884_v1  ;;  %9813 = vmatpush.bf16.msrb.mxu1 %v11295_v5 }
 0x31d   : > { %16721 = vst [vmem:[#allocation4_spill] sm:$0xff] %v11996_v4  ;;  %9832 = vmatpush.bf16.msrb.mxu3 %v11303_v7  ;;  %vm10459_vm12 = vcmp.lt.s32.totalorder %v10458_v33, 0  ;;  %v1493_v29 = vsel %vm1492_vm11, %v1491_v19, 0  ;;  %vm1957_vm13 = vcmp.gt.s32.totalorder %v1956_v3, 0  ;;  %v5081_v6 = vand.u32 2139095040, %v11996_v4 }
 0x31e   : > { %16722 = vst [vmem:[#allocation5_spill] sm:$0xff] %v11999_v59  ;;  %v5546_v36 = vand.u32 2139095040, %v11999_v59  ;;  %vm2422_vm14 = vcmp.gt.s32.totalorder %v2421_v30, 0  ;;  %v2886_v38 = vadd.s32 1, %v10487_v62  ;;  %v1890_v39 = vadd.s32 536870912, %v1889_v23 }
 0x31f   : > { %v12018_v40 = vsel %vm10459_vm12, 0, %v10458_v33  ;;  %v1958_v41 = vsel %vm1957_vm13, %v1956_v3, 0  ;;  %v12020_v35 = vand.u32 31, %v1493_v29  ;;  %v2423_v8 = vsel %vm2422_vm14, %v2421_v30, 0 }
 0x320   : > { %v5082_v43 = vshrl.u32 %v5081_v6, 23  ;;  %v5547_v18 = vshrl.u32 %v5546_v36, 23  ;;  %vm2887_vm15 = vcmp.gt.s32.totalorder %v2886_v38, 0  ;;  %v1440_v44 = vsub.s32 4294967266, %v12018_v40 }
 0x321   : > { %v12023_v45 = vshrl.u32 %v1890_v39, 30  ;;  %v12025_v47 = vand.u32 31, %v1958_v41  ;;  %v12030_v17 = vshrl.u32 %v1493_v29, 5  ;;  %v12032_v51 = vshrl.u32 %v1958_v41, 5 }
 0x322   : > { %v12034_v52 = vand.u32 31, %v2423_v8  ;;  %v12037_v48 = vsub.s32 32, %v12020_v35  ;;  %v10529_v55 = vadd.s32 4294967169, %v5082_v43  ;;  %v10538_v56 = vadd.s32 4294967169, %v5547_v18 }
 0x323   : > { %16723 = vst [vmem:[#allocation6_spill] sm:$0xff] %v12025_v47  ;;  %v12039_v19 = vadd.s32 127, %v1440_v44  ;;  %v1892_v53 = vshll.u32 %v12023_v45, 30  ;;  %v2259_v0 = vand.u32 2139095040, %v12027_v60  ;;  %v12044_v58 = vsub.s32 32, %v12025_v47 }
 0x324   : > { %16724 = vst [vmem:[#allocation7_spill] sm:$0xff] %v12032_v51  ;;  %v12046_v33 = vshrl.u32 %v2423_v8, 5  ;;  %v12051_v5 = vsub.s32 32, %v12034_v52  ;;  %v1420_v62 = vadd.s32 %v11931_v31, %v11916_v27  ;;  %v1436_v26 = vsub.s32 32, %v12018_v40 }
 0x325   : > { %16725 = vst [vmem:[#allocation8_spill] sm:$0xff] %v12034_v52  ;;  %v12060_v29 = vadd.s32 1, %v10529_v55  ;;  %v12062_v6 = vadd.s32 1, %v10538_v56  ;;  %v1442_v36 = vshll.u32 %v12039_v19, 23  ;;  %vm1328_vm11 = vcmp.lt.s32.totalorder %v11756_v2, 0 }
 0x326   : > { %16726 = vst [vmem:[#allocation9_spill] sm:$0xff] %v12044_v58  ;;  %vm1793_vm13 = vcmp.lt.s32.totalorder %v11765_v14, 0 }
 0x327   : > { %16727 = vst [vmem:[#allocation10_spill] sm:$0xff] %v12046_v33  ;;  %vm5089_vm8 = vcmp.gt.s32.totalorder %v12060_v29, 0  ;;  %vm5554_vm10 = vcmp.gt.s32.totalorder %v12062_v6, 0  ;;  %v16766_v33 = vmov 0  }
 0x328   : > { %16728 = vst [vmem:[#allocation11_spill] sm:$0xff] %v12051_v5 }
 0x349   : > { %v1105_v63 = vpop.permute.xlu0 %1104 }
 0x34a   : > { %1117 = vst.msk [vmem:[#allocation2] sm:$0xff] %vm1116_vm3, %v1105_v63  ;;  %v2888_v63 = vsel %vm2887_vm15, %v2886_v38, 0  ;;  %v2260_v38 = vshrl.u32 %v2259_v0, 23 }
 0x34b   : > { %v12053_v7 = vshrl.u32 %v2888_v63, 5  ;;  %v12055_v11 = vand.u32 31, %v2888_v63 }
 0x34c   : > { %v10475_v0 = vadd.s32 4294967169, %v2260_v38 }
 0x34d   : > { %16729 = vst [vmem:[#allocation12_spill] sm:$0xff] %v12053_v7  ;;  %v604_v7 = vld [vmem:[%s11958_s24 + $0x10] sm:$0xff] }
 0x34e   : > { %16730 = vst [vmem:[#allocation13_spill] sm:$0xff] %v12055_v11 }
 0x34f   : > { %1098 = vst.msk [vmem:[#allocation2 + $0x30] sm:$0xff] %vm16626_vm2, %v604_v7  ;;  %v16753_v7 = vmov 683565275  }
 0x351   : > { %v12013_v9 = vld [vmem:[#allocation2] sm:$0xff]  ;;  %v1107_v37 = vpop.permute.xlu0 %1106 }
 0x352   : > { %v1174_v34 = vand.u32 2139095040, %v12013_v9  ;;  %1118 = vst.msk [vmem:[#allocation2 + $0x18] sm:$0xff] %vm1116_vm3, %v1107_v37  ;;  %v16529_v49 = vand.u32 2147483647, %v12013_v9  ;;  %v12065_v37 = vsub.s32 %v1889_v23, %v1892_v53 }
 0x354   : > { %v1175_v42 = vshrl.u32 %v1174_v34, 23  ;;  %v1178_v1 = vand.u32 8388607, %v16529_v49  ;;  %v12069_v34 = vld [vmem:[#allocation2 + $0x50] sm:$0xff]  ;;  %vm1894_vm6 = vcmp.lt.s32.totalorder %v12065_v37, 0 }
 0x355   : > { %v2724_v55 = vand.u32 2139095040, %v12069_v34 }
 0x356   : > { %v10454_v46 = vadd.s32 4294967169, %v1175_v42  ;;  %v1179_v41 = vor.u32 8388608, %v1178_v1  ;;  %v1111_v1 = vpop.permute.xlu2 %1110 }
 0x357   : > { %1120 = vst.msk [vmem:[#allocation2 + $0x48] sm:$0xff] %vm1116_vm3, %v1111_v1 }
 0x358   : > { %v1181_v54 = vadd.s32 1, %v10454_v46  ;;  %v12106_v38 = vshll.u32 %v1179_v41, 8 }
 0x35a   : > { %vm1182_vm0 = vcmp.gt.s32.totalorder %v1181_v54, 0 }
 0x35b   : > { %v1183_v3 = vsel %vm1182_vm0, %v1181_v54, 0 }
 0x35c   : > { %v1185_v30 = vand.u32 31, %v1183_v3  ;;  %v12071_v42 = vshrl.u32 %v1183_v3, 5 }
 0x35e   : > { %v12067_v39 = vsub.s32 32, %v1185_v30  ;;  %v1188_v27 = vshll.u32 %v16537_v28, %v1185_v30  ;;  %v1191_v31 = vshll.u32 %v16533_v20, %v1185_v30  ;;  %v1194_v23 = vshll.u32 %v16531_v22, %v1185_v30 }
 0x35f   : > { %v1197_v44 = vshll.u32 %v16535_v16, %v1185_v30  ;;  %v1200_v54 = vshll.u32 %v16541_v10, %v1185_v30  ;;  %vm1203_vm1 = vcmp.lt.s32.totalorder %v12071_v42, 1  ;;  %vm1206_vm4 = vcmp.lt.s32.totalorder %v12071_v42, 4 }
 0x360   : > { %v1189_v8 = vshrl.u32 %v16533_v20, %v12067_v39  ;;  %v1192_v43 = vshrl.u32 %v16531_v22, %v12067_v39  ;;  %v1195_v18 = vshrl.u32 %v16535_v16, %v12067_v39  ;;  %v1198_v46 = vshrl.u32 %v16541_v10, %v12067_v39 }
 0x361   : > { %v1201_v63 = vshrl.u32 %v16539_v12, %v12067_v39  ;;  %vm1205_vm5 = vcmp.lt.s32.totalorder %v12071_v42, 3  ;;  %vm1204_vm7 = vcmp.lt.s32.totalorder %v12071_v42, 2  ;;  %v1443_v22 = vor.u32 4788187, %v1442_v36 }
 0x362   : > { %v12089_v56 = vor.u32 %v1189_v8, %v1188_v27  ;;  %v12091_v19 = vor.u32 %v1192_v43, %v1191_v31  ;;  %v12093_v53 = vor.u32 %v1195_v18, %v1194_v23  ;;  %v1199_v3 = vor.u32 %v1198_v46, %v1197_v44 }
 0x363   : > { %v1202_v49 = vor.u32 %v1201_v63, %v1200_v54  ;;  %v1895_v31 = vsub.s32 0, %v12065_v37  ;;  %v1438_v18 = vshrl.u32 %v1420_v62, %v1436_v26  ;;  %v2266_v44 = vadd.s32 1, %v10475_v0 }
 0x364   : > { %v1211_v30 = vsel %vm1203_vm1, %v12089_v56, %v12091_v19  ;;  %v1215_v27 = vsel %vm1203_vm1, %v12091_v19, %v12093_v53  ;;  %v1212_v8 = vsel %vm1206_vm4, %v1199_v3, 920167782  ;;  %v1437_v62 = vshll.u32 %v11950_v21, %v12018_v40 }
 0x365   : > { %v1216_v43 = vsel %vm1206_vm4, %v1202_v49, 1326507024  ;;  %v1213_v23 = vsel %vm1205_vm5, %v12093_v53, %v1212_v8  ;;  %v1220_v49 = vand.u32 65535, %v12106_v38  ;;  %v1896_v8 = vsel %vm1894_vm6, %v1895_v31, %v12065_v37 }
 0x366   : > { %v1217_v41 = vsel %vm1205_vm5, %v1199_v3, %v1216_v43  ;;  %v1214_v46 = vsel %vm1204_vm7, %v1211_v30, %v1213_v23  ;;  %v1221_v3 = vshrl.u32 %v12106_v38, 16  ;;  %v2725_v26 = vshrl.u32 %v2724_v55, 23 }
 0x367   : > { %v1218_v54 = vsel %vm1204_vm7, %v1215_v27, %v1217_v41  ;;  %v1245_v32 = vshrl.u32 %v1214_v46, 16  ;;  %v1244_v30 = vand.u32 65535, %v1214_v46  ;;  %v12133_v27 = vld [vmem:[#allocation2 + $0x18] sm:$0xff]  ;;  %v12136_v43 = vsub.s32 32, %v12055_v11 }
 0x368   : > { %v1222_v63 = vand.u32 65535, %v1218_v54  ;;  %v1223_v1 = vshrl.u32 %v1218_v54, 16  ;;  %vm2267_vm9 = vcmp.gt.s32.totalorder %v2266_v44, 0  ;;  %v1439_v31 = vor.u32 %v1438_v18, %v1437_v62 }
 0x369   : > { %16731 = vst [vmem:[#allocation14_spill] sm:$0xff] %v12136_v43  ;;  %v12140_v23 = vmul.u32 %v1245_v32, %v1220_v49  ;;  %v5090_v41 = vsel %vm5089_vm8, %v12060_v29, 0  ;;  %v1897_v54 = vclz %v1896_v8  ;;  %v1444_v21 = vand.u32 2147483647, %v1443_v22 }
 0x36a   : > { %v12131_v0 = vmul.u32 %v1223_v1, %v1220_v49  ;;  %v12138_v36 = vmul.u32 %v1222_v63, %v1221_v3  ;;  %v1224_v40 = vmul.u32 %v1222_v63, %v1220_v49  ;;  %v1639_v46 = vand.u32 2139095040, %v12133_v27 }
 0x36b   : > { %v12146_v20 = vsel %vm2267_vm9, %v2266_v44, 0  ;;  %v10484_v16 = vadd.s32 4294967169, %v2725_v26  ;;  %v1246_v28 = vmul.u32 %v1244_v30, %v1220_v49  ;;  %v1250_v12 = vshll.u32 %v12140_v23, 16  ;;  %v11293_v26 = vld [vmem:[%s16522_s12 + $0x18] sm:$0xff] }
 0x36c   : > { %v1228_v55 = vshll.u32 %v12131_v0, 16  ;;  %v1230_v18 = vshll.u32 %v12138_v36, 16  ;;  %v12151_v8 = vmul.u32 %v1244_v30, %v1221_v3  ;;  %v1446_v22 = vcvt.s32.f32 %v1439_v31 }
 0x36d   : > { %v10467_v63 = vadd.s32 4294967294, %v1897_v54  ;;  %v5555_v62 = vsel %vm5554_vm10, %v12062_v6, 0  ;;  %v1227_v49 = vmul.u32 %v1223_v1, %v1221_v3  ;;  %vm1254_vm15 = vc.u32 %v1246_v28, %v1250_v12  ;;  %v11294_v6 = vld [vmem:[%s16522_s12 + $0x20] sm:$0xff] }
 0x36e   : > { %vm1232_vm12 = vc.u32 %v1224_v40, %v1228_v55  ;;  %v1234_v29 = vadd.s32 %v1228_v55, %v1224_v40  ;;  %v1640_v10 = vshrl.u32 %v1639_v46, 23  ;;  %v1447_v40 = vmul.f32 %v1446_v22, %v1444_v21  ;;  %v11302_v1 = vld [vmem:[%s16522_s12 + $0x60] sm:$0xff]  ;;  %9814 = vmatpush.bf16.msrb.mxu1 %v11294_v6 }
 0x36f   : > { %v1233_v44 = vsel %vm1232_vm12, 1, %v16544_v24  ;;  %v12163_v30 = vand.u32 31, %v12146_v20  ;;  %v2731_v31 = vadd.s32 1, %v10484_v16  ;;  %v1249_v54 = vmul.u32 %v1245_v32, %v1221_v3  ;;  %v11312_v16 = vld [vmem:[%s16522_s12 + $0xb0] sm:$0xff]  ;;  %9833 = vmatpush.bf16.msrb.mxu3 %v11302_v1 }
 0x370   : > { %vm12158_vm14 = vc.u32 %v1234_v29, %v1230_v18  ;;  %v1235_v55 = vadd.s32 %v1233_v44, %v1227_v49  ;;  %v16546_v18 = vshll.u32 %v12151_v8, 16  ;;  %v1255_v29 = vsel %vm1254_vm15, 1, %v16544_v24  ;;  %9850 = vmatpush.bf16.msrb.mxu0 %v11312_v16 }
 0x371   : > { %16734 = vst [vmem:[#allocation15_spill] sm:$0xff] %v12163_v30  ;;  %v12173_v46 = vadd.s32 %v1250_v12, %v1246_v28  ;;  %v1450_v32 = vsub.s32 4, %v11941_v61  ;;  %v12179_v3 = vand.u32 31, %v5090_v41  ;;  %vm10468_vm0 = vcmp.lt.s32.totalorder %v10467_v63, 0 }
 0x372   : > { %v1237_v21 = vsel %vm12158_vm14, 1, %v16544_v24  ;;  %v12184_v22 = vand.u32 31, %v5555_v62  ;;  %v1257_v44 = vadd.s32 %v1255_v29, %v1249_v54  ;;  %v10463_v12 = vadd.s32 4294967169, %v1640_v10  ;;  %v11301_v54 = vld [vmem:[%s16522_s12 + $0x58] sm:$0xff]  ;;  %9815 = vmatpush.bf16.msrb.mxu1 %v11293_v26 }
 0x373   : > { %16735 = vst [vmem:[#allocation16_spill] sm:$0xff] %v12179_v3  ;;  %vm1258_vm6 = vc.u32 %v12173_v46, %v16546_v18  ;;  %v1448_v28 = vxor.u32 2147483648, %v1447_v40  ;;  %v1915_v49 = vsub.s32 4, %v12023_v45  ;;  %vm2732_vm8 = vcmp.gt.s32.totalorder %v2731_v31, 0  ;;  %v11311_v18 = vld [vmem:[%s16522_s12 + $0xa8] sm:$0xff]  ;;  %9834 = vmatpush.bf16.msrb.mxu3 %v11301_v54 }
 0x374   : > { %16736 = vst [vmem:[#allocation17_spill] sm:$0xff] %v12184_v22  ;;  %v1259_v15 = vsel %vm1258_vm6, 1, %v16544_v24  ;;  %v16737_v6 = vand.u32 2147483647, %v11756_v2  ;;  %v16738_v1 = vmov 0  ;;  %v12203_v10 = vshrl.u32 %v5090_v41, 5  ;;  %9851 = vmatpush.bf16.msrb.mxu0 %v11311_v18 }
 0x375   : > { %v12206_v29 = vsel %vm10468_vm0, 0, %v10467_v63  ;;  %v12209_v16 = vsub.s32 32, %v12163_v30  ;;  %v1239_v24 = vadd.s32 %v1237_v21, %v1235_v55  ;;  %v12220_v41 = vsub.s32 32, %v12179_v3 }
 0x376   : > { %vm12199_vm9 = vcmp.le.f32.partialorder %v16737_v6, 0.7853982  ;;  %16741 = vst [vmem:[#allocation19_spill] sm:$0xff] %v12203_v10  ;;  %v12217_v6 = vsel %vm1328_vm11, %v1450_v32, %v11941_v61  ;;  %v1885_v63 = vadd.s32 %v11979_v50, %v11969_v13  ;;  %v12224_v59 = vshrl.u32 %v5555_v62, 5  ;;  %v1109_v62 = vpop.permute.xlu1 %1108 }
 0x377   : > { %v16739_v1 = vsel %vm12199_vm9, 4294967295, %v16738_v1  ;;  %16742 = vst [vmem:[#allocation20_spill] sm:$0xff] %v12209_v16  ;;  %v2733_v55 = vsel %vm2732_vm8, %v2731_v31, 0  ;;  %v1229_v21 = vshrl.u32 %v12131_v0, 16  ;;  %v1261_v10 = vadd.s32 %v1259_v15, %v1257_v44 }
 0x378   : > { %16740 = vst [vmem:[#allocation18_spill] sm:$0xff] %v16739_v1  ;;  %v1646_v4 = vadd.s32 1, %v10463_v12  ;;  %v1449_v61 = vsel %vm1328_vm11, %v1448_v28, %v1447_v40  ;;  %v1905_v32 = vsub.s32 4294967266, %v12206_v29  ;;  %v12235_v13 = vsel %vm1793_vm13, %v1915_v49, %v12023_v45  ;;  %v12252_v28 = vld [vmem:[#allocation2 + $0x48] sm:$0xff] }
 0x379   : > { %16743 = vst [vmem:[#allocation21_spill] sm:$0xff] %v12217_v6  ;;  %v12238_v50 = vsub.s32 32, %v12184_v22  ;;  %v12242_v15 = vshrl.u32 %v12146_v20, 5  ;;  %v16749_v0 = vmov 920167782   ;;  %v1240_v40 = vadd.s32 %v1239_v24, %v1229_v21 }
 0x37a   : > { %16744 = vst [vmem:[#allocation22_spill] sm:$0xff] %v12220_v41  ;;  %v2283_v31 = vshrl.u32 %v16749_v0, %v12209_v16  ;;  %v1251_v18 = vshrl.u32 %v12140_v23, 16  ;;  %v16750_v45 = vmov 1326507024   ;;  %v12250_v12 = vand.u32 31, %v2733_v55 }
 0x37b   : > { %16745 = vst [vmem:[#allocation23_spill] sm:$0xff] %v12224_v59  ;;  %v2286_v44 = vshrl.u32 %v16750_v45, %v12209_v16  ;;  %v1187_v49 = vshrl.u32 %v16753_v7, %v12067_v39  ;;  %v1208_v20 = vsel %vm1206_vm4, %v12093_v53, 2102212464  ;;  %v1231_v24 = vshrl.u32 %v12138_v36, 16 }
 0x37c   : > { %16746 = vst [vmem:[#allocation24_spill] sm:$0xff] %v12235_v13  ;;  %v1253_v23 = vshrl.u32 %v12151_v8, 16  ;;  %v1262_v26 = vadd.s32 %v1261_v10, %v1251_v18  ;;  %v1906_v54 = vadd.s32 127, %v1905_v32  ;;  %v16754_v21 = vmov 2102212464  }
 0x37d   : > { %16747 = vst [vmem:[#allocation25_spill] sm:$0xff] %v12238_v50  ;;  %v2285_v16 = vshll.u32 %v16749_v0, %v12163_v30  ;;  %v1207_v39 = vsel %vm1203_vm1, %v1187_v49, %v12089_v56  ;;  %v2569_v59 = vand.u32 2139095040, %v12252_v28  ;;  %v1209_v53 = vsel %vm1205_vm5, %v12091_v19, %v1208_v20  ;;  %v11292_v50 = vld [vmem:[%s16522_s12 + $0x10] sm:$0xff] }
 0x37e   : > { %16748 = vst [vmem:[#allocation26_spill] sm:$0xff] %v12242_v15  ;;  %v12272_v36 = vadd.s32 %v1240_v40, %v1231_v24  ;;  %v1263_v10 = vadd.s32 %v1262_v26, %v1253_v23  ;;  %v12277_v32 = vsel %vm12199_vm9, %v11756_v2, %v1449_v61  ;;  %vm16628_vm4 = vcmp.lt.s32.totalorder %v12242_v15, 4  ;;  %9816 = vmatpush.bf16.msrb.mxu1 %v11292_v50 }
 0x37f   : > { %1119 = vst.msk [vmem:[#allocation2 + $0x30] sm:$0xff] %vm1116_vm3, %v1109_v62  ;;  %vm1647_vm3 = vcmp.gt.s32.totalorder %v1646_v4, 0  ;;  %v2282_v62 = vshll.u32 %v16754_v21, %v12163_v30  ;;  %v16560_v18 = vand.u32 2147483647, %v12133_v27  ;;  %v2287_v49 = vor.u32 %v2286_v44, %v2285_v16 }
 0x380   : > { %16751 = vst [vmem:[#allocation27_spill] sm:$0xff] %v12250_v12  ;;  %v1648_v30 = vsel %vm1647_vm3, %v1646_v4, 0  ;;  %v12284_v22 = vsub.s32 32, %v12250_v12  ;;  %v16758_v19 = vshll.u32 %v12151_v8, 16  ;;  %v1901_v20 = vsub.s32 32, %v12206_v29 }
 0x381   : > { %16752 = vst [vmem:[#allocation28_spill] sm:$0xff] %v12252_v28  ;;  %v12281_v56 = vor.u32 %v2283_v31, %v2282_v62  ;;  %v1907_v2 = vshll.u32 %v1906_v54, 23  ;;  %v1210_v61 = vsel %vm1204_vm7, %v1207_v39, %v1209_v53  ;;  %v12295_v24 = vmul.f32 2.0, %v12013_v9 }
 0x382   : > { %16755 = vst [vmem:[#allocation29_spill] sm:$0xff] %v12277_v32  ;;  %v12289_v40 = vadd.s32 %v12173_v46, %v16758_v19  ;;  %v2570_v4 = vshrl.u32 %v2569_v59, 23  ;;  %v1267_v16 = vadd.s32 1, %v1263_v10  ;;  %v1650_v31 = vand.u32 31, %v1648_v30 }
 0x383   : > { %16756 = vst [vmem:[#allocation30_spill] sm:$0xff] %v12281_v56  ;;  %v1902_v8 = vshll.u32 %v12065_v37, %v12206_v29  ;;  %v12301_v46 = vshrl.u32 %v2733_v55, 5  ;;  %v12305_v44 = vshll.u32 %v16754_v21, %v12250_v12  ;;  %v1643_v42 = vand.u32 8388607, %v16560_v18 }
 0x384   : > { %16757 = vst [vmem:[#allocation31_spill] sm:$0xff] %v12284_v22  ;;  %vm1266_vm1 = vc.u32 %v12272_v36, %v12289_v40  ;;  %v12312_v59 = vsel %vm16628_vm4, %v12281_v56, 920167782  ;;  %v12316_v23 = vsel %vm16628_vm4, %v2287_v49, 1326507024  ;;  %v12320_v37 = vshrl.u32 %v16749_v0, %v12284_v22 }
 0x385   : > { %16759 = vst [vmem:[#allocation32_spill] sm:$0xff] %v12295_v24  ;;  %v1264_v29 = vmul.u32 %v12106_v38, %v1210_v61  ;;  %v1903_v55 = vshrl.u32 %v1885_v63, %v1901_v20  ;;  %v12325_v26 = vshll.u32 %v16749_v0, %v12250_v12  ;;  %v1268_v54 = vsel %vm1266_vm1, %v1267_v16, %v1263_v10 }
 0x386   : > { %16760 = vst [vmem:[#allocation33_spill] sm:$0xff] %v12301_v46  ;;  %v12327_v62 = vsub.s32 32, %v1650_v31  ;;  %v1908_v39 = vor.u32 4788187, %v1907_v2  ;;  %v10481_v53 = vadd.s32 4294967169, %v2570_v4  ;;  %v4926_v49 = vand.u32 2139095040, %v12295_v24 }
 0x387   : > { %16761 = vst [vmem:[#allocation34_spill] sm:$0xff] %v12312_v59  ;;  %v1269_v19 = vadd.s32 %v1268_v54, %v1264_v29  ;;  %v1644_v18 = vor.u32 8388608, %v1643_v42  ;;  %v12330_v59 = vshrl.u32 %v1648_v30, 5  ;;  %v1653_v56 = vshll.u32 %v16753_v7, %v1650_v31 }
 0x388   : > { %16762 = vst [vmem:[#allocation35_spill] sm:$0xff] %v12316_v23  ;;  %v16763_v38 = vmov 2475754826   ;;  %v16764_v10 = vmov 2131351028   ;;  %v1660_v2 = vshrl.u32 %v16754_v21, %v12327_v62  ;;  %v1662_v30 = vshll.u32 %v16754_v21, %v1650_v31 }
 0x389   : > { %v1654_v63 = vshrl.u32 %v16763_v38, %v12327_v62  ;;  %v1270_v20 = vadd.s32 536870912, %v1269_v19  ;;  %v1656_v61 = vshll.u32 %v16763_v38, %v1650_v31  ;;  %v1657_v16 = vshrl.u32 %v16764_v10, %v12327_v62 }
 0x38a   : > { %v1659_v42 = vshll.u32 %v16764_v10, %v1650_v31  ;;  %v1663_v29 = vshrl.u32 %v16749_v0, %v12327_v62  ;;  %v1904_v54 = vor.u32 %v1903_v55, %v1902_v8  ;;  %v2576_v12 = vadd.s32 1, %v10481_v53 }
 0x38b   : > { %v12340_v4 = vor.u32 %v1654_v63, %v1653_v56  ;;  %v12346_v23 = vshrl.u32 %v1270_v20, 30  ;;  %v12348_v15 = vor.u32 %v1657_v16, %v1656_v61  ;;  %v11300_v56 = vld [vmem:[%s16522_s12 + $0x50] sm:$0xff]  ;;  %v11310_v63 = vld [vmem:[%s16522_s12 + $0xa0] sm:$0xff]  ;;  %v1665_v55 = vshll.u32 %v16749_v0, %v1650_v31 }
 0x38c   : > { %v12359_v24 = vor.u32 %v1660_v2, %v1659_v42  ;;  %v1664_v8 = vor.u32 %v1663_v29, %v1662_v30  ;;  %v1666_v53 = vshrl.u32 %v16750_v45, %v12327_v62  ;;  %v1909_v20 = vand.u32 2147483647, %v1908_v39  ;;  %9835 = vmatpush.bf16.msrb.mxu3 %v11300_v56  ;;  %9852 = vmatpush.bf16.msrb.mxu0 %v11310_v63  ;;  %v11291_v42 = vld [vmem:[%s16522_s12 + $0x8] sm:$0xff]  ;;  %v11309_v30 = vld [vmem:[%s16522_s12 + $0x98] sm:$0xff] }
 0x38d   : > { %v1272_v61 = vshll.u32 %v12346_v23, 30  ;;  %v4927_v16 = vshrl.u32 %v4926_v49, 23  ;;  %vm1668_vm5 = vcmp.lt.s32.totalorder %v12330_v59, 1  ;;  %vm1671_vm7 = vcmp.lt.s32.totalorder %v12330_v59, 4  ;;  %9817 = vmatpush.bf16.msrb.mxu1 %v11291_v42  ;;  %v11290_v42 = vld [vmem:[%s16522_s12] sm:$0xff] }
 0x38e   : > { %v1667_v3 = vor.u32 %v1666_v53, %v1665_v55  ;;  %v1676_v2 = vsel %vm1668_vm5, %v12340_v4, %v12348_v15  ;;  %v12371_v31 = vshll.u32 %v1644_v18, 8  ;;  %v12375_v39 = vshrl.u32 %v16750_v45, %v12284_v22  ;;  %v11299_v18 = vld [vmem:[%s16522_s12 + $0x48] sm:$0xff] }
 0x38f   : > { %v12377_v49 = vsub.s32 %v1269_v19, %v1272_v61  ;;  %vm1670_vm10 = vcmp.lt.s32.totalorder %v12330_v59, 3  ;;  %v1677_v50 = vsel %vm1671_vm7, %v1664_v8, 920167782  ;;  %v1911_v29 = vcvt.s32.f32 %v1904_v54 }
 0x390   : > { %vm2577_vm11 = vcmp.gt.s32.totalorder %v2576_v12, 0  ;;  %vm1669_vm12 = vcmp.lt.s32.totalorder %v12330_v59, 2  ;;  %v1678_v19 = vsel %vm1670_vm10, %v12359_v24, %v1677_v50  ;;  %v1680_v55 = vsel %vm1668_vm5, %v12348_v15, %v12359_v24  ;;  %9836 = vmatpush.bf16.msrb.mxu3 %v11299_v18  ;;  %9853 = vmatpush.bf16.msrb.mxu0 %v11309_v30  ;;  %v11308_v18 = vld [vmem:[%s16522_s12 + $0x90] sm:$0xff] }
 0x391   : > { %vm1274_vm14 = vcmp.lt.s32.totalorder %v12377_v49, 0  ;;  %v1275_v56 = vsub.s32 0, %v12377_v49  ;;  %v1679_v63 = vsel %vm1669_vm12, %v1676_v2, %v1678_v19  ;;  %v1681_v54 = vsel %vm1671_vm7, %v1667_v3, 1326507024  ;;  %v11298_v3 = vld [vmem:[%s16522_s12 + $0x40] sm:$0xff]  ;;  %9818 = vmatpush.bf16.msrb.mxu1 %v11290_v42 }
 0x392   : > { %v1685_v53 = vand.u32 65535, %v12371_v31  ;;  %v1709_v61 = vand.u32 65535, %v1679_v63  ;;  %v1710_v50 = vshrl.u32 %v1679_v63, 16  ;;  %v12406_v22 = vmul.f32 %v1911_v29, %v1909_v20 }
 0x393   : > { %v1276_v41 = vsel %vm1274_vm14, %v1275_v56, %v12377_v49  ;;  %v10526_v2 = vadd.s32 4294967169, %v4927_v16  ;;  %v1682_v19 = vsel %vm1670_vm10, %v1664_v8, %v1681_v54  ;;  %v1686_v16 = vshrl.u32 %v12371_v31, 16 }
 0x394   : > { %v1277_v20 = vclz %v1276_v41  ;;  %v1683_v30 = vsel %vm1669_vm12, %v1680_v55, %v1682_v19  ;;  %v1712_v29 = vmul.u32 %v1710_v50, %v1685_v53  ;;  %v12425_v8 = vor.u32 %v12320_v37, %v12305_v44  ;;  %9837 = vmatpush.bf16.msrb.mxu3 %v11298_v3  ;;  %9854 = vmatpush.bf16.msrb.mxu0 %v11308_v18 }
 0x395   : > { %v12428_v56 = vsel %vm2577_vm11, %v2576_v12, 0  ;;  %v1687_v63 = vand.u32 65535, %v1683_v30  ;;  %v1688_v54 = vshrl.u32 %v1683_v30, 16  ;;  %v1711_v1 = vmul.u32 %v1709_v61, %v1685_v53 }
 0x396   : > { %16765 = vst [vmem:[#allocation36_spill] sm:$0xff] %v12425_v8  ;;  %v10455_v13 = vadd.s32 4294967294, %v1277_v20  ;;  %v1713_v41 = vmul.u32 %v1709_v61, %v1686_v16  ;;  %v1715_v6 = vshll.u32 %v1712_v29, 16  ;;  %v12431_v19 = vadd.s32 1, %v10526_v2 }
 0x397   : > { %v1690_v43 = vmul.u32 %v1688_v54, %v1685_v53  ;;  %v1691_v11 = vmul.u32 %v1687_v63, %v1686_v16  ;;  %v12435_v12 = vand.u32 31, %v12428_v56  ;;  %v1689_v42 = vmul.u32 %v1687_v63, %v1685_v53 }
 0x398   : > { %vm10456_vm15 = vcmp.lt.s32.totalorder %v10455_v13, 0  ;;  %vm1719_vm0 = vc.u32 %v1711_v1, %v1715_v6  ;;  %v1714_v61 = vmul.u32 %v1710_v50, %v1686_v16  ;;  %v1692_v20 = vmul.u32 %v1688_v54, %v1686_v16 }
 0x399   : > { %v12437_v37 = vsel %vm10456_vm15, 0, %v10455_v13  ;;  %v1693_v3 = vshll.u32 %v1690_v43, 16  ;;  %v1695_v30 = vshll.u32 %v1691_v11, 16  ;;  %v1717_v2 = vshll.u32 %v1713_v41, 16 }
 0x39a   : > { %v1285_v18 = vsub.s32 4294967266, %v12437_v37  ;;  %v1720_v5 = vsel %vm1719_vm0, 1, %v16766_v33  ;;  %v1721_v44 = vadd.s32 %v1715_v6, %v1711_v1  ;;  %v12442_v52 = vsub.s32 32, %v12435_v12 }
 0x39b   : > { %vm1697_vm6 = vc.u32 %v1689_v42, %v1693_v3  ;;  %v1699_v55 = vadd.s32 %v1693_v3, %v1689_v42  ;;  %v12446_v13 = vshll.u32 %v16749_v0, %v12435_v12  ;;  %v1722_v50 = vadd.s32 %v1720_v5, %v1714_v61 }
 0x39c   : > { %v1698_v53 = vsel %vm1697_vm6, 1, %v16766_v33  ;;  %v1673_v16 = vsel %vm1671_vm7, %v12359_v24, 2102212464  ;;  %vm1723_vm3 = vc.u32 %v1721_v44, %v1717_v2  ;;  %v1286_v54 = vadd.s32 127, %v1285_v18 }
 0x39d   : > { %v1700_v63 = vadd.s32 %v1698_v53, %v1692_v20  ;;  %vm1701_vm8 = vc.u32 %v1699_v55, %v1695_v30  ;;  %v1652_v1 = vshrl.u32 %v16753_v7, %v12327_v62  ;;  %v1724_v42 = vsel %vm1723_vm3, 1, %v16766_v33 }
 0x39e   : > { %v1702_v6 = vsel %vm1701_vm8, 1, %v16766_v33  ;;  %v1694_v3 = vshrl.u32 %v1690_v43, 16  ;;  %v1716_v58 = vshrl.u32 %v1712_v29, 16  ;;  %v1726_v47 = vadd.s32 %v1724_v42, %v1722_v50  ;;  %v11446_v50 = vld [vmem:[#allocation2 + $0x8] sm:$0xff] }
 0x39f   : > { %v1704_v51 = vadd.s32 %v1702_v6, %v1700_v63  ;;  %v1281_v5 = vsub.s32 32, %v12437_v37  ;;  %v1672_v24 = vsel %vm1668_vm5, %v1652_v1, %v12340_v4  ;;  %v1674_v55 = vsel %vm1670_vm10, %v12348_v15, %v1673_v16  ;;  %v11307_v15 = vld [vmem:[%s16522_s12 + $0x88] sm:$0xff]  ;;  %v12485_v16 = vld [vmem:[#allocation2 + $0x30] sm:$0xff]  ;;  %v11447_v63 = vld [vmem:[#allocation2 + $0x20] sm:$0xff] }
 0x3a0   : > { %v12464_v62 = vmul.f32 2.0, %v12133_v27  ;;  %v1696_v61 = vshrl.u32 %v1691_v11, 16  ;;  %v1718_v20 = vshrl.u32 %v1713_v41, 16  ;;  %v1727_v43 = vadd.s32 %v1726_v47, %v1716_v58  ;;  %16768 = vst [vmem:[#allocation38_spill] sm:$0xff] %v12485_v16  ;;  %9855 = vmatpush.bf16.msrb.mxu0 %v11307_v15 }
 0x3a1   : > { %v1705_v18 = vadd.s32 %v1704_v51, %v1694_v3  ;;  %v2596_v29 = vshrl.u32 %v16750_v45, %v12442_v52  ;;  %v1265_v30 = vadd.s32 %v12289_v40, %v12272_v36  ;;  %v1287_v53 = vshll.u32 %v1286_v54, 23  ;;  %v11306_v3 = vld [vmem:[%s16522_s12 + $0x80] sm:$0xff] }
 0x3a2   : > { %16767 = vst [vmem:[#allocation37_spill] sm:$0xff] %v12464_v62  ;;  %v1155_v4 = vpack.c.bf16 %v11446_v50, %v12013_v9  ;;  %v2587_v11 = vshrl.u32 %v16764_v10, %v12442_v52  ;;  %v12478_v47 = vadd.s32 %v1721_v44, %v1717_v2  ;;  %v1728_v58 = vadd.s32 %v1727_v43, %v1718_v20 }
 0x3a3   : > { %v12476_v51 = vadd.s32 %v1705_v18, %v1696_v61  ;;  %v12481_v41 = vshrl.u32 %v12428_v56, 5  ;;  %v1283_v36 = vshrl.u32 %v1265_v30, %v1281_v5  ;;  %v1675_v40 = vsel %vm1669_vm12, %v1672_v24, %v1674_v55 }
 0x3a4   : > { %v1157_v54 = vpack.c.bf16 %v11447_v63, %v12133_v27  ;;  %1163 = vst [vmem:[#allocation3] sm:$0xff] %v1155_v4  ;;  %v2590_v1 = vshrl.u32 %v16754_v21, %v12442_v52  ;;  %v1732_v44 = vadd.s32 1, %v1728_v58  ;;  %v5391_v56 = vand.u32 2139095040, %v12464_v62  ;;  %9856 = vmatpush.bf16.msrb.mxu0 %v11306_v3 }
 0x3a5   : > { %vm1731_vm1 = vc.u32 %v12476_v51, %v12478_v47  ;;  %v2593_v59 = vshrl.u32 %v16749_v0, %v12442_v52  ;;  %v2597_v2 = vor.u32 %v2596_v29, %v12446_v13  ;;  %v1282_v6 = vshll.u32 %v12377_v49, %v12437_v37 }
 0x3a6   : > { %v1288_v42 = vor.u32 4788187, %v1287_v53  ;;  %1165 = vst [vmem:[#allocation3 + $0x3c] sm:$0xff] %v1157_v54  ;;  %v16769_v5 = vand.u32 2147483647, %v11765_v14  ;;  %v16770_v24 = vmov 0  ;;  %v2586_v55 = vshll.u32 %v16763_v38, %v12435_v12 }
 0x3a7   : > { %v1729_v13 = vmul.u32 %v12371_v31, %v1675_v40  ;;  %v1733_v61 = vsel %vm1731_vm1, %v1732_v44, %v1728_v58  ;;  %v2104_v49 = vand.u32 2139095040, %v12485_v16  ;;  %v16773_v37 = vand.u32 2147483647, %v12252_v28 }
 0x3a8   : > { %vm12503_vm5 = vcmp.le.f32.partialorder %v16769_v5, 0.7853982  ;;  %v2589_v20 = vshll.u32 %v16764_v10, %v12435_v12  ;;  %v2592_v43 = vshll.u32 %v16754_v21, %v12435_v12  ;;  %v1284_v29 = vor.u32 %v1283_v36, %v1282_v6 }
 0x3a9   : > { %v16771_v24 = vsel %vm12503_vm5, 4294967295, %v16770_v24  ;;  %v2573_v18 = vand.u32 8388607, %v16773_v37  ;;  %v12517_v30 = vor.u32 %v2587_v11, %v2586_v55  ;;  %vm2601_vm7 = vcmp.lt.s32.totalorder %v12481_v41, 4 }
 0x3aa   : > { %16772 = vst [vmem:[#allocation39_spill] sm:$0xff] %v16771_v24  ;;  %v12520_v53 = vadd.s32 %v1733_v61, %v1729_v13  ;;  %v5392_v31 = vshrl.u32 %v5391_v56, 23  ;;  %v2591_v50 = vor.u32 %v2590_v1, %v2589_v20  ;;  %v2594_v4 = vor.u32 %v2593_v59, %v2592_v43 }
 0x3ab   : > { %v2611_v15 = vsel %vm2601_vm7, %v2597_v2, 1326507024  ;;  %v1289_v58 = vand.u32 2147483647, %v1288_v42  ;;  %v2105_v40 = vshrl.u32 %v2104_v49, 23  ;;  %v1156_v54 = vpack.c.bf16 %v11947_v57, %v11947_v57 }
 0x3ac   : > { %v1158_v36 = vpack.c.bf16 %v11952_v25, %v11952_v25  ;;  %v1159_v11 = vpack.c.bf16 %v12027_v60, %v12485_v16  ;;  %v16774_v44 = vxor.u32 2147483648, %v12406_v22  ;;  %v2574_v56 = vor.u32 8388608, %v2573_v18 }
 0x3ad   : > { %v1291_v59 = vcvt.s32.f32 %v1284_v29  ;;  %vm4934_vm10 = vcmp.gt.s32.totalorder %v12431_v19, 0  ;;  %vm2598_vm11 = vcmp.lt.s32.totalorder %v12481_v41, 1  ;;  %vm2600_vm12 = vcmp.lt.s32.totalorder %v12481_v41, 3  ;;  %1164 = vst [vmem:[#allocation3 + $0x8] sm:$0xf] %v1156_v54 }
 0x3ae   : > { %v1914_v1 = vsel %vm1793_vm13, %v16774_v44, %v12406_v22  ;;  %v1735_v57 = vadd.s32 536870912, %v12520_v53  ;;  %v10535_v25 = vadd.s32 4294967169, %v5392_v31  ;;  %v2584_v60 = vshrl.u32 %v16763_v38, %v12442_v52  ;;  %1166 = vst [vmem:[#allocation3 + $0x44] sm:$0xf] %v1158_v36 }
 0x3af   : > { %v2610_v14 = vsel %vm2598_vm11, %v12517_v30, %v2591_v50  ;;  %v2612_v22 = vsel %vm2600_vm12, %v2594_v4, %v2611_v15  ;;  %v1292_v2 = vmul.f32 %v1291_v59, %v1289_v58  ;;  %v12548_v6 = vmul.f32 %v12277_v32, %v12277_v32  ;;  %1167 = vst [vmem:[#allocation3 + $0x78] sm:$0xff] %v1159_v11 }
 0x3b0   : > { %vm16627_vm13 = vcmp.lt.s32.totalorder %v12301_v46, 4  ;;  %v16586_v42 = vand.u32 2147483647, %v12485_v16  ;;  %v10472_v3 = vadd.s32 4294967169, %v2105_v40  ;;  %v12554_v5 = vsel %vm12503_vm5, %v11447_v63, %v1914_v1 }
 0x3b1   : > { %16775 = vst [vmem:[#allocation40_spill] sm:$0xff] %v12554_v5  ;;  %v2752_v55 = vor.u32 %v12375_v39, %v12325_v26  ;;  %v2583_v13 = vshll.u32 %v16753_v7, %v12435_v12  ;;  %vm2599_vm14 = vcmp.lt.s32.totalorder %v12481_v41, 2  ;;  %v4935_v49 = vsel %vm4934_vm10, %v12431_v19, 0 }
 0x3b2   : > { %v12563_v61 = vsel %vm2599_vm14, %v2610_v14, %v2612_v22  ;;  %v12568_v37 = vshrl.u32 %v1735_v57, 30  ;;  %v5398_v63 = vadd.s32 1, %v10535_v25  ;;  %v12573_v26 = vsel %vm16627_vm13, %v12425_v8, 920167782 }
 0x3b3   : > { %16776 = vst [vmem:[#allocation41_spill] sm:$0xff] %v12573_v26  ;;  %v2585_v39 = vor.u32 %v2584_v60, %v2583_v13  ;;  %v12575_v12 = vshll.u32 %v2574_v56, 8  ;;  %v1293_v18 = vxor.u32 2147483648, %v1292_v2  ;;  %v2607_v20 = vsel %vm2601_vm7, %v2594_v4, 920167782  ;;  %v11337_v13 = vld [vmem:[%s16522_s12 + $0x178] sm:$0xff] }
 0x3b4   : > { %v1295_v43 = vsub.s32 4, %v12346_v23  ;;  %v2108_v19 = vand.u32 8388607, %v16586_v42  ;;  %v2111_v29 = vadd.s32 1, %v10472_v3  ;;  %v12584_v31 = vmul.f32 %v12554_v5, %v12554_v5  ;;  %9906 = vmatpush.bf16.msra.mxu3 %v11337_v13  ;;  %v10602_v13 = vld [vmem:[#allocation3 + $0x3c] sm:$0xf0] }
 0x3b5   : > { %16777 = vst [vmem:[#allocation42_spill] sm:$0xff] %v12575_v12  ;;  %v12588_v15 = vsel %vm16627_vm13, %v2752_v55, 1326507024  ;;  %v2618_v58 = vshrl.u32 %v12563_v61, 16  ;;  %v12591_v40 = vand.u32 31, %v4935_v49  ;;  %vm1173_vm0 = vcmp.lt.s32.totalorder %v12013_v9, 0 }
 0x3b6   : > { %16778 = vst [vmem:[#allocation43_spill] sm:$0xff] %v12584_v31  ;;  %v16781_v4 = vand.u32 2147483647, %v12013_v9  ;;  %v1737_v36 = vshll.u32 %v12568_v37, 30  ;;  %vm5399_vm6 = vcmp.gt.s32.totalorder %v5398_v63, 0  ;;  %v2606_v11 = vsel %vm2598_vm11, %v2585_v39, %v12517_v30  ;;  %v11345_v42 = vld [vmem:[%s16522_s12 + $0x1b8] sm:$0xff] }
 0x3b7   : > { %16779 = vst [vmem:[#allocation44_spill] sm:$0xff] %v12588_v15  ;;  %v2608_v44 = vsel %vm2600_vm12, %v2591_v50, %v2607_v20  ;;  %v12607_v1 = vand.u32 65535, %v12575_v12  ;;  %v1294_v56 = vsel %vm1173_vm0, %v1293_v18, %v1292_v2  ;;  %v1296_v59 = vsel %vm1173_vm0, %v1295_v43, %v12346_v23  ;;  %9925 = vmatpush.bf16.msra.mxu0 %v11345_v42 }
 0x3b8   : > { %16780 = vst [vmem:[#allocation45_spill] sm:$0xff] %v12591_v40  ;;  %vm12595_vm15 = vcmp.le.f32.partialorder %v16781_v4, 0.7853982  ;;  %v12610_v57 = vshrl.u32 %v4935_v49, 5  ;;  %v2109_v25 = vor.u32 8388608, %v2108_v19  ;;  %vm2112_vm8 = vcmp.gt.s32.totalorder %v2111_v29, 0 }
 0x3b9   : > { %16784 = vst [vmem:[#allocation46_spill] sm:$0xff] %v12607_v1  ;;  %v2603_v60 = vsel %vm2601_vm7, %v2591_v50, 2102212464  ;;  %v12615_v14 = vmul.u32 %v2618_v58, %v12607_v1  ;;  %v12618_v22 = vsub.s32 32, %v12591_v40  ;;  %v5400_v3 = vsel %vm5399_vm6, %v5398_v63, 0 }
 0x3ba   : > { %16785 = vst [vmem:[#allocation47_spill] sm:$0xff] %v12610_v57  ;;  %v2582_v55 = vshrl.u32 %v16753_v7, %v12442_v52  ;;  %v12624_v23 = vsel %vm2599_vm14, %v2606_v11, %v2608_v44  ;;  %v12629_v2 = vsel %vm12595_vm15, %v12013_v9, %v1294_v56  ;;  %v12632_v50 = vsub.s32 %v12520_v53, %v1737_v36  ;;  %v11321_v56 = vld [vmem:[%s16522_s12 + $0xf8] sm:$0xff]  ;;  %v11268_v4 = vld [vmem:[#allocation3 + $0x40] sm:$0xf0] }
 0x3bb   : > { %16786 = vst [vmem:[#allocation48_spill] sm:$0xff] %v12615_v14  ;;  %v12638_v49 = vshrl.u32 %v12575_v12, 16  ;;  %v2617_v52 = vand.u32 65535, %v12563_v61  ;;  %v12643_v63 = vsel %vm12595_vm15, 0, %v1296_v59  ;;  %v2113_v18 = vsel %vm2112_vm8, %v2111_v29, 0  ;;  %v11336_v61 = vld [vmem:[%s16522_s12 + $0x170] sm:$0xff]  ;;  %9868 = vmatpush.bf16.msrb.mxu2 %v11321_v56 }
 0x3bc   : > { %16787 = vst [vmem:[#allocation49_spill] sm:$0xff] %v12618_v22  ;;  %v2602_v9 = vsel %vm2598_vm11, %v2582_v55, %v2585_v39  ;;  %v2604_v53 = vsel %vm2600_vm12, %v12517_v30, %v2603_v60  ;;  %v12650_v20 = vand.u32 31, %v5400_v3  ;;  %v12652_v43 = vshll.u32 %v2109_v25, 8  ;;  %v11267_v30 = vld [vmem:[#allocation3 + $0x38] sm:$0xf0]  ;;  %9907 = vmatpush.bf16.msra.mxu3 %v11336_v61  ;;  %v11335_v61 = vld [vmem:[%s16522_s12 + $0x168] sm:$0xff] }
 0x3bd   : > { %16788 = vst [vmem:[#allocation50_spill] sm:$0xff] %v12624_v23  ;;  %v16589_v29 = vand.u32 65535, %v12624_v23  ;;  %v12662_v39 = vmul.f32 %v12629_v2, %v12629_v2  ;;  %v12665_v54 = vadd.s32 3, %v12643_v63  ;;  %v1740_v36 = vsub.s32 0, %v12632_v50  ;;  %v11329_v59 = vld [vmem:[%s16522_s12 + $0x138] sm:$0xff] }
 0x3be   : > { %16789 = vst [vmem:[#allocation51_spill] sm:$0xff] %v12629_v2  ;;  %v12668_v11 = vshrl.u32 %v5400_v3, 5  ;;  %v2115_v44 = vand.u32 31, %v2113_v18  ;;  %v12678_v25 = vsel %vm2599_vm14, %v2602_v9, %v2604_v53  ;;  %v12681_v60 = vmul.u32 %v2617_v52, %v12607_v1  ;;  %v10600_v3 = vld [vmem:[#allocation3] sm:$0xf]  ;;  %9887 = vmatpush.bf16.msra.mxu1 %v11329_v59  ;;  %v11333_v23 = vld [vmem:[%s16522_s12 + $0x158] sm:$0xff] }
 0x3bf   : > { %16790 = vst [vmem:[#allocation52_spill] sm:$0xff] %v12638_v49  ;;  %v12684_v55 = vmul.u32 %v2617_v52, %v12638_v49  ;;  %vm1739_vm3 = vcmp.lt.s32.totalorder %v12632_v50, 0  ;;  %v12691_v19 = vmul.u32 %v2618_v58, %v12638_v49  ;;  %v12694_v41 = vsub.s32 32, %v12650_v20  ;;  %v10608_v52 = vld [vmem:[#allocation3 + $0x8] sm:$0xf]  ;;  %v12728_v59 = vld [vmem:[#allocation2 + $0x40] sm:$0xff] }
 0x3c0   : > { %16791 = vst [vmem:[#allocation53_spill] sm:$0xff] %v12643_v63  ;;  %v12697_v9 = vand.u32 65535, %v12652_v43  ;;  %v10601_v53 = vor.u32 %v11267_v30, %v10600_v3  ;;  %v12702_v12 = vmul.u32 %v16589_v29, %v12607_v1  ;;  %v12707_v58 = vadd.s32 %v12478_v47, %v12476_v51  ;;  %9908 = vmatpush.bf16.msra.mxu3 %v11335_v61 }
 0x3c1   : > { %16792 = vst [vmem:[#allocation54_spill] sm:$0xff] %v12650_v20  ;;  %v12710_v16 = vshrl.u32 %v12652_v43, 16  ;;  %v1741_v30 = vsel %vm1739_vm3, %v1740_v36, %v12632_v50  ;;  %v12718_v56 = vsub.s32 32, %v2115_v44  ;;  %v12721_v3 = vshll.u32 %v16753_v7, %v2115_v44  ;;  %v11275_v20 = vld [vmem:[#allocation3 + $0x7c] sm:$0xf] }
 0x3c2   : > { %16793 = vst [vmem:[#allocation55_spill] sm:$0xff] %v12652_v43  ;;  %9819 = vmatmul.bf16.vlgmr.msrb.gmra.mxu1 %v10601_v53  ;;  %v12724_v47 = vshll.u32 %v16763_v38, %v2115_v44  ;;  %v10609_v29 = vor.u32 %v11268_v4, %v10608_v52  ;;  %v1160_v42 = vpack.c.bf16 %v12728_v59, %v12728_v59  ;;  %v1742_v53 = vclz %v1741_v30 }
 0x3c3   : > { %16794 = vst [vmem:[#allocation56_spill] sm:$0xff] %v12665_v54  ;;  %v12733_v36 = vshll.u32 %v16764_v10, %v2115_v44  ;;  %v12745_v52 = vshrl.u32 %v2113_v18, 5  ;;  %v1499_v49 = vshrl.u32 %v16763_v38, %v12037_v48  ;;  %v12758_v18 = vshll.u32 %v16749_v0, %v2115_v44 }
 0x3c4   : > { %16795 = vst [vmem:[#allocation57_spill] sm:$0xff] %v12668_v11  ;;  %9857 = vmatmul.bf16.vlgmr.msrb.gmra.mxu0 %v10609_v29  ;;  %v1502_v30 = vshrl.u32 %v16764_v10, %v12037_v48  ;;  %v10464_v14 = vadd.s32 4294967294, %v1742_v53  ;;  %v1510_v43 = vshll.u32 %v16749_v0, %v12020_v35  ;;  %v1511_v8 = vshrl.u32 %v16750_v45, %v12037_v48 }
 0x3c5   : > { %16796 = vst [vmem:[#allocation58_spill] sm:$0xff] %v12678_v25  ;;  %v1307_v25 = vmul.f32 -0.00019511016, %v12662_v39  ;;  %vm1513_vm1 = vcmp.lt.s32.totalorder %v12030_v17, 1  ;;  %vm1515_vm7 = vcmp.lt.s32.totalorder %v12030_v17, 3  ;;  %vm1516_vm10 = vcmp.lt.s32.totalorder %v12030_v17, 4 }
 0x3c6   : > { %16797 = vst [vmem:[#allocation59_spill] sm:$0xff] %v12681_v60  ;;  %vm1638_vm11 = vcmp.lt.s32.totalorder %v12133_v27, 0  ;;  %vm1514_vm12 = vcmp.lt.s32.totalorder %v12030_v17, 2  ;;  %vm10465_vm14 = vcmp.lt.s32.totalorder %v10464_v14, 0 }
 0x3c7   : > { %16798 = vst [vmem:[#allocation60_spill] sm:$0xff] %v12684_v55  ;;  %v12736_v55 = vshll.u32 %v16754_v21, %v2115_v44  ;;  %v12754_v60 = vadd.f32 0.008332121, %v1307_v25  ;;  %v1504_v25 = vshll.u32 %v16764_v10, %v12020_v35  ;;  %v12772_v44 = vshrl.u32 %v16753_v7, %v12718_v56 }
 0x3c8   : > { %16799 = vst [vmem:[#allocation61_spill] sm:$0xff] %v12691_v19  ;;  %v11260_v19 = vld [vmem:[#allocation3 + $0x4] sm:$0xf] }
 0x3c9   : > { %16800 = vst [vmem:[#allocation62_spill] sm:$0xff] %v12694_v41  ;;  %v10605_v51 = vor.u32 %v11260_v19, %v10602_v13  ;;  %v12738_v19 = vld [vmem:[#allocation2 + $0x58] sm:$0xff]  ;;  %v12742_v13 = vld [vmem:[#allocation2 + $0x10] sm:$0xff] }
 0x3ca   : > { %16801 = vst [vmem:[#allocation63_spill] sm:$0xff] %v12697_v9  ;;  %v1162_v4 = vpack.c.bf16 %v12738_v19, %v12738_v19  ;;  %v16805_v29 = vand.u32 2147483647, %v12742_v13  ;;  %vm16654_vm13 = vweird.f32 %v12742_v13 }
 0x3cb   : > { %16802 = vst [vmem:[#allocation64_spill] sm:$0xff] %v12702_v12  ;;  %v1161_v12 = vpack.c.bf16 %v12069_v34, %v12252_v28  ;;  %9838 = vmatmul.bf16.vlgmr.msrb.gmra.mxu3 %v10605_v51  ;;  %v11334_v28 = vld [vmem:[%s16522_s12 + $0x160] sm:$0xff]  ;;  %v1498_v51 = vshll.u32 %v16753_v7, %v12020_v35  ;;  %v1505_v34 = vshrl.u32 %v16754_v21, %v12037_v48 }
 0x3cc   : > { %16803 = vst [vmem:[#allocation65_spill] sm:$0xff] %v12710_v16  ;;  %v1488_v61 = vand.u32 8388607, %v16805_v29  ;;  %v1508_v29 = vshrl.u32 %v16749_v0, %v12037_v48  ;;  %9909 = vmatpush.bf16.msra.mxu3 %v11334_v28  ;;  %v1512_v28 = vor.u32 %v1511_v8, %v1510_v43  ;;  %v12804_v43 = vshrl.u32 %v16754_v21, %v12718_v56 }
 0x3cd   : > { %16804 = vst [vmem:[#allocation66_spill] sm:$0xff] %v12742_v13 }
 0x3ce   : > { %1169 = vst [vmem:[#allocation3 + $0xb4] sm:$0xff] %v1161_v12  ;;  %v1501_v12 = vshll.u32 %v16763_v38, %v12020_v35  ;;  %v1489_v53 = vor.u32 8388608, %v1488_v61  ;;  %v1526_v16 = vsel %vm1516_vm10, %v1512_v28, 1326507024 }
 0x3cf   : > { %1168 = vst [vmem:[#allocation3 + $0x80] sm:$0xf] %v1160_v42  ;;  %v1500_v42 = vor.u32 %v1499_v49, %v1498_v51  ;;  %v1497_v49 = vshrl.u32 %v16753_v7, %v12037_v48  ;;  %v1506_v51 = vor.u32 %v1505_v34, %v1504_v25  ;;  %v10660_v48 = vld [vmem:[#allocation3 + $0x78] sm:$0xf]  ;;  %v11332_v34 = vld [vmem:[%s16522_s12 + $0x150] sm:$0xff]  ;;  %v12815_v25 = vshrl.u32 %v16749_v0, %v12718_v56 }
 0x3d0   : > { %1170 = vst [vmem:[#allocation3 + $0xbc] sm:$0xf] %v1162_v4  ;;  %v1507_v4 = vshll.u32 %v16754_v21, %v12020_v35  ;;  %v1503_v1 = vor.u32 %v1502_v30, %v1501_v12  ;;  %v12793_v35 = vshrl.u32 %v16763_v38, %v12718_v56  ;;  %v12797_v12 = vshrl.u32 %v16764_v10, %v12718_v56 }
 0x3d1   : > { %9910 = vmatpush.bf16.msra.mxu3 %v11333_v23  ;;  %v1518_v61 = vsel %vm1516_vm10, %v1506_v51, 2102212464  ;;  %v1517_v23 = vsel %vm1513_vm1, %v1497_v49, %v1500_v42  ;;  %v12827_v9 = vshll.u32 %v1489_v53, 8 }
 0x3d2   : > { %v1509_v15 = vor.u32 %v1508_v29, %v1507_v4  ;;  %v1521_v8 = vsel %vm1513_vm1, %v1500_v42, %v1503_v1  ;;  %v1525_v11 = vsel %vm1513_vm1, %v1503_v1, %v1506_v51  ;;  %v1519_v57 = vsel %vm1515_vm7, %v1503_v1, %v1518_v61 }
 0x3d3   : > { %v1530_v53 = vand.u32 65535, %v12827_v9  ;;  %v12842_v1 = vmul.f32 %v12754_v60, %v12662_v39  ;;  %v16806_v60 = vsub.s32 4, %v12568_v37 }
 0x3d4   : > { %v1522_v30 = vsel %vm1516_vm10, %v1509_v15, 920167782  ;;  %v1527_v42 = vsel %vm1515_vm7, %v1509_v15, %v1526_v16  ;;  %v12845_v15 = vsel %vm10465_vm14, 0, %v10464_v14  ;;  %v11330_v14 = vld [vmem:[%s16522_s12 + $0x140] sm:$0xff] }
 0x3d5   : > { %v11282_v4 = vld [vmem:[#allocation3 + $0xb0] sm:$0xf0]  ;;  %v1523_v46 = vsel %vm1515_vm7, %v1506_v51, %v1522_v30  ;;  %v10662_v40 = vld [vmem:[#allocation3 + $0xb4] sm:$0xf0]  ;;  %9911 = vmatpush.bf16.msra.mxu3 %v11332_v34  ;;  %v1528_v28 = vsel %vm1514_vm12, %v1525_v11, %v1527_v42  ;;  %v12849_v11 = vsel %vm1514_vm12, %v1517_v23, %v1519_v57 }
 0x3d6   : > { %v10668_v29 = vld [vmem:[#allocation3 + $0x80] sm:$0xf]  ;;  %v10661_v41 = vor.u32 %v11282_v4, %v10660_v48  ;;  %v1524_v62 = vsel %vm1514_vm12, %v1521_v8, %v1523_v46  ;;  %v11331_v46 = vld [vmem:[%s16522_s12 + $0x148] sm:$0xff]  ;;  %v1531_v48 = vshrl.u32 %v12827_v9, 16  ;;  %v1532_v16 = vand.u32 65535, %v1528_v28 }
 0x3d7   : > { %v11283_v26 = vld [vmem:[#allocation3 + $0xb8] sm:$0xf0]  ;;  %v1554_v49 = vand.u32 65535, %v1524_v62  ;;  %v1555_v30 = vshrl.u32 %v1524_v62, 16  ;;  %v10665_v62 = vor.u32 %v11275_v20, %v10662_v40  ;;  %v12856_v40 = vsel %vm1638_vm11, %v16806_v60, %v12568_v37 }
 0x3d8   : > { %v10669_v51 = vor.u32 %v11283_v26, %v10668_v29  ;;  %9824 = vmatmul.bf16.gmra.mxu1 %v10661_v41  ;;  %v1533_v26 = vshrl.u32 %v1528_v28, 16  ;;  %v1534_v4 = vmul.u32 %v1532_v16, %v1530_v53  ;;  %v1536_v42 = vmul.u32 %v1532_v16, %v1531_v48 }
 0x3d9   : > { %v1556_v8 = vmul.u32 %v1554_v49, %v1530_v53  ;;  %v1557_v34 = vmul.u32 %v1555_v30, %v1530_v53  ;;  %v1558_v61 = vmul.u32 %v1554_v49, %v1531_v48  ;;  %9912 = vmatpush.bf16.msra.mxu3 %v11331_v46  ;;  %v1559_v20 = vmul.u32 %v1555_v30, %v1531_v48 }
 0x3da   : > { %v1535_v29 = vmul.u32 %v1533_v26, %v1530_v53  ;;  %9862 = vmatmul.bf16.gmra.mxu0 %v10669_v51  ;;  %v1537_v23 = vmul.u32 %v1533_v26, %v1531_v48  ;;  %v1540_v28 = vshll.u32 %v1536_v42, 16  ;;  %v1574_v37 = vmul.u32 %v12827_v9, %v12849_v11 }
 0x3db   : > { %9843 = vmatmul.bf16.gmra.mxu3 %v10665_v62  ;;  %v1560_v17 = vshll.u32 %v1557_v34, 16  ;;  %v1562_v57 = vshll.u32 %v1558_v61, 16  ;;  %v12864_v62 = vld [vmem:[#allocation2 + $0x28] sm:$0xff]  ;;  %v1561_v16 = vshrl.u32 %v1557_v34, 16  ;;  %v1541_v41 = vshrl.u32 %v1536_v42, 16 }
 0x3dc   : > { %v1538_v49 = vshll.u32 %v1535_v29, 16  ;;  %16807 = vst [vmem:[#allocation67_spill] sm:$0xff] %v12864_v62  ;;  %v16616_v51 = vand.u32 2147483647, %v12864_v62  ;;  %v1539_v60 = vshrl.u32 %v1535_v29, 16 }
 0x3dd   : > { %vm1564_vm15 = vc.u32 %v1556_v8, %v1560_v17  ;;  %v1566_v53 = vadd.s32 %v1560_v17, %v1556_v8  ;;  %9913 = vmatpush.bf16.msra.mxu3 %v11330_v14  ;;  %v16808_v11 = vand.u32 2147483647, %v12133_v27 }
 0x3de   : > { %vm1542_vm0 = vc.u32 %v1534_v4, %v1538_v49  ;;  %v1544_v46 = vadd.s32 %v1538_v49, %v1534_v4  ;;  %v1565_v30 = vsel %vm1564_vm15, 1, %v16766_v33  ;;  %v1563_v4 = vshrl.u32 %v1558_v61, 16 }
 0x3df   : > { %v1543_v48 = vsel %vm1542_vm0, 1, %v16766_v33  ;;  %v1567_v26 = vadd.s32 %v1565_v30, %v1559_v20  ;;  %vm1568_vm6 = vc.u32 %v1566_v53, %v1562_v57  ;;  %vm12872_vm3 = vcmp.le.f32.partialorder %v16808_v11, 0.7853982  ;;  %v16811_v20 = vld [vmem:[#allocation6_spill] sm:$0xff] }
 0x3e0   : > { %v1545_v8 = vadd.s32 %v1543_v48, %v1537_v23  ;;  %vm1546_vm8 = vc.u32 %v1544_v46, %v1540_v28  ;;  %v1569_v9 = vsel %vm1568_vm6, 1, %v16766_v33  ;;  %v12877_v14 = vadd.s32 %v1566_v53, %v1562_v57  ;;  %v16812_v23 = vld [vmem:[#allocation9_spill] sm:$0xff] }
 0x3e1   : > { %v1547_v34 = vsel %vm1546_vm8, 1, %v16766_v33  ;;  %v1571_v29 = vadd.s32 %v1569_v9, %v1567_v26  ;;  %v1963_v42 = vshll.u32 %v16753_v7, %v16811_v20  ;;  %v1964_v28 = vshrl.u32 %v16763_v38, %v16812_v23 }
 0x3e2   : > { %v1549_v49 = vadd.s32 %v1547_v34, %v1545_v8  ;;  %v1966_v46 = vshll.u32 %v16763_v38, %v16811_v20  ;;  %v1953_v48 = vand.u32 8388607, %v16616_v51  ;;  %v1967_v61 = vshrl.u32 %v16764_v10, %v16812_v23 }
 0x3e3   : > { %v1572_v30 = vadd.s32 %v1571_v29, %v1561_v16  ;;  %v1969_v57 = vshll.u32 %v16764_v10, %v16811_v20  ;;  %v1965_v26 = vor.u32 %v1964_v28, %v1963_v42  ;;  %v1970_v8 = vshrl.u32 %v16754_v21, %v16812_v23 }
 0x3e4   : > { %v1550_v53 = vadd.s32 %v1549_v49, %v1539_v60  ;;  %v1972_v9 = vshll.u32 %v16754_v21, %v16811_v20  ;;  %v12895_v34 = vor.u32 %v1967_v61, %v1966_v46  ;;  %v1973_v16 = vshrl.u32 %v16749_v0, %v16812_v23  ;;  %v16813_v49 = vld [vmem:[#allocation7_spill] sm:$0xff] }
 0x3e5   : > { %v1573_v11 = vadd.s32 %v1572_v30, %v1563_v4  ;;  %v1975_v29 = vshll.u32 %v16749_v0, %v16811_v20  ;;  %v1971_v63 = vor.u32 %v1970_v8, %v1969_v57  ;;  %v1976_v60 = vshrl.u32 %v16750_v45, %v16812_v23 }
 0x3e6   : > { %v12901_v51 = vadd.s32 %v1550_v53, %v1541_v41  ;;  %vm1978_vm1 = vcmp.lt.s32.totalorder %v16813_v49, 1  ;;  %v1750_v42 = vsub.s32 4294967266, %v12845_v15  ;;  %v1954_v4 = vor.u32 8388608, %v1953_v48 }
 0x3e7   : > { %v1577_v28 = vadd.s32 1, %v1573_v11  ;;  %v1974_v46 = vor.u32 %v1973_v16, %v1972_v9  ;;  %v1977_v30 = vor.u32 %v1976_v60, %v1975_v29  ;;  %vm1980_vm10 = vcmp.lt.s32.totalorder %v16813_v49, 3 }
 0x3e8   : > { %vm1576_vm7 = vc.u32 %v12901_v51, %v12877_v14  ;;  %vm1981_vm12 = vcmp.lt.s32.totalorder %v16813_v49, 4  ;;  %v12913_v41 = vshrl.u32 %v16750_v45, %v12718_v56  ;;  %vm1979_vm14 = vcmp.lt.s32.totalorder %v16813_v49, 2 }
 0x3e9   : > { %v1578_v20 = vsel %vm1576_vm7, %v1577_v28, %v1573_v11  ;;  %v1986_v48 = vsel %vm1978_vm1, %v1965_v26, %v12895_v34  ;;  %v12922_v61 = vsel %vm12872_vm3, 0, %v12856_v40  ;;  %v1987_v53 = vsel %vm1981_vm12, %v1974_v46, 920167782 }
 0x3ea   : > { %v1579_v57 = vadd.s32 %v1578_v20, %v1574_v37  ;;  %v1990_v56 = vsel %vm1978_vm1, %v12895_v34, %v1971_v63  ;;  %v1751_v8 = vadd.s32 127, %v1750_v42  ;;  %v1988_v9 = vsel %vm1980_vm10, %v1971_v63, %v1987_v53 }
 0x3eb   : > { %v1991_v11 = vsel %vm1981_vm12, %v1977_v30, 1326507024  ;;  %v12933_v16 = vshll.u32 %v1954_v4, 8  ;;  %v16814_v40 = vsub.s32 32, %v12845_v15  ;;  %v1989_v60 = vsel %vm1979_vm14, %v1986_v48, %v1988_v9 }
 0x3ec   : > { %v1580_v29 = vadd.s32 536870912, %v1579_v57  ;;  %v1992_v28 = vsel %vm1980_vm10, %v1974_v46, %v1991_v11  ;;  %v2019_v4 = vand.u32 65535, %v1989_v60  ;;  %v1752_v48 = vshll.u32 %v1751_v8, 23 }
 0x3ed   : > { %v1748_v37 = vshrl.u32 %v12707_v58, %v16814_v40  ;;  %v1993_v42 = vsel %vm1979_vm14, %v1990_v56, %v1992_v28  ;;  %v1995_v20 = vand.u32 65535, %v12933_v16  ;;  %v1996_v30 = vshrl.u32 %v12933_v16, 16 }
 0x3ee   : > { %v12946_v53 = vshrl.u32 %v1580_v29, 30  ;;  %v1997_v22 = vand.u32 65535, %v1993_v42  ;;  %v1998_v5 = vshrl.u32 %v1993_v42, 16  ;;  %v2020_v58 = vshrl.u32 %v1989_v60, 16 }
 0x3ef   : > { %v1747_v40 = vshll.u32 %v12632_v50, %v12845_v15  ;;  %v12952_v46 = vor.u32 %v12793_v35, %v12721_v3  ;;  %v1962_v56 = vshrl.u32 %v16753_v7, %v16812_v23  ;;  %v12958_v9 = vor.u32 %v12797_v12, %v12724_v47 }
 0x3f0   : > { %v1582_v11 = vshll.u32 %v12946_v53, 30  ;;  %v1999_v29 = vmul.u32 %v1997_v22, %v1995_v20  ;;  %v2000_v28 = vmul.u32 %v1998_v5, %v1995_v20  ;;  %v12965_v50 = vor.u32 %v12804_v43, %v12733_v36 }
 0x3f1   : > { %v12961_v60 = vor.u32 %v1748_v37, %v1747_v40  ;;  %v2001_v15 = vmul.u32 %v1997_v22, %v1996_v30  ;;  %v2022_v3 = vmul.u32 %v2020_v58, %v1995_v20  ;;  %v2002_v8 = vmul.u32 %v1998_v5, %v1996_v30 }
 0x3f2   : > { %v1583_v35 = vsub.s32 %v1579_v57, %v1582_v11  ;;  %v2003_v42 = vshll.u32 %v2000_v28, 16  ;;  %v2023_v23 = vmul.u32 %v2019_v4, %v1996_v30  ;;  %v12967_v31 = vor.u32 4788187, %v1752_v48 }
 0x3f3   : > { %v1982_v47 = vsel %vm1978_vm1, %v1962_v56, %v1965_v26  ;;  %v2005_v12 = vshll.u32 %v2001_v15, 16  ;;  %v2021_v32 = vmul.u32 %v2019_v4, %v1995_v20  ;;  %v1983_v40 = vsel %vm1981_vm12, %v1971_v63, 2102212464 }
 0x3f4   : > { %vm1584_vm15 = vcmp.lt.s32.totalorder %v1583_v35, 0  ;;  %v1585_v37 = vsub.s32 0, %v1583_v35  ;;  %vm2007_vm0 = vc.u32 %v1999_v29, %v2003_v42  ;;  %v2009_v36 = vadd.s32 %v2003_v42, %v1999_v29 }
 0x3f5   : > { %v2008_v22 = vsel %vm2007_vm0, 1, %v16766_v33  ;;  %v2024_v43 = vmul.u32 %v2020_v58, %v1996_v30  ;;  %v2025_v5 = vshll.u32 %v2022_v3, 16  ;;  %v2004_v11 = vshrl.u32 %v2000_v28, 16 }
 0x3f6   : > { %v1586_v57 = vsel %vm1584_vm15, %v1585_v37, %v1583_v35  ;;  %v2010_v48 = vadd.s32 %v2008_v22, %v2002_v8  ;;  %v2027_v24 = vshll.u32 %v2023_v23, 16  ;;  %vm2011_vm6 = vc.u32 %v2009_v36, %v2005_v12 }
 0x3f7   : > { %v1587_v54 = vclz %v1586_v57  ;;  %vm2029_vm8 = vc.u32 %v2021_v32, %v2025_v5  ;;  %v2031_v26 = vadd.s32 %v2025_v5, %v2021_v32  ;;  %v1984_v20 = vsel %vm1980_vm10, %v12895_v34, %v1983_v40 }
 0x3f8   : > { %v2006_v4 = vshrl.u32 %v2001_v15, 16  ;;  %v2012_v63 = vsel %vm2011_vm6, 1, %v16766_v33  ;;  %v2030_v56 = vsel %vm2029_vm8, 1, %v16766_v33  ;;  %v1575_v28 = vadd.s32 %v12877_v14, %v12901_v51 }
 0x3f9   : > { %v10461_v29 = vadd.s32 4294967294, %v1587_v54  ;;  %v2014_v30 = vadd.s32 %v2012_v63, %v2010_v48  ;;  %v2032_v58 = vadd.s32 %v2030_v56, %v2024_v43  ;;  %vm2033_vm1 = vc.u32 %v2031_v26, %v2027_v24 }
 0x3fa   : > { %v2026_v8 = vshrl.u32 %v2022_v3, 16  ;;  %v2034_v42 = vsel %vm2033_vm1, 1, %v16766_v33  ;;  %v16623_v32 = vand.u32 2147483647, %v12728_v59  ;;  %v1985_v34 = vsel %vm1979_vm14, %v1982_v47, %v1984_v20 }
 0x3fb   : > { %vm10462_vm7 = vcmp.lt.s32.totalorder %v10461_v29, 0  ;;  %v2015_v15 = vadd.s32 %v2014_v30, %v2004_v11  ;;  %v2036_v12 = vadd.s32 %v2034_v42, %v2032_v58  ;;  %v1756_v37 = vcvt.s32.f32 %v12961_v60 }
 0x3fc   : > { %v1590_v54 = vsel %vm10462_vm7, 0, %v10461_v29  ;;  %v2028_v40 = vshrl.u32 %v2023_v23, 16  ;;  %v12986_v22 = vadd.s32 %v2031_v26, %v2027_v24  ;;  %vm1483_vm10 = vcmp.lt.s32.totalorder %v12742_v13, 0  ;;  %v16815_v23 = vld [vmem:[#allocation8_spill] sm:$0xff]  ;;  %v16816_v26 = vld [vmem:[#allocation11_spill] sm:$0xff] }
 0x3fd   : > { %v1591_v51 = vsub.s32 32, %v1590_v54  ;;  %v1592_v14 = vshll.u32 %v1583_v35, %v1590_v54  ;;  %v1595_v3 = vsub.s32 4294967266, %v1590_v54  ;;  %v12989_v36 = vadd.s32 %v2015_v15, %v2006_v4 }
 0x3fe   : > { %v1605_v43 = vsub.s32 4, %v12946_v53  ;;  %v2037_v5 = vadd.s32 %v2036_v12, %v2026_v8  ;;  %v2039_v49 = vmul.u32 %v12933_v16, %v1985_v34  ;;  %v2418_v47 = vand.u32 8388607, %v16623_v32 }
 0x3ff   : > { %v1593_v57 = vshrl.u32 %v1575_v28, %v1591_v51  ;;  %v1596_v11 = vadd.s32 127, %v1595_v3  ;;  %v2428_v24 = vshll.u32 %v16753_v7, %v16815_v23  ;;  %v2431_v48 = vshll.u32 %v16763_v38, %v16815_v23 }
 0x400   : > { %v2038_v35 = vadd.s32 %v2037_v5, %v2028_v40  ;;  %vm2041_vm12 = vc.u32 %v12989_v36, %v12986_v22  ;;  %v2432_v20 = vshrl.u32 %v16764_v10, %v16816_v26  ;;  %v2434_v16 = vshll.u32 %v16764_v10, %v16815_v23 }
 0x401   : > { %v1594_v4 = vor.u32 %v1593_v57, %v1592_v14  ;;  %v1597_v63 = vshll.u32 %v1596_v11, 23  ;;  %v2435_v56 = vshrl.u32 %v16754_v21, %v16816_v26  ;;  %v2437_v29 = vshll.u32 %v16754_v21, %v16815_v23  ;;  %v16817_v11 = vld [vmem:[#allocation10_spill] sm:$0xff] }
 0x402   : > { %v2042_v30 = vadd.s32 1, %v2038_v35  ;;  %v2429_v58 = vshrl.u32 %v16763_v38, %v16816_v26  ;;  %v2438_v28 = vshrl.u32 %v16749_v0, %v16816_v26  ;;  %v2440_v8 = vshll.u32 %v16749_v0, %v16815_v23 }
 0x403   : > { %v1598_v42 = vor.u32 4788187, %v1597_v63  ;;  %v1601_v34 = vcvt.s32.f32 %v1594_v4  ;;  %v2419_v15 = vor.u32 8388608, %v2418_v47  ;;  %v2441_v12 = vshrl.u32 %v16750_v45, %v16816_v26 }
 0x404   : > { %v2043_v54 = vsel %vm2041_vm12, %v2042_v30, %v2038_v35  ;;  %v13017_v40 = vor.u32 %v2432_v20, %v2431_v48  ;;  %v13019_v51 = vor.u32 %v2435_v56, %v2434_v16  ;;  %v2439_v14 = vor.u32 %v2438_v28, %v2437_v29 }
 0x405   : > { %v1599_v3 = vand.u32 2147483647, %v1598_v42  ;;  %v2044_v5 = vadd.s32 %v2043_v54, %v2039_v49  ;;  %v2442_v57 = vor.u32 %v2441_v12, %v2440_v8  ;;  %vm2443_vm14 = vcmp.lt.s32.totalorder %v16817_v11, 1 }
 0x406   : > { %v16818_v32 = vand.u32 2147483647, %v12742_v13  ;;  %v1606_v47 = vsel %vm1483_vm10, %v1605_v43, %v12946_v53  ;;  %v13031_v48 = vor.u32 %v2429_v58, %v2428_v24  ;;  %vm2446_vm0 = vcmp.lt.s32.totalorder %v16817_v11, 4 }
 0x407   : > { %v1602_v35 = vmul.f32 %v1601_v34, %v1599_v3  ;;  %v2045_v20 = vadd.s32 536870912, %v2044_v5  ;;  %vm2444_vm6 = vcmp.lt.s32.totalorder %v16817_v11, 2  ;;  %vm2445_vm8 = vcmp.lt.s32.totalorder %v16817_v11, 3 }
 0x408   : > { %vm13024_vm15 = vcmp.le.f32.partialorder %v16818_v32, 0.7853982  ;;  %v2452_v32 = vsel %vm2446_vm0, %v2439_v14, 920167782  ;;  %v2455_v49 = vsel %vm2443_vm14, %v13017_v40, %v13019_v51  ;;  %v2456_v53 = vsel %vm2446_vm0, %v2442_v57, 1326507024 }
 0x409   : > { %v13044_v43 = vshll.u32 %v2419_v15, 8  ;;  %v1754_v24 = vand.u32 2147483647, %v12967_v31  ;;  %v1603_v16 = vxor.u32 2147483648, %v1602_v35  ;;  %v13049_v4 = vsel %vm13024_vm15, 0, %v1606_v47 }
 0x40a   : > { %16821 = vst [vmem:[#allocation6_spill] sm:$0xff] %v13049_v4  ;;  %v13051_v63 = vshrl.u32 %v2045_v20, 30  ;;  %v2451_v56 = vsel %vm2443_vm14, %v13031_v48, %v13017_v40  ;;  %v2457_v29 = vsel %vm2445_vm8, %v2439_v14, %v2456_v53  ;;  %v2453_v8 = vsel %vm2445_vm8, %v13019_v51, %v2452_v32 }
 0x40b   : > { %v13060_v30 = vand.u32 65535, %v13044_v43  ;;  %v13063_v31 = vshrl.u32 %v13044_v43, 16  ;;  %v1604_v58 = vsel %vm1483_vm10, %v1603_v16, %v1602_v35  ;;  %v2458_v42 = vsel %vm2444_vm6, %v2455_v49, %v2457_v29 }
 0x40c   : > { %v2047_v28 = vshll.u32 %v13051_v63, 30  ;;  %v13076_v34 = vsel %vm13024_vm15, %v12742_v13, %v1604_v58  ;;  %v1625_v15 = vadd.s32 3, %v13049_v4  ;;  %v2462_v12 = vand.u32 65535, %v2458_v42 }
 0x40d   : > { %v2463_v54 = vshrl.u32 %v2458_v42, 16  ;;  %v13080_v14 = vadd.f32 -0.16666654, %v12842_v1  ;;  %v13084_v3 = vmul.f32 %v1756_v37, %v1754_v24  ;;  %v1609_v57 = vmul.f32 %v13076_v34, %v13076_v34 }
 0x40e   : > { %v13088_v47 = vsub.s32 %v2044_v5, %v2047_v28  ;;  %v2454_v23 = vsel %vm2444_vm6, %v2451_v56, %v2453_v8  ;;  %v2464_v35 = vmul.u32 %v2462_v12, %v13060_v30  ;;  %v13097_v1 = vmul.u32 %v2462_v12, %v13063_v31 }
 0x40f   : > { %v13094_v20 = vmul.u32 %v2463_v54, %v13060_v30  ;;  %v1610_v32 = vmul.f32 -0.001358992, %v1609_v57  ;;  %v1617_v60 = vmul.f32 -0.00019511016, %v1609_v57  ;;  %v13101_v49 = vand.u32 3, %v1625_v15 }
 0x410   : > { %vm2049_vm1 = vcmp.lt.s32.totalorder %v13088_v47, 0  ;;  %v2050_v37 = vsub.s32 0, %v13088_v47  ;;  %v2427_v5 = vshrl.u32 %v16753_v7, %v16816_v26  ;;  %v2484_v24 = vand.u32 65535, %v2454_v23 }
 0x411   : > { %v2468_v53 = vshll.u32 %v13094_v20, 16  ;;  %v1611_v16 = vadd.f32 0.041655596, %v1610_v32  ;;  %v1618_v56 = vadd.f32 0.008332121, %v1617_v60  ;;  %v2470_v58 = vshll.u32 %v13097_v1, 16 }
 0x412   : > { %v2051_v29 = vsel %vm2049_vm1, %v2050_v37, %v13088_v47  ;;  %v2485_v42 = vshrl.u32 %v2454_v23, 16  ;;  %v2467_v2 = vmul.u32 %v2463_v54, %v13063_v31  ;;  %vm1628_vm10 = vcmp.eq.s32.totalorder %v13101_v49, 0 }
 0x413   : > { %v2052_v28 = vclz %v2051_v29  ;;  %vm2472_vm7 = vc.u32 %v2464_v35, %v2468_v53  ;;  %v2474_v8 = vadd.s32 %v2468_v53, %v2464_v35  ;;  %v1612_v15 = vmul.f32 %v1611_v16, %v1609_v57 }
 0x414   : > { %v1619_v4 = vmul.f32 %v1618_v56, %v1609_v57  ;;  %vm1631_vm12 = vcmp.eq.s32.totalorder %v13101_v49, 2  ;;  %vm1948_vm15 = vcmp.lt.s32.totalorder %v12864_v62, 0  ;;  %v2040_v26 = vadd.s32 %v12986_v22, %v12989_v36 }
 0x415   : > { %v10470_v32 = vadd.s32 4294967294, %v2052_v28  ;;  %v2473_v60 = vsel %vm2472_vm7, 1, %v16766_v33  ;;  %v1613_v35 = vadd.f32 -0.4999988, %v1612_v15  ;;  %vm1627_vm1 = vcmp.lt.s32.totalorder %v13101_v49, 2 }
 0x416   : > { %v1620_v23 = vadd.f32 -0.16666654, %v1619_v4  ;;  %v2447_v54 = vsel %vm2443_vm14, %v2427_v5, %v13031_v48  ;;  %vm2476_vm2 = vc.u32 %v2474_v8, %v2470_v58  ;;  %v2448_v37 = vsel %vm2446_vm0, %v13019_v51, 2102212464 }
 0x417   : > { %vm10471_vm4 = vcmp.lt.s32.totalorder %v10470_v32, 0  ;;  %v2487_v22 = vmul.u32 %v2485_v42, %v13060_v30  ;;  %v13126_v36 = vmul.u32 %v2484_v24, %v13063_v31  ;;  %v1614_v4 = vmul.f32 %v1613_v35, %v1609_v57 }
 0x418   : > { %v1621_v53 = vmul.f32 %v1620_v23, %v1609_v57  ;;  %v2055_v16 = vsel %vm10471_vm4, 0, %v10470_v32  ;;  %v2475_v56 = vadd.s32 %v2473_v60, %v2467_v2  ;;  %v2477_v58 = vsel %vm2476_vm2, 1, %v16766_v33 }
 0x419   : > { %v2056_v29 = vsub.s32 32, %v2055_v16  ;;  %v2057_v48 = vshll.u32 %v13088_v47, %v2055_v16  ;;  %v2060_v5 = vsub.s32 4294967266, %v2055_v16  ;;  %v13130_v28 = vadd.f32 1.0, %v1614_v4 }
 0x41a   : > { %v1622_v8 = vadd.f32 1.0, %v1621_v53  ;;  %v2070_v51 = vsub.s32 4, %v13051_v63  ;;  %v2486_v15 = vmul.u32 %v2484_v24, %v13060_v30  ;;  %v16823_v12 = vand.u32 2147483647, %v12864_v62 }
 0x41b   : > { %16822 = vst [vmem:[#allocation9_spill] sm:$0xff] %v13130_v28  ;;  %v2058_v2 = vshrl.u32 %v2040_v26, %v2056_v29  ;;  %v2061_v57 = vadd.s32 127, %v2060_v5  ;;  %v2469_v47 = vshrl.u32 %v13094_v20, 16  ;;  %v2489_v32 = vmul.u32 %v2485_v42, %v13063_v31 }
 0x41c   : > { %vm13136_vm14 = vcmp.le.f32.partialorder %v16823_v12, 0.7853982  ;;  %v13143_v60 = vmul.f32 %v1622_v8, %v13076_v34  ;;  %v16629_v23 = vxor.u32 2147483648, %v13130_v28  ;;  %v2479_v4 = vadd.s32 %v2477_v58, %v2475_v56 }
 0x41d   : > { %v2490_v53 = vshll.u32 %v2487_v22, 16  ;;  %v2059_v30 = vor.u32 %v2058_v2, %v2057_v48  ;;  %v2062_v24 = vshll.u32 %v2061_v57, 23  ;;  %v2449_v12 = vsel %vm2445_vm8, %v13017_v40, %v2448_v37 }
 0x41e   : > { %16826 = vst [vmem:[#allocation7_spill] sm:$0xff] %v13143_v60  ;;  %v2492_v26 = vshll.u32 %v13126_v36, 16  ;;  %v16630_v16 = vxor.u32 2147483648, %v13143_v60  ;;  %v1633_v31 = vsel %vm1631_vm12, %v16629_v23, %v13143_v60  ;;  %v2071_v34 = vsel %vm1948_vm15, %v2070_v51, %v13051_v63 }
 0x41f   : > { %vm2494_vm2 = vc.u32 %v2486_v15, %v2490_v53  ;;  %v2063_v20 = vor.u32 4788187, %v2062_v24  ;;  %v2066_v42 = vcvt.s32.f32 %v2059_v30  ;;  %v2496_v40 = vadd.s32 %v2490_v53, %v2486_v15 }
 0x420   : > { %v2495_v56 = vsel %vm2494_vm2, 1, %v16766_v33  ;;  %v1630_v37 = vsel %vm1628_vm10, %v13130_v28, %v16630_v16  ;;  %v2471_v29 = vshrl.u32 %v13097_v1, 16  ;;  %v2480_v48 = vadd.s32 %v2479_v4, %v2469_v47 }
 0x421   : > { %v2497_v5 = vadd.s32 %v2495_v56, %v2489_v32  ;;  %v1634_v58 = vsel %vm1627_vm1, %v1630_v37, %v1633_v31  ;;  %v2064_v63 = vand.u32 2147483647, %v2063_v20  ;;  %v2491_v8 = vshrl.u32 %v2487_v22, 16  ;;  %v16830_v20 = vld [vmem:[#allocation14_spill] sm:$0xff] }
 0x422   : > { %vm2498_vm4 = vc.u32 %v2496_v40, %v2492_v26  ;;  %v1635_v51 = vsel %vm16654_vm13, nan, %v1634_v58  ;;  %v2450_v15 = vsel %vm2444_vm6, %v2447_v54, %v2449_v12  ;;  %v2493_v2 = vshrl.u32 %v13126_v36, 16  ;;  %v16829_v12 = vld [vmem:[#allocation13_spill] sm:$0xff] }
 0x423   : > { %v2499_v57 = vsel %vm2498_vm4, 1, %v16766_v33  ;;  %v2067_v53 = vmul.f32 %v2066_v42, %v2064_v63  ;;  %v3032_v1 = vpack.c.bf16 %v1635_v51, %v1635_v51  ;;  %v16631_v32 = vand.u32 2147483647, %v12738_v19  ;;  %v11369_v58 = vld [vmem:[%s16522_s12 + $0x278] sm:$0xff]  ;;  %v11320_v51 = vld [vmem:[%s16522_s12 + $0xf0] sm:$0xff] }
 0x424   : > { %v2501_v47 = vadd.s32 %v2499_v57, %v2497_v5  ;;  %v16827_v49 = vxor.u32 2147483648, %v13084_v3  ;;  %v13182_v4 = vsel %vm13136_vm14, 0, %v2071_v34  ;;  %v13184_v11 = vadd.s32 %v2480_v48, %v2471_v29  ;;  %9982 = vmatpush.bf16.msrb.mxu3 %v11369_v58  ;;  %9869 = vmatpush.bf16.msrb.mxu2 %v11320_v51 }
 0x425   : > { %16828 = vst [vmem:[#allocation8_spill] sm:$0xff] %v13182_v4  ;;  %v13186_v54 = vadd.s32 %v2496_v40, %v2492_v26  ;;  %v2068_v36 = vxor.u32 2147483648, %v2067_v53  ;;  %v2504_v24 = vmul.u32 %v13044_v43, %v2450_v15  ;;  %v2896_v31 = vshll.u32 %v16763_v38, %v16829_v12  ;;  %v11328_v15 = vld [vmem:[%s16522_s12 + $0x130] sm:$0xff] }
 0x426   : > { %v1759_v22 = vsel %vm1638_vm11, %v16827_v49, %v13084_v3  ;;  %3040 = vst [vmem:[#allocation3 + $0x14] sm:$0xf] %v3032_v1  ;;  %v2502_v30 = vadd.s32 %v2501_v47, %v2491_v8  ;;  %v2897_v27 = vshrl.u32 %v16764_v10, %v16830_v20  ;;  %v2899_v3 = vshll.u32 %v16764_v10, %v16829_v12  ;;  %v16831_v47 = vld [vmem:[#allocation12_spill] sm:$0xff] }
 0x427   : > { %v2900_v34 = vshrl.u32 %v16754_v21, %v16830_v20  ;;  %v2902_v26 = vshll.u32 %v16754_v21, %v16829_v12  ;;  %v2069_v42 = vsel %vm1948_vm15, %v2068_v36, %v2067_v53  ;;  %v2883_v43 = vand.u32 8388607, %v16631_v32  ;;  %9888 = vmatpush.bf16.msra.mxu1 %v11328_v15 }
 0x428   : > { %v2503_v56 = vadd.s32 %v2502_v30, %v2493_v2  ;;  %v2903_v40 = vshrl.u32 %v16749_v0, %v16830_v20  ;;  %v13208_v37 = vsel %vm13136_vm14, %v12864_v62, %v2069_v42  ;;  %vm2506_vm11 = vc.u32 %v13184_v11, %v13186_v54  ;;  %v11344_v2 = vld [vmem:[%s16522_s12 + $0x1b0] sm:$0xff] }
 0x429   : > { %v2905_v29 = vshll.u32 %v16749_v0, %v16829_v12  ;;  %v2906_v48 = vshrl.u32 %v16750_v45, %v16830_v20  ;;  %v2074_v5 = vmul.f32 %v13208_v37, %v13208_v37  ;;  %v2893_v35 = vshll.u32 %v16753_v7, %v16829_v12  ;;  %v11368_v30 = vld [vmem:[%s16522_s12 + $0x270] sm:$0xff]  ;;  %9926 = vmatpush.bf16.msra.mxu0 %v11344_v2  ;;  %v11318_v2 = vld [vmem:[%s16522_s12 + $0xe0] sm:$0xff] }
 0x42a   : > { %v2507_v63 = vadd.s32 1, %v2503_v56  ;;  %v2894_v8 = vshrl.u32 %v16763_v38, %v16830_v20  ;;  %v13234_v57 = vor.u32 %v2897_v27, %v2896_v31  ;;  %v13236_v53 = vor.u32 %v2900_v34, %v2899_v3  ;;  %v11319_v27 = vld [vmem:[%s16522_s12 + $0xe8] sm:$0xff]  ;;  %9983 = vmatpush.bf16.msrb.mxu3 %v11368_v30 }
 0x42b   : > { %v2904_v1 = vor.u32 %v2903_v40, %v2902_v26  ;;  %vm2908_vm0 = vcmp.lt.s32.totalorder %v16831_v47, 1  ;;  %v2075_v49 = vmul.f32 -0.001358992, %v2074_v5  ;;  %v2082_v36 = vmul.f32 -0.00019511016, %v2074_v5  ;;  %v11327_v3 = vld [vmem:[%s16522_s12 + $0x128] sm:$0xff]  ;;  %9870 = vmatpush.bf16.msrb.mxu2 %v11319_v27 }
 0x42c   : > { %v2508_v12 = vsel %vm2506_vm11, %v2507_v63, %v2503_v56  ;;  %v2907_v42 = vor.u32 %v2906_v48, %v2905_v29  ;;  %v2090_v31 = vadd.s32 3, %v13182_v4  ;;  %v2884_v26 = vor.u32 8388608, %v2883_v43  ;;  %v11343_v56 = vld [vmem:[%s16522_s12 + $0x1a8] sm:$0xff]  ;;  %v13259_v48 = vld [vmem:[#allocation2 + $0x18] sm:$0xff]  ;;  %9889 = vmatpush.bf16.msra.mxu1 %v11327_v3  ;;  %v11342_v27 = vld [vmem:[%s16522_s12 + $0x1a0] sm:$0xff] }
 0x42d   : > { %v2509_v34 = vadd.s32 %v2508_v12, %v2504_v24  ;;  %vm2911_vm6 = vcmp.lt.s32.totalorder %v16831_v47, 4  ;;  %v2076_v40 = vadd.f32 0.041655596, %v2075_v49  ;;  %v2083_v58 = vadd.f32 0.008332121, %v2082_v36  ;;  %v11326_v49 = vld [vmem:[%s16522_s12 + $0x120] sm:$0xff]  ;;  %9927 = vmatpush.bf16.msra.mxu0 %v11343_v56 }
 0x42e   : > { %v13256_v29 = vor.u32 %v2894_v8, %v2893_v35  ;;  %vm2910_vm8 = vcmp.lt.s32.totalorder %v16831_v47, 3  ;;  %v13264_v24 = vsel %vm12872_vm3, %v13259_v48, %v1759_v22  ;;  %vm2909_vm7 = vcmp.lt.s32.totalorder %v16831_v47, 2  ;;  %v11367_v8 = vld [vmem:[%s16522_s12 + $0x268] sm:$0xff] }
 0x42f   : > { %v2510_v43 = vadd.s32 536870912, %v2509_v34  ;;  %v2920_v63 = vsel %vm2908_vm0, %v13234_v57, %v13236_v53  ;;  %v2077_v51 = vmul.f32 %v2076_v40, %v2074_v5  ;;  %v2084_v35 = vmul.f32 %v2083_v58, %v2074_v5  ;;  %9984 = vmatpush.bf16.msrb.mxu3 %v11367_v8  ;;  %9871 = vmatpush.bf16.msrb.mxu2 %v11318_v2  ;;  %v11325_v8 = vld [vmem:[%s16522_s12 + $0x118] sm:$0xff] }
 0x430   : > { %v2917_v17 = vsel %vm2911_vm6, %v2904_v1, 920167782  ;;  %v2921_v22 = vsel %vm2911_vm6, %v2907_v42, 1326507024  ;;  %v13278_v15 = vand.u32 3, %v2090_v31  ;;  %v13290_v12 = vshll.u32 %v2884_v26, 8  ;;  %9890 = vmatpush.bf16.msra.mxu1 %v11326_v49 }
 0x431   : > { %v13286_v36 = vshrl.u32 %v2510_v43, 30  ;;  %v2922_v30 = vsel %vm2910_vm8, %v2904_v1, %v2921_v22  ;;  %v2078_v42 = vadd.f32 -0.4999988, %v2077_v51  ;;  %v2085_v31 = vadd.f32 -0.16666654, %v2084_v35  ;;  %v11366_v35 = vld [vmem:[%s16522_s12 + $0x260] sm:$0xff]  ;;  %9928 = vmatpush.bf16.msra.mxu0 %v11342_v27 }
 0x432   : > { %v2916_v3 = vsel %vm2908_vm0, %v13256_v29, %v13234_v57  ;;  %v2923_v40 = vsel %vm2909_vm7, %v2920_v63, %v2922_v30  ;;  %v2918_v1 = vsel %vm2910_vm8, %v13236_v53, %v2917_v17  ;;  %v2925_v26 = vand.u32 65535, %v13290_v12 }
 0x433   : > { %v2512_v58 = vshll.u32 %v13286_v36, 30  ;;  %v13307_v56 = vshrl.u32 %v13290_v12, 16  ;;  %v2079_v43 = vmul.f32 %v2078_v42, %v2074_v5  ;;  %v2086_v51 = vmul.f32 %v2085_v31, %v2074_v5  ;;  %v11317_v5 = vld [vmem:[%s16522_s12 + $0xd8] sm:$0xff]  ;;  %9985 = vmatpush.bf16.msrb.mxu3 %v11366_v35 }
 0x434   : > { %v2927_v22 = vand.u32 65535, %v2923_v40  ;;  %v2928_v63 = vshrl.u32 %v2923_v40, 16  ;;  %v13314_v30 = vmul.f32 %v13264_v24, %v13264_v24  ;;  %vm2092_vm3 = vcmp.lt.s32.totalorder %v13278_v15, 2  ;;  %v11341_v40 = vld [vmem:[%s16522_s12 + $0x198] sm:$0xff]  ;;  %9872 = vmatpush.bf16.msrb.mxu2 %v11317_v5  ;;  %9891 = vmatpush.bf16.msra.mxu1 %v11325_v8 }
 0x435   : > { %vm2096_vm10 = vcmp.eq.s32.totalorder %v13278_v15, 2  ;;  %v13324_v17 = vsub.s32 %v2509_v34, %v2512_v58  ;;  %v13326_v42 = vadd.f32 1.0, %v2079_v43  ;;  %v2087_v31 = vadd.f32 1.0, %v2086_v51  ;;  %9929 = vmatpush.bf16.msra.mxu0 %v11341_v40 }
 0x436   : > { %v2919_v2 = vsel %vm2909_vm7, %v2916_v3, %v2918_v1  ;;  %v2929_v49 = vmul.u32 %v2927_v22, %v2925_v26  ;;  %v2930_v16 = vmul.u32 %v2928_v63, %v2925_v26  ;;  %v13336_v34 = vmul.u32 %v2927_v22, %v13307_v56 }
 0x437   : > { %16832 = vst [vmem:[#allocation11_spill] sm:$0xff] %v13326_v42  ;;  %vm2514_vm12 = vcmp.lt.s32.totalorder %v13324_v17, 0  ;;  %v2515_v23 = vsub.s32 0, %v13324_v17  ;;  %v13339_v58 = vmul.f32 %v2087_v31, %v13208_v37  ;;  %vm2093_vm15 = vcmp.eq.s32.totalorder %v13278_v15, 0 }
 0x438   : > { %v16632_v27 = vxor.u32 2147483648, %v13326_v42  ;;  %v2949_v43 = vand.u32 65535, %v2919_v2  ;;  %v2932_v1 = vmul.u32 %v2928_v63, %v13307_v56  ;;  %v2933_v51 = vshll.u32 %v2930_v16, 16 }
 0x439   : > { %16833 = vst [vmem:[#allocation10_spill] sm:$0xff] %v13339_v58  ;;  %v2516_v3 = vsel %vm2514_vm12, %v2515_v23, %v13324_v17  ;;  %v2950_v32 = vshrl.u32 %v2919_v2, 16  ;;  %v16638_v22 = vxor.u32 2147483648, %v13339_v58  ;;  %v2935_v35 = vshll.u32 %v13336_v34, 16 }
 0x43a   : > { %v2098_v37 = vsel %vm2096_vm10, %v16632_v27, %v13339_v58  ;;  %v2517_v31 = vclz %v2516_v3  ;;  %v1772_v5 = vmul.f32 -0.00019511016, %v13314_v30  ;;  %vm16653_vm1 = vweird.f32 %v12864_v62 }
 0x43b   : > { %vm2937_vm14 = vc.u32 %v2929_v49, %v2933_v51  ;;  %v2939_v23 = vadd.s32 %v2933_v51, %v2929_v49  ;;  %v2095_v63 = vsel %vm2093_vm15, %v13326_v42, %v16638_v22  ;;  %v2505_v8 = vadd.s32 %v13186_v54, %v13184_v11 }
 0x43c   : > { %v10479_v2 = vadd.s32 4294967294, %v2517_v31  ;;  %v2938_v40 = vsel %vm2937_vm14, 1, %v16766_v33  ;;  %v2099_v3 = vsel %vm2092_vm3, %v2095_v63, %v2098_v37  ;;  %v2951_v13 = vmul.u32 %v2949_v43, %v2925_v26 }
 0x43d   : > { %v2940_v27 = vadd.s32 %v2938_v40, %v2932_v1  ;;  %v2952_v28 = vmul.u32 %v2950_v32, %v2925_v26  ;;  %v2100_v49 = vsel %vm16653_vm1, nan, %v2099_v3  ;;  %v2934_v51 = vshrl.u32 %v2930_v16, 16  ;;  %v11262_v40 = vld [vmem:[#allocation3 + $0x14] sm:$0xf] }
 0x43e   : > { %vm10480_vm2 = vcmp.lt.s32.totalorder %v10479_v2, 0  ;;  %vm2941_vm4 = vc.u32 %v2939_v23, %v2935_v35  ;;  %v3034_v58 = vpack.c.bf16 %v2100_v49, %v2100_v49  ;;  %v2953_v11 = vmul.u32 %v2949_v43, %v13307_v56 }
 0x43f   : > { %v2520_v22 = vsel %vm10480_vm2, 0, %v10479_v2  ;;  %v2942_v42 = vsel %vm2941_vm4, 1, %v16766_v33  ;;  %v1773_v1 = vadd.f32 0.008332121, %v1772_v5  ;;  %v2892_v26 = vshrl.u32 %v16753_v7, %v16830_v20 }
 0x440   : > { %v2521_v54 = vsub.s32 32, %v2520_v22  ;;  %v2522_v31 = vshll.u32 %v13324_v17, %v2520_v22  ;;  %v2525_v15 = vsub.s32 4294967266, %v2520_v22  ;;  %v2944_v37 = vadd.s32 %v2942_v42, %v2940_v27  ;;  %3042 = vst [vmem:[#allocation3 + $0x50] sm:$0xf] %v3034_v58 }
 0x441   : > { %v2954_v63 = vmul.u32 %v2950_v32, %v13307_v56  ;;  %v2955_v16 = vshll.u32 %v2952_v28, 16  ;;  %v2535_v2 = vsub.s32 4, %v13286_v36  ;;  %v2913_v43 = vsel %vm2911_vm6, %v13236_v53, 2102212464 }
 0x442   : > { %v2523_v35 = vshrl.u32 %v2505_v8, %v2521_v54  ;;  %v2526_v23 = vadd.s32 127, %v2525_v15  ;;  %v2936_v17 = vshrl.u32 %v13336_v34, 16  ;;  %v2957_v22 = vshll.u32 %v2953_v11, 16 }
 0x443   : > { %vm2959_vm11 = vc.u32 %v2951_v13, %v2955_v16  ;;  %v2961_v42 = vadd.s32 %v2955_v16, %v2951_v13  ;;  %v2945_v5 = vadd.s32 %v2944_v37, %v2934_v51  ;;  %v2912_v32 = vsel %vm2908_vm0, %v2892_v26, %v13256_v29  ;;  %v13386_v51 = vld [vmem:[#allocation2 + $0x40] sm:$0xff] }
 0x444   : > { %v2524_v58 = vor.u32 %v2523_v35, %v2522_v31  ;;  %v2527_v27 = vshll.u32 %v2526_v23, 23  ;;  %v2960_v20 = vsel %vm2959_vm11, 1, %v16766_v33  ;;  %v2956_v56 = vshrl.u32 %v2952_v28, 16  ;;  %16834 = vst [vmem:[#allocation13_spill] sm:$0xff] %v13386_v51 }
 0x445   : > { %v2962_v8 = vadd.s32 %v2960_v20, %v2954_v63  ;;  %vm2963_vm3 = vc.u32 %v2961_v42, %v2957_v22  ;;  %v2914_v34 = vsel %vm2910_vm8, %v13234_v57, %v2913_v43  ;;  %v1774_v49 = vmul.f32 %v1773_v1, %v13314_v30 }
 0x446   : > { %v2528_v3 = vor.u32 4788187, %v2527_v27  ;;  %v2531_v53 = vcvt.s32.f32 %v2524_v58  ;;  %v2964_v13 = vsel %vm2963_vm3, 1, %v16766_v33  ;;  %vm2413_vm6 = vcmp.lt.s32.totalorder %v13386_v51, 0 }
 0x447   : > { %v2958_v54 = vshrl.u32 %v2953_v11, 16  ;;  %v2966_v29 = vadd.s32 %v2964_v13, %v2962_v8  ;;  %v10618_v28 = vld [vmem:[#allocation3 + $0x4c] sm:$0xf0]  ;;  %v2536_v15 = vsel %vm2413_vm6, %v2535_v2, %v13286_v36  ;;  %v13392_v37 = vadd.s32 %v2945_v5, %v2936_v17 }
 0x448   : > { %v2529_v31 = vand.u32 2147483647, %v2528_v3  ;;  %v13394_v26 = vadd.s32 %v2961_v42, %v2957_v22  ;;  %v13397_v57 = vadd.s32 3, %v12922_v61  ;;  %v10621_v1 = vor.u32 %v11262_v40, %v10618_v28 }
 0x449   : > { %v2915_v63 = vsel %vm2909_vm7, %v2912_v32, %v2914_v34  ;;  %v2967_v16 = vadd.s32 %v2966_v29, %v2956_v56  ;;  %v2129_v11 = vor.u32 %v12815_v25, %v12736_v55  ;;  %v2132_v35 = vor.u32 %v12913_v41, %v12758_v18 }
 0x44a   : > { %v16835_v36 = vand.u32 2147483647, %v12728_v59  ;;  %v2532_v2 = vmul.f32 %v2531_v53, %v2529_v31  ;;  %v1775_v43 = vadd.f32 -0.16666654, %v1774_v49  ;;  %vm2133_vm8 = vcmp.lt.s32.totalorder %v12745_v52, 1  ;;  %9914 = vmatmul.bf16.vlgmr.msra.gmra.mxu3 %v10621_v1  ;;  %v16839_v1 = vld [vmem:[#allocation21_spill] sm:$0xff] }
 0x44b   : > { %v2968_v17 = vadd.s32 %v2967_v16, %v2958_v54  ;;  %v2969_v25 = vmul.u32 %v13290_v12, %v2915_v63  ;;  %vm2971_vm7 = vc.u32 %v13392_v37, %v13394_v26  ;;  %v1462_v59 = vmul.f32 -0.00019511016, %v12548_v6 }
 0x44c   : > { %vm13407_vm0 = vcmp.le.f32.partialorder %v16835_v36, 0.7853982  ;;  %v2533_v55 = vxor.u32 2147483648, %v2532_v2  ;;  %v1311_v18 = vmul.f32 %v13080_v14, %v12662_v39  ;;  %vm16662_vm10 = vcmp.lt.s32.totalorder %v12745_v52, 2 }
 0x44d   : > { %v13414_v47 = vsel %vm13407_vm0, 0, %v2536_v15  ;;  %vm2136_vm12 = vcmp.lt.s32.totalorder %v12745_v52, 4  ;;  %v2972_v41 = vadd.s32 1, %v2968_v17  ;;  %v1455_v22 = vmul.f32 -0.001358992, %v12548_v6 }
 0x44e   : > { %16838 = vst [vmem:[#allocation14_spill] sm:$0xff] %v13414_v47  ;;  %vm2135_vm15 = vcmp.lt.s32.totalorder %v12745_v52, 3  ;;  %v2138_v12 = vsel %vm2136_vm12, %v12965_v50, 2102212464  ;;  %v2142_v42 = vsel %vm2136_vm12, %v2129_v11, 920167782  ;;  %v2534_v58 = vsel %vm2413_vm6, %v2533_v55, %v2532_v2 }
 0x44f   : > { %v1776_v14 = vmul.f32 %v1775_v43, %v13314_v30  ;;  %v13437_v27 = vsel %vm13407_vm0, %v13386_v51, %v2534_v58  ;;  %v2555_v5 = vadd.s32 3, %v13414_v47  ;;  %v2973_v20 = vsel %vm2971_vm7, %v2972_v41, %v2968_v17  ;;  %v16841_v43 = vld [vmem:[#allocation51_spill] sm:$0xff] }
 0x450   : > { %v13444_v32 = vsel %vm2133_vm8, %v12772_v44, %v12952_v46  ;;  %v2539_v56 = vmul.f32 %v13437_v27, %v13437_v27  ;;  %v2974_v8 = vadd.s32 %v2973_v20, %v2969_v25  ;;  %v1463_v40 = vadd.f32 0.008332121, %v1462_v59  ;;  %v16842_v25 = vld [vmem:[#allocation4_spill] sm:$0xff] }
 0x451   : > { %v1312_v3 = vadd.f32 1.0, %v1311_v18  ;;  %v13451_v53 = vsel %vm2135_vm15, %v12958_v9, %v2138_v12  ;;  %v2141_v34 = vsel %vm2133_vm8, %v12952_v46, %v12958_v9  ;;  %v1456_v13 = vadd.f32 0.041655596, %v1455_v22 }
 0x452   : > { %v2143_v44 = vsel %vm2135_vm15, %v12965_v50, %v2142_v42  ;;  %v2540_v49 = vmul.f32 -0.001358992, %v2539_v56  ;;  %v2547_v54 = vmul.f32 -0.00019511016, %v2539_v56  ;;  %v2975_v29 = vadd.s32 536870912, %v2974_v8 }
 0x453   : > { %v1777_v28 = vadd.f32 1.0, %v1776_v14  ;;  %v2146_v31 = vsel %vm2136_vm12, %v2132_v35, 1326507024  ;;  %v13462_v15 = vand.u32 3, %v2555_v5  ;;  %v1453_v16 = vsel %vm12199_vm9, 0, %v16839_v1 }
 0x454   : > { %v2541_v36 = vadd.f32 0.041655596, %v2540_v49  ;;  %v2548_v46 = vadd.f32 0.008332121, %v2547_v54  ;;  %v2976_v23 = vshrl.u32 %v2975_v29, 30  ;;  %v1464_v2 = vmul.f32 %v1463_v40, %v12548_v6 }
 0x455   : > { %v13469_v17 = vmul.f32 %v1312_v3, %v16841_v43  ;;  %v13475_v55 = vsel %vm2133_vm8, %v12958_v9, %v12965_v50  ;;  %v1457_v35 = vmul.f32 %v1456_v13, %v12548_v6  ;;  %v16643_v59 = vand.u32 2147483647, %v16842_v25 }
 0x456   : > { %v13481_v18 = vsel %vm16662_vm10, %v2141_v34, %v2143_v44  ;;  %v2542_v41 = vmul.f32 %v2541_v36, %v2539_v56  ;;  %v2549_v22 = vmul.f32 %v2548_v46, %v2539_v56  ;;  %v2977_v12 = vshll.u32 %v2976_v23, 30 }
 0x457   : > { %v13484_v42 = vmul.f32 %v1777_v28, %v13264_v24  ;;  %v13488_v58 = vsel %vm2135_vm15, %v2129_v11, %v2146_v31  ;;  %vm2558_vm9 = vcmp.eq.s32.totalorder %v13462_v15, 0  ;;  %v1470_v9 = vadd.s32 3, %v1453_v16  ;;  %v13496_v24 = vld [vmem:[#allocation2 + $0x58] sm:$0xff]  ;;  %v16844_v11 = vld [vmem:[#allocation56_spill] sm:$0xff] }
 0x458   : > { %v2543_v50 = vadd.f32 -0.4999988, %v2542_v41  ;;  %v2550_v14 = vadd.f32 -0.16666654, %v2549_v22  ;;  %vm2557_vm14 = vcmp.lt.s32.totalorder %v13462_v15, 2  ;;  %v13492_v5 = vsub.s32 %v2974_v8, %v2977_v12  ;;  %16843 = vst [vmem:[#allocation12_spill] sm:$0xff] %v13496_v24 }
 0x459   : > { %v1465_v20 = vadd.f32 -0.16666654, %v1464_v2  ;;  %vm16650_vm2 = vweird.f32 %v13386_v51  ;;  %vm2561_vm4 = vcmp.eq.s32.totalorder %v13462_v15, 2  ;;  %vm2878_vm11 = vcmp.lt.s32.totalorder %v13496_v24, 0  ;;  %v16845_v28 = vld [vmem:[#allocation24_spill] sm:$0xff] }
 0x45a   : > { %v13500_v40 = vand.u32 3, %v16844_v11  ;;  %v1458_v3 = vadd.f32 -0.4999988, %v1457_v35  ;;  %v13504_v34 = vand.u32 8388607, %v16643_v59  ;;  %v2544_v13 = vmul.f32 %v2543_v50, %v2539_v56  ;;  %v16852_v50 = vld [vmem:[#allocation22_spill] sm:$0xff] }
 0x45b   : > { %v2551_v8 = vmul.f32 %v2550_v14, %v2539_v56  ;;  %vm2979_vm3 = vcmp.lt.s32.totalorder %v13492_v5, 0  ;;  %v2980_v44 = vsub.s32 0, %v13492_v5  ;;  %v2970_v49 = vadd.s32 %v13394_v26, %v13392_v37  ;;  %v16853_v11 = vld [vmem:[#allocation16_spill] sm:$0xff] }
 0x45c   : > { %v1300_v54 = vmul.f32 -0.001358992, %v12662_v39  ;;  %v13511_v29 = vand.u32 3, %v1470_v9  ;;  %v13516_v1 = vsel %vm12503_vm5, 0, %v16845_v28  ;;  %v13518_v63 = vadd.f32 1.0, %v2544_v13 }
 0x45d   : > { %v2552_v36 = vadd.f32 1.0, %v2551_v8  ;;  %v2981_v56 = vsel %vm2979_vm3, %v2980_v44, %v13492_v5  ;;  %v1466_v46 = vmul.f32 %v1465_v20, %v12548_v6  ;;  %v16848_v2 = vand.u32 2147483647, %v12738_v19 }
 0x45e   : > { %16847 = vst [vmem:[#allocation21_spill] sm:$0xff] %v13518_v63  ;;  %v2982_v26 = vclz %v2981_v56  ;;  %v1301_v43 = vadd.f32 0.041655596, %v1300_v54  ;;  %v1459_v35 = vmul.f32 %v1458_v3, %v12548_v6  ;;  %v16641_v12 = vxor.u32 2147483648, %v13518_v63 }
 0x45f   : > { %vm13524_vm6 = vcmp.le.f32.partialorder %v16848_v2, 0.7853982  ;;  %v13531_v22 = vmul.f32 %v2552_v36, %v13437_v27  ;;  %v3000_v9 = vsub.s32 4, %v2976_v23  ;;  %v5096_v14 = vshrl.u32 %v16763_v38, %v16852_v50 }
 0x460   : > { %v10488_v19 = vadd.s32 4294967294, %v2982_v26  ;;  %v1302_v20 = vmul.f32 %v1301_v43, %v12662_v39  ;;  %v5095_v13 = vshll.u32 %v16753_v7, %v16853_v11  ;;  %v5098_v6 = vshll.u32 %v16763_v38, %v16853_v11 }
 0x461   : > { %16851 = vst [vmem:[#allocation18_spill] sm:$0xff] %v13531_v22  ;;  %v16642_v3 = vxor.u32 2147483648, %v13531_v22  ;;  %v2563_v27 = vsel %vm2561_vm4, %v16641_v12, %v13531_v22  ;;  %v1467_v8 = vadd.f32 1.0, %v1466_v46  ;;  %v5099_v44 = vshrl.u32 %v16764_v10, %v16852_v50 }
 0x462   : > { %vm10489_vm5 = vcmp.lt.s32.totalorder %v10488_v19, 0  ;;  %v1303_v54 = vadd.f32 -0.4999988, %v1302_v20  ;;  %v13549_v28 = vadd.f32 1.0, %v1459_v35  ;;  %v13551_v31 = vand.u32 3, %v1453_v16 }
 0x463   : > { %v2560_v36 = vsel %vm2558_vm9, %v13518_v63, %v16642_v3  ;;  %v2985_v56 = vsel %vm10489_vm5, 0, %v10488_v19  ;;  %v3001_v2 = vsel %vm2878_vm11, %v3000_v9, %v2976_v23  ;;  %vm1318_vm0 = vcmp.eq.s32.totalorder %v13500_v40, 0  ;;  %v16854_v19 = vld [vmem:[#allocation29_spill] sm:$0xff] }
 0x464   : > { %v13561_v46 = vor.u32 %v5096_v14, %v5095_v13  ;;  %v2564_v26 = vsel %vm2557_vm14, %v2560_v36, %v2563_v27  ;;  %v2986_v43 = vsub.s32 32, %v2985_v56  ;;  %v2987_v16 = vshll.u32 %v13492_v5, %v2985_v56  ;;  %v16855_v27 = vld [vmem:[#allocation43_spill] sm:$0xff] }
 0x465   : > { %v2990_v35 = vsub.s32 4294967266, %v2985_v56  ;;  %vm1473_vm8 = vcmp.eq.s32.totalorder %v13511_v29, 0  ;;  %v2565_v20 = vsel %vm16650_vm2, nan, %v2564_v26  ;;  %vm1321_vm7 = vcmp.eq.s32.totalorder %v13500_v40, 2 }
 0x466   : > { %v13571_v23 = vmul.f32 %v1467_v8, %v16854_v19  ;;  %v13573_v9 = vor.u32 %v5099_v44, %v5098_v6  ;;  %v5101_v15 = vshll.u32 %v16764_v10, %v16853_v11  ;;  %v2988_v14 = vshrl.u32 %v2970_v49, %v2986_v43  ;;  %v13593_v43 = vld [vmem:[#allocation2] sm:$0xff] }
 0x467   : > { %v2991_v13 = vadd.s32 127, %v2990_v35  ;;  %v1304_v5 = vmul.f32 %v1303_v54, %v12662_v39  ;;  %vm1317_vm12 = vcmp.lt.s32.totalorder %v13500_v40, 2  ;;  %vm1476_vm15 = vcmp.eq.s32.totalorder %v13511_v29, 2 }
 0x468   : > { %v1920_v36 = vmul.f32 -0.001358992, %v16855_v27  ;;  %v13583_v56 = vsel %vm13524_vm6, 0, %v3001_v2  ;;  %vm1472_vm9 = vcmp.lt.s32.totalorder %v13511_v29, 2  ;;  %v1927_v6 = vmul.f32 -0.00019511016, %v16855_v27 }
 0x469   : > { %16856 = vst [vmem:[#allocation51_spill] sm:$0xff] %v13583_v56  ;;  %v5102_v49 = vshrl.u32 %v16754_v21, %v16852_v50  ;;  %v5104_v39 = vshll.u32 %v16754_v21, %v16853_v11  ;;  %v2989_v8 = vor.u32 %v2988_v14, %v2987_v16  ;;  %v2992_v44 = vshll.u32 %v2991_v13, 23  ;;  %v13601_v14 = vld [vmem:[#allocation2 + $0x8] sm:$0xff] }
 0x46a   : > { %v3036_v54 = vpack.c.bf16 %v2565_v20, %v2565_v20  ;;  %v13591_v26 = vadd.f32 1.0, %v1304_v5  ;;  %vm1314_vm14 = vweird.f32 %v13593_v43  ;;  %v1921_v2 = vadd.f32 0.041655596, %v1920_v36 }
 0x46b   : > { %v1928_v35 = vadd.f32 0.008332121, %v1927_v6  ;;  %v1935_v19 = vadd.s32 3, %v13516_v1  ;;  %v5108_v12 = vshrl.u32 %v16750_v45, %v16852_v50  ;;  %v2993_v3 = vor.u32 4788187, %v2992_v44 }
 0x46c   : > { %v2996_v59 = vcvt.s32.f32 %v2989_v8  ;;  %3044 = vst [vmem:[#allocation3 + $0x8c] sm:$0xf] %v3036_v54  ;;  %v16644_v16 = vxor.u32 2147483648, %v13469_v17  ;;  %vm1469_vm4 = vweird.f32 %v13601_v14  ;;  %v1474_v13 = vxor.u32 2147483648, %v13571_v23 }
 0x46d   : > { %v1922_v36 = vmul.f32 %v1921_v2, %v16855_v27  ;;  %v1929_v6 = vmul.f32 %v1928_v35, %v16855_v27  ;;  %v2994_v41 = vand.u32 2147483647, %v2993_v3  ;;  %v5105_v44 = vshrl.u32 %v16749_v0, %v16852_v50 }
 0x46e   : > { %v1320_v8 = vsel %vm1318_vm0, %v13591_v26, %v16644_v16  ;;  %v5107_v54 = vshll.u32 %v16749_v0, %v16853_v11  ;;  %v3020_v20 = vadd.s32 3, %v13583_v56  ;;  %v1475_v2 = vsel %vm1473_vm8, %v13549_v28, %v1474_v13  ;;  %v16860_v56 = vld [vmem:[#allocation40_spill] sm:$0xff] }
 0x46f   : > { %v1923_v35 = vadd.f32 -0.4999988, %v1922_v36  ;;  %v1930_v3 = vadd.f32 -0.16666654, %v1929_v6  ;;  %vm3347_vm3 = vcmp.eq.s32.totalorder %v13551_v31, 0  ;;  %v2997_v5 = vmul.f32 %v2996_v59, %v2994_v41 }
 0x470   : > { %v16857_v16 = vxor.u32 2147483648, %v13591_v26  ;;  %vm3350_vm5 = vcmp.eq.s32.totalorder %v13551_v31, 2  ;;  %v13628_v11 = vor.u32 %v5102_v49, %v5101_v15  ;;  %v5109_v63 = vor.u32 %v5108_v12, %v5107_v54 }
 0x471   : > { %v16858_v36 = vxor.u32 2147483648, %v13549_v28  ;;  %v1931_v41 = vmul.f32 %v1930_v3, %v16855_v27  ;;  %v13638_v6 = vand.u32 3, %v1935_v19  ;;  %vm3346_vm0 = vcmp.lt.s32.totalorder %v13551_v31, 2 }
 0x472   : > { %v1323_v51 = vsel %vm1321_vm7, %v16857_v16, %v13469_v17  ;;  %v2998_v16 = vxor.u32 2147483648, %v2997_v5  ;;  %v1924_v12 = vmul.f32 %v1923_v35, %v16855_v27  ;;  %v5106_v40 = vor.u32 %v5105_v44, %v5104_v39  ;;  %v11316_v44 = vld [vmem:[%s16522_s12 + $0xd0] sm:$0xff] }
 0x473   : > { %v1324_v22 = vsel %vm1317_vm12, %v1320_v8, %v1323_v51  ;;  %v1478_v59 = vsel %vm1476_vm15, %v16858_v36, %v13571_v23  ;;  %v13644_v51 = vand.u32 3, %v3020_v20  ;;  %v13647_v49 = vand.u32 3, %v13516_v1  ;;  %v16859_v8 = vld [vmem:[#allocation19_spill] sm:$0xff]  ;;  %v11340_v35 = vld [vmem:[%s16522_s12 + $0x190] sm:$0xff]  ;;  %9873 = vmatpush.bf16.msrb.mxu2 %v11316_v44 }
 0x474   : > { %v1479_v15 = vsel %vm1472_vm9, %v1475_v2, %v1478_v59  ;;  %vm16656_vm8 = vcmp.lt.s32.totalorder %v16859_v8, 1  ;;  %vm16660_vm7 = vcmp.lt.s32.totalorder %v16859_v8, 4  ;;  %v2999_v19 = vsel %vm2878_vm11, %v2998_v16, %v2997_v5  ;;  %v11324_v2 = vld [vmem:[%s16522_s12 + $0x110] sm:$0xff]  ;;  %v13697_v59 = vld [vmem:[#allocation2 + $0x20] sm:$0xff]  ;;  %9930 = vmatpush.bf16.msra.mxu0 %v11340_v35  ;;  %v16862_v35 = vld [vmem:[#allocation49_spill] sm:$0xff] }
 0x475   : > { %v1325_v54 = vsel %vm1314_vm14, nan, %v1324_v22  ;;  %v1932_v29 = vadd.f32 1.0, %v1931_v41  ;;  %v5123_v27 = vsel %vm16660_vm7, %v5109_v63, 1326507024  ;;  %v13660_v39 = vsel %vm13524_vm6, %v13496_v24, %v2999_v19  ;;  %v11365_v63 = vld [vmem:[%s16522_s12 + $0x258] sm:$0xff]  ;;  %v11364_v19 = vld [vmem:[%s16522_s12 + $0x250] sm:$0xff]  ;;  %9892 = vmatpush.bf16.msra.mxu1 %v11324_v2 }
 0x476   : > { %v1480_v1 = vsel %vm1469_vm4, nan, %v1479_v15  ;;  %vm1938_vm12 = vcmp.eq.s32.totalorder %v13638_v6, 0  ;;  %vm1941_vm15 = vcmp.eq.s32.totalorder %v13638_v6, 2  ;;  %vm16661_vm11 = vcmp.lt.s32.totalorder %v16859_v8, 2  ;;  %9986 = vmatpush.bf16.msrb.mxu3 %v11365_v63 }
 0x477   : > { %vm16655_vm9 = vcmp.lt.s32.totalorder %v16859_v8, 3  ;;  %v13670_v22 = vmul.f32 %v13660_v39, %v13660_v39  ;;  %v13675_v37 = vadd.f32 1.0, %v1924_v12  ;;  %vm1937_vm6 = vcmp.lt.s32.totalorder %v13638_v6, 2 }
 0x478   : > { %v5119_v20 = vsel %vm16660_vm7, %v5106_v40, 920167782  ;;  %v5122_v5 = vsel %vm16656_vm8, %v13573_v9, %v13628_v11  ;;  %v1765_v3 = vmul.f32 -0.001358992, %v13314_v30  ;;  %v13695_v36 = vand.u32 3, %v13397_v57 }
 0x479   : > { %vm1934_vm2 = vweird.f32 %v13697_v59  ;;  %v3031_v41 = vpack.c.bf16 %v1480_v1, %v1325_v54  ;;  %v5124_v16 = vsel %vm16655_vm9, %v5106_v40, %v5123_v27  ;;  %v3005_v15 = vmul.f32 -0.001358992, %v13670_v22  ;;  %v11315_v40 = vld [vmem:[%s16522_s12 + $0xc8] sm:$0xff] }
 0x47a   : > { %v3012_v12 = vmul.f32 -0.00019511016, %v13670_v22  ;;  %v13708_v57 = vmul.f32 %v1932_v29, %v16860_v56  ;;  %v3349_v47 = vsel %vm3347_vm3, %v13549_v28, %v1474_v13  ;;  %v11323_v54 = vld [vmem:[%s16522_s12 + $0x108] sm:$0xff]  ;;  %v1766_v27 = vadd.f32 0.041655596, %v1765_v3  ;;  %9987 = vmatpush.bf16.msrb.mxu3 %v11364_v19  ;;  %9874 = vmatpush.bf16.msrb.mxu2 %v11315_v40  ;;  %v11322_v19 = vld [vmem:[%s16522_s12 + $0x100] sm:$0xff] }
 0x47b   : > { %v16861_v1 = vxor.u32 2147483648, %v13549_v28  ;;  %vm3809_vm1 = vcmp.eq.s32.totalorder %v13647_v49, 0  ;;  %v13729_v13 = vsel %vm16656_vm8, %v13561_v46, %v13573_v9  ;;  %v13734_v29 = vsel %vm16655_vm9, %v13628_v11, %v5119_v20  ;;  %v11339_v28 = vld [vmem:[%s16522_s12 + $0x188] sm:$0xff]  ;;  %3039 = vst [vmem:[#allocation3 + $0xc] sm:$0xff] %v3031_v41  ;;  %9893 = vmatpush.bf16.msra.mxu1 %v11323_v54  ;;  %v11338_v40 = vld [vmem:[%s16522_s12 + $0x180] sm:$0xff] }
 0x47c   : > { %v3006_v63 = vadd.f32 0.041655596, %v3005_v15  ;;  %v3013_v44 = vadd.f32 0.008332121, %v3012_v12  ;;  %v13743_v2 = vsel %vm16661_vm11, %v5122_v5, %v5124_v16  ;;  %vm3026_vm3 = vcmp.eq.s32.totalorder %v13644_v51, 2  ;;  %v11363_v5 = vld [vmem:[%s16522_s12 + $0x248] sm:$0xff]  ;;  %9931 = vmatpush.bf16.msra.mxu0 %v11339_v28 }
 0x47d   : > { %v3352_v56 = vsel %vm3350_vm5, %v16861_v1, %v13571_v23  ;;  %v1767_v3 = vmul.f32 %v1766_v27, %v13314_v30  ;;  %vm1783_vm5 = vcmp.eq.s32.totalorder %v13695_v36, 0  ;;  %v1784_v20 = vxor.u32 2147483648, %v13484_v42  ;;  %v11314_v16 = vld [vmem:[%s16522_s12 + $0xc0] sm:$0xff]  ;;  %v16863_v1 = vld [vmem:[#allocation53_spill] sm:$0xff] }
 0x47e   : > { %v3353_v23 = vsel %vm3346_vm0, %v3349_v47, %v3352_v56  ;;  %v13751_v15 = vshrl.u32 %v16763_v38, %v16862_v35  ;;  %v3007_v31 = vmul.f32 %v3006_v63, %v13670_v22  ;;  %v3014_v47 = vmul.f32 %v3013_v44, %v13670_v22  ;;  %9988 = vmatpush.bf16.msrb.mxu3 %v11363_v5 }
 0x47f   : > { %vm1786_vm0 = vcmp.eq.s32.totalorder %v13695_v36, 2  ;;  %v1939_v41 = vxor.u32 2147483648, %v13708_v57  ;;  %v1942_v12 = vxor.u32 2147483648, %v13675_v37  ;;  %vm3812_vm13 = vcmp.eq.s32.totalorder %v13647_v49, 2  ;;  %9875 = vmatpush.bf16.msrb.mxu2 %v11314_v16  ;;  %9894 = vmatpush.bf16.msra.mxu1 %v11322_v19 }
 0x480   : > { %v1768_v27 = vadd.f32 -0.4999988, %v1767_v3  ;;  %vm1782_vm8 = vcmp.lt.s32.totalorder %v13695_v36, 2  ;;  %v3191_v56 = vand.u32 3, %v16863_v1  ;;  %v3354_v63 = vsel %vm1469_vm4, nan, %v3353_v23  ;;  %v11361_v3 = vld [vmem:[%s16522_s12 + $0x238] sm:$0xff]  ;;  %9932 = vmatpush.bf16.msra.mxu0 %v11338_v40 }
 0x481   : > { %v3653_v44 = vand.u32 3, %v12922_v61  ;;  %v3008_v62 = vadd.f32 -0.4999988, %v3007_v31  ;;  %v3015_v60 = vadd.f32 -0.16666654, %v3014_v47  ;;  %vm1779_vm11 = vweird.f32 %v13259_v48  ;;  %v11353_v61 = vld [vmem:[%s16522_s12 + $0x1f8] sm:$0xff] }
 0x482   : > { %v1940_v54 = vsel %vm1938_vm12, %v13675_v37, %v1939_v41  ;;  %v1943_v14 = vsel %vm1941_vm15, %v1942_v12, %v13708_v57  ;;  %vm3808_vm4 = vcmp.lt.s32.totalorder %v13647_v49, 2  ;;  %vm16704_vm10 = vweird.f32 %v13496_v24  ;;  %v11377_v31 = vld [vmem:[%s16522_s12 + $0x2b8] sm:$0xff] }
 0x483   : > { %v1769_v28 = vmul.f32 %v1768_v27, %v13314_v30  ;;  %v1944_v23 = vsel %vm1937_vm6, %v1940_v54, %v1943_v14  ;;  %vm3192_vm7 = vcmp.lt.s32.totalorder %v3191_v56, 2  ;;  %vm3193_vm9 = vcmp.eq.s32.totalorder %v3191_v56, 0  ;;  %v11362_v30 = vld [vmem:[%s16522_s12 + $0x240] sm:$0xff]  ;;  %9944 = vmatpush.bf16.msra.mxu2 %v11353_v61  ;;  %9963 = vmatpush.bf16.msrb.mxu1 %v11361_v3 }
 0x484   : > { %v3009_v47 = vmul.f32 %v3008_v62, %v13670_v22  ;;  %v3016_v1 = vmul.f32 %v3015_v60, %v13670_v22  ;;  %v1945_v6 = vsel %vm1934_vm2, nan, %v1944_v23  ;;  %v16864_v27 = vxor.u32 2147483648, %v13469_v17  ;;  %10001 = vmatpush.bf16.msrb.mxu0 %v11377_v31  ;;  %9989 = vmatpush.bf16.msrb.mxu3 %v11362_v30 }
 0x485   : > { %v1770_v14 = vadd.f32 1.0, %v1769_v28  ;;  %vm3196_vm12 = vcmp.eq.s32.totalorder %v3191_v56, 2  ;;  %vm3654_vm15 = vcmp.lt.s32.totalorder %v3653_v44, 2  ;;  %vm3655_vm6 = vcmp.eq.s32.totalorder %v3653_v44, 0 }
 0x486   : > { %v3195_v54 = vsel %vm3193_vm9, %v13591_v26, %v16864_v27  ;;  %v13809_v62 = vadd.f32 1.0, %v3009_v47  ;;  %v3017_v60 = vadd.f32 1.0, %v3016_v1  ;;  %v16866_v22 = vxor.u32 2147483648, %v13591_v26 }
 0x487   : > { %v3811_v23 = vsel %vm3809_vm1, %v13675_v37, %v1939_v41  ;;  %v1785_v16 = vsel %vm1783_vm5, %v1770_v14, %v1784_v20  ;;  %v1787_v19 = vxor.u32 2147483648, %v1770_v14  ;;  %v3657_v27 = vsel %vm3655_vm6, %v1770_v14, %v1784_v20  ;;  %v16872_v14 = vld [vmem:[#allocation45_spill] sm:$0xff] }
 0x488   : > { %16865 = vst [vmem:[#allocation56_spill] sm:$0xff] %v13809_v62  ;;  %v3198_v5 = vsel %vm3196_vm12, %v16866_v22, %v13469_v17  ;;  %v13821_v40 = vmul.f32 %v3017_v60, %v13660_v39  ;;  %v16663_v26 = vxor.u32 2147483648, %v13809_v62  ;;  %vm3658_vm1 = vcmp.eq.s32.totalorder %v3653_v44, 2 }
 0x489   : > { %v3199_v28 = vsel %vm3192_vm7, %v3195_v54, %v3198_v5  ;;  %v1788_v37 = vsel %vm1786_vm0, %v1787_v19, %v13484_v42  ;;  %v3660_v41 = vsel %vm3658_vm1, %v1787_v19, %v13484_v42  ;;  %v3814_v20 = vsel %vm3812_vm13, %v1942_v12, %v13708_v57 }
 0x48a   : > { %16867 = vst [vmem:[#allocation24_spill] sm:$0xff] %v13821_v40  ;;  %v3200_v17 = vsel %vm1314_vm14, nan, %v3199_v28  ;;  %v16664_v39 = vxor.u32 2147483648, %v13821_v40  ;;  %v3028_v43 = vsel %vm3026_vm3, %v16663_v26, %v13821_v40  ;;  %v1789_v61 = vsel %vm1782_vm8, %v1785_v16, %v1788_v37 }
 0x48b   : > { %v4895_v56 = vpack.c.bf16 %v3354_v63, %v3200_v17  ;;  %v3661_v3 = vsel %vm3654_vm15, %v3657_v27, %v3660_v41  ;;  %v1790_v42 = vsel %vm1779_vm11, nan, %v1789_v61  ;;  %v3815_v12 = vsel %vm3808_vm4, %v3811_v23, %v3814_v20  ;;  %v16868_v63 = vld [vmem:[#allocation32_spill] sm:$0xff]  ;;  %v11261_v61 = vld [vmem:[#allocation3 + $0xc] sm:$0xf] }
 0x48c   : > { %v3662_v57 = vsel %vm1779_vm11, nan, %v3661_v3  ;;  %v4923_v31 = vand.u32 2147483647, %v16868_v63  ;;  %vm16869_vm13 = vcmp.eq.s32.totalorder %v13644_v51, 0  ;;  %v3033_v44 = vpack.c.bf16 %v1945_v6, %v1790_v42 }
 0x48d   : > { %4903 = vst [vmem:[#allocation3 + $0x18] sm:$0xff] %v4895_v56  ;;  %v3025_v36 = vsel %vm16869_vm13, %v13809_v62, %v16664_v39  ;;  %v3816_v47 = vsel %vm1934_vm2, nan, %v3815_v12  ;;  %v16870_v1 = vor.u32 8388608, %v13504_v34  ;;  %vm16871_vm14 = vcmp.lt.s32.totalorder %v13644_v51, 2  ;;  %v10616_v12 = vld [vmem:[#allocation3 + $0x10] sm:$0xf] }
 0x48e   : > { %v3029_v49 = vsel %vm16871_vm14, %v3025_v36, %v3028_v43  ;;  %v4897_v30 = vpack.c.bf16 %v3816_v47, %v3662_v57  ;;  %v4930_v54 = vand.u32 8388607, %v4923_v31  ;;  %v4940_v60 = vshll.u32 %v16753_v7, %v16872_v14  ;;  %3041 = vst [vmem:[#allocation3 + $0x48] sm:$0xff] %v3033_v44  ;;  %v16873_v43 = vld [vmem:[#allocation47_spill] sm:$0xff] }
 0x48f   : > { %v13858_v48 = vshll.u32 %v16870_v1, 8  ;;  %v3030_v6 = vsel %vm16704_vm10, nan, %v3029_v49  ;;  %v4943_v59 = vshll.u32 %v16763_v38, %v16872_v14  ;;  %v4944_v34 = vshrl.u32 %v16764_v10, %v16862_v35 }
 0x490   : > { %v5129_v51 = vand.u32 65535, %v13743_v2  ;;  %v3038_v22 = vpack.c.bf16 %v3030_v6, %v3030_v6  ;;  %4905 = vst [vmem:[#allocation3 + $0x54] sm:$0xff] %v4897_v30  ;;  %v4942_v5 = vor.u32 %v13751_v15, %v4940_v60  ;;  %v4946_v23 = vshll.u32 %v16764_v10, %v16872_v14  ;;  %v11277_v6 = vld [vmem:[#allocation3 + $0x8c] sm:$0xf] }
 0x491   : > { %v4947_v16 = vshrl.u32 %v16754_v21, %v16862_v35  ;;  %v4931_v19 = vor.u32 8388608, %v4930_v54  ;;  %v4945_v28 = vor.u32 %v4944_v34, %v4943_v59  ;;  %v4949_v27 = vshll.u32 %v16754_v21, %v16872_v14 }
 0x492   : > { %v4950_v17 = vshrl.u32 %v16749_v0, %v16862_v35  ;;  %3046 = vst [vmem:[#allocation3 + $0xc8] sm:$0xf] %v3038_v22  ;;  %v4939_v37 = vshrl.u32 %v16753_v7, %v16862_v35  ;;  %v4952_v15 = vshll.u32 %v16749_v0, %v16872_v14  ;;  %v4953_v20 = vshrl.u32 %v16750_v45, %v16862_v35 }
 0x493   : > { %v4948_v41 = vor.u32 %v4947_v16, %v4946_v23  ;;  %vm4955_vm2 = vcmp.lt.s32.totalorder %v16873_v43, 1  ;;  %vm4956_vm8 = vcmp.lt.s32.totalorder %v16873_v43, 2  ;;  %vm4958_vm7 = vcmp.lt.s32.totalorder %v16873_v43, 4 }
 0x494   : > { %v4951_v56 = vor.u32 %v4950_v17, %v4949_v27  ;;  %v4954_v3 = vor.u32 %v4953_v20, %v4952_v15  ;;  %vm4957_vm11 = vcmp.lt.s32.totalorder %v16873_v43, 3  ;;  %v4963_v57 = vsel %vm4955_vm2, %v4942_v5, %v4945_v28  ;;  %v10624_v22 = vld [vmem:[#allocation3 + $0x18] sm:$0xf] }
 0x495   : > { %v4960_v42 = vsel %vm4958_vm7, %v4948_v41, 2102212464  ;;  %v4967_v35 = vsel %vm4955_vm2, %v4945_v28, %v4948_v41  ;;  %v13896_v44 = vshll.u32 %v4931_v19, 8  ;;  %v5130_v47 = vshrl.u32 %v13743_v2, 16  ;;  %v10610_v1 = vld [vmem:[#allocation3 + $0x44] sm:$0xf0] }
 0x496   : > { %v4964_v36 = vsel %vm4958_vm7, %v4951_v56, 920167782  ;;  %v11269_v49 = vld [vmem:[#allocation3 + $0x48] sm:$0xf0]  ;;  %v4959_v30 = vsel %vm4955_vm2, %v4939_v37, %v4942_v5  ;;  %v4961_v54 = vsel %vm4957_vm11, %v4945_v28, %v4960_v42  ;;  %v4968_v60 = vsel %vm4958_vm7, %v4954_v3, 1326507024 }
 0x497   : > { %v4965_v14 = vsel %vm4957_vm11, %v4948_v41, %v4964_v36  ;;  %v10613_v59 = vor.u32 %v11261_v61, %v10610_v1  ;;  %v10617_v34 = vor.u32 %v11269_v49, %v10616_v12  ;;  %v11270_v23 = vld [vmem:[#allocation3 + $0x50] sm:$0xf0]  ;;  %v4969_v5 = vsel %vm4957_vm11, %v4951_v56, %v4968_v60 }
 0x498   : > { %v4966_v16 = vsel %vm4956_vm8, %v4963_v57, %v4965_v14  ;;  %v10625_v19 = vor.u32 %v11270_v23, %v10624_v22  ;;  %v4970_v28 = vsel %vm4956_vm8, %v4967_v35, %v4969_v5  ;;  %v4972_v27 = vand.u32 65535, %v13896_v44 }
 0x499   : > { %v4973_v17 = vshrl.u32 %v13896_v44, 16  ;;  %v10678_v37 = vld [vmem:[#allocation3 + $0xc4] sm:$0xf0]  ;;  %9876 = vmatmul.bf16.vlgmr.msrb.gmra.mxu2 %v10613_v59  ;;  %9895 = vmatmul.bf16.vlgmr.msra.gmra.mxu1 %v10617_v34  ;;  %v4974_v41 = vand.u32 65535, %v4970_v28  ;;  %v4975_v15 = vshrl.u32 %v4970_v28, 16  ;;  %v4996_v20 = vand.u32 65535, %v4966_v16 }
 0x49a   : > { %v4997_v61 = vshrl.u32 %v4966_v16, 16  ;;  %vm16874_vm9 = vcmp.lt.s32.totalorder %v12745_v52, 2  ;;  %v10681_v3 = vor.u32 %v11277_v6, %v10678_v37  ;;  %9933 = vmatmul.bf16.vlgmr.msra.gmra.mxu0 %v10625_v19  ;;  %vm16875_vm3 = vcmp.lt.s32.totalorder %v16859_v8, 2 }
 0x49b   : > { %v13917_v56 = vsel %vm16874_vm9, %v13475_v55, %v13488_v58  ;;  %v13923_v42 = vsel %vm16875_vm3, %v13729_v13, %v13734_v29  ;;  %v5127_v57 = vand.u32 65535, %v13858_v48  ;;  %v13928_v12 = vsel %vm4956_vm8, %v4959_v30, %v4961_v54  ;;  %vm16876_vm1 = vmmov %vm16874_vm9 }
 0x49c   : > { %v4977_v36 = vmul.u32 %v4975_v15, %v4972_v27  ;;  %v4978_v35 = vmul.u32 %v4974_v41, %v4973_v17  ;;  %v5128_v1 = vshrl.u32 %v13858_v48, 16  ;;  %9919 = vmatmul.bf16.gmra.mxu3 %v10681_v3  ;;  %v4999_v55 = vmul.u32 %v4997_v61, %v4972_v27  ;;  %vm16884_vm9 = vmmov %vm16875_vm3 }
 0x49d   : > { %v5000_v58 = vmul.u32 %v4996_v20, %v4973_v17  ;;  %v5131_v49 = vmul.u32 %v5129_v51, %v5127_v57  ;;  %v13935_v13 = vmul.u32 %v5130_v47, %v5127_v57  ;;  %v4976_v29 = vmul.u32 %v4974_v41, %v4972_v27 }
 0x49e   : > { %v4979_v14 = vmul.u32 %v4975_v15, %v4973_v17  ;;  %v4980_v60 = vshll.u32 %v4977_v36, 16  ;;  %v13939_v43 = vmul.u32 %v5129_v51, %v5128_v1  ;;  %v4981_v30 = vshrl.u32 %v4977_v36, 16 }
 0x49f   : > { %v4998_v54 = vmul.u32 %v4996_v20, %v4972_v27  ;;  %v5001_v6 = vmul.u32 %v4997_v61, %v4973_v17  ;;  %v5002_v59 = vshll.u32 %v4999_v55, 16  ;;  %v4982_v34 = vshll.u32 %v4978_v35, 16 }
 0x4a0   : > { %vm4984_vm5 = vc.u32 %v4976_v29, %v4980_v60  ;;  %v4986_v22 = vadd.s32 %v4980_v60, %v4976_v29  ;;  %v5004_v23 = vshll.u32 %v5000_v58, 16  ;;  %v5135_v19 = vshll.u32 %v13935_v13, 16 }
 0x4a1   : > { %v4985_v16 = vsel %vm4984_vm5, 1, %v16766_v33  ;;  %vm5006_vm0 = vc.u32 %v4998_v54, %v5002_v59  ;;  %v5008_v5 = vadd.s32 %v5002_v59, %v4998_v54  ;;  %v4983_v28 = vshrl.u32 %v4978_v35, 16 }
 0x4a2   : > { %v4987_v37 = vadd.s32 %v4985_v16, %v4979_v14  ;;  %vm4988_vm4 = vc.u32 %v4986_v22, %v4982_v34  ;;  %v5007_v51 = vsel %vm5006_vm0, 1, %v16766_v33  ;;  %v5003_v27 = vshrl.u32 %v4999_v55, 16 }
 0x4a3   : > { %v4989_v41 = vsel %vm4988_vm4, 1, %v16766_v33  ;;  %v5009_v17 = vadd.s32 %v5007_v51, %v5001_v6  ;;  %vm5010_vm12 = vc.u32 %v5008_v5, %v5004_v23  ;;  %v5134_v61 = vmul.u32 %v5130_v47, %v5128_v1 }
 0x4a4   : > { %v4991_v15 = vadd.s32 %v4989_v41, %v4987_v37  ;;  %v5011_v20 = vsel %vm5010_vm12, 1, %v16766_v33  ;;  %v5137_v3 = vshll.u32 %v13939_v43, 16  ;;  %vm5139_vm15 = vc.u32 %v5131_v49, %v5135_v19 }
 0x4a5   : > { %v5013_v36 = vadd.s32 %v5011_v20, %v5009_v17  ;;  %v5141_v35 = vadd.s32 %v5135_v19, %v5131_v49  ;;  %v5151_v29 = vand.u32 65535, %v13923_v42  ;;  %v5005_v60 = vshrl.u32 %v5000_v58, 16 }
 0x4a6   : > { %v4992_v14 = vadd.s32 %v4991_v15, %v4981_v30  ;;  %v5140_v54 = vsel %vm5139_vm15, 1, %v16766_v33  ;;  %v5152_v55 = vshrl.u32 %v13923_v42, 16  ;;  %v13952_v6 = vadd.s32 %v5008_v5, %v5004_v23 }
 0x4a7   : > { %v5014_v59 = vadd.s32 %v5013_v36, %v5003_v27  ;;  %v5142_v34 = vadd.s32 %v5140_v54, %v5134_v61  ;;  %vm5143_vm6 = vc.u32 %v5141_v35, %v5137_v3  ;;  %v5155_v16 = vmul.u32 %v5151_v29, %v5128_v1  ;;  %v16880_v61 = vld [vmem:[#allocation5_spill] sm:$0xff] }
 0x4a8   : > { %v13954_v2 = vadd.s32 %v4992_v14, %v4983_v28  ;;  %v5144_v47 = vsel %vm5143_vm6, 1, %v16766_v33  ;;  %v5154_v22 = vmul.u32 %v5152_v55, %v5127_v57  ;;  %v13961_v58 = vsel %vm16876_vm1, %v13444_v32, %v13451_v53 }
 0x4a9   : > { %16877 = vst [vmem:[#allocation39_spill] sm:$0xff] %v13961_v58  ;;  %v2174_v49 = vand.u32 65535, %v13481_v18  ;;  %v5015_v42 = vadd.s32 %v5014_v59, %v5005_v60  ;;  %v5146_v30 = vadd.s32 %v5144_v47, %v5142_v34  ;;  %v2153_v23 = vshrl.u32 %v13917_v56, 16  ;;  %v16882_v60 = vld [vmem:[#allocation63_spill] sm:$0xff]  ;;  %v16883_v34 = vld [vmem:[#allocation25_spill] sm:$0xff] }
 0x4aa   : > { %vm5018_vm13 = vc.u32 %v13954_v2, %v13952_v6  ;;  %v5153_v5 = vmul.u32 %v5151_v29, %v5127_v57  ;;  %v5157_v19 = vshll.u32 %v5154_v22, 16  ;;  %v5016_v28 = vmul.u32 %v13896_v44, %v13928_v12 }
 0x4ab   : > { %v5019_v37 = vadd.s32 1, %v5015_v42  ;;  %v5094_v52 = vshrl.u32 %v16753_v7, %v16852_v50  ;;  %v5136_v32 = vshrl.u32 %v13935_v13, 16  ;;  %v5156_v53 = vmul.u32 %v5152_v55, %v5128_v1 }
 0x4ac   : > { %v5159_v51 = vshll.u32 %v5155_v16, 16  ;;  %vm5161_vm14 = vc.u32 %v5153_v5, %v5157_v19  ;;  %v5163_v41 = vadd.s32 %v5157_v19, %v5153_v5  ;;  %vm16878_vm2 = vcmp.lt.s32.totalorder %v16859_v8, 4  ;;  %v16885_v5 = vld [vmem:[#allocation17_spill] sm:$0xff] }
 0x4ad   : > { %v5020_v27 = vsel %vm5018_vm13, %v5019_v37, %v5015_v42  ;;  %v5115_v17 = vsel %vm16878_vm2, %v13628_v11, 2102212464  ;;  %v5147_v57 = vadd.s32 %v5146_v30, %v5136_v32  ;;  %v5162_v15 = vsel %vm5161_vm14, 1, %v16766_v33 }
 0x4ae   : > { %v16665_v44 = vshrl.u32 %v13481_v18, 16  ;;  %v5021_v12 = vadd.s32 %v5020_v27, %v5016_v28  ;;  %v5164_v20 = vadd.s32 %v5162_v15, %v5156_v53  ;;  %vm5165_vm8 = vc.u32 %v5163_v41, %v5159_v51 }
 0x4af   : > { %vm16879_vm7 = vcmp.lt.s32.totalorder %v16859_v8, 1  ;;  %v5138_v1 = vshrl.u32 %v13939_v43, 16  ;;  %v5166_v13 = vsel %vm5165_vm8, 1, %v16766_v33  ;;  %v16668_v3 = vand.u32 2147483647, %v16880_v61 }
 0x4b0   : > { %v5114_v50 = vsel %vm16879_vm7, %v5094_v52, %v13561_v46  ;;  %v5022_v36 = vadd.s32 536870912, %v5021_v12  ;;  %vm16881_vm11 = vcmp.lt.s32.totalorder %v16859_v8, 3  ;;  %v5158_v35 = vshrl.u32 %v5154_v22, 16 }
 0x4b1   : > { %v5116_v11 = vsel %vm16881_vm11, %v13573_v9, %v5115_v17  ;;  %v5168_v29 = vadd.s32 %v5166_v13, %v5164_v20  ;;  %v2152_v14 = vand.u32 65535, %v13917_v56  ;;  %v13990_v54 = vmul.u32 %v2153_v23, %v16882_v60 }
 0x4b2   : > { %v13992_v46 = vadd.s32 %v5147_v57, %v5138_v1  ;;  %v5160_v43 = vshrl.u32 %v5155_v16, 16  ;;  %v13994_v55 = vshrl.u32 %v5022_v36, 30  ;;  %v5564_v47 = vshrl.u32 %v16764_v10, %v16883_v34 }
 0x4b3   : > { %v5169_v59 = vadd.s32 %v5168_v29, %v5158_v35  ;;  %v5567_v9 = vshrl.u32 %v16754_v21, %v16883_v34  ;;  %v5117_v22 = vsel %vm16884_vm9, %v5114_v50, %v5116_v11  ;;  %v14002_v42 = vadd.s32 %v5163_v41, %v5159_v51  ;;  %v16887_v29 = vld [vmem:[#allocation23_spill] sm:$0xff] }
 0x4b4   : > { %v5550_v30 = vand.u32 8388607, %v16668_v3  ;;  %v5563_v16 = vshll.u32 %v16763_v38, %v16885_v5  ;;  %v5024_v19 = vshll.u32 %v13994_v55, 30  ;;  %v5566_v37 = vshll.u32 %v16764_v10, %v16885_v5 }
 0x4b5   : > { %v5170_v28 = vadd.s32 %v5169_v59, %v5160_v43  ;;  %v5570_v52 = vshrl.u32 %v16749_v0, %v16883_v34  ;;  %vm5173_vm3 = vc.u32 %v13992_v46, %v14002_v42  ;;  %v5569_v8 = vshll.u32 %v16754_v21, %v16885_v5  ;;  %v16888_v43 = vld [vmem:[#allocation65_spill] sm:$0xff] }
 0x4b6   : > { %v5572_v32 = vshll.u32 %v16749_v0, %v16885_v5  ;;  %v5573_v53 = vshrl.u32 %v16750_v45, %v16883_v34  ;;  %v5025_v51 = vsub.s32 %v5021_v12, %v5024_v19  ;;  %v14021_v27 = vor.u32 %v5564_v47, %v5563_v16 }
 0x4b7   : > { %v5174_v41 = vadd.s32 1, %v5170_v28  ;;  %v14023_v17 = vor.u32 %v5567_v9, %v5566_v37  ;;  %v16666_v57 = vshll.u32 %v13990_v54, 16  ;;  %v5171_v15 = vmul.u32 %v13858_v48, %v5117_v22 }
 0x4b8   : > { %v5551_v20 = vor.u32 8388608, %v5550_v30  ;;  %v5574_v50 = vor.u32 %v5573_v53, %v5572_v32  ;;  %vm5026_vm5 = vcmp.lt.s32.totalorder %v5025_v51, 0  ;;  %v5027_v1 = vsub.s32 0, %v5025_v51 }
 0x4b9   : > { %v5175_v13 = vsel %vm5173_vm3, %v5174_v41, %v5170_v28  ;;  %v5571_v36 = vor.u32 %v5570_v52, %v5569_v8  ;;  %v14028_v11 = vmul.u32 %v2152_v14, %v16882_v60  ;;  %v14033_v12 = vmul.u32 %v2174_v49, %v16882_v60 }
 0x4ba   : > { %v5176_v35 = vadd.s32 %v5175_v13, %v5171_v15  ;;  %vm5575_vm0 = vcmp.lt.s32.totalorder %v16887_v29, 1  ;;  %v14037_v59 = vmul.u32 %v2152_v14, %v16888_v43  ;;  %v5028_v48 = vsel %vm5026_vm5, %v5027_v1, %v5025_v51 }
 0x4bb   : > { %16886 = vst [vmem:[#allocation22_spill] sm:$0xff] %v14033_v12  ;;  %vm5578_vm4 = vcmp.lt.s32.totalorder %v16887_v29, 4  ;;  %v5587_v47 = vsel %vm5575_vm0, %v14021_v27, %v14023_v17  ;;  %v5029_v9 = vclz %v5028_v48  ;;  %vm5577_vm12 = vcmp.lt.s32.totalorder %v16887_v29, 3 }
 0x4bc   : > { %v5177_v22 = vadd.s32 536870912, %v5176_v35  ;;  %v5588_v30 = vsel %vm5578_vm4, %v5574_v50, 1326507024  ;;  %vm2162_vm15 = vc.u32 %v14028_v11, %v16666_v57  ;;  %vm5576_vm6 = vcmp.lt.s32.totalorder %v16887_v29, 2  ;;  %v16898_v57 = vld [vmem:[#allocation54_spill] sm:$0xff] }
 0x4bd   : > { %v5589_v14 = vsel %vm5577_vm12, %v5571_v36, %v5588_v30  ;;  %v14053_v16 = vshll.u32 %v5551_v20, 8  ;;  %v14058_v19 = vmul.u32 %v2153_v23, %v16888_v43  ;;  %v10527_v28 = vadd.s32 4294967294, %v5029_v9 }
 0x4be   : > { %v5178_v37 = vshrl.u32 %v5177_v22, 30  ;;  %v14062_v52 = vsel %vm5576_vm6, %v5587_v47, %v5589_v14  ;;  %v14068_v32 = vmul.u32 %v16665_v44, %v16882_v60  ;;  %v14073_v53 = vmul.u32 %v2174_v49, %v16888_v43 }
 0x4bf   : > { %v5595_v56 = vshrl.u32 %v14062_v52, 16  ;;  %v14077_v23 = vsel %vm2162_vm15, 1, %v16766_v33  ;;  %vm10528_vm1 = vcmp.lt.s32.totalorder %v10527_v28, 0  ;;  %v5561_v15 = vshrl.u32 %v16763_v38, %v16883_v34 }
 0x4c0   : > { %16889 = vst [vmem:[#allocation16_spill] sm:$0xff] %v14073_v53  ;;  %v5179_v41 = vshll.u32 %v5178_v37, 30  ;;  %v5032_v20 = vsel %vm10528_vm1, 0, %v10527_v28  ;;  %v5047_v50 = vsub.s32 4, %v13994_v55  ;;  %vm5080_vm13 = vcmp.lt.s32.totalorder %v16842_v25, 0 }
 0x4c1   : > { %v14084_v60 = vand.u32 65535, %v14053_v16  ;;  %v5017_v49 = vadd.s32 %v13952_v6, %v13954_v2  ;;  %v5033_v1 = vsub.s32 32, %v5032_v20  ;;  %v5037_v13 = vsub.s32 4294967266, %v5032_v20 }
 0x4c2   : > { %v5560_v48 = vshll.u32 %v16753_v7, %v16885_v5  ;;  %vm14092_vm14 = vcmp.le.f32.partialorder %v4923_v31, 0.7853982  ;;  %vm4925_vm2 = vcmp.lt.s32.totalorder %v16868_v63, 0  ;;  %v5180_v9 = vsub.s32 %v5176_v35, %v5179_v41 }
 0x4c3   : > { %v14098_v22 = vmul.u32 %v5595_v56, %v14084_v60  ;;  %v5034_v30 = vshll.u32 %v5025_v51, %v5032_v20  ;;  %v5035_v14 = vshrl.u32 %v5017_v49, %v5033_v1  ;;  %v5038_v6 = vadd.s32 127, %v5037_v13 }
 0x4c4   : > { %v16892_v2 = vand.u32 2147483647, %v16842_v25  ;;  %v5562_v5 = vor.u32 %v5561_v15, %v5560_v48  ;;  %v5048_v31 = vsel %vm4925_vm2, %v5047_v50, %v13994_v55  ;;  %vm5181_vm7 = vcmp.lt.s32.totalorder %v5180_v9, 0 }
 0x4c5   : > { %v5182_v26 = vsub.s32 0, %v5180_v9  ;;  %v5594_v35 = vand.u32 65535, %v14062_v52  ;;  %v5036_v41 = vor.u32 %v5035_v14, %v5034_v30  ;;  %v5039_v39 = vshll.u32 %v5038_v6, 23 }
 0x4c6   : > { %vm14102_vm8 = vcmp.le.f32.partialorder %v16892_v2, 0.7853982  ;;  %v5202_v51 = vsub.s32 4, %v5178_v37  ;;  %v5584_v20 = vsel %vm5578_vm4, %v5571_v36, 920167782  ;;  %v5559_v1 = vshrl.u32 %v16753_v7, %v16883_v34 }
 0x4c7   : > { %v5183_v49 = vsel %vm5181_vm7, %v5182_v26, %v5180_v9  ;;  %v14115_v15 = vshrl.u32 %v14053_v16, 16  ;;  %v5600_v13 = vshll.u32 %v14098_v22, 16  ;;  %v5040_v55 = vor.u32 4788187, %v5039_v39 }
 0x4c8   : > { %v14120_v50 = vsel %vm14092_vm14, 0, %v5048_v31  ;;  %v5184_v52 = vclz %v5183_v49  ;;  %v5580_v48 = vsel %vm5578_vm4, %v14023_v17, 2102212464  ;;  %v5583_v26 = vsel %vm5575_vm0, %v5562_v5, %v14021_v27 }
 0x4c9   : > { %16895 = vst [vmem:[#allocation29_spill] sm:$0xff] %v14120_v50  ;;  %v5585_v34 = vsel %vm5577_vm12, %v14023_v17, %v5584_v20  ;;  %v5596_v36 = vmul.u32 %v5594_v35, %v14084_v60  ;;  %v14133_v39 = vmul.u32 %v5594_v35, %v14115_v15  ;;  %v5041_v30 = vand.u32 2147483647, %v5040_v55 }
 0x4ca   : > { %v5043_v14 = vcvt.s32.f32 %v5036_v41  ;;  %v10530_v6 = vadd.s32 4294967294, %v5184_v52  ;;  %v5203_v2 = vsel %vm5080_vm13, %v5202_v51, %v5178_v37  ;;  %v5172_v31 = vadd.s32 %v14002_v42, %v13992_v46 }
 0x4cb   : > { %v5579_v49 = vsel %vm5575_vm0, %v5559_v1, %v5562_v5  ;;  %vm5604_vm11 = vc.u32 %v5596_v36, %v5600_v13  ;;  %v5606_v44 = vadd.s32 %v5600_v13, %v5596_v36  ;;  %v5581_v35 = vsel %vm5577_vm12, %v14021_v27, %v5580_v48 }
 0x4cc   : > { %v5044_v17 = vmul.f32 %v5043_v14, %v5041_v30  ;;  %vm10531_vm9 = vcmp.lt.s32.totalorder %v10530_v6, 0  ;;  %v5586_v41 = vsel %vm5576_vm6, %v5583_v26, %v5585_v34  ;;  %v5067_v20 = vadd.s32 3, %v14120_v50 }
 0x4cd   : > { %v5187_v37 = vsel %vm10531_vm9, 0, %v10530_v6  ;;  %v14149_v46 = vsel %vm14102_vm8, 0, %v5203_v2  ;;  %v5602_v42 = vshll.u32 %v14133_v39, 16  ;;  %v5605_v13 = vsel %vm5604_vm11, 1, %v16766_v33 }
 0x4ce   : > { %16896 = vst [vmem:[#allocation43_spill] sm:$0xff] %v14149_v46  ;;  %v5045_v5 = vxor.u32 2147483648, %v5044_v17  ;;  %v5188_v51 = vsub.s32 32, %v5187_v37  ;;  %v5192_v1 = vsub.s32 4294967266, %v5187_v37  ;;  %v5599_v55 = vmul.u32 %v5595_v56, %v14115_v15 }
 0x4cf   : > { %vm5608_vm3 = vc.u32 %v5606_v44, %v5602_v42  ;;  %v5616_v27 = vand.u32 65535, %v5586_v41  ;;  %v5617_v52 = vshrl.u32 %v5586_v41, 16  ;;  %v5189_v26 = vshll.u32 %v5180_v9, %v5187_v37 }
 0x4d0   : > { %v5046_v48 = vsel %vm4925_vm2, %v5045_v5, %v5044_v17  ;;  %v5190_v34 = vshrl.u32 %v5172_v31, %v5188_v51  ;;  %v5193_v36 = vadd.s32 127, %v5192_v1  ;;  %v14161_v14 = vand.u32 3, %v5067_v20  ;;  %v16897_v31 = vld [vmem:[#allocation37_spill] sm:$0xff] }
 0x4d1   : > { %v14159_v30 = vsel %vm14092_vm14, %v16868_v63, %v5046_v48  ;;  %v5222_v6 = vadd.s32 3, %v14149_v46  ;;  %v5607_v2 = vadd.s32 %v5605_v13, %v5599_v55  ;;  %v5609_v9 = vsel %vm5608_vm3, 1, %v16766_v33 }
 0x4d2   : > { %v14166_v44 = vmul.f32 %v14159_v30, %v14159_v30  ;;  %v5191_v56 = vor.u32 %v5190_v34, %v5189_v26  ;;  %v5194_v41 = vshll.u32 %v5193_v36, 23  ;;  %v16667_v17 = vand.u32 2147483647, %v16897_v31 }
 0x4d3   : > { %v5601_v37 = vshrl.u32 %v14098_v22, 16  ;;  %v14173_v20 = vmul.u32 %v5617_v52, %v14084_v60  ;;  %v14179_v1 = vsel %vm5576_vm6, %v5579_v49, %v5581_v35  ;;  %v14181_v13 = vand.u32 3, %v5222_v6  ;;  %v16899_v49 = vld [vmem:[#allocation62_spill] sm:$0xff] }
 0x4d4   : > { %v5052_v42 = vmul.f32 -0.001358992, %v14166_v44  ;;  %v5059_v5 = vmul.f32 -0.00019511016, %v14166_v44  ;;  %v5195_v51 = vor.u32 4788187, %v5194_v41  ;;  %v5611_v55 = vadd.s32 %v5609_v9, %v5607_v2 }
 0x4d5   : > { %v14184_v48 = vmul.u32 %v5616_v27, %v14084_v60  ;;  %v14187_v22 = vmul.u32 %v5616_v27, %v14115_v15  ;;  %v5198_v8 = vcvt.s32.f32 %v5191_v56  ;;  %v5395_v41 = vand.u32 8388607, %v16667_v17 }
 0x4d6   : > { %v5053_v26 = vadd.f32 0.041655596, %v5052_v42  ;;  %v5060_v34 = vadd.f32 0.008332121, %v5059_v5  ;;  %v5196_v36 = vand.u32 2147483647, %v5195_v51  ;;  %v5405_v29 = vshll.u32 %v16753_v7, %v16898_v57 }
 0x4d7   : > { %v5406_v35 = vshrl.u32 %v16763_v38, %v16899_v49  ;;  %v5622_v6 = vshll.u32 %v14173_v20, 16  ;;  %v5408_v27 = vshll.u32 %v16763_v38, %v16898_v57  ;;  %v5409_v2 = vshrl.u32 %v16764_v10, %v16899_v49 }
 0x4d8   : > { %v5199_v60 = vmul.f32 %v5198_v8, %v5196_v36  ;;  %v5412_v56 = vshrl.u32 %v16754_v21, %v16899_v49  ;;  %v5414_v9 = vshll.u32 %v16754_v21, %v16898_v57  ;;  %v5415_v42 = vshrl.u32 %v16749_v0, %v16899_v49 }
 0x4d9   : > { %v5417_v5 = vshll.u32 %v16749_v0, %v16898_v57  ;;  %v5418_v8 = vshrl.u32 %v16750_v45, %v16899_v49  ;;  %v5054_v51 = vmul.f32 %v5053_v26, %v14166_v44  ;;  %v5061_v36 = vmul.f32 %v5060_v34, %v14166_v44 }
 0x4da   : > { %v5200_v17 = vxor.u32 2147483648, %v5199_v60  ;;  %v5411_v3 = vshll.u32 %v16764_v10, %v16898_v57  ;;  %v5416_v47 = vor.u32 %v5415_v42, %v5414_v9  ;;  %v5621_v62 = vmul.u32 %v5617_v52, %v14115_v15 }
 0x4db   : > { %v5419_v24 = vor.u32 %v5418_v8, %v5417_v5  ;;  %v5407_v4 = vor.u32 %v5406_v35, %v5405_v29  ;;  %v5410_v46 = vor.u32 %v5409_v2, %v5408_v27  ;;  %v5396_v34 = vor.u32 8388608, %v5395_v41 }
 0x4dc   : > { %v5201_v50 = vsel %vm5080_vm13, %v5200_v17, %v5199_v60  ;;  %v5413_v45 = vor.u32 %v5412_v56, %v5411_v3  ;;  %v14223_v0 = vadd.s32 %v5611_v55, %v5601_v37  ;;  %vm14226_vm5 = vc.u32 %v14184_v48, %v5622_v6  ;;  %v16902_v3 = vld [vmem:[#allocation57_spill] sm:$0xff] }
 0x4dd   : > { %v14221_v26 = vsel %vm14102_vm8, %v16842_v25, %v5201_v50  ;;  %v5055_v15 = vadd.f32 -0.4999988, %v5054_v51  ;;  %v5062_v52 = vadd.f32 -0.16666654, %v5061_v36  ;;  %vm5423_vm0 = vcmp.lt.s32.totalorder %v16902_v3, 4 }
 0x4de   : > { %v14232_v17 = vmul.f32 %v14221_v26, %v14221_v26  ;;  %vm5420_vm4 = vcmp.lt.s32.totalorder %v16902_v3, 1  ;;  %vm5422_vm12 = vcmp.lt.s32.totalorder %v16902_v3, 3  ;;  %v5429_v28 = vsel %vm5423_vm0, %v5416_v47, 920167782 }
 0x4df   : > { %v5433_v50 = vsel %vm5423_vm0, %v5419_v24, 1326507024  ;;  %v5428_v41 = vsel %vm5420_vm4, %v5407_v4, %v5410_v46  ;;  %v5432_v29 = vsel %vm5420_vm4, %v5410_v46, %v5413_v45  ;;  %v5430_v35 = vsel %vm5422_vm12, %v5413_v45, %v5429_v28 }
 0x4e0   : > { %v5207_v37 = vmul.f32 -0.001358992, %v14232_v17  ;;  %v5214_v55 = vmul.f32 -0.00019511016, %v14232_v17  ;;  %v5434_v60 = vsel %vm5422_vm12, %v5416_v47, %v5433_v50  ;;  %v14251_v27 = vshll.u32 %v5396_v34, 8 }
 0x4e1   : > { %vm5421_vm15 = vcmp.lt.s32.totalorder %v16902_v3, 2  ;;  %v5056_v42 = vmul.f32 %v5055_v15, %v14166_v44  ;;  %v5627_v47 = vsel %vm14226_vm5, 1, %v16766_v33  ;;  %v5063_v51 = vmul.f32 %v5062_v52, %v14166_v44 }
 0x4e2   : > { %v5208_v2 = vadd.f32 0.041655596, %v5207_v37  ;;  %v5215_v56 = vadd.f32 0.008332121, %v5214_v55  ;;  %v5431_v5 = vsel %vm5421_vm15, %v5428_v41, %v5430_v35  ;;  %v5435_v8 = vsel %vm5421_vm15, %v5432_v29, %v5434_v60 }
 0x4e3   : > { %v5437_v34 = vand.u32 65535, %v14251_v27  ;;  %v5439_v28 = vand.u32 65535, %v5435_v8  ;;  %v5438_v50 = vshrl.u32 %v14251_v27, 16  ;;  %v5440_v15 = vshrl.u32 %v5435_v8, 16 }
 0x4e4   : > { %v5216_v36 = vmul.f32 %v5215_v56, %v14232_v17  ;;  %v5461_v37 = vand.u32 65535, %v5431_v5  ;;  %v5462_v55 = vshrl.u32 %v5431_v5, 16  ;;  %v5209_v41 = vmul.f32 %v5208_v2, %v14232_v17 }
 0x4e5   : > { %v5404_v29 = vshrl.u32 %v16753_v7, %v16899_v49  ;;  %v5628_v57 = vadd.s32 %v5622_v6, %v14184_v48  ;;  %v5425_v44 = vsel %vm5423_vm0, %v5413_v45, 2102212464  ;;  %v5442_v52 = vmul.u32 %v5440_v15, %v5437_v34 }
 0x4e6   : > { %v5217_v35 = vadd.f32 -0.16666654, %v5216_v36  ;;  %v5443_v60 = vmul.u32 %v5439_v28, %v5438_v50  ;;  %v5629_v56 = vadd.s32 %v5627_v47, %v5621_v62  ;;  %v5464_v5 = vmul.u32 %v5462_v55, %v5437_v34 }
 0x4e7   : > { %v5424_v8 = vsel %vm5420_vm4, %v5404_v29, %v5407_v4  ;;  %v5465_v40 = vmul.u32 %v5461_v37, %v5438_v50  ;;  %v14277_v2 = vadd.f32 1.0, %v5056_v42  ;;  %v5064_v36 = vadd.f32 1.0, %v5063_v51 }
 0x4e8   : > { %v5218_v9 = vmul.f32 %v5217_v35, %v14232_v17  ;;  %v5441_v24 = vmul.u32 %v5439_v28, %v5437_v34  ;;  %v5445_v49 = vshll.u32 %v5442_v52, 16  ;;  %v5210_v58 = vadd.f32 -0.4999988, %v5209_v41 }
 0x4e9   : > { %16903 = vst [vmem:[#allocation19_spill] sm:$0xff] %v14277_v2  ;;  %v5426_v48 = vsel %vm5422_vm12, %v5410_v46, %v5425_v44  ;;  %v5444_v45 = vmul.u32 %v5440_v15, %v5438_v50  ;;  %v5467_v6 = vshll.u32 %v5464_v5, 16  ;;  %v5447_v12 = vshll.u32 %v5443_v60, 16 }
 0x4ea   : > { %vm5449_vm6 = vc.u32 %v5441_v24, %v5445_v49  ;;  %v5451_v62 = vadd.s32 %v5445_v49, %v5441_v24  ;;  %v5463_v47 = vmul.u32 %v5461_v37, %v5437_v34  ;;  %v5219_v35 = vadd.f32 1.0, %v5218_v9 }
 0x4eb   : > { %v5450_v4 = vsel %vm5449_vm6, 1, %v16766_v33  ;;  %v5466_v29 = vmul.u32 %v5462_v55, %v5438_v50  ;;  %v5469_v53 = vshll.u32 %v5465_v40, 16  ;;  %v14283_v28 = vmul.f32 %v5064_v36, %v14159_v30 }
 0x4ec   : > { %v5452_v42 = vadd.s32 %v5450_v4, %v5444_v45  ;;  %vm5453_vm1 = vc.u32 %v5451_v62, %v5447_v12  ;;  %vm5471_vm13 = vc.u32 %v5463_v47, %v5467_v6  ;;  %v5473_v51 = vadd.s32 %v5467_v6, %v5463_v47  ;;  %v14305_v62 = vld [vmem:[#allocation2 + $0x38] sm:$0xff] }
 0x4ed   : > { %16904 = vst [vmem:[#allocation40_spill] sm:$0xff] %v14283_v28  ;;  %v5454_v46 = vsel %vm5453_vm1, 1, %v16766_v33  ;;  %v5472_v15 = vsel %vm5471_vm13, 1, %v16766_v33  ;;  %v16905_v41 = vshll.u32 %v14187_v22, 16  ;;  %v5446_v24 = vshrl.u32 %v5442_v52, 16 }
 0x4ee   : > { %v5456_v9 = vadd.s32 %v5454_v46, %v5452_v42  ;;  %v5474_v34 = vadd.s32 %v5472_v15, %v5466_v29  ;;  %vm5475_vm2 = vc.u32 %v5473_v51, %v5469_v53  ;;  %v5211_v50 = vmul.f32 %v5210_v58, %v14232_v17  ;;  %v16911_v15 = vld [vmem:[#allocation15_spill] sm:$0xff] }
 0x4ef   : > { %vm5630_vm14 = vc.u32 %v5628_v57, %v16905_v41  ;;  %v5448_v37 = vshrl.u32 %v5443_v60, 16  ;;  %v5468_v12 = vshrl.u32 %v5464_v5, 16  ;;  %v5476_v55 = vsel %vm5475_vm2, 1, %v16766_v33 }
 0x4f0   : > { %v14292_v30 = vmul.f32 %v5219_v35, %v14221_v26  ;;  %v5457_v44 = vadd.s32 %v5456_v9, %v5446_v24  ;;  %v5478_v36 = vadd.s32 %v5476_v55, %v5474_v34  ;;  %v5631_v49 = vsel %vm5630_vm14, 1, %v16766_v33 }
 0x4f1   : > { %v16681_v45 = vxor.u32 2147483648, %v14277_v2  ;;  %v5427_v52 = vsel %vm5421_vm15, %v5424_v8, %v5426_v48  ;;  %v16906_v6 = vshrl.u32 %v14133_v39, 16  ;;  %v5633_v17 = vadd.s32 %v5631_v49, %v5629_v56 }
 0x4f2   : > { %v14303_v60 = vadd.s32 %v5457_v44, %v5448_v37  ;;  %v5470_v5 = vshrl.u32 %v5465_v40, 16  ;;  %v5479_v26 = vadd.s32 %v5478_v36, %v5468_v12  ;;  %v16685_v47 = vand.u32 2147483647, %v14305_v62 }
 0x4f3   : > { %v14301_v58 = vadd.s32 %v14223_v0, %v16906_v6  ;;  %v16682_v35 = vxor.u32 2147483648, %v14283_v28  ;;  %v14309_v4 = vadd.s32 %v5473_v51, %v5469_v53  ;;  %v16907_v3 = vmov %v16905_v41  ;;  %v16910_v51 = vld [vmem:[#allocation20_spill] sm:$0xff]  ;;  %v16913_v6 = vld [vmem:[#allocation35_spill] sm:$0xff] }
 0x4f4   : > { %v14313_v8 = vadd.s32 %v5628_v57, %v16907_v3  ;;  %v16908_v0 = vshrl.u32 %v14173_v20, 16  ;;  %vm5070_vm8 = vcmp.eq.s32.totalorder %v14161_v14, 0  ;;  %v14318_v56 = vadd.f32 1.0, %v5211_v50 }
 0x4f5   : > { %v16684_v40 = vxor.u32 2147483648, %v14292_v30  ;;  %v5480_v48 = vadd.s32 %v5479_v26, %v5470_v5  ;;  %v5481_v29 = vmul.u32 %v14251_v27, %v5427_v52  ;;  %vm5483_vm7 = vc.u32 %v14303_v60, %v14309_v4 }
 0x4f6   : > { %v5634_v39 = vadd.s32 %v5633_v17, %v16908_v0  ;;  %v16909_v53 = vshrl.u32 %v14187_v22, 16  ;;  %vm5638_vm11 = vc.u32 %v14301_v58, %v14313_v8  ;;  %v2263_v20 = vand.u32 8388607, %v16685_v47  ;;  %v16914_v17 = vld [vmem:[#allocation30_spill] sm:$0xff] }
 0x4f7   : > { %v5484_v57 = vadd.s32 1, %v5480_v48  ;;  %v2274_v46 = vshrl.u32 %v16763_v38, %v16910_v51  ;;  %v2276_v41 = vshll.u32 %v16763_v38, %v16911_v15  ;;  %v2277_v27 = vshrl.u32 %v16764_v10, %v16910_v51 }
 0x4f8   : > { %v5635_v42 = vadd.s32 %v5634_v39, %v16909_v53  ;;  %vm5069_vm9 = vcmp.lt.s32.totalorder %v14161_v14, 2  ;;  %v5636_v22 = vmul.u32 %v14053_v16, %v14179_v1  ;;  %v2279_v9 = vshll.u32 %v16764_v10, %v16911_v15  ;;  %v16912_v1 = vld [vmem:[#allocation26_spill] sm:$0xff] }
 0x4f9   : > { %v2280_v34 = vshrl.u32 %v16754_v21, %v16910_v51  ;;  %v5485_v50 = vsel %vm5483_vm7, %v5484_v57, %v5480_v48  ;;  %v2264_v37 = vor.u32 8388608, %v2263_v20  ;;  %v2273_v12 = vshll.u32 %v16753_v7, %v16911_v15 }
 0x4fa   : > { %v5639_v24 = vadd.s32 1, %v5635_v42  ;;  %v14345_v55 = vor.u32 %v2277_v27, %v2276_v41  ;;  %v5486_v44 = vadd.s32 %v5485_v50, %v5481_v29  ;;  %vm2290_vm3 = vcmp.lt.s32.totalorder %v16912_v1, 3 }
 0x4fb   : > { %v14350_v16 = vor.u32 %v2280_v34, %v2279_v9  ;;  %v14353_v52 = vor.u32 %v2274_v46, %v2273_v12  ;;  %vm2288_vm5 = vcmp.lt.s32.totalorder %v16912_v1, 1  ;;  %v2302_v5 = vsel %vm2290_vm3, %v16914_v17, %v16913_v6 }
 0x4fc   : > { %v5640_v36 = vsel %vm5638_vm11, %v5639_v24, %v5635_v42  ;;  %vm5073_vm0 = vcmp.eq.s32.totalorder %v14161_v14, 2  ;;  %v5487_v26 = vadd.s32 536870912, %v5486_v44  ;;  %vm2289_vm4 = vcmp.lt.s32.totalorder %v16912_v1, 2 }
 0x4fd   : > { %v5641_v49 = vadd.s32 %v5640_v36, %v5636_v22  ;;  %v2300_v3 = vsel %vm2288_vm5, %v14345_v55, %v14350_v16  ;;  %v5075_v0 = vsel %vm5073_vm0, %v16681_v45, %v14283_v28  ;;  %vm16708_vm12 = vweird.f32 %v16842_v25  ;;  %v16915_v22 = vld [vmem:[#allocation34_spill] sm:$0xff] }
 0x4fe   : > { %vm5225_vm15 = vcmp.eq.s32.totalorder %v14181_v13, 0  ;;  %v2303_v48 = vsel %vm2289_vm4, %v2300_v3, %v2302_v5  ;;  %v5072_v29 = vsel %vm5070_vm8, %v14277_v2, %v16682_v35  ;;  %v16683_v53 = vxor.u32 2147483648, %v14318_v56 }
 0x4ff   : > { %v5642_v39 = vadd.s32 536870912, %v5641_v49  ;;  %v14379_v42 = vshrl.u32 %v5487_v26, 30  ;;  %v14381_v20 = vshll.u32 %v2264_v37, 8  ;;  %v5227_v57 = vsel %vm5225_vm15, %v14318_v56, %v16684_v40 }
 0x500   : > { %v2296_v15 = vsel %vm2288_vm5, %v14353_v52, %v14345_v55  ;;  %v2308_v41 = vshrl.u32 %v2303_v48, 16  ;;  %v2298_v24 = vsel %vm2290_vm3, %v14350_v16, %v16915_v22  ;;  %v2307_v34 = vand.u32 65535, %v2303_v48 }
 0x501   : > { %v5643_v46 = vshrl.u32 %v5642_v39, 30  ;;  %v5489_v27 = vshll.u32 %v14379_v42, 30  ;;  %v14396_v9 = vand.u32 65535, %v14381_v20  ;;  %vm16706_vm6 = vweird.f32 %v16868_v63 }
 0x502   : > { %v5076_v50 = vsel %vm5069_vm9, %v5072_v29, %v5075_v0  ;;  %vm5228_vm1 = vcmp.eq.s32.totalorder %v14181_v13, 2  ;;  %vm5224_vm13 = vcmp.lt.s32.totalorder %v14181_v13, 2  ;;  %vm5545_vm14 = vcmp.lt.s32.totalorder %v16880_v61, 0  ;;  %v11401_v0 = vld [vmem:[%s16522_s12 + $0x378] sm:$0xff] }
 0x503   : > { %v5644_v37 = vshll.u32 %v5643_v46, 30  ;;  %v5230_v12 = vsel %vm5228_vm1, %v16683_v53, %v14292_v30  ;;  %v14406_v36 = vsub.s32 %v5486_v44, %v5489_v27  ;;  %v14410_v6 = vmul.u32 %v2308_v41, %v14396_v9  ;;  %10058 = vmatpush.bf16.msra.mxu3 %v11401_v0 }
 0x504   : > { %v5231_v17 = vsel %vm5224_vm13, %v5227_v57, %v5230_v12  ;;  %v2299_v14 = vsel %vm2289_vm4, %v2296_v15, %v2298_v24  ;;  %v2306_v26 = vshrl.u32 %v14381_v20, 16  ;;  %v14419_v13 = vsel %vm16706_vm6, nan, %v5076_v50 }
 0x505   : > { %v14412_v5 = vsub.s32 %v5641_v49, %v5644_v37  ;;  %vm5390_vm2 = vcmp.lt.s32.totalorder %v16897_v31, 0  ;;  %vm5491_vm8 = vcmp.lt.s32.totalorder %v14406_v36, 0  ;;  %v5492_v44 = vsub.s32 0, %v14406_v36 }
 0x506   : > { %v2309_v3 = vmul.u32 %v2307_v34, %v14396_v9  ;;  %v16916_v49 = vand.u32 2147483647, %v16880_v61  ;;  %v14433_v48 = vmul.u32 %v2307_v34, %v2306_v26  ;;  %v2313_v29 = vshll.u32 %v14410_v6, 16 }
 0x507   : > { %vm5646_vm11 = vcmp.lt.s32.totalorder %v14412_v5, 0  ;;  %v5647_v39 = vsub.s32 0, %v14412_v5  ;;  %v14438_v57 = vsel %vm16708_vm12, nan, %v5231_v17  ;;  %v5493_v15 = vsel %vm5491_vm8, %v5492_v44, %v14406_v36 }
 0x508   : > { %vm14427_vm7 = vcmp.le.f32.partialorder %v16916_v49, 0.7853982  ;;  %v5637_v27 = vadd.s32 %v14313_v8, %v14301_v58  ;;  %v2330_v22 = vshrl.u32 %v2299_v14, 16  ;;  %v5494_v24 = vclz %v5493_v15 }
 0x509   : > { %v5648_v50 = vsel %vm5646_vm11, %v5647_v39, %v14412_v5  ;;  %v5667_v37 = vsub.s32 4, %v5643_v46  ;;  %vm2317_vm9 = vc.u32 %v2309_v3, %v2313_v29  ;;  %v5482_v34 = vadd.s32 %v14309_v4, %v14303_v60 }
 0x50a   : > { %v5649_v12 = vclz %v5648_v50  ;;  %v2272_v49 = vshrl.u32 %v16753_v7, %v16910_v51  ;;  %v2319_v17 = vadd.s32 %v2313_v29, %v2309_v3  ;;  %v10536_v45 = vadd.s32 4294967294, %v5494_v24 }
 0x50b   : > { %v5512_v44 = vsub.s32 4, %v14379_v42  ;;  %vm16919_vm0 = vcmp.lt.s32.totalorder %v16912_v1, 4  ;;  %v2315_v8 = vshll.u32 %v14433_v48, 16  ;;  %v2318_v15 = vsel %vm2317_vm9, 1, %v16766_v33 }
 0x50c   : > { %v2293_v58 = vsel %vm16919_vm0, %v14350_v16, 2102212464  ;;  %v10539_v39 = vadd.s32 4294967294, %v5649_v12  ;;  %v2329_v35 = vand.u32 65535, %v2299_v14  ;;  %v14455_v60 = vmul.u32 %v2330_v22, %v14396_v9 }
 0x50d   : > { %vm10537_vm15 = vcmp.lt.s32.totalorder %v10536_v45, 0  ;;  %v5668_v4 = vsel %vm5545_vm14, %v5667_v37, %v5643_v46  ;;  %v2312_v51 = vmul.u32 %v2308_v41, %v2306_v26  ;;  %vm2321_vm1 = vc.u32 %v2319_v17, %v2315_v8 }
 0x50e   : > { %v5497_v3 = vsel %vm10537_vm15, 0, %v10536_v45  ;;  %vm10540_vm13 = vcmp.lt.s32.totalorder %v10539_v39, 0  ;;  %v2292_v16 = vsel %vm2288_vm5, %v2272_v49, %v14353_v52  ;;  %v2294_v29 = vsel %vm2290_vm3, %v14345_v55, %v2293_v58 }
 0x50f   : > { %v16920_v14 = vand.u32 2147483647, %v16897_v31  ;;  %v5498_v50 = vsub.s32 32, %v5497_v3  ;;  %v5502_v46 = vsub.s32 4294967266, %v5497_v3  ;;  %v5513_v45 = vsel %vm5390_vm2, %v5512_v44, %v14379_v42 }
 0x510   : > { %v2320_v41 = vadd.s32 %v2318_v15, %v2312_v51  ;;  %v5652_v37 = vsel %vm10540_vm13, 0, %v10539_v39  ;;  %v14476_v52 = vsel %vm14427_vm7, 0, %v5668_v4  ;;  %v2322_v55 = vsel %vm2321_vm1, 1, %v16766_v33 }
 0x511   : > { %vm14467_vm8 = vcmp.le.f32.partialorder %v16920_v14, 0.7853982  ;;  %v2335_v12 = vshll.u32 %v14455_v60, 16  ;;  %v5499_v49 = vshll.u32 %v14406_v36, %v5497_v3  ;;  %v5500_v17 = vshrl.u32 %v5482_v34, %v5498_v50 }
 0x512   : > { %v5503_v58 = vadd.s32 127, %v5502_v46  ;;  %v2333_v8 = vmul.u32 %v2329_v35, %v2306_v26  ;;  %v5653_v14 = vsub.s32 32, %v5652_v37  ;;  %v5657_v53 = vsub.s32 4294967266, %v5652_v37 }
 0x513   : > { %v2314_v40 = vshrl.u32 %v14410_v6, 16  ;;  %v2331_v42 = vmul.u32 %v2329_v35, %v14396_v9  ;;  %v5501_v44 = vor.u32 %v5500_v17, %v5499_v49  ;;  %v2324_v15 = vadd.s32 %v2322_v55, %v2320_v41 }
 0x514   : > { %v5504_v39 = vshll.u32 %v5503_v58, 23  ;;  %v2334_v4 = vmul.u32 %v2330_v22, %v2306_v26  ;;  %v5654_v51 = vshll.u32 %v14412_v5, %v5652_v37  ;;  %v5655_v47 = vshrl.u32 %v5637_v27, %v5653_v14 }
 0x515   : > { %v5658_v63 = vadd.s32 127, %v5657_v53  ;;  %vm2339_vm3 = vc.u32 %v2331_v42, %v2335_v12  ;;  %v2337_v36 = vshll.u32 %v2333_v8, 16  ;;  %v2341_v3 = vadd.s32 %v2335_v12, %v2331_v42 }
 0x516   : > { %v5505_v2 = vor.u32 4788187, %v5504_v39  ;;  %v2340_v34 = vsel %vm2339_vm3, 1, %v16766_v33  ;;  %v5656_v50 = vor.u32 %v5655_v47, %v5654_v51  ;;  %v6783_v6 = vpack.c.bf16 %v14438_v57, %v14419_v13  ;;  %v16925_v51 = vld [vmem:[#allocation31_spill] sm:$0xff] }
 0x517   : > { %v5659_v46 = vshll.u32 %v5658_v63, 23  ;;  %v2342_v35 = vadd.s32 %v2340_v34, %v2334_v4  ;;  %v5508_v49 = vcvt.s32.f32 %v5501_v44  ;;  %v14489_v26 = vsel %vm2289_vm4, %v2292_v16, %v2294_v29  ;;  %v14499_v29 = vld [vmem:[#allocation2 + $0x50] sm:$0xff] }
 0x518   : > { %v5506_v9 = vand.u32 2147483647, %v5505_v2  ;;  %vm2343_vm5 = vc.u32 %v2341_v3, %v2337_v36  ;;  %v14493_v53 = vsel %vm14467_vm8, 0, %v5513_v45  ;;  %6791 = vst [vmem:[#allocation3 + $0x24] sm:$0xff] %v6783_v6  ;;  %v2325_v27 = vadd.s32 %v2324_v15, %v2314_v40 }
 0x519   : > { %16923 = vst [vmem:[#allocation49_spill] sm:$0xff] %v14493_v53  ;;  %v5660_v5 = vor.u32 4788187, %v5659_v46  ;;  %v2344_v63 = vsel %vm2343_vm5, 1, %v16766_v33  ;;  %v5687_v13 = vadd.s32 3, %v14476_v52  ;;  %v2336_v2 = vshrl.u32 %v14455_v60, 16 }
 0x51a   : > { %v5509_v47 = vmul.f32 %v5508_v49, %v5506_v9  ;;  %v2346_v57 = vadd.s32 %v2344_v63, %v2342_v35  ;;  %v5663_v1 = vcvt.s32.f32 %v5656_v50  ;;  %v2316_v16 = vshrl.u32 %v14433_v48, 16 }
 0x51b   : > { %v5661_v22 = vand.u32 2147483647, %v5660_v5  ;;  %v16693_v45 = vand.u32 2147483647, %v14499_v29  ;;  %v5532_v37 = vadd.s32 3, %v14493_v53  ;;  %v2338_v40 = vshrl.u32 %v2333_v8, 16 }
 0x51c   : > { %v5510_v41 = vxor.u32 2147483648, %v5509_v47  ;;  %v2347_v55 = vadd.s32 %v2346_v57, %v2336_v2  ;;  %v16924_v12 = vshll.u32 %v13990_v54, 16  ;;  %v14508_v60 = vadd.s32 %v14077_v23, %v14058_v19 }
 0x51d   : > { %v5664_v58 = vmul.f32 %v5663_v1, %v5661_v22  ;;  %v14510_v14 = vadd.s32 %v2325_v27, %v2316_v16  ;;  %v14514_v42 = vand.u32 3, %v5687_v13  ;;  %v2349_v8 = vmul.u32 %v14381_v20, %v14489_v26  ;;  %v16927_v27 = vld [vmem:[#allocation33_spill] sm:$0xff]  ;;  %v11352_v13 = vld [vmem:[%s16522_s12 + $0x1f0] sm:$0xff] }
 0x51e   : > { %v2164_v17 = vadd.s32 %v16924_v12, %v14028_v11  ;;  %v5511_v48 = vsel %vm5390_vm2, %v5510_v41, %v5509_v47  ;;  %v2348_v44 = vadd.s32 %v2347_v55, %v2338_v40  ;;  %v14523_v19 = vadd.s32 %v2341_v3, %v2337_v36  ;;  %v16926_v3 = vld [vmem:[#allocation27_spill] sm:$0xff]  ;;  %v11360_v16 = vld [vmem:[%s16522_s12 + $0x230] sm:$0xff]  ;;  %9945 = vmatpush.bf16.msra.mxu2 %v11352_v13 }
 0x51f   : > { %v14521_v11 = vsel %vm14467_vm8, %v16897_v31, %v5511_v48  ;;  %v5665_v39 = vxor.u32 2147483648, %v5664_v58  ;;  %v14527_v23 = vand.u32 8388607, %v16693_v45  ;;  %v14531_v4 = vand.u32 3, %v5532_v37  ;;  %v11376_v41 = vld [vmem:[%s16522_s12 + $0x2b0] sm:$0xff]  ;;  %v11351_v48 = vld [vmem:[%s16522_s12 + $0x1e8] sm:$0xff]  ;;  %9964 = vmatpush.bf16.msrb.mxu1 %v11360_v16 }
 0x520   : > { %v5516_v15 = vmul.f32 %v14521_v11, %v14521_v11  ;;  %v2739_v20 = vshrl.u32 %v16763_v38, %v16925_v51  ;;  %v2742_v24 = vshrl.u32 %v16764_v10, %v16925_v51  ;;  %vm2351_vm4 = vc.u32 %v14510_v14, %v14523_v19  ;;  %10002 = vmatpush.bf16.msrb.mxu0 %v11376_v41  ;;  %v11399_v13 = vld [vmem:[%s16522_s12 + $0x368] sm:$0xff]  ;;  %v11264_v45 = vld [vmem:[#allocation3 + $0x24] sm:$0xf] }
 0x521   : > { %v5666_v34 = vsel %vm5545_vm14, %v5665_v39, %v5664_v58  ;;  %v2352_v36 = vadd.s32 1, %v2348_v44  ;;  %v2738_v50 = vshll.u32 %v16753_v7, %v16926_v3  ;;  %v2741_v9 = vshll.u32 %v16763_v38, %v16926_v3  ;;  %v11400_v58 = vld [vmem:[%s16522_s12 + $0x370] sm:$0xff] }
 0x522   : > { %v5517_v46 = vmul.f32 -0.001358992, %v5516_v15  ;;  %v5524_v6 = vmul.f32 -0.00019511016, %v5516_v15  ;;  %v14546_v35 = vsel %vm14427_vm7, %v16880_v61, %v5666_v34  ;;  %v2729_v26 = vor.u32 8388608, %v14527_v23  ;;  %10059 = vmatpush.bf16.msra.mxu3 %v11400_v58  ;;  %9946 = vmatpush.bf16.msra.mxu2 %v11351_v48  ;;  %v16934_v48 = vld [vmem:[#allocation16_spill] sm:$0xff] }
 0x523   : > { %v14552_v49 = vmul.f32 %v14546_v35, %v14546_v35  ;;  %v2745_v5 = vshrl.u32 %v16754_v21, %v16925_v51  ;;  %vm2753_vm14 = vcmp.lt.s32.totalorder %v16927_v27, 1  ;;  %v14564_v2 = vor.u32 %v2739_v20, %v2738_v50  ;;  %v16935_v20 = vld [vmem:[#allocation44_spill] sm:$0xff] }
 0x524   : > { %v5518_v63 = vadd.f32 0.041655596, %v5517_v46  ;;  %v5525_v47 = vadd.f32 0.008332121, %v5524_v6  ;;  %v14566_v57 = vor.u32 %v2742_v24, %v2741_v9  ;;  %v2353_v37 = vsel %vm2351_vm4, %v2352_v36, %v2348_v44 }
 0x525   : > { %v5672_v22 = vmul.f32 -0.001358992, %v14552_v49  ;;  %v5679_v1 = vmul.f32 -0.00019511016, %v14552_v49  ;;  %v2744_v40 = vshll.u32 %v16764_v10, %v16926_v3  ;;  %v16928_v39 = vshll.u32 %v14037_v59, 16  ;;  %v11359_v3 = vld [vmem:[%s16522_s12 + $0x228] sm:$0xff] }
 0x526   : > { %v5519_v55 = vmul.f32 %v5518_v63, %v5516_v15  ;;  %v5526_v12 = vmul.f32 %v5525_v47, %v5516_v15  ;;  %vm2755_vm7 = vcmp.lt.s32.totalorder %v16927_v27, 3  ;;  %v16931_v44 = vshrl.u32 %v13481_v18, 16  ;;  %9965 = vmatpush.bf16.msrb.mxu1 %v11359_v3  ;;  %10060 = vmatpush.bf16.msra.mxu3 %v11399_v13 }
 0x527   : > { %vm14589_vm2 = vc.u32 %v2164_v17, %v16928_v39  ;;  %v5673_v34 = vadd.f32 0.041655596, %v5672_v22  ;;  %v5680_v36 = vadd.f32 0.008332121, %v5679_v1  ;;  %v11375_v17 = vld [vmem:[%s16522_s12 + $0x2a8] sm:$0xff]  ;;  %v14603_v50 = vor.u32 %v2745_v5, %v2744_v40  ;;  %v16932_v40 = vld [vmem:[#allocation41_spill] sm:$0xff] }
 0x528   : > { %v2179_v24 = vmul.u32 %v16931_v44, %v16888_v43  ;;  %v5520_v46 = vadd.f32 -0.4999988, %v5519_v55  ;;  %v5527_v6 = vadd.f32 -0.16666654, %v5526_v12  ;;  %v14605_v9 = vadd.s32 %v2353_v37, %v2349_v8  ;;  %10003 = vmatpush.bf16.msrb.mxu0 %v11375_v17  ;;  %v11374_v37 = vld [vmem:[%s16522_s12 + $0x2a0] sm:$0xff]  ;;  %v16936_v44 = vld [vmem:[#allocation36_spill] sm:$0xff] }
 0x529   : > { %v14611_v18 = vsel %vm2753_vm14, %v14564_v2, %v14566_v57  ;;  %vm5535_vm11 = vcmp.eq.s32.totalorder %v14531_v4, 0  ;;  %vm5538_vm9 = vcmp.eq.s32.totalorder %v14531_v4, 2  ;;  %v5674_v43 = vmul.f32 %v5673_v34, %v14552_v49  ;;  %v16937_v17 = vld [vmem:[#allocation22_spill] sm:$0xff] }
 0x52a   : > { %v5681_v63 = vmul.f32 %v5680_v36, %v14552_v49  ;;  %v2159_v5 = vshrl.u32 %v13990_v54, 16  ;;  %v2167_v8 = vsel %vm14589_vm2, 1, %v16766_v33  ;;  %vm2754_vm0 = vcmp.lt.s32.totalorder %v16927_v27, 2  ;;  %v11350_v54 = vld [vmem:[%s16522_s12 + $0x1e0] sm:$0xff] }
 0x52b   : > { %v5521_v47 = vmul.f32 %v5520_v46, %v5516_v15  ;;  %v5528_v0 = vmul.f32 %v5527_v6, %v5516_v15  ;;  %vm5534_vm15 = vcmp.lt.s32.totalorder %v14531_v4, 2  ;;  %v2169_v22 = vadd.s32 %v2167_v8, %v14508_v60  ;;  %v11358_v15 = vld [vmem:[%s16522_s12 + $0x220] sm:$0xff]  ;;  %9947 = vmatpush.bf16.msra.mxu2 %v11350_v54 }
 0x52c   : > { %v2180_v1 = vshll.u32 %v14068_v32, 16  ;;  %v5675_v16 = vadd.f32 -0.4999988, %v5674_v43  ;;  %v5682_v41 = vadd.f32 -0.16666654, %v5681_v63  ;;  %vm5693_vm1 = vcmp.eq.s32.totalorder %v14514_v42, 2  ;;  %9966 = vmatpush.bf16.msrb.mxu1 %v11358_v15  ;;  %10004 = vmatpush.bf16.msrb.mxu0 %v11374_v37 }
 0x52d   : > { %v14642_v60 = vsel %vm2755_vm7, %v14603_v50, %v16932_v40  ;;  %v2765_v55 = vsel %vm2753_vm14, %v14566_v57, %v14603_v50  ;;  %v14648_v12 = vadd.f32 1.0, %v5521_v47  ;;  %v5529_v58 = vadd.f32 1.0, %v5528_v0  ;;  %v11398_v63 = vld [vmem:[%s16522_s12 + $0x360] sm:$0xff] }
 0x52e   : > { %vm16705_vm13 = vweird.f32 %v16897_v31  ;;  %vm5690_vm8 = vcmp.eq.s32.totalorder %v14514_v42, 0  ;;  %v2182_v39 = vshll.u32 %v16934_v48, 16  ;;  %v2767_v34 = vsel %vm2755_vm7, %v16936_v44, %v16935_v20  ;;  %10061 = vmatpush.bf16.msra.mxu3 %v11398_v63 }
 0x52f   : > { %16933 = vst [vmem:[#allocation53_spill] sm:$0xff] %v14648_v12  ;;  %v5676_v36 = vmul.f32 %v5675_v16, %v14552_v49  ;;  %v5683_v3 = vmul.f32 %v5682_v41, %v14552_v49  ;;  %vm5689_vm3 = vcmp.lt.s32.totalorder %v14514_v42, 2  ;;  %vm2184_vm5 = vc.u32 %v16937_v17, %v2180_v1 }
 0x530   : > { %v2186_v46 = vadd.s32 %v2180_v1, %v16937_v17  ;;  %v14663_v6 = vmul.f32 %v5529_v58, %v14521_v11  ;;  %v16689_v43 = vxor.u32 2147483648, %v14648_v12  ;;  %v2170_v8 = vadd.s32 %v2169_v22, %v2159_v5 }
 0x531   : > { %v2185_v49 = vsel %vm2184_vm5, 1, %v16766_v33  ;;  %v14670_v47 = vadd.f32 1.0, %v5676_v36  ;;  %v5684_v0 = vadd.f32 1.0, %v5683_v3  ;;  %v2161_v16 = vshrl.u32 %v14037_v59, 16 }
 0x532   : > { %16938 = vst [vmem:[#allocation45_spill] sm:$0xff] %v14663_v6  ;;  %v2187_v1 = vadd.s32 %v2185_v49, %v2179_v24  ;;  %vm2188_vm4 = vc.u32 %v2186_v46, %v2182_v39  ;;  %v16690_v11 = vxor.u32 2147483648, %v14663_v6  ;;  %v2181_v13 = vshrl.u32 %v14068_v32, 16  ;;  %v16939_v49 = vld [vmem:[#allocation39_spill] sm:$0xff] }
 0x533   : > { %v2189_v54 = vsel %vm2188_vm4, 1, %v16766_v33  ;;  %v14677_v41 = vmul.f32 %v5684_v0, %v14546_v35  ;;  %v16691_v5 = vxor.u32 2147483648, %v14670_v47  ;;  %v2355_v40 = vadd.s32 536870912, %v14605_v9  ;;  %v16940_v0 = vld [vmem:[#allocation55_spill] sm:$0xff] }
 0x534   : > { %v2191_v22 = vadd.s32 %v2189_v54, %v2187_v1  ;;  %v5537_v24 = vsel %vm5535_vm11, %v14648_v12, %v16690_v11  ;;  %v5540_v59 = vsel %vm5538_vm9, %v16689_v43, %v14663_v6  ;;  %v14691_v32 = vadd.s32 %v2170_v8, %v2161_v16  ;;  %v16941_v54 = vld [vmem:[#allocation46_spill] sm:$0xff] }
 0x535   : > { %v2768_v35 = vsel %vm2754_vm0, %v2765_v55, %v2767_v34  ;;  %v5541_v15 = vsel %vm5534_vm15, %v5537_v24, %v5540_v59  ;;  %v16692_v37 = vxor.u32 2147483648, %v14677_v41  ;;  %v2183_v58 = vshrl.u32 %v16934_v48, 16 }
 0x536   : > { %v2192_v20 = vadd.s32 %v2191_v22, %v2181_v13  ;;  %v5695_v44 = vsel %vm5693_vm1, %v16691_v5, %v14677_v41  ;;  %v14704_v36 = vadd.s32 %v2186_v46, %v2182_v39  ;;  %v14706_v3 = vshrl.u32 %v2355_v40, 30  ;;  %v16942_v22 = vld [vmem:[#allocation50_spill] sm:$0xff] }
 0x537   : > { %v14710_v55 = vshll.u32 %v2729_v26, 8  ;;  %v5542_v4 = vsel %vm16705_vm13, nan, %v5541_v15  ;;  %v5692_v48 = vsel %vm5690_vm8, %v14670_v47, %v16692_v37  ;;  %v2773_v17 = vshrl.u32 %v2768_v35, 16  ;;  %v16952_v37 = vld [vmem:[#allocation61_spill] sm:$0xff] }
 0x538   : > { %v2193_v34 = vadd.s32 %v2192_v20, %v2183_v58  ;;  %vm16707_vm2 = vweird.f32 %v16880_v61  ;;  %v5696_v39 = vsel %vm5689_vm3, %v5692_v48, %v5695_v44  ;;  %vm2196_vm11 = vc.u32 %v14691_v32, %v14704_v36  ;;  %v16944_v58 = vld [vmem:[#allocation48_spill] sm:$0xff]  ;;  %v16946_v20 = vld [vmem:[#allocation59_spill] sm:$0xff] }
 0x539   : > { %v2357_v23 = vshll.u32 %v14706_v3, 30  ;;  %v5697_v26 = vsel %vm16707_vm2, nan, %v5696_v39  ;;  %v2770_v63 = vand.u32 65535, %v14710_v55  ;;  %v2772_v8 = vand.u32 65535, %v2768_v35  ;;  %v16947_v39 = vld [vmem:[#allocation52_spill] sm:$0xff] }
 0x53a   : > { %v2197_v46 = vadd.s32 1, %v2193_v34  ;;  %v2194_v1 = vmul.u32 %v16940_v0, %v16939_v49  ;;  %v6785_v16 = vpack.c.bf16 %v5697_v26, %v5542_v4  ;;  %v14737_v42 = vsel %vm2754_vm0, %v14611_v18, %v14642_v60 }
 0x53b   : > { %v14731_v13 = vsub.s32 %v14605_v9, %v2357_v23  ;;  %v16943_v40 = vshrl.u32 %v16942_v22, 16  ;;  %v14745_v35 = vshrl.u32 %v14710_v55, 16  ;;  %v14747_v15 = vmul.u32 %v2773_v17, %v2770_v63 }
 0x53c   : > { %v2198_v59 = vsel %vm2196_vm11, %v2197_v46, %v2193_v34  ;;  %v16945_v9 = vshll.u32 %v16944_v58, 16  ;;  %6793 = vst [vmem:[#allocation3 + $0x60] sm:$0xff] %v6785_v16  ;;  %v2774_v60 = vmul.u32 %v2772_v8, %v2770_v63  ;;  %v2795_v34 = vshrl.u32 %v14737_v42, 16 }
 0x53d   : > { %v14742_v24 = vmul.u32 %v16943_v40, %v16941_v54  ;;  %v2199_v44 = vadd.s32 %v2198_v59, %v2194_v1  ;;  %vm2359_vm15 = vcmp.lt.s32.totalorder %v14731_v13, 0  ;;  %v2360_v18 = vsub.s32 0, %v14731_v13 }
 0x53e   : > { %vm2627_vm9 = vc.u32 %v16946_v20, %v16945_v9  ;;  %v14755_v4 = vmul.u32 %v2772_v8, %v14745_v35  ;;  %v2778_v48 = vshll.u32 %v14747_v15, 16  ;;  %v16948_v23 = vand.u32 65535, %v16942_v22 }
 0x53f   : > { %v16949_v46 = vmov %v16943_v40  ;;  %v2200_v0 = vadd.s32 536870912, %v2199_v44  ;;  %v2361_v1 = vsel %vm2359_vm15, %v2360_v18, %v14731_v13  ;;  %v2628_v8 = vsel %vm2627_vm9, 1, %v16766_v33  ;;  %v14772_v40 = vld [vmem:[#allocation2 + $0x30] sm:$0xff] }
 0x540   : > { %v14762_v26 = vmul.u32 %v16948_v23, %v16947_v39  ;;  %v14767_v49 = vmul.u32 %v16949_v46, %v16947_v39  ;;  %v2362_v16 = vclz %v2361_v1  ;;  %vm2782_vm1 = vc.u32 %v2774_v60, %v2778_v48  ;;  %v16950_v1 = vld [vmem:[#allocation60_spill] sm:$0xff] }
 0x541   : > { %v2794_v54 = vand.u32 65535, %v14737_v42  ;;  %v14775_v59 = vmul.f32 2.0, %v14772_v40  ;;  %v14777_v9 = vshrl.u32 %v2200_v0, 30  ;;  %v2777_v22 = vmul.u32 %v2773_v17, %v14745_v35 }
 0x542   : > { %v2780_v39 = vshll.u32 %v14755_v4, 16  ;;  %v10476_v23 = vadd.s32 4294967294, %v2362_v16  ;;  %v2783_v18 = vsel %vm2782_vm1, 1, %v16766_v33  ;;  %v2784_v46 = vadd.s32 %v2778_v48, %v2774_v60 }
 0x543   : > { %v14782_v43 = vmul.u32 %v2795_v34, %v2770_v63  ;;  %v16951_v42 = vshll.u32 %v16944_v58, 16  ;;  %v14791_v0 = vadd.s32 %v2628_v8, %v16952_v37  ;;  %v2202_v17 = vshll.u32 %v14777_v9, 30  ;;  %v10634_v31 = vld [vmem:[#allocation3 + $0x5c] sm:$0xf0] }
 0x544   : > { %vm10477_vm8 = vcmp.lt.s32.totalorder %v10476_v23, 0  ;;  %v2785_v16 = vadd.s32 %v2783_v18, %v2777_v22  ;;  %vm2786_vm3 = vc.u32 %v2784_v46, %v2780_v39  ;;  %v14795_v60 = vmul.u32 %v2794_v54, %v14745_v35 }
 0x545   : > { %v14788_v5 = vadd.s32 %v16951_v42, %v16946_v20  ;;  %v10637_v48 = vor.u32 %v11264_v45, %v10634_v31  ;;  %v2203_v11 = vsub.s32 %v2199_v44, %v2202_v17  ;;  %v2365_v12 = vsel %vm10477_vm8, 0, %v10476_v23 }
 0x546   : > { %v2800_v6 = vshll.u32 %v14782_v43, 16  ;;  %v5856_v20 = vand.u32 2139095040, %v14775_v59  ;;  %v2350_v37 = vadd.s32 %v14523_v19, %v14510_v14  ;;  %v2366_v8 = vsub.s32 32, %v2365_v12 }
 0x547   : > { %v2370_v42 = vsub.s32 4294967266, %v2365_v12  ;;  %9990 = vmatmul.bf16.vlgmr.msrb.gmra.mxu3 %v10637_v48  ;;  %vm2204_vm5 = vcmp.lt.s32.totalorder %v2203_v11, 0  ;;  %v2205_v28 = vsub.s32 0, %v2203_v11  ;;  %v2787_v22 = vsel %vm2786_vm3, 1, %v16766_v33 }
 0x548   : > { %v2796_v39 = vmul.u32 %v2794_v54, %v2770_v63  ;;  %v2367_v18 = vshll.u32 %v14731_v13, %v2365_v12  ;;  %v2368_v31 = vshrl.u32 %v2350_v37, %v2366_v8  ;;  %v2789_v44 = vadd.s32 %v2787_v22, %v2785_v16 }
 0x549   : > { %v2371_v45 = vadd.s32 127, %v2370_v42  ;;  %v2206_v23 = vsel %vm2204_vm5, %v2205_v28, %v2203_v11  ;;  %v2802_v46 = vshll.u32 %v14795_v60, 16  ;;  %v14804_v53 = vshrl.u32 %v5856_v20, 23 }
 0x54a   : > { %vm2804_vm4 = vc.u32 %v2796_v39, %v2800_v6  ;;  %v2806_v17 = vadd.s32 %v2800_v6, %v2796_v39  ;;  %v2207_v14 = vclz %v2206_v23  ;;  %v2779_v48 = vshrl.u32 %v14747_v15, 16 }
 0x54b   : > { %v2372_v19 = vshll.u32 %v2371_v45, 23  ;;  %v2369_v61 = vor.u32 %v2368_v31, %v2367_v18  ;;  %v2799_v25 = vmul.u32 %v2795_v34, %v14745_v35  ;;  %v2805_v63 = vsel %vm2804_vm4, 1, %v16766_v33 }
 0x54c   : > { %vm2808_vm11 = vc.u32 %v2806_v17, %v2802_v46  ;;  %v10473_v12 = vadd.s32 4294967294, %v2207_v14  ;;  %vm2258_vm9 = vcmp.lt.s32.totalorder %v14305_v62, 0  ;;  %v2737_v13 = vshrl.u32 %v16753_v7, %v16925_v51 }
 0x54d   : > { %v2373_v28 = vor.u32 4788187, %v2372_v19  ;;  %vm16953_vm15 = vcmp.lt.s32.totalorder %v16927_v27, 4  ;;  %v2790_v54 = vadd.s32 %v2789_v44, %v2779_v48  ;;  %v2807_v16 = vadd.s32 %v2805_v63, %v2799_v25  ;;  %v16958_v27 = vld [vmem:[#allocation38_spill] sm:$0xff] }
 0x54e   : > { %v2758_v6 = vsel %vm16953_vm15, %v14603_v50, 2102212464  ;;  %v2809_v15 = vsel %vm2808_vm11, 1, %v16766_v33  ;;  %vm10474_vm1 = vcmp.lt.s32.totalorder %v10473_v12, 0  ;;  %v2757_v34 = vsel %vm2753_vm14, %v2737_v13, %v14564_v2  ;;  %v16963_v2 = vld [vmem:[#allocation58_spill] sm:$0xff] }
 0x54f   : > { %v2374_v35 = vand.u32 2147483647, %v2373_v28  ;;  %v2781_v20 = vshrl.u32 %v14755_v4, 16  ;;  %v2210_v37 = vsel %vm10474_vm1, 0, %v10473_v12  ;;  %v2376_v8 = vcvt.s32.f32 %v2369_v61 }
 0x550   : > { %v2801_v51 = vshrl.u32 %v14782_v43, 16  ;;  %v2811_v42 = vadd.s32 %v2809_v15, %v2807_v16  ;;  %v2195_v50 = vadd.s32 %v14704_v36, %v14691_v32  ;;  %v2211_v22 = vsub.s32 32, %v2210_v37 }
 0x551   : > { %v2215_v25 = vsub.s32 4294967266, %v2210_v37  ;;  %v2759_v39 = vsel %vm2755_vm7, %v14566_v57, %v2758_v6  ;;  %v16954_v18 = vand.u32 2147483647, %v14305_v62  ;;  %v2377_v4 = vmul.f32 %v2376_v8, %v2374_v35 }
 0x552   : > { %v14832_v61 = vadd.s32 %v2790_v54, %v2781_v20  ;;  %v2812_v43 = vadd.s32 %v2811_v42, %v2801_v51  ;;  %v2212_v31 = vshll.u32 %v2203_v11, %v2210_v37  ;;  %v2213_v45 = vshrl.u32 %v2195_v50, %v2211_v22  ;;  %v16962_v37 = vld [vmem:[#allocation64_spill] sm:$0xff] }
 0x553   : > { %vm14828_vm8 = vcmp.le.f32.partialorder %v16954_v18, 0.7853982  ;;  %v2216_v44 = vadd.s32 127, %v2215_v25  ;;  %v2803_v32 = vshrl.u32 %v14795_v60, 16  ;;  %v2378_v36 = vxor.u32 2147483648, %v2377_v4 }
 0x554   : > { %v2380_v23 = vsub.s32 4, %v14706_v3  ;;  %v2760_v57 = vsel %vm2754_vm0, %v2757_v34, %v2759_v39  ;;  %v14838_v14 = vadd.s32 %v2806_v17, %v2802_v46  ;;  %vm2103_vm14 = vcmp.lt.s32.totalorder %v14772_v40, 0 }
 0x555   : > { %v2214_v19 = vor.u32 %v2213_v45, %v2212_v31  ;;  %v2217_v48 = vshll.u32 %v2216_v44, 23  ;;  %v2225_v63 = vsub.s32 4, %v14777_v9  ;;  %v2813_v12 = vadd.s32 %v2812_v43, %v2803_v32 }
 0x556   : > { %v2379_v11 = vsel %vm2258_vm9, %v2378_v36, %v2377_v4  ;;  %v16957_v60 = vshll.u32 %v16950_v1, 16  ;;  %v2645_v28 = vshll.u32 %v14742_v24, 16  ;;  %vm2816_vm0 = vc.u32 %v14832_v61, %v14838_v14 }
 0x557   : > { %v16959_v46 = vand.u32 2147483647, %v16958_v27  ;;  %v2218_v13 = vor.u32 4788187, %v2217_v48  ;;  %v14859_v6 = vsel %vm14828_vm8, %v14305_v62, %v2379_v11  ;;  %v2624_v54 = vshrl.u32 %v16944_v58, 16 }
 0x558   : > { %vm2631_vm7 = vc.u32 %v14788_v5, %v16957_v60  ;;  %v2221_v16 = vcvt.s32.f32 %v2214_v19  ;;  %v14865_v15 = vmul.f32 %v14859_v6, %v14859_v6  ;;  %v2647_v34 = vshll.u32 %v14762_v26, 16 }
 0x559   : > { %vm14852_vm3 = vcmp.le.f32.partialorder %v16959_v46, 0.7853982  ;;  %v2632_v5 = vsel %vm2631_vm7, 1, %v16766_v33  ;;  %v2219_v20 = vand.u32 2147483647, %v2218_v13  ;;  %vm2649_vm5 = vc.u32 %v16962_v37, %v2645_v28 }
 0x55a   : > { %v2634_v35 = vadd.s32 %v2632_v5, %v14791_v0  ;;  %v2651_v8 = vadd.s32 %v2645_v28, %v16962_v37  ;;  %v2817_v51 = vadd.s32 1, %v2813_v12  ;;  %v2385_v42 = vmul.f32 -0.001358992, %v14865_v15 }
 0x55b   : > { %v2392_v58 = vmul.f32 -0.00019511016, %v14865_v15  ;;  %v2650_v22 = vsel %vm2649_vm5, 1, %v16766_v33  ;;  %v2222_v25 = vmul.f32 %v2221_v16, %v2219_v20  ;;  %v2381_v0 = vsel %vm2258_vm9, %v2380_v23, %v14706_v3 }
 0x55c   : > { %v2635_v50 = vadd.s32 %v2634_v35, %v2624_v54  ;;  %v2652_v39 = vadd.s32 %v2650_v22, %v14767_v49  ;;  %vm2653_vm4 = vc.u32 %v2651_v8, %v2647_v34  ;;  %v2626_v4 = vshrl.u32 %v16950_v1, 16  ;;  %v16964_v35 = vld [vmem:[#allocation42_spill] sm:$0xff] }
 0x55d   : > { %v2393_v18 = vadd.f32 0.008332121, %v2392_v58  ;;  %v2654_v43 = vsel %vm2653_vm4, 1, %v16766_v33  ;;  %v2814_v31 = vmul.u32 %v14710_v55, %v2760_v57  ;;  %v2223_v45 = vxor.u32 2147483648, %v2222_v25 }
 0x55e   : > { %v2646_v44 = vshrl.u32 %v14742_v24, 16  ;;  %v2656_v32 = vadd.s32 %v2654_v43, %v2652_v39  ;;  %v2818_v36 = vsel %vm2816_vm0, %v2817_v51, %v2813_v12  ;;  %v2226_v3 = vsel %vm2103_vm14, %v2225_v63, %v14777_v9 }
 0x55f   : > { %v2386_v49 = vadd.f32 0.041655596, %v2385_v42  ;;  %v2394_v23 = vmul.f32 %v2393_v18, %v14865_v15  ;;  %v14889_v1 = vadd.s32 %v2635_v50, %v2626_v4  ;;  %v2224_v55 = vsel %vm2103_vm14, %v2223_v45, %v2222_v25 }
 0x560   : > { %v2648_v57 = vshrl.u32 %v14762_v26, 16  ;;  %v2657_v24 = vadd.s32 %v2656_v32, %v2646_v44  ;;  %v2819_v19 = vadd.s32 %v2818_v36, %v2814_v31  ;;  %v10544_v48 = vadd.s32 4294967169, %v14804_v53 }
 0x561   : > { %v2227_v12 = vsel %vm14852_vm3, %v14772_v40, %v2224_v55  ;;  %v2395_v11 = vadd.f32 -0.16666654, %v2394_v23  ;;  %v14898_v9 = vadd.s32 %v2651_v8, %v2647_v34  ;;  %v2383_v60 = vsel %vm14828_vm8, 0, %v2381_v0 }
 0x562   : > { %v2229_v63 = vmul.f32 %v2227_v12, %v2227_v12  ;;  %v2658_v28 = vadd.s32 %v2657_v24, %v2648_v57  ;;  %v2820_v27 = vadd.s32 536870912, %v2819_v19  ;;  %v14904_v26 = vsel %vm14852_vm3, 0, %v2226_v3 }
 0x563   : > { %v2387_v46 = vmul.f32 %v2386_v49, %v14865_v15  ;;  %vm2661_vm11 = vc.u32 %v14889_v1, %v14898_v9  ;;  %v14910_v53 = vmul.f32 2.0, %v14305_v62  ;;  %v2659_v34 = vmul.u32 %v16964_v35, %v16963_v2 }
 0x564   : > { %v2230_v13 = vmul.f32 -0.001358992, %v2229_v63  ;;  %v2237_v54 = vmul.f32 -0.00019511016, %v2229_v63  ;;  %v2662_v5 = vadd.s32 1, %v2658_v28  ;;  %v14912_v16 = vshrl.u32 %v2820_v27, 30 }
 0x565   : > { %v5863_v20 = vadd.s32 1, %v10544_v48  ;;  %v2396_v17 = vmul.f32 %v2395_v11, %v14865_v15  ;;  %v2400_v37 = vadd.s32 3, %v2383_v60  ;;  %v2245_v62 = vadd.s32 3, %v14904_v26 }
 0x566   : > { %v2231_v8 = vadd.f32 0.041655596, %v2230_v13  ;;  %v2238_v51 = vadd.f32 0.008332121, %v2237_v54  ;;  %v2663_v42 = vsel %vm2661_vm11, %v2662_v5, %v2658_v28  ;;  %v2822_v58 = vshll.u32 %v14912_v16, 30 }
 0x567   : > { %v2388_v50 = vadd.f32 -0.4999988, %v2387_v46  ;;  %v2664_v22 = vadd.s32 %v2663_v42, %v2659_v34  ;;  %v6011_v18 = vand.u32 2139095040, %v14910_v53  ;;  %vm5864_vm9 = vcmp.gt.s32.totalorder %v5863_v20, 0 }
 0x568   : > { %v2232_v25 = vmul.f32 %v2231_v8, %v2229_v63  ;;  %v2239_v0 = vmul.f32 %v2238_v51, %v2229_v63  ;;  %v14919_v39 = vsub.s32 %v2819_v19, %v2822_v58  ;;  %v2397_v4 = vadd.f32 1.0, %v2396_v17  ;;  %v16968_v51 = vld [vmem:[#allocation28_spill] sm:$0xff] }
 0x569   : > { %v14922_v43 = vand.u32 3, %v2400_v37  ;;  %v2665_v31 = vadd.s32 536870912, %v2664_v22  ;;  %v14926_v36 = vand.u32 3, %v2245_v62  ;;  %v2389_v3 = vmul.f32 %v2388_v50, %v14865_v15 }
 0x56a   : > { %v2233_v45 = vadd.f32 -0.4999988, %v2232_v25  ;;  %v2240_v44 = vadd.f32 -0.16666654, %v2239_v0  ;;  %vm2824_vm15 = vcmp.lt.s32.totalorder %v14919_v39, 0  ;;  %v2825_v32 = vsub.s32 0, %v14919_v39 }
 0x56b   : > { %v14929_v49 = vshrl.u32 %v2665_v31, 30  ;;  %v6012_v24 = vshrl.u32 %v6011_v18, 23  ;;  %v14932_v19 = vsel %vm5864_vm9, %v5863_v20, 0  ;;  %vm2723_vm1 = vcmp.lt.s32.totalorder %v14499_v29, 0  ;;  %v14981_v25 = vld [vmem:[#allocation2 + $0x38] sm:$0xff] }
 0x56c   : > { %v2234_v23 = vmul.f32 %v2233_v45, %v2229_v63  ;;  %v2241_v55 = vmul.f32 %v2240_v44, %v2229_v63  ;;  %v2826_v57 = vsel %vm2824_vm15, %v2825_v32, %v14919_v39  ;;  %v14937_v27 = vmul.f32 %v2397_v4, %v14859_v6  ;;  %v14951_v6 = vld [vmem:[#allocation2 + $0x48] sm:$0xff] }
 0x56d   : > { %v2667_v48 = vshll.u32 %v14929_v49, 30  ;;  %v2827_v11 = vclz %v2826_v57  ;;  %vm2403_vm8 = vcmp.eq.s32.totalorder %v14922_v43, 0  ;;  %v2815_v15 = vadd.s32 %v14838_v14, %v14832_v61 }
 0x56e   : > { %v2242_v28 = vadd.f32 1.0, %v2241_v55  ;;  %v14942_v63 = vand.u32 3, %v2383_v60  ;;  %v14944_v46 = vadd.f32 1.0, %v2234_v23  ;;  %vm2247_vm14 = vcmp.lt.s32.totalorder %v14926_v36, 2 }
 0x56f   : > { %vm2248_vm7 = vcmp.eq.s32.totalorder %v14926_v36, 0  ;;  %vm2406_vm0 = vcmp.eq.s32.totalorder %v14922_v43, 2  ;;  %v14949_v13 = vsub.s32 %v2664_v22, %v2667_v48  ;;  %v10485_v54 = vadd.s32 4294967294, %v2827_v11 }
 0x570   : > { %vm2568_vm3 = vcmp.lt.s32.totalorder %v14951_v6, 0  ;;  %v14954_v5 = vmul.f32 %v2242_v28, %v2227_v12  ;;  %vm2251_vm5 = vcmp.eq.s32.totalorder %v14926_v36, 2  ;;  %v14957_v61 = vadd.f32 1.0, %v2389_v3 }
 0x571   : > { %v10547_v14 = vadd.s32 4294967169, %v6012_v24  ;;  %vm2402_vm4 = vcmp.lt.s32.totalorder %v14922_v43, 2  ;;  %vm2669_vm11 = vcmp.lt.s32.totalorder %v14949_v13, 0  ;;  %v2670_v60 = vsub.s32 0, %v14949_v13 }
 0x572   : > { %v16965_v2 = vand.u32 2147483647, %v14499_v29  ;;  %vm10486_vm15 = vcmp.lt.s32.totalorder %v10485_v54, 0  ;;  %v6008_v12 = vand.u32 2147483647, %v14910_v53  ;;  %vm2244_vm10 = vweird.f32 %v14772_v40 }
 0x573   : > { %v2249_v34 = vxor.u32 2147483648, %v14954_v5  ;;  %v2404_v20 = vxor.u32 2147483648, %v14937_v27  ;;  %v2830_v17 = vsel %vm10486_vm15, 0, %v10485_v54  ;;  %v2845_v37 = vsub.s32 4, %v14912_v16 }
 0x574   : > { %vm14964_vm9 = vcmp.le.f32.partialorder %v16965_v2, 0.7853982  ;;  %v2252_v8 = vxor.u32 2147483648, %v14944_v46  ;;  %v16969_v42 = vand.u32 2147483647, %v16968_v51  ;;  %v2671_v62 = vsel %vm2669_vm11, %v2670_v60, %v14949_v13 }
 0x575   : > { %v2831_v50 = vsub.s32 32, %v2830_v17  ;;  %v2835_v22 = vsub.s32 4294967266, %v2830_v17  ;;  %vm2399_vm6 = vweird.f32 %v14981_v25  ;;  %v2407_v0 = vxor.u32 2147483648, %v14957_v61 }
 0x576   : > { %vm14976_vm13 = vcmp.le.f32.partialorder %v16969_v42, 0.7853982  ;;  %v2672_v18 = vclz %v2671_v62  ;;  %v2690_v4 = vsub.s32 4, %v14929_v49  ;;  %vm4271_vm15 = vcmp.eq.s32.totalorder %v14942_v63, 0 }
 0x577   : > { %v6018_v31 = vadd.s32 1, %v10547_v14  ;;  %v2250_v45 = vsel %vm2248_vm7, %v14944_v46, %v2249_v34  ;;  %v2832_v44 = vshll.u32 %v14919_v39, %v2830_v17  ;;  %v2833_v32 = vshrl.u32 %v2815_v15, %v2831_v50 }
 0x578   : > { %v2836_v3 = vadd.s32 127, %v2835_v22  ;;  %v2660_v23 = vadd.s32 %v14898_v9, %v14889_v1  ;;  %v10482_v55 = vadd.s32 4294967294, %v2672_v18  ;;  %v2846_v57 = vsel %vm2723_vm1, %v2845_v37, %v14912_v16 }
 0x579   : > { %vm4274_vm11 = vcmp.eq.s32.totalorder %v14942_v63, 2  ;;  %v15001_v24 = vand.u32 8388607, %v6008_v12  ;;  %v2253_v39 = vsel %vm2251_vm5, %v2252_v8, %v14954_v5  ;;  %v2405_v1 = vsel %vm2403_vm8, %v14957_v61, %v2404_v20 }
 0x57a   : > { %v2834_v9 = vor.u32 %v2833_v32, %v2832_v44  ;;  %v2837_v48 = vshll.u32 %v2836_v3, 23  ;;  %v2254_v16 = vsel %vm2247_vm14, %v2250_v45, %v2253_v39  ;;  %v2408_v11 = vsel %vm2406_vm0, %v2407_v0, %v14937_v27 }
 0x57b   : > { %vm10483_vm7 = vcmp.lt.s32.totalorder %v10482_v55, 0  ;;  %vm6019_vm2 = vcmp.gt.s32.totalorder %v6018_v31, 0  ;;  %v2691_v15 = vsel %vm2568_vm3, %v2690_v4, %v14929_v49  ;;  %v2409_v60 = vsel %vm2402_vm4, %v2405_v1, %v2408_v11 }
 0x57c   : > { %v2675_v28 = vsel %vm10483_vm7, 0, %v10482_v55  ;;  %v2838_v54 = vor.u32 4788187, %v2837_v48  ;;  %v6020_v14 = vsel %vm6019_vm2, %v6018_v31, 0  ;;  %v2848_v36 = vsel %vm14964_vm9, 0, %v2846_v57 }
 0x57d   : > { %v2676_v2 = vsub.s32 32, %v2675_v28  ;;  %v2680_v17 = vsub.s32 4294967266, %v2675_v28  ;;  %v2255_v37 = vsel %vm2244_vm10, nan, %v2254_v16  ;;  %v2841_v42 = vcvt.s32.f32 %v2834_v9 }
 0x57e   : > { %v2839_v51 = vand.u32 2147483647, %v2838_v54  ;;  %v6022_v62 = vand.u32 31, %v6020_v14  ;;  %v2677_v50 = vshll.u32 %v14949_v13, %v2675_v28  ;;  %v15028_v18 = vsel %vm14976_vm13, 0, %v2691_v15 }
 0x57f   : > { %v2678_v22 = vshrl.u32 %v2660_v23, %v2676_v2  ;;  %v2681_v49 = vadd.s32 127, %v2680_v17  ;;  %v2410_v43 = vsel %vm2399_vm6, nan, %v2409_v60  ;;  %v2865_v31 = vadd.s32 3, %v2848_v36 }
 0x580   : > { %v2842_v4 = vmul.f32 %v2841_v42, %v2839_v51  ;;  %v4273_v45 = vsel %vm4271_vm15, %v14957_v61, %v2404_v20  ;;  %v3035_v3 = vpack.c.bf16 %v2410_v43, %v2255_v37  ;;  %v15035_v55 = vsub.s32 32, %v6022_v62 }
 0x581   : > { %v2679_v44 = vor.u32 %v2678_v22, %v2677_v50  ;;  %v2682_v32 = vshll.u32 %v2681_v49, 23  ;;  %v2710_v13 = vadd.s32 3, %v15028_v18  ;;  %vm4270_vm2 = vcmp.lt.s32.totalorder %v14942_v63, 2 }
 0x582   : > { %v2843_v23 = vxor.u32 2147483648, %v2842_v4  ;;  %v4276_v57 = vsel %vm4274_vm11, %v2407_v0, %v14937_v27  ;;  %v15043_v39 = vshrl.u32 %v14932_v19, 5  ;;  %v15046_v1 = vand.u32 31, %v14932_v19  ;;  %3043 = vst [vmem:[#allocation3 + $0x84] sm:$0xff] %v3035_v3 }
 0x583   : > { %v2683_v61 = vor.u32 4788187, %v2682_v32  ;;  %v4277_v20 = vsel %vm4270_vm2, %v4273_v45, %v4276_v57  ;;  %v15050_v48 = vand.u32 3, %v2865_v31  ;;  %v15052_v16 = vand.u32 3, %v2848_v36 }
 0x584   : > { %v2844_v9 = vsel %vm2723_vm1, %v2843_v23, %v2842_v4  ;;  %v6016_v11 = vor.u32 8388608, %v15001_v24  ;;  %v2686_v27 = vcvt.s32.f32 %v2679_v44  ;;  %v16972_v19 = vmov 920167782  }
 0x585   : > { %v2684_v63 = vand.u32 2147483647, %v2683_v61  ;;  %v15058_v0 = vsel %vm14964_vm9, %v14499_v29, %v2844_v9  ;;  %v6035_v28 = vshrl.u32 %v16972_v19, %v15035_v55  ;;  %v15062_v15 = vand.u32 3, %v2710_v13 }
 0x586   : > { %v2849_v54 = vmul.f32 %v15058_v0, %v15058_v0  ;;  %v15068_v60 = vsel %vm2399_vm6, nan, %v4277_v20  ;;  %v16973_v24 = vmov 1326507024   ;;  %v6026_v35 = vshrl.u32 %v16763_v38, %v15035_v55 }
 0x587   : > { %v6038_v2 = vshrl.u32 %v16973_v24, %v15035_v55  ;;  %v2687_v17 = vmul.f32 %v2686_v27, %v2684_v63  ;;  %v6029_v36 = vshrl.u32 %v16764_v10, %v15035_v55  ;;  %v6034_v37 = vshll.u32 %v16754_v21, %v6022_v62 }
 0x588   : > { %v2850_v51 = vmul.f32 -0.001358992, %v2849_v54  ;;  %v2857_v42 = vmul.f32 -0.00019511016, %v2849_v54  ;;  %v15077_v50 = vshrl.u32 %v6020_v14, 5  ;;  %v6037_v25 = vshll.u32 %v16972_v19, %v6022_v62 }
 0x589   : > { %v2688_v22 = vxor.u32 2147483648, %v2687_v17  ;;  %v6025_v49 = vshll.u32 %v16753_v7, %v6022_v62  ;;  %v6028_v43 = vshll.u32 %v16763_v38, %v6022_v62  ;;  %v15082_v4 = vor.u32 %v6035_v28, %v6034_v37 }
 0x58a   : > { %v2851_v31 = vadd.f32 0.041655596, %v2850_v51  ;;  %v2858_v45 = vadd.f32 0.008332121, %v2857_v42  ;;  %v6032_v44 = vshrl.u32 %v16754_v21, %v15035_v55  ;;  %v6039_v32 = vor.u32 %v6038_v2, %v6037_v25  ;;  %v11349_v51 = vld [vmem:[%s16522_s12 + $0x1d8] sm:$0xff] }
 0x58b   : > { %v2689_v3 = vsel %vm2568_vm3, %v2688_v22, %v2687_v17  ;;  %v15088_v14 = vor.u32 %v6026_v35, %v6025_v49  ;;  %v15090_v13 = vor.u32 %v6029_v36, %v6028_v43  ;;  %v6031_v23 = vshll.u32 %v16764_v10, %v6022_v62  ;;  %v11373_v42 = vld [vmem:[%s16522_s12 + $0x298] sm:$0xff]  ;;  %9948 = vmatpush.bf16.msra.mxu2 %v11349_v51 }
 0x58c   : > { %v15096_v57 = vsel %vm14976_vm13, %v14951_v6, %v2689_v3  ;;  %v2852_v61 = vmul.f32 %v2851_v31, %v2849_v54  ;;  %v2859_v20 = vmul.f32 %v2858_v45, %v2849_v54  ;;  %vm6043_vm6 = vcmp.lt.s32.totalorder %v15077_v50, 4  ;;  %10005 = vmatpush.bf16.msrb.mxu0 %v11373_v42 }
 0x58d   : > { %v2694_v9 = vmul.f32 %v15096_v57, %v15096_v57  ;;  %vm6040_vm1 = vcmp.lt.s32.totalorder %v15077_v50, 1  ;;  %v6049_v63 = vsel %vm6043_vm6, %v15082_v4, 920167782  ;;  %v15105_v27 = vshll.u32 %v6016_v11, 8 }
 0x58e   : > { %v2853_v62 = vadd.f32 -0.4999988, %v2852_v61  ;;  %v2860_v28 = vadd.f32 -0.16666654, %v2859_v20  ;;  %vm2871_vm13 = vcmp.eq.s32.totalorder %v15050_v48, 2  ;;  %v15108_v58 = vor.u32 %v6032_v44, %v6031_v23 }
 0x58f   : > { %v6053_v2 = vsel %vm6043_vm6, %v6039_v32, 1326507024  ;;  %v2695_v17 = vmul.f32 -0.001358992, %v2694_v9  ;;  %v2702_v35 = vmul.f32 -0.00019511016, %v2694_v9  ;;  %vm2864_vm9 = vweird.f32 %v14499_v29 }
 0x590   : > { %vm2868_vm8 = vcmp.eq.s32.totalorder %v15050_v48, 0  ;;  %v4115_v36 = vand.u32 3, %v14904_v26  ;;  %vm4733_vm14 = vcmp.eq.s32.totalorder %v15052_v16, 0  ;;  %vm4736_vm0 = vcmp.eq.s32.totalorder %v15052_v16, 2  ;;  %v11357_v26 = vld [vmem:[%s16522_s12 + $0x218] sm:$0xff] }
 0x591   : > { %vm6042_vm3 = vcmp.lt.s32.totalorder %v15077_v50, 3  ;;  %v2854_v11 = vmul.f32 %v2853_v62, %v2849_v54  ;;  %v2861_v37 = vmul.f32 %v2860_v28, %v2849_v54  ;;  %vm2867_vm5 = vcmp.lt.s32.totalorder %v15050_v48, 2  ;;  %9967 = vmatpush.bf16.msrb.mxu1 %v11357_v26 }
 0x592   : > { %vm4732_vm4 = vcmp.lt.s32.totalorder %v15052_v16, 2  ;;  %v5853_v25 = vand.u32 2147483647, %v14775_v59  ;;  %v15133_v54 = vsel %vm6040_vm1, %v15088_v14, %v15090_v13  ;;  %v2696_v22 = vadd.f32 0.041655596, %v2695_v17 }
 0x593   : > { %v2703_v49 = vadd.f32 0.008332121, %v2702_v35  ;;  %vm4117_vm15 = vcmp.eq.s32.totalorder %v4115_v36, 0  ;;  %v15137_v43 = vand.u32 3, %v15028_v18  ;;  %v2855_v31 = vadd.f32 1.0, %v2854_v11 }
 0x594   : > { %v2862_v45 = vadd.f32 1.0, %v2861_v37  ;;  %v4119_v44 = vsel %vm4117_vm15, %v14944_v46, %v2249_v34  ;;  %vm4120_vm11 = vcmp.eq.s32.totalorder %v4115_v36, 2  ;;  %v2697_v32 = vmul.f32 %v2696_v22, %v2694_v9 }
 0x595   : > { %v2704_v3 = vmul.f32 %v2703_v49, %v2694_v9  ;;  %vm4116_vm7 = vcmp.lt.s32.totalorder %v4115_v36, 2  ;;  %v4122_v23 = vsel %vm4120_vm11, %v2252_v8, %v14954_v5  ;;  %vm2716_vm2 = vcmp.eq.s32.totalorder %v15062_v15, 2 }
 0x596   : > { %v2863_v18 = vmul.f32 %v2862_v45, %v15058_v0  ;;  %v2872_v61 = vxor.u32 2147483648, %v2855_v31  ;;  %v4123_v20 = vsel %vm4116_vm7, %v4119_v44, %v4122_v23  ;;  %v15151_v34 = vsel %vm6040_vm1, %v15090_v13, %v15108_v58 }
 0x597   : > { %v2698_v62 = vadd.f32 -0.4999988, %v2697_v32  ;;  %v2705_v28 = vadd.f32 -0.16666654, %v2704_v3  ;;  %v4124_v17 = vsel %vm2244_vm10, nan, %v4123_v20  ;;  %v15158_v46 = vsel %vm6042_vm3, %v15108_v58, %v6049_v63 }
 0x598   : > { %vm2713_vm15 = vcmp.eq.s32.totalorder %v15062_v15, 0  ;;  %v2869_v5 = vxor.u32 2147483648, %v2863_v18  ;;  %vm4579_vm11 = vcmp.eq.s32.totalorder %v15137_v43, 0  ;;  %v4899_v8 = vpack.c.bf16 %v15068_v60, %v4124_v17 }
 0x599   : > { %v15166_v0 = vsel %vm6042_vm3, %v15082_v4, %v6053_v2  ;;  %v2699_v35 = vmul.f32 %v2698_v62, %v2694_v9  ;;  %v2706_v40 = vmul.f32 %v2705_v28, %v2694_v9  ;;  %vm2712_vm10 = vcmp.lt.s32.totalorder %v15062_v15, 2 }
 0x59a   : > { %v2873_v63 = vsel %vm2871_vm13, %v2872_v61, %v2863_v18  ;;  %vm4578_vm7 = vcmp.lt.s32.totalorder %v15137_v43, 2  ;;  %v5860_v36 = vand.u32 8388607, %v5853_v25  ;;  %vm2709_vm12 = vweird.f32 %v14951_v6  ;;  %4907 = vst [vmem:[#allocation3 + $0x90] sm:$0xff] %v4899_v8 }
 0x59b   : > { %v2870_v60 = vsel %vm2868_vm8, %v2855_v31, %v2869_v5  ;;  %v4735_v4 = vsel %vm4733_vm14, %v2855_v31, %v2869_v5  ;;  %v4738_v9 = vsel %vm4736_vm0, %v2872_v61, %v2863_v18  ;;  %v5868_v2 = vsub.s32 32, %v15046_v1 }
 0x59c   : > { %v2700_v11 = vadd.f32 1.0, %v2699_v35  ;;  %v2707_v37 = vadd.f32 1.0, %v2706_v40  ;;  %v2874_v51 = vsel %vm2867_vm5, %v2870_v60, %v2873_v63  ;;  %v4739_v26 = vsel %vm4732_vm4, %v4735_v4, %v4738_v9 }
 0x59d   : > { %v2875_v42 = vsel %vm2864_vm9, nan, %v2874_v51  ;;  %vm4582_vm13 = vcmp.eq.s32.totalorder %v15137_v43, 2  ;;  %v4740_v22 = vsel %vm2864_vm9, nan, %v4739_v26  ;;  %v5870_v49 = vshll.u32 %v16753_v7, %v15046_v1 }
 0x59e   : > { %v2708_v31 = vmul.f32 %v2707_v37, %v15096_v57  ;;  %v2717_v45 = vxor.u32 2147483648, %v2700_v11  ;;  %v5861_v44 = vor.u32 8388608, %v5860_v36  ;;  %v5871_v48 = vshrl.u32 %v16763_v38, %v5868_v2 }
 0x59f   : > { %v5873_v16 = vshll.u32 %v16763_v38, %v15046_v1  ;;  %v5874_v32 = vshrl.u32 %v16764_v10, %v5868_v2  ;;  %v5876_v3 = vshll.u32 %v16764_v10, %v15046_v1  ;;  %v5877_v29 = vshrl.u32 %v16754_v21, %v5868_v2 }
 0x5a0   : > { %vm6041_vm8 = vcmp.lt.s32.totalorder %v15077_v50, 2  ;;  %v2714_v23 = vxor.u32 2147483648, %v2708_v31  ;;  %v2718_v57 = vsel %vm2716_vm2, %v2717_v45, %v2708_v31  ;;  %v4584_v18 = vsel %vm4582_vm13, %v2717_v45, %v2708_v31 }
 0x5a1   : > { %v5879_v61 = vshll.u32 %v16754_v21, %v15046_v1  ;;  %v5872_v20 = vor.u32 %v5871_v48, %v5870_v49  ;;  %v5875_v62 = vor.u32 %v5874_v32, %v5873_v16  ;;  %v5878_v28 = vor.u32 %v5877_v29, %v5876_v3 }
 0x5a2   : > { %v5880_v17 = vshrl.u32 %v16972_v19, %v5868_v2  ;;  %v2715_v5 = vsel %vm2713_vm15, %v2700_v11, %v2714_v23  ;;  %v4581_v8 = vsel %vm4579_vm11, %v2700_v11, %v2714_v23  ;;  %v5882_v35 = vshll.u32 %v16972_v19, %v15046_v1 }
 0x5a3   : > { %v5883_v40 = vshrl.u32 %v16973_v24, %v5868_v2  ;;  %v2719_v63 = vsel %vm2712_vm10, %v2715_v5, %v2718_v57  ;;  %v4585_v36 = vsel %vm4578_vm7, %v4581_v8, %v4584_v18  ;;  %v5869_v60 = vshrl.u32 %v16753_v7, %v5868_v2 }
 0x5a4   : > { %v5881_v4 = vor.u32 %v5880_v17, %v5879_v61  ;;  %v2720_v9 = vsel %vm2709_vm12, nan, %v2719_v63  ;;  %v4586_v11 = vsel %vm2709_vm12, nan, %v4585_v36  ;;  %vm5885_vm14 = vcmp.lt.s32.totalorder %v15043_v39, 1 }
 0x5a5   : > { %v5884_v37 = vor.u32 %v5883_v40, %v5882_v35  ;;  %v3037_v1 = vpack.c.bf16 %v2875_v42, %v2720_v9  ;;  %v4901_v51 = vpack.c.bf16 %v4740_v22, %v4586_v11  ;;  %vm5887_vm0 = vcmp.lt.s32.totalorder %v15043_v39, 3  ;;  %v10684_v40 = vld [vmem:[#allocation3 + $0x90] sm:$0xf] }
 0x5a6   : > { %vm5888_vm5 = vcmp.lt.s32.totalorder %v15043_v39, 4  ;;  %v5893_v43 = vsel %vm5885_vm14, %v5872_v20, %v5875_v62  ;;  %v5897_v2 = vsel %vm5885_vm14, %v5875_v62, %v5878_v28  ;;  %vm5886_vm4 = vcmp.lt.s32.totalorder %v15043_v39, 2 }
 0x5a7   : > { %v5890_v15 = vsel %vm5888_vm5, %v5878_v28, 2102212464  ;;  %v5894_v26 = vsel %vm5888_vm5, %v5881_v4, 920167782  ;;  %3045 = vst [vmem:[#allocation3 + $0xc0] sm:$0xff] %v3037_v1  ;;  %v15229_v45 = vshll.u32 %v5861_v44, 8  ;;  %v5889_v42 = vsel %vm5885_vm14, %v5869_v60, %v5872_v20 }
 0x5a8   : > { %v5895_v49 = vsel %vm5887_vm0, %v5878_v28, %v5894_v26  ;;  %v5898_v31 = vsel %vm5888_vm5, %v5884_v37, 1326507024  ;;  %4909 = vst [vmem:[#allocation3 + $0xcc] sm:$0xff] %v4901_v51  ;;  %v6055_v16 = vsel %vm6041_vm8, %v15151_v34, %v15166_v0  ;;  %v5891_v32 = vsel %vm5887_vm0, %v5875_v62, %v5890_v15  ;;  %v11276_v62 = vld [vmem:[#allocation3 + $0x84] sm:$0xf] }
 0x5a9   : > { %v5896_v22 = vsel %vm5886_vm4, %v5893_v43, %v5895_v49  ;;  %v5899_v48 = vsel %vm5887_vm0, %v5881_v4, %v5898_v31  ;;  %v5902_v3 = vand.u32 65535, %v15229_v45  ;;  %v5903_v23 = vshrl.u32 %v15229_v45, 16  ;;  %v10676_v28 = vld [vmem:[#allocation3 + $0x88] sm:$0xf] }
 0x5aa   : > { %v5900_v44 = vsel %vm5886_vm4, %v5897_v2, %v5899_v48  ;;  %v5926_v29 = vand.u32 65535, %v5896_v22  ;;  %v5927_v61 = vshrl.u32 %v5896_v22, 16  ;;  %v15249_v20 = vsel %vm6041_vm8, %v15133_v54, %v15158_v46 }
 0x5ab   : > { %v5904_v57 = vand.u32 65535, %v5900_v44  ;;  %v5905_v18 = vshrl.u32 %v5900_v44, 16  ;;  %v15252_v34 = vand.u32 65535, %v15105_v27  ;;  %v6060_v0 = vshrl.u32 %v6055_v16, 16 }
 0x5ac   : > { %v15256_v17 = vsel %vm5886_vm4, %v5889_v42, %v5891_v32  ;;  %v15259_v35 = vshrl.u32 %v15105_v27, 16  ;;  %v5928_v63 = vmul.u32 %v5926_v29, %v5902_v3  ;;  %v5929_v36 = vmul.u32 %v5927_v61, %v5902_v3 }
 0x5ad   : > { %v5907_v5 = vmul.u32 %v5905_v18, %v5902_v3  ;;  %v5908_v8 = vmul.u32 %v5904_v57, %v5903_v23  ;;  %v5930_v54 = vmul.u32 %v5926_v29, %v5903_v23  ;;  %v6059_v46 = vand.u32 65535, %v6055_v16 }
 0x5ae   : > { %v10670_v60 = vld [vmem:[#allocation3 + $0xbc] sm:$0xf0]  ;;  %v11284_v4 = vld [vmem:[#allocation3 + $0xc0] sm:$0xf0]  ;;  %v5906_v9 = vmul.u32 %v5904_v57, %v5902_v3  ;;  %v5909_v11 = vmul.u32 %v5905_v18, %v5903_v23  ;;  %v5931_v1 = vmul.u32 %v5927_v61, %v5903_v23  ;;  %v6062_v26 = vmul.u32 %v6060_v0, %v15252_v34 }
 0x5af   : > { %v5910_v37 = vshll.u32 %v5907_v5, 16  ;;  %v10673_v51 = vor.u32 %v11276_v62, %v10670_v60  ;;  %v10677_v39 = vor.u32 %v11284_v4, %v10676_v28  ;;  %v11285_v15 = vld [vmem:[#allocation3 + $0xc8] sm:$0xf0]  ;;  %v5912_v43 = vshll.u32 %v5908_v8, 16 }
 0x5b0   : > { %v10685_v2 = vor.u32 %v11285_v15, %v10684_v40  ;;  %v5932_v31 = vshll.u32 %v5929_v36, 16  ;;  %v5911_v42 = vshrl.u32 %v5907_v5, 16  ;;  %v5934_v48 = vshll.u32 %v5930_v54, 16 }
 0x5b1   : > { %vm5914_vm12 = vc.u32 %v5906_v9, %v5910_v37  ;;  %v5916_v49 = vadd.s32 %v5910_v37, %v5906_v9  ;;  %9881 = vmatmul.bf16.gmra.mxu2 %v10673_v51  ;;  %9900 = vmatmul.bf16.gmra.mxu1 %v10677_v39  ;;  %v15264_v16 = vmul.u32 %v6059_v46, %v15259_v35  ;;  %v6065_v57 = vshll.u32 %v6062_v26, 16 }
 0x5b2   : > { %v5915_v22 = vsel %vm5914_vm12, 1, %v16766_v33  ;;  %9938 = vmatmul.bf16.gmra.mxu0 %v10685_v2  ;;  %vm5936_vm2 = vc.u32 %v5928_v63, %v5932_v31  ;;  %v5938_v44 = vadd.s32 %v5932_v31, %v5928_v63  ;;  %v6061_v23 = vmul.u32 %v6059_v46, %v15252_v34 }
 0x5b3   : > { %v5917_v32 = vadd.s32 %v5915_v22, %v5909_v11  ;;  %vm5918_vm9 = vc.u32 %v5916_v49, %v5912_v43  ;;  %v5937_v29 = vsel %vm5936_vm2, 1, %v16766_v33  ;;  %v5913_v18 = vshrl.u32 %v5908_v8, 16 }
 0x5b4   : > { %v5919_v3 = vsel %vm5918_vm9, 1, %v16766_v33  ;;  %v5939_v62 = vadd.s32 %v5937_v29, %v5931_v1  ;;  %vm5940_vm15 = vc.u32 %v5938_v44, %v5934_v48  ;;  %v5933_v28 = vshrl.u32 %v5929_v36, 16 }
 0x5b5   : > { %v5921_v61 = vadd.s32 %v5919_v3, %v5917_v32  ;;  %v5941_v5 = vsel %vm5940_vm15, 1, %v16766_v33  ;;  %v6064_v40 = vmul.u32 %v6060_v0, %v15259_v35  ;;  %v6067_v60 = vshll.u32 %v15264_v16, 16 }
 0x5b6   : > { %v5943_v63 = vadd.s32 %v5941_v5, %v5939_v62  ;;  %vm6069_vm11 = vc.u32 %v6061_v23, %v6065_v57  ;;  %v6071_v9 = vadd.s32 %v6065_v57, %v6061_v23  ;;  %v5935_v11 = vshrl.u32 %v5930_v54, 16  ;;  %v11463_v54 = vld [vmem:[#allocation2 + $0x50] sm:$0xff] }
 0x5b7   : > { %v5922_v4 = vadd.s32 %v5921_v61, %v5911_v42  ;;  %v6070_v37 = vsel %vm6069_vm11, 1, %v16766_v33  ;;  %v6081_v46 = vand.u32 65535, %v15249_v20  ;;  %v6082_v8 = vshrl.u32 %v15249_v20, 16 }
 0x5b8   : > { %v5944_v36 = vadd.s32 %v5943_v63, %v5933_v28  ;;  %v6072_v51 = vadd.s32 %v6070_v37, %v6064_v40  ;;  %vm6073_vm10 = vc.u32 %v6071_v9, %v6067_v60  ;;  %v15277_v39 = vadd.s32 %v5938_v44, %v5934_v48 }
 0x5b9   : > { %v15275_v1 = vadd.s32 %v5922_v4, %v5913_v18  ;;  %v6074_v0 = vsel %vm6073_vm10, 1, %v16766_v33  ;;  %v6084_v15 = vmul.u32 %v6082_v8, %v15252_v34  ;;  %v6085_v43 = vmul.u32 %v6081_v46, %v15259_v35 }
 0x5ba   : > { %v15282_v2 = vmul.f32 2.0, %v11463_v54  ;;  %v5945_v49 = vadd.s32 %v5944_v36, %v5935_v11  ;;  %v6076_v31 = vadd.s32 %v6074_v0, %v6072_v51  ;;  %v6083_v20 = vmul.u32 %v6081_v46, %v15252_v34 }
 0x5bb   : > { %vm5948_vm7 = vc.u32 %v15275_v1, %v15277_v39  ;;  %v6087_v42 = vshll.u32 %v6084_v15, 16  ;;  %v5946_v22 = vmul.u32 %v15229_v45, %v15256_v17  ;;  %v6066_v32 = vshrl.u32 %v6062_v26, 16 }
 0x5bc   : > { %v5949_v48 = vadd.s32 1, %v5945_v49  ;;  %v6086_v44 = vmul.u32 %v6082_v8, %v15259_v35  ;;  %v6089_v3 = vshll.u32 %v6085_v43, 16  ;;  %v6476_v61 = vand.u32 2139095040, %v15282_v2 }
 0x5bd   : > { %vm6091_vm13 = vc.u32 %v6083_v20, %v6087_v42  ;;  %v6093_v29 = vadd.s32 %v6087_v42, %v6083_v20  ;;  %v6077_v57 = vadd.s32 %v6076_v31, %v6066_v32  ;;  %v6045_v34 = vsel %vm6043_vm6, %v15108_v58, 2102212464 }
 0x5be   : > { %v5950_v23 = vsel %vm5948_vm7, %v5949_v48, %v5945_v49  ;;  %v6092_v18 = vsel %vm6091_vm13, 1, %v16766_v33  ;;  %v6024_v45 = vshrl.u32 %v16753_v7, %v15035_v55  ;;  %v6068_v17 = vshrl.u32 %v15264_v16, 16 }
 0x5bf   : > { %v5951_v62 = vadd.s32 %v5950_v23, %v5946_v22  ;;  %v6094_v28 = vadd.s32 %v6092_v18, %v6086_v44  ;;  %vm6095_vm14 = vc.u32 %v6093_v29, %v6089_v3  ;;  %v15300_v26 = vmul.f32 2.0, %v14951_v6 }
 0x5c0   : > { %v6096_v35 = vsel %vm6095_vm14, 1, %v16766_v33  ;;  %v6088_v40 = vshrl.u32 %v6084_v15, 16  ;;  %v6044_v4 = vsel %vm6040_vm1, %v6024_v45, %v15088_v14  ;;  %v6046_v58 = vsel %vm6042_vm3, %v15090_v13, %v6045_v34 }
 0x5c1   : > { %v5952_v5 = vadd.s32 536870912, %v5951_v62  ;;  %v6098_v60 = vadd.s32 %v6096_v35, %v6094_v28  ;;  %v15308_v63 = vadd.s32 %v6077_v57, %v6068_v17  ;;  %v6477_v55 = vshrl.u32 %v6476_v61, 23 }
 0x5c2   : > { %v6090_v9 = vshrl.u32 %v6085_v43, 16  ;;  %v6097_v6 = vadd.s32 %v6093_v29, %v6089_v3  ;;  %v6047_v46 = vsel %vm6041_vm8, %v6044_v4, %v6046_v58  ;;  %v6321_v14 = vand.u32 2139095040, %v15300_v26 }
 0x5c3   : > { %v15310_v16 = vshrl.u32 %v5952_v5, 30  ;;  %v6099_v11 = vadd.s32 %v6098_v60, %v6088_v40  ;;  %v10556_v36 = vadd.s32 4294967169, %v6477_v55  ;;  %v6101_v0 = vmul.u32 %v15105_v27, %v6047_v46 }
 0x5c4   : > { %vm6103_vm6 = vc.u32 %v15308_v63, %v6097_v6  ;;  %v6322_v54 = vshrl.u32 %v6321_v14, 23  ;;  %v16709_v17 = vand.u32 2147483647, %v15282_v2  ;;  %v5947_v4 = vadd.s32 %v15277_v39, %v15275_v1 }
 0x5c5   : > { %v5954_v37 = vshll.u32 %v15310_v16, 30  ;;  %v6100_v8 = vadd.s32 %v6099_v11, %v6090_v9  ;;  %v6483_v31 = vadd.s32 1, %v10556_v36  ;;  %vm5855_vm11 = vcmp.lt.s32.totalorder %v14775_v59, 0 }
 0x5c6   : > { %v10553_v22 = vadd.s32 4294967169, %v6322_v54  ;;  %v15330_v9 = vand.u32 8388607, %v16709_v17  ;;  %vm6010_vm10 = vcmp.lt.s32.totalorder %v14910_v53, 0  ;;  %vm15416_vm14 = vcmp.le.f32.partialorder %v6008_v12, 0.7853982 }
 0x5c7   : > { %v5955_v13 = vsub.s32 %v5951_v62, %v5954_v37  ;;  %v6104_v51 = vadd.s32 1, %v6100_v8  ;;  %vm6484_vm3 = vcmp.gt.s32.totalorder %v6483_v31, 0 }
 0x5c8   : > { %v6485_v3 = vsel %vm6484_vm3, %v6483_v31, 0  ;;  %v6328_v29 = vadd.s32 1, %v10553_v22  ;;  %v6102_v31 = vadd.s32 %v6097_v6, %v15308_v63  ;;  %v6481_v6 = vor.u32 8388608, %v15330_v9 }
 0x5c9   : > { %vm5956_vm1 = vcmp.lt.s32.totalorder %v5955_v13, 0  ;;  %v5957_v15 = vsub.s32 0, %v5955_v13  ;;  %v6105_v43 = vsel %vm6103_vm6, %v6104_v51, %v6100_v8  ;;  %v6487_v57 = vand.u32 31, %v6485_v3 }
 0x5ca   : > { %v6106_v49 = vadd.s32 %v6105_v43, %v6101_v0  ;;  %vm6329_vm5 = vcmp.gt.s32.totalorder %v6328_v29, 0  ;;  %v15332_v11 = vshrl.u32 %v6485_v3, 5 }
 0x5cb   : > { %v5958_v20 = vsel %vm5956_vm1, %v5957_v15, %v5955_v13  ;;  %v15321_v28 = vsub.s32 32, %v6487_v57  ;;  %v6330_v45 = vsel %vm6329_vm5, %v6328_v29, 0  ;;  %v6502_v37 = vshll.u32 %v16972_v19, %v6487_v57 }
 0x5cc   : > { %v5959_v42 = vclz %v5958_v20  ;;  %v6107_v50 = vadd.s32 536870912, %v6106_v49  ;;  %v6332_v60 = vand.u32 31, %v6330_v45  ;;  %v6493_v51 = vshll.u32 %v16763_v38, %v6487_v57 }
 0x5cd   : > { %v6503_v58 = vshrl.u32 %v16973_v24, %v15321_v28  ;;  %v6494_v14 = vshrl.u32 %v16764_v10, %v15321_v28  ;;  %v6497_v1 = vshrl.u32 %v16754_v21, %v15321_v28  ;;  %v6500_v0 = vshrl.u32 %v16972_v19, %v15321_v28 }
 0x5ce   : > { %v10545_v48 = vadd.s32 4294967294, %v5959_v42  ;;  %v15318_v32 = vshrl.u32 %v6107_v50, 30  ;;  %v6496_v54 = vshll.u32 %v16764_v10, %v6487_v57  ;;  %v6490_v20 = vshll.u32 %v16753_v7, %v6487_v57 }
 0x5cf   : > { %v6491_v42 = vshrl.u32 %v16763_v38, %v15321_v28  ;;  %v6499_v50 = vshll.u32 %v16754_v21, %v6487_v57  ;;  %vm6508_vm12 = vcmp.lt.s32.totalorder %v15332_v11, 4  ;;  %v15355_v63 = vsub.s32 32, %v6332_v60 }
 0x5d0   : > { %v6109_v44 = vshll.u32 %v15318_v32, 30  ;;  %vm10546_vm8 = vcmp.lt.s32.totalorder %v10545_v48, 0  ;;  %v15350_v3 = vor.u32 %v6497_v1, %v6496_v54  ;;  %vm6505_vm9 = vcmp.lt.s32.totalorder %v15332_v11, 1 }
 0x5d1   : > { %v5962_v23 = vsel %vm10546_vm8, 0, %v10545_v48  ;;  %vm6506_vm2 = vcmp.lt.s32.totalorder %v15332_v11, 2  ;;  %vm6507_vm15 = vcmp.lt.s32.totalorder %v15332_v11, 3  ;;  %v6339_v9 = vshrl.u32 %v16764_v10, %v15355_v63 }
 0x5d2   : > { %v6110_v27 = vsub.s32 %v6106_v49, %v6109_v44  ;;  %v5967_v61 = vsub.s32 4294967266, %v5962_v23  ;;  %v5963_v35 = vsub.s32 32, %v5962_v23  ;;  %v5964_v15 = vshll.u32 %v5955_v13, %v5962_v23 }
 0x5d3   : > { %v6504_v49 = vor.u32 %v6503_v58, %v6502_v37  ;;  %v15348_v44 = vor.u32 %v6494_v14, %v6493_v51  ;;  %v6501_v23 = vor.u32 %v6500_v0, %v6499_v50  ;;  %v6335_v58 = vshll.u32 %v16753_v7, %v6332_v60 }
 0x5d4   : > { %vm6111_vm0 = vcmp.lt.s32.totalorder %v6110_v27, 0  ;;  %v6112_v18 = vsub.s32 0, %v6110_v27  ;;  %v5968_v40 = vadd.s32 127, %v5967_v61  ;;  %v5965_v46 = vshrl.u32 %v5947_v4, %v5963_v35 }
 0x5d5   : > { %v6518_v57 = vsel %vm6508_vm12, %v6504_v49, 1326507024  ;;  %v6517_v4 = vsel %vm6505_vm9, %v15348_v44, %v15350_v3  ;;  %v6342_v37 = vshrl.u32 %v16754_v21, %v15355_v63  ;;  %v6344_v14 = vshll.u32 %v16754_v21, %v6332_v60 }
 0x5d6   : > { %v6113_v62 = vsel %vm6111_vm0, %v6112_v18, %v6110_v27  ;;  %v5969_v39 = vshll.u32 %v5968_v40, 23  ;;  %v5966_v22 = vor.u32 %v5965_v46, %v5964_v15  ;;  %v15353_v18 = vshrl.u32 %v6330_v45, 5 }
 0x5d7   : > { %v6114_v34 = vclz %v6113_v62  ;;  %v16710_v62 = vand.u32 2147483647, %v15300_v26  ;;  %v6345_v1 = vshrl.u32 %v16972_v19, %v15355_v63  ;;  %v6347_v51 = vshll.u32 %v16972_v19, %v6332_v60 }
 0x5d8   : > { %v5970_v13 = vor.u32 4788187, %v5969_v39  ;;  %v5973_v35 = vcvt.s32.f32 %v5966_v22  ;;  %v6348_v0 = vshrl.u32 %v16973_v24, %v15355_v63  ;;  %v6514_v49 = vsel %vm6508_vm12, %v6501_v23, 920167782 }
 0x5d9   : > { %v10548_v5 = vadd.s32 4294967294, %v6114_v34  ;;  %v15361_v34 = vor.u32 %v6491_v42, %v6490_v20  ;;  %v6325_v46 = vand.u32 8388607, %v16710_v62  ;;  %v6346_v54 = vor.u32 %v6345_v1, %v6344_v14 }
 0x5da   : > { %v5971_v45 = vand.u32 2147483647, %v5970_v13  ;;  %v6349_v50 = vor.u32 %v6348_v0, %v6347_v51  ;;  %vm6353_vm7 = vcmp.lt.s32.totalorder %v15353_v18, 4  ;;  %vm6350_vm13 = vcmp.lt.s32.totalorder %v15353_v18, 1 }
 0x5db   : > { %vm10549_vm4 = vcmp.lt.s32.totalorder %v10548_v5, 0  ;;  %vm6352_vm6 = vcmp.lt.s32.totalorder %v15353_v18, 3  ;;  %vm15430_vm1 = vcmp.le.f32.partialorder %v5853_v25, 0.7853982  ;;  %vm6351_vm3 = vcmp.lt.s32.totalorder %v15353_v18, 2 }
 0x5dc   : > { %v6117_v55 = vsel %vm10549_vm4, 0, %v10548_v5  ;;  %v5974_v15 = vmul.f32 %v5973_v35, %v5971_v45 }
 0x5dd   : > { %v6122_v8 = vsub.s32 4294967266, %v6117_v55  ;;  %v6118_v36 = vsub.s32 32, %v6117_v55  ;;  %v6119_v61 = vshll.u32 %v6110_v27, %v6117_v55  ;;  %v6519_v27 = vsel %vm6507_vm15, %v6501_v23, %v6518_v57 }
 0x5de   : > { %v6336_v55 = vshrl.u32 %v16763_v38, %v15355_v63  ;;  %v6520_v22 = vsel %vm6506_vm2, %v6517_v4, %v6519_v27  ;;  %v6515_v23 = vsel %vm6507_vm15, %v15350_v3, %v6514_v49  ;;  %v5975_v57 = vxor.u32 2147483648, %v5974_v15 }
 0x5df   : > { %v6123_v43 = vadd.s32 127, %v6122_v8  ;;  %v6120_v29 = vshrl.u32 %v6102_v31, %v6118_v36  ;;  %v6338_v8 = vshll.u32 %v16763_v38, %v6332_v60  ;;  %v6341_v36 = vshll.u32 %v16764_v10, %v6332_v60 }
 0x5e0   : > { %v15391_v31 = vor.u32 %v6336_v55, %v6335_v58  ;;  %v6326_v60 = vor.u32 8388608, %v6325_v46  ;;  %v5976_v25 = vsel %vm5855_vm11, %v5975_v57, %v5974_v15 }
 0x5e1   : > { %v6124_v48 = vshll.u32 %v6123_v43, 23  ;;  %v6121_v40 = vor.u32 %v6120_v29, %v6119_v61  ;;  %v15393_v20 = vor.u32 %v6339_v9, %v6338_v8  ;;  %v6343_v42 = vor.u32 %v6342_v37, %v6341_v36 }
 0x5e2   : > { %v6513_v29 = vsel %vm6505_vm9, %v15361_v34, %v15348_v44  ;;  %v6359_v61 = vsel %vm6353_vm7, %v6346_v54, 920167782  ;;  %v15438_v58 = vshll.u32 %v6326_v60, 8  ;;  %v6524_v37 = vand.u32 65535, %v6520_v22 }
 0x5e3   : > { %v6125_v5 = vor.u32 4788187, %v6124_v48  ;;  %v6128_v43 = vcvt.s32.f32 %v6121_v40  ;;  %v15399_v48 = vshll.u32 %v6481_v6, 8  ;;  %v6363_v6 = vsel %vm6353_vm7, %v6349_v50, 1326507024 }
 0x5e4   : > { %v6362_v45 = vsel %vm6350_vm13, %v15393_v20, %v6343_v42  ;;  %v6525_v40 = vshrl.u32 %v6520_v22, 16  ;;  %v6360_v12 = vsel %vm6352_vm6, %v6343_v42, %v6359_v61  ;;  %v6364_v27 = vsel %vm6352_vm6, %v6346_v54, %v6363_v6 }
 0x5e5   : > { %v6126_v39 = vand.u32 2147483647, %v6125_v5  ;;  %v6358_v5 = vsel %vm6350_vm13, %v15391_v31, %v15393_v20  ;;  %v15442_v9 = vand.u32 65535, %v15399_v48  ;;  %v6365_v8 = vsel %vm6351_vm3, %v6362_v45, %v6364_v27 }
 0x5e6   : > { %v6361_v46 = vsel %vm6351_vm3, %v6358_v5, %v6360_v12  ;;  %v15452_v14 = vsel %vm6506_vm2, %v6513_v29, %v6515_v23  ;;  %v6367_v1 = vand.u32 65535, %v15438_v58  ;;  %v15456_v36 = vshrl.u32 %v15399_v48, 16 }
 0x5e7   : > { %v6129_v13 = vmul.f32 %v6128_v43, %v6126_v39  ;;  %v6369_v39 = vand.u32 65535, %v6365_v8  ;;  %v15459_v51 = vmul.u32 %v6525_v40, %v15442_v9  ;;  %v6368_v0 = vshrl.u32 %v15438_v58, 16 }
 0x5e8   : > { %v6370_v15 = vshrl.u32 %v6365_v8, 16  ;;  %v6391_v43 = vand.u32 65535, %v6361_v46  ;;  %v6392_v54 = vshrl.u32 %v6361_v46, 16  ;;  %v15465_v49 = vsel %vm15430_vm1, %v14775_v59, %v5976_v25 }
 0x5e9   : > { %v6130_v55 = vxor.u32 2147483648, %v6129_v13  ;;  %v6526_v60 = vmul.u32 %v6524_v37, %v15442_v9  ;;  %v6373_v23 = vmul.u32 %v6369_v39, %v6368_v0  ;;  %v15472_v57 = vmul.u32 %v6524_v37, %v15456_v36 }
 0x5ea   : > { %v6372_v29 = vmul.u32 %v6370_v15, %v6367_v1  ;;  %v6529_v61 = vmul.u32 %v6525_v40, %v15456_v36  ;;  %v6394_v6 = vmul.u32 %v6392_v54, %v6367_v1  ;;  %v6395_v5 = vmul.u32 %v6391_v43, %v6368_v0 }
 0x5eb   : > { %v6131_v50 = vsel %vm6010_vm10, %v6130_v55, %v6129_v13  ;;  %v6530_v45 = vshll.u32 %v15459_v51, 16  ;;  %v6547_v12 = vshrl.u32 %v15452_v14, 16  ;;  %v15479_v13 = vmul.f32 %v15465_v49, %v15465_v49 }
 0x5ec   : > { %v15484_v27 = vsel %vm15416_vm14, %v14910_v53, %v6131_v50  ;;  %v6371_v55 = vmul.u32 %v6369_v39, %v6367_v1  ;;  %v6375_v37 = vshll.u32 %v6372_v29, 16  ;;  %v6334_v40 = vshrl.u32 %v16753_v7, %v15355_v63 }
 0x5ed   : > { %v6355_v25 = vsel %vm6353_vm7, %v6343_v42, 2102212464  ;;  %v6374_v46 = vmul.u32 %v6370_v15, %v6368_v0  ;;  %v6397_v8 = vshll.u32 %v6394_v6, 16  ;;  %v6377_v17 = vshll.u32 %v6373_v23, 16 }
 0x5ee   : > { %vm6379_vm8 = vc.u32 %v6371_v55, %v6375_v37  ;;  %v6381_v62 = vadd.s32 %v6375_v37, %v6371_v55  ;;  %v6393_v22 = vmul.u32 %v6391_v43, %v6367_v1  ;;  %v15492_v24 = vmul.f32 %v15484_v27, %v15484_v27 }
 0x5ef   : > { %v6380_v50 = vsel %vm6379_vm8, 1, %v16766_v33  ;;  %v6396_v39 = vmul.u32 %v6392_v54, %v6368_v0  ;;  %v6399_v19 = vshll.u32 %v6395_v5, 16  ;;  %v6354_v42 = vsel %vm6350_vm13, %v6334_v40, %v15391_v31 }
 0x5f0   : > { %v6382_v21 = vadd.s32 %v6380_v50, %v6374_v46  ;;  %vm6383_vm0 = vc.u32 %v6381_v62, %v6377_v17  ;;  %vm6401_vm5 = vc.u32 %v6393_v22, %v6397_v8  ;;  %v6403_v63 = vadd.s32 %v6397_v8, %v6393_v22 }
 0x5f1   : > { %v6356_v1 = vsel %vm6352_vm6, %v15393_v20, %v6355_v25  ;;  %v6384_v15 = vsel %vm6383_vm0, 1, %v16766_v33  ;;  %v6402_v43 = vsel %vm6401_vm5, 1, %v16766_v33  ;;  %v6376_v55 = vshrl.u32 %v6372_v29, 16 }
 0x5f2   : > { %v6386_v37 = vadd.s32 %v6384_v15, %v6382_v21  ;;  %v6404_v0 = vadd.s32 %v6402_v43, %v6396_v39  ;;  %vm6405_vm4 = vc.u32 %v6403_v63, %v6399_v19  ;;  %v5989_v17 = vmul.f32 -0.00019511016, %v15479_v13 }
 0x5f3   : > { %v6144_v62 = vmul.f32 -0.00019511016, %v15492_v24  ;;  %v6406_v54 = vsel %vm6405_vm4, 1, %v16766_v33  ;;  %v6532_v31 = vshll.u32 %v15472_v57, 16  ;;  %v6378_v22 = vshrl.u32 %v6373_v23, 16 }
 0x5f4   : > { %v6387_v40 = vadd.s32 %v6386_v37, %v6376_v55  ;;  %v6398_v46 = vshrl.u32 %v6394_v6, 16  ;;  %v6408_v20 = vadd.s32 %v6406_v54, %v6404_v0  ;;  %v6357_v25 = vsel %vm6351_vm3, %v6354_v42, %v6356_v1 }
 0x5f5   : > { %v6400_v8 = vshrl.u32 %v6395_v5, 16  ;;  %vm6534_vm7 = vc.u32 %v6526_v60, %v6530_v45  ;;  %v6536_v21 = vadd.s32 %v6530_v45, %v6526_v60  ;;  %v6549_v15 = vmul.u32 %v6547_v12, %v15442_v9 }
 0x5f6   : > { %v15509_v29 = vadd.s32 %v6387_v40, %v6378_v22  ;;  %v6409_v50 = vadd.s32 %v6408_v20, %v6398_v46  ;;  %v6535_v39 = vsel %vm6534_vm7, 1, %v16766_v33  ;;  %v15513_v43 = vadd.s32 %v6403_v63, %v6399_v19 }
 0x5f7   : > { %v6537_v10 = vadd.s32 %v6535_v39, %v6529_v61  ;;  %vm6538_vm13 = vc.u32 %v6536_v21, %v6532_v31  ;;  %v16978_v23 = vand.u32 65535, %v15452_v14  ;;  %v6489_v5 = vshrl.u32 %v16753_v7, %v15321_v28 }
 0x5f8   : > { %v6410_v18 = vadd.s32 %v6409_v50, %v6400_v8  ;;  %v6531_v60 = vshrl.u32 %v15459_v51, 16  ;;  %v6539_v45 = vsel %vm6538_vm13, 1, %v16766_v33  ;;  %vm6413_vm6 = vc.u32 %v15509_v29, %v15513_v43 }
 0x5f9   : > { %v6550_v6 = vmul.u32 %v16978_v23, %v15456_v36  ;;  %v6541_v42 = vadd.s32 %v6539_v45, %v6537_v10  ;;  %v16979_v19 = vmov %v16978_v23  ;;  %v6552_v63 = vshll.u32 %v6549_v15, 16 }
 0x5fa   : > { %v6548_v61 = vmul.u32 %v16979_v19, %v15442_v9  ;;  %v5990_v1 = vadd.f32 0.008332121, %v5989_v17  ;;  %v6145_v55 = vadd.f32 0.008332121, %v6144_v62  ;;  %v6411_v37 = vmul.u32 %v15438_v58, %v6357_v25 }
 0x5fb   : > { %v6414_v0 = vadd.s32 1, %v6410_v18  ;;  %v6551_v28 = vmul.u32 %v6547_v12, %v15456_v36  ;;  %v6554_v54 = vshll.u32 %v6550_v6, 16  ;;  %v6510_v10 = vsel %vm6508_vm12, %v15350_v3, 2102212464 }
 0x5fc   : > { %vm6556_vm3 = vc.u32 %v6548_v61, %v6552_v63  ;;  %v6558_v51 = vadd.s32 %v6552_v63, %v6548_v61  ;;  %v6542_v22 = vadd.s32 %v6541_v42, %v6531_v60  ;;  %v5982_v9 = vmul.f32 -0.001358992, %v15479_v13 }
 0x5fd   : > { %v6415_v31 = vsel %vm6413_vm6, %v6414_v0, %v6410_v18  ;;  %v6557_v14 = vsel %vm6556_vm3, 1, %v16766_v33  ;;  %v5991_v58 = vmul.f32 %v5990_v1, %v15479_v13  ;;  %v6137_v36 = vmul.f32 -0.001358992, %v15492_v24 }
 0x5fe   : > { %v6416_v17 = vadd.s32 %v6415_v31, %v6411_v37  ;;  %v6559_v62 = vadd.s32 %v6557_v14, %v6551_v28  ;;  %vm6560_vm8 = vc.u32 %v6558_v51, %v6554_v54  ;;  %v6533_v12 = vshrl.u32 %v15472_v57, 16 }
 0x5ff   : > { %v6561_v40 = vsel %vm6560_vm8, 1, %v16766_v33  ;;  %v6146_v46 = vmul.f32 %v6145_v55, %v15492_v24  ;;  %v6553_v3 = vshrl.u32 %v6549_v15, 16  ;;  %v5977_v8 = vsub.s32 4, %v15310_v16 }
 0x600   : > { %v6417_v20 = vadd.s32 536870912, %v6416_v17  ;;  %v6563_v25 = vadd.s32 %v6561_v40, %v6559_v62  ;;  %v6509_v21 = vsel %vm6505_vm9, %v6489_v5, %v15361_v34  ;;  %v6511_v50 = vsel %vm6507_vm15, %v15348_v44, %v6510_v10 }
 0x601   : > { %v15546_v39 = vadd.s32 %v6542_v22, %v6533_v12  ;;  %v5983_v57 = vadd.f32 0.041655596, %v5982_v9  ;;  %v6555_v18 = vshrl.u32 %v6550_v6, 16  ;;  %v5992_v45 = vadd.f32 -0.16666654, %v5991_v58 }
 0x602   : > { %v15548_v23 = vshrl.u32 %v6417_v20, 30  ;;  %v6564_v60 = vadd.s32 %v6563_v25, %v6553_v3  ;;  %v6132_v15 = vsub.s32 4, %v15318_v32  ;;  %v6138_v42 = vadd.f32 0.041655596, %v6137_v36 }
 0x603   : > { %v15551_v19 = vadd.s32 %v6558_v51, %v6554_v54  ;;  %v6147_v61 = vadd.f32 -0.16666654, %v6146_v46  ;;  %v6512_v5 = vsel %vm6506_vm2, %v6509_v21, %v6511_v50  ;;  %v5978_v6 = vsel %vm5855_vm11, %v5977_v8, %v15310_v16 }
 0x604   : > { %v6419_v34 = vshll.u32 %v15548_v23, 30  ;;  %v6565_v44 = vadd.s32 %v6564_v60, %v6555_v18  ;;  %v5984_v63 = vmul.f32 %v5983_v57, %v15479_v13  ;;  %v5993_v37 = vmul.f32 %v5992_v45, %v15479_v13 }
 0x605   : > { %vm6568_vm12 = vc.u32 %v15546_v39, %v15551_v19  ;;  %v6133_v0 = vsel %vm6010_vm10, %v6132_v15, %v15318_v32  ;;  %v6139_v11 = vmul.f32 %v6138_v42, %v15492_v24  ;;  %v6566_v28 = vmul.u32 %v15399_v48, %v6512_v5 }
 0x606   : > { %v6420_v1 = vsub.s32 %v6416_v17, %v6419_v34  ;;  %v6569_v55 = vadd.s32 1, %v6565_v44  ;;  %v6148_v54 = vmul.f32 %v6147_v61, %v15492_v24  ;;  %v15571_v10 = vsel %vm15430_vm1, 0, %v5978_v6 }
 0x607   : > { %v5985_v22 = vadd.f32 -0.4999988, %v5984_v63  ;;  %v15575_v9 = vsel %vm15416_vm14, 0, %v6133_v0  ;;  %v6140_v32 = vadd.f32 -0.4999988, %v6139_v11  ;;  %v5994_v48 = vadd.f32 1.0, %v5993_v37 }
 0x608   : > { %vm6421_vm9 = vcmp.lt.s32.totalorder %v6420_v1, 0  ;;  %v6422_v51 = vsub.s32 0, %v6420_v1  ;;  %v6570_v31 = vsel %vm6568_vm12, %v6569_v55, %v6565_v44  ;;  %v6149_v58 = vadd.f32 1.0, %v6148_v54 }
 0x609   : > { %v6571_v16 = vadd.s32 %v6570_v31, %v6566_v28  ;;  %v5986_v40 = vmul.f32 %v5985_v22, %v15479_v13  ;;  %v5997_v4 = vadd.s32 3, %v15571_v10  ;;  %v6152_v46 = vadd.s32 3, %v15575_v9 }
 0x60a   : > { %v6423_v14 = vsel %vm6421_vm9, %v6422_v51, %v6420_v1  ;;  %v6141_v20 = vmul.f32 %v6140_v32, %v15492_v24  ;;  %v15585_v3 = vmul.f32 %v5994_v48, %v15465_v49  ;;  %v15588_v25 = vmul.f32 %v6149_v58, %v15484_v27 }
 0x60b   : > { %v6424_v17 = vclz %v6423_v14  ;;  %v6572_v62 = vadd.s32 536870912, %v6571_v16  ;;  %v6412_v21 = vadd.s32 %v15513_v43, %v15509_v29  ;;  %v15592_v57 = vadd.f32 1.0, %v5986_v40 }
 0x60c   : > { %v5998_v18 = vand.u32 3, %v5997_v4  ;;  %v6153_v60 = vand.u32 3, %v6152_v46  ;;  %v15594_v45 = vadd.f32 1.0, %v6141_v20  ;;  %v6001_v61 = vxor.u32 2147483648, %v15585_v3  ;;  %v16981_v20 = vld [vmem:[#allocation43_spill] sm:$0xff] }
 0x60d   : > { %v10554_v36 = vadd.s32 4294967294, %v6424_v17  ;;  %v15577_v12 = vshrl.u32 %v6572_v62, 30  ;;  %v6156_v27 = vxor.u32 2147483648, %v15588_v25  ;;  %v6004_v43 = vxor.u32 2147483648, %v15592_v57 }
 0x60e   : > { %vm6000_vm11 = vcmp.eq.s32.totalorder %v5998_v18, 0  ;;  %vm6151_vm10 = vweird.f32 %v14910_v53  ;;  %vm6155_vm14 = vcmp.eq.s32.totalorder %v6153_v60, 0  ;;  %v6159_v6 = vxor.u32 2147483648, %v15594_v45 }
 0x60f   : > { %vm10555_vm2 = vcmp.lt.s32.totalorder %v10554_v36, 0  ;;  %v6574_v35 = vshll.u32 %v15577_v12, 30  ;;  %vm5996_vm1 = vweird.f32 %v14775_v59  ;;  %v6002_v55 = vsel %vm6000_vm11, %v15592_v57, %v6001_v61 }
 0x610   : > { %v6427_v8 = vsel %vm10555_vm2, 0, %v10554_v36  ;;  %vm6003_vm0 = vcmp.eq.s32.totalorder %v5998_v18, 2  ;;  %v6157_v37 = vsel %vm6155_vm14, %v15594_v45, %v6156_v27  ;;  %v6442_v28 = vsub.s32 4, %v15548_v23 }
 0x611   : > { %v6428_v13 = vsub.s32 32, %v6427_v8  ;;  %v6432_v50 = vsub.s32 4294967266, %v6427_v8  ;;  %v6575_v24 = vsub.s32 %v6571_v16, %v6574_v35  ;;  %v6429_v15 = vshll.u32 %v6420_v1, %v6427_v8 }
 0x612   : > { %vm5999_vm5 = vcmp.lt.s32.totalorder %v5998_v18, 2  ;;  %v6005_v51 = vsel %vm6003_vm0, %v6004_v43, %v15585_v3  ;;  %vm6154_vm4 = vcmp.lt.s32.totalorder %v6153_v60, 2  ;;  %vm6158_vm7 = vcmp.eq.s32.totalorder %v6153_v60, 2 }
 0x613   : > { %v6430_v42 = vshrl.u32 %v6412_v21, %v6428_v13  ;;  %v6433_v49 = vadd.s32 127, %v6432_v50  ;;  %vm6576_vm15 = vcmp.lt.s32.totalorder %v6575_v24, 0  ;;  %v6577_v34 = vsub.s32 0, %v6575_v24 }
 0x614   : > { %v6006_v31 = vsel %vm5999_vm5, %v6002_v55, %v6005_v51  ;;  %v6160_v16 = vsel %vm6158_vm7, %v6159_v6, %v15588_v25  ;;  %vm6320_vm6 = vcmp.lt.s32.totalorder %v15300_v26, 0  ;;  %v6567_v32 = vadd.s32 %v15551_v19, %v15546_v39 }
 0x615   : > { %v6431_v5 = vor.u32 %v6430_v42, %v6429_v15  ;;  %v6434_v29 = vshll.u32 %v6433_v49, 23  ;;  %v6578_v44 = vsel %vm6576_vm15, %v6577_v34, %v6575_v24  ;;  %v6161_v14 = vsel %vm6154_vm4, %v6157_v37, %v6160_v16 }
 0x616   : > { %v6579_v1 = vclz %v6578_v44  ;;  %v6443_v48 = vsel %vm6320_vm6, %v6442_v28, %v15548_v23  ;;  %v6007_v40 = vsel %vm5996_vm1, nan, %v6006_v31  ;;  %v16980_v4 = vand.u32 2147483647, %v15300_v26 }
 0x617   : > { %v6435_v63 = vor.u32 4788187, %v6434_v29  ;;  %v6438_v11 = vcvt.s32.f32 %v6431_v5  ;;  %v6597_v46 = vsub.s32 4, %v15577_v12  ;;  %v7097_v35 = vand.u32 3, %v16981_v20 }
 0x618   : > { %v10557_v54 = vadd.s32 4294967294, %v6579_v1  ;;  %vm6319_vm3 = vcmp.le.f32.partialorder %v16980_v4, 0.7853982  ;;  %v6162_v19 = vsel %vm6151_vm10, nan, %v6161_v14  ;;  %v16982_v49 = vand.u32 2147483647, %v15282_v2 }
 0x619   : > { %v6436_v0 = vand.u32 2147483647, %v6435_v63  ;;  %v15628_v50 = vsel %vm6319_vm3, 0, %v6443_v48  ;;  %v6787_v42 = vpack.c.bf16 %v6162_v19, %v6007_v40  ;;  %vm6475_vm12 = vcmp.lt.s32.totalorder %v15282_v2, 0 }
 0x61a   : > { %vm10558_vm13 = vcmp.lt.s32.totalorder %v10557_v54, 0  ;;  %vm15632_vm8 = vcmp.le.f32.partialorder %v16982_v49, 0.7853982  ;;  %vm7099_vm9 = vcmp.eq.s32.totalorder %v7097_v35, 0  ;;  %v6598_v63 = vsel %vm6475_vm12, %v6597_v46, %v15577_v12  ;;  %v16991_v49 = vld [vmem:[#allocation6_spill] sm:$0xff] }
 0x61b   : > { %v6439_v22 = vmul.f32 %v6438_v11, %v6436_v0  ;;  %v6582_v17 = vsel %vm10558_vm13, 0, %v10557_v54  ;;  %v6462_v1 = vadd.s32 3, %v15628_v50  ;;  %6795 = vst [vmem:[#allocation3 + $0x9c] sm:$0xff] %v6787_v42  ;;  %vm7098_vm2 = vcmp.lt.s32.totalorder %v7097_v35, 2  ;;  %v11356_v42 = vld [vmem:[%s16522_s12 + $0x210] sm:$0xff] }
 0x61c   : > { %v6583_v58 = vsub.s32 32, %v6582_v17  ;;  %v6587_v36 = vsub.s32 4294967266, %v6582_v17  ;;  %v6584_v21 = vshll.u32 %v6575_v24, %v6582_v17  ;;  %v7559_v24 = vand.u32 3, %v14476_v52  ;;  %9968 = vmatpush.bf16.msrb.mxu1 %v11356_v42 }
 0x61d   : > { %v6440_v62 = vxor.u32 2147483648, %v6439_v22  ;;  %v16985_v55 = vxor.u32 2147483648, %v14292_v30  ;;  %vm7102_vm15 = vcmp.eq.s32.totalorder %v7097_v35, 2  ;;  %v6600_v54 = vsel %vm15632_vm8, 0, %v6598_v63 }
 0x61e   : > { %v6585_v13 = vshrl.u32 %v6567_v32, %v6583_v58  ;;  %v6588_v39 = vadd.s32 127, %v6587_v36  ;;  %v16986_v51 = vxor.u32 2147483648, %v14318_v56  ;;  %vm7561_vm11 = vcmp.eq.s32.totalorder %v7559_v24, 0 }
 0x61f   : > { %v6441_v8 = vsel %vm6320_vm6, %v6440_v62, %v6439_v22  ;;  %v7101_v37 = vsel %vm7099_vm9, %v14318_v56, %v16985_v55  ;;  %v15651_v31 = vand.u32 3, %v15575_v9  ;;  %v15653_v17 = vand.u32 3, %v6462_v1 }
 0x620   : > { %v6444_v23 = vsel %vm6319_vm3, %v15300_v26, %v6441_v8  ;;  %v6586_v60 = vor.u32 %v6585_v13, %v6584_v21  ;;  %v6589_v15 = vshll.u32 %v6588_v39, 23  ;;  %v7104_v12 = vsel %vm7102_vm15, %v16986_v51, %v14292_v30  ;;  %v16988_v30 = vld [vmem:[#allocation4_spill] sm:$0xff] }
 0x621   : > { %v6446_v18 = vmul.f32 %v6444_v23, %v6444_v23  ;;  %v7105_v32 = vsel %vm7098_vm2, %v7101_v37, %v7104_v12  ;;  %v16987_v62 = vxor.u32 2147483648, %v14677_v41  ;;  %vm7564_vm14 = vcmp.eq.s32.totalorder %v7559_v24, 2  ;;  %v11371_v12 = vld [vmem:[%s16522_s12 + $0x288] sm:$0xff] }
 0x622   : > { %v6590_v44 = vor.u32 4788187, %v6589_v15  ;;  %v6593_v52 = vcvt.s32.f32 %v6586_v60  ;;  %v6617_v56 = vadd.s32 3, %v6600_v54  ;;  %vm16989_vm0 = vweird.f32 %v16988_v30  ;;  %v11397_v60 = vld [vmem:[%s16522_s12 + $0x358] sm:$0xff]  ;;  %v11348_v15 = vld [vmem:[%s16522_s12 + $0x1d0] sm:$0xff] }
 0x623   : > { %v6447_v5 = vmul.f32 -0.001358992, %v6446_v18  ;;  %v6454_v29 = vmul.f32 -0.00019511016, %v6446_v18  ;;  %v7563_v48 = vsel %vm7561_vm11, %v14670_v47, %v16987_v62  ;;  %v15660_v4 = vsel %vm16989_vm0, nan, %v7105_v32  ;;  %10062 = vmatpush.bf16.msra.mxu3 %v11397_v60  ;;  %9949 = vmatpush.bf16.msra.mxu2 %v11348_v15  ;;  %v17000_v60 = vld [vmem:[#allocation66_spill] sm:$0xff] }
 0x624   : > { %v6591_v28 = vand.u32 2147483647, %v6590_v44  ;;  %vm7560_vm5 = vcmp.lt.s32.totalorder %v7559_v24, 2  ;;  %v16990_v9 = vxor.u32 2147483648, %v14670_v47  ;;  %vm8023_vm4 = vcmp.eq.s32.totalorder %v15651_v31, 0  ;;  %v16992_v24 = vld [vmem:[#allocation8_spill] sm:$0xff] }
 0x625   : > { %v6448_v0 = vadd.f32 0.041655596, %v6447_v5  ;;  %v6455_v11 = vadd.f32 0.008332121, %v6454_v29  ;;  %vm8026_vm7 = vcmp.eq.s32.totalorder %v15651_v31, 2  ;;  %vm6465_vm13 = vcmp.eq.s32.totalorder %v15653_v17, 0 }
 0x626   : > { %v6594_v14 = vmul.f32 %v6593_v52, %v6591_v28  ;;  %v7566_v46 = vsel %vm7564_vm14, %v16990_v9, %v14677_v41  ;;  %vm6468_vm6 = vcmp.eq.s32.totalorder %v15653_v17, 2  ;;  %v15676_v47 = vand.u32 3, %v6600_v54  ;;  %v16993_v29 = vld [vmem:[#allocation5_spill] sm:$0xff]  ;;  %v11355_v28 = vld [vmem:[%s16522_s12 + $0x208] sm:$0xff] }
 0x627   : > { %v6449_v16 = vmul.f32 %v6448_v0, %v6446_v18  ;;  %v6456_v22 = vmul.f32 %v6455_v11, %v6446_v18  ;;  %v7567_v21 = vsel %vm7560_vm5, %v7563_v48, %v7566_v46  ;;  %vm6464_vm3 = vcmp.lt.s32.totalorder %v15653_v17, 2  ;;  %v11372_v0 = vld [vmem:[%s16522_s12 + $0x290] sm:$0xff]  ;;  %v11395_v9 = vld [vmem:[%s16522_s12 + $0x348] sm:$0xff]  ;;  %v11346_v46 = vld [vmem:[%s16522_s12 + $0x1c0] sm:$0xff]  ;;  %9969 = vmatpush.bf16.msrb.mxu1 %v11355_v28 }
 0x628   : > { %v6595_v40 = vxor.u32 2147483648, %v6594_v14  ;;  %v3499_v34 = vand.u32 3, %v16991_v49  ;;  %v15698_v5 = vand.u32 3, %v16992_v24  ;;  %v11396_v11 = vld [vmem:[%s16522_s12 + $0x350] sm:$0xff]  ;;  %10006 = vmatpush.bf16.msrb.mxu0 %v11372_v0  ;;  %vm8022_vm11 = vcmp.lt.s32.totalorder %v15651_v31, 2  ;;  %v11393_v28 = vld [vmem:[%s16522_s12 + $0x338] sm:$0xff] }
 0x629   : > { %v6450_v58 = vadd.f32 -0.4999988, %v6449_v16  ;;  %v6457_v36 = vadd.f32 -0.16666654, %v6456_v22  ;;  %v16995_v16 = vld [vmem:[#allocation7_spill] sm:$0xff]  ;;  %10063 = vmatpush.bf16.msra.mxu3 %v11396_v11  ;;  %vm17001_vm14 = vweird.f32 %v17000_v60  ;;  %v8025_v42 = vsel %vm8023_vm4, %v15594_v45, %v6156_v27 }
 0x62a   : > { %v6596_v8 = vsel %vm6475_vm12, %v6595_v40, %v6594_v14  ;;  %vm3500_vm12 = vcmp.lt.s32.totalorder %v3499_v34, 2  ;;  %vm3501_vm9 = vcmp.eq.s32.totalorder %v3499_v34, 0  ;;  %vm3504_vm2 = vcmp.eq.s32.totalorder %v3499_v34, 2  ;;  %v16997_v14 = vld [vmem:[#allocation9_spill] sm:$0xff]  ;;  %v15797_v17 = vld [vmem:[%s16523_s13] ss:$0 sm:$0xff] }
 0x62b   : > { %v6451_v20 = vmul.f32 %v6450_v58, %v6446_v18  ;;  %v6458_v35 = vmul.f32 %v6457_v36, %v6446_v18  ;;  %v15674_v13 = vsel %vm15632_vm8, %v15282_v2, %v6596_v8  ;;  %v15685_v18 = vand.u32 3, %v6617_v56  ;;  %v16999_v58 = vld [vmem:[#allocation29_spill] sm:$0xff]  ;;  %v11354_v8 = vld [vmem:[%s16522_s12 + $0x200] sm:$0xff] }
 0x62c   : > { %v15683_v19 = vmul.f32 %v15674_v13, %v15674_v13  ;;  %vm16994_vm8 = vweird.f32 %v16993_v29  ;;  %v16996_v22 = vxor.u32 2147483648, %v16995_v16  ;;  %v16998_v62 = vxor.u32 2147483648, %v16997_v14  ;;  %10007 = vmatpush.bf16.msrb.mxu0 %v11371_v12  ;;  %v11263_v27 = vld [vmem:[#allocation3 + $0x1c] sm:$0xf]  ;;  %9970 = vmatpush.bf16.msrb.mxu1 %v11354_v8 }
 0x62d   : > { %v15678_v41 = vadd.f32 1.0, %v6451_v20  ;;  %v6459_v39 = vadd.f32 1.0, %v6458_v35  ;;  %v15702_v44 = vsel %vm16994_vm8, nan, %v7567_v21  ;;  %vm3963_vm15 = vcmp.eq.s32.totalorder %v15698_v5, 0  ;;  %v9820_v35 = vpop.f32.mrf.mxu1  ;;  %v11370_v21 = vld [vmem:[%s16522_s12 + $0x280] sm:$0xff]  ;;  %10064 = vmatpush.bf16.msra.mxu3 %v11395_v9  ;;  %v17009_v9 = vld [vmem:[#allocation40_spill] sm:$0xff] }
 0x62e   : > { %v6602_v55 = vmul.f32 -0.001358992, %v15683_v19  ;;  %v6609_v37 = vmul.f32 -0.00019511016, %v15683_v19  ;;  %v3503_v32 = vsel %vm3501_vm9, %v16997_v14, %v16996_v22  ;;  %v3506_v48 = vsel %vm3504_vm2, %v16998_v62, %v16995_v16  ;;  %v11272_v22 = vld [vmem:[#allocation3 + $0x60] sm:$0xf0] }
 0x62f   : > { %v15704_v63 = vmul.f32 %v6459_v39, %v6444_v23  ;;  %v6469_v1 = vxor.u32 2147483648, %v15678_v41  ;;  %v11347_v23 = vld [vmem:[%s16522_s12 + $0x1c8] sm:$0xff]  ;;  %v15733_v36 = vand.u32 3, %v16999_v58  ;;  %v3507_v20 = vsel %vm3500_vm12, %v3503_v32, %v3506_v48  ;;  %v10626_v39 = vld [vmem:[#allocation3 + $0x54] sm:$0xf0] }
 0x630   : > { %v6603_v54 = vadd.f32 0.041655596, %v6602_v55  ;;  %v6610_v51 = vadd.f32 0.008332121, %v6609_v37  ;;  %9950 = vmatpush.bf16.msra.mxu2 %v11347_v23  ;;  %v3508_v15 = vsel %vm17001_vm14, nan, %v3507_v20  ;;  %vm3962_vm0 = vcmp.lt.s32.totalorder %v15698_v5, 2  ;;  %10008 = vmatpush.bf16.msrb.mxu0 %v11370_v21 }
 0x631   : > { %v6466_v52 = vxor.u32 2147483648, %v15704_v63  ;;  %v8028_v49 = vsel %vm8026_vm7, %v6159_v6, %v15588_v25  ;;  %vm6461_vm5 = vweird.f32 %v15300_v26  ;;  %v6470_v34 = vsel %vm6468_vm6, %v6469_v1, %v15704_v63  ;;  %v17002_v55 = vld [vmem:[#allocation10_spill] sm:$0xff]  ;;  %v17004_v37 = vld [vmem:[#allocation11_spill] sm:$0xff]  ;;  %v11385_v23 = vld [vmem:[%s16522_s12 + $0x2f8] sm:$0xff]  ;;  %10039 = vmatpush.bf16.msra.mxu1 %v11393_v28 }
 0x632   : > { %v6604_v56 = vmul.f32 %v6603_v54, %v15683_v19  ;;  %v6611_v30 = vmul.f32 %v6610_v51, %v15683_v19  ;;  %v17003_v45 = vxor.u32 2147483648, %v17002_v55  ;;  %vm6620_vm4 = vcmp.eq.s32.totalorder %v15685_v18, 0  ;;  %v17006_v32 = vld [vmem:[#allocation49_spill] sm:$0xff] }
 0x633   : > { %v6467_v40 = vsel %vm6465_vm13, %v15678_v41, %v6466_v52  ;;  %vm6623_vm13 = vcmp.eq.s32.totalorder %v15685_v18, 2  ;;  %v10629_v0 = vor.u32 %v11263_v27, %v10626_v39  ;;  %vm3966_vm7 = vcmp.eq.s32.totalorder %v15698_v5, 2  ;;  %v17011_v5 = vld [vmem:[#allocation19_spill] sm:$0xff]  ;;  %v11405_v26 = vld [vmem:[%s16522_s12 + $0x398] sm:$0xff] }
 0x634   : > { %v6605_v24 = vadd.f32 -0.4999988, %v6604_v56  ;;  %v6612_v29 = vadd.f32 -0.16666654, %v6611_v30  ;;  %v3965_v25 = vsel %vm3963_vm15, %v17004_v37, %v17003_v45  ;;  %v6471_v6 = vsel %vm6464_vm3, %v6467_v40, %v6470_v34  ;;  %9951 = vmatpush.bf16.msra.mxu2 %v11346_v46  ;;  %v17007_v40 = vld [vmem:[#allocation67_spill] sm:$0xff] }
 0x635   : > { %v4896_v11 = vpack.c.bf16 %v3508_v15, %v3508_v15  ;;  %vm6619_vm6 = vcmp.lt.s32.totalorder %v15685_v18, 2  ;;  %v17005_v12 = vxor.u32 2147483648, %v17004_v37  ;;  %vm6944_vm3 = vcmp.lt.s32.totalorder %v15733_v36, 2  ;;  %v10640_v30 = vld [vmem:[#allocation3 + $0x28] sm:$0xf] }
 0x636   : > { %v6606_v54 = vmul.f32 %v6605_v24, %v15683_v19  ;;  %v6613_v51 = vmul.f32 %v6612_v29, %v15683_v19  ;;  %vm6616_vm8 = vweird.f32 %v15282_v2  ;;  %v11394_v19 = vld [vmem:[%s16522_s12 + $0x340] sm:$0xff]  ;;  %vm6945_vm12 = vcmp.eq.s32.totalorder %v15733_v36, 0  ;;  %v17013_v29 = vld [vmem:[#allocation45_spill] sm:$0xff] }
 0x637   : > { %v3968_v16 = vsel %vm3966_vm7, %v17005_v12, %v17002_v55  ;;  %4904 = vst [vmem:[#allocation3 + $0x20] sm:$0xf] %v4896_v11  ;;  %vm6948_vm9 = vcmp.eq.s32.totalorder %v15733_v36, 2  ;;  %v7405_v62 = vand.u32 3, %v17006_v32  ;;  %vm17008_vm2 = vweird.f32 %v17007_v40  ;;  %9952 = vmatmul.bf16.vlgmr.msra.gmra.mxu2 %v10629_v0  ;;  %v17015_v55 = vld [vmem:[#allocation53_spill] sm:$0xff]  ;;  %10065 = vmatpush.bf16.msra.mxu3 %v11394_v19  ;;  %v17019_v12 = vld [vmem:[#allocation14_spill] sm:$0xff] }
 0x638   : > { %v3969_v14 = vsel %vm3962_vm0, %v3965_v25, %v3968_v16  ;;  %v15812_v48 = vadd.f32 1.0, %v6606_v54  ;;  %v6614_v58 = vadd.f32 1.0, %v6613_v51  ;;  %v17010_v46 = vxor.u32 2147483648, %v17009_v9  ;;  %10020 = vmatpush.bf16.msrb.mxu2 %v11385_v23  ;;  %v17016_v25 = vld [vmem:[#allocation32_spill] sm:$0xff]  ;;  %v9822_v51 = vpop.f32.mrf.mxu1  ;;  %v17020_v19 = vld [vmem:[#allocation37_spill] sm:$0xff] }
 0x639   : > { %v3970_v56 = vsel %vm17008_vm2, nan, %v3969_v14  ;;  %vm8485_vm15 = vcmp.eq.s32.totalorder %v15676_v47, 0  ;;  %v10641_v60 = vor.u32 %v11272_v22, %v10640_v30  ;;  %v17012_v15 = vxor.u32 2147483648, %v17011_v5  ;;  %v11384_v54 = vld [vmem:[%s16522_s12 + $0x2f0] sm:$0xff] }
 0x63a   : > { %v6947_v20 = vsel %vm6945_vm12, %v17011_v5, %v17010_v46  ;;  %v4898_v39 = vpack.c.bf16 %v3970_v56, %v3970_v56  ;;  %vm7407_vm14 = vcmp.eq.s32.totalorder %v7405_v62, 0  ;;  %v15824_v8 = vmul.f32 %v6614_v58, %v15674_v13  ;;  %v17022_v58 = vld [vmem:[#allocation51_spill] sm:$0xff] }
 0x63b   : > { %v6950_v34 = vsel %vm6948_vm9, %v17012_v15, %v17009_v9  ;;  %v6624_v21 = vxor.u32 2147483648, %v15812_v48  ;;  %v17014_v27 = vxor.u32 2147483648, %v17013_v29  ;;  %v9821_v37 = vadd.f32 %v15797_v17, %v9820_v35  ;;  %10009 = vmatmul.bf16.vlgmr.msrb.gmra.mxu0 %v10641_v60  ;;  %v11383_v9 = vld [vmem:[%s16522_s12 + $0x2e8] sm:$0xff]  ;;  %v17023_v60 = vld [vmem:[#allocation18_spill] sm:$0xff] }
 0x63c   : > { %v6951_v24 = vsel %vm6944_vm3, %v6947_v20, %v6950_v34  ;;  %4906 = vst [vmem:[#allocation3 + $0x5c] sm:$0xf] %v4898_v39  ;;  %vm17017_vm0 = vweird.f32 %v17016_v25  ;;  %vm7410_vm7 = vcmp.eq.s32.totalorder %v7405_v62, 2  ;;  %v15837_v13 = vsel %vm8022_vm11, %v8025_v42, %v8028_v49  ;;  %v9839_v49 = vpop.f32.mrf.mxu3  ;;  %10021 = vmatpush.bf16.msrb.mxu2 %v11384_v54  ;;  %v11391_v46 = vld [vmem:[%s16522_s12 + $0x328] sm:$0xff]  ;;  %v17025_v34 = vld [vmem:[#allocation21_spill] sm:$0xff] }
 0x63d   : > { %v7409_v45 = vsel %vm7407_vm14, %v17015_v55, %v17014_v27  ;;  %v6952_v11 = vsel %vm17017_vm0, nan, %v6951_v24  ;;  %v6621_v36 = vxor.u32 2147483648, %v15824_v8  ;;  %vm7406_vm3 = vcmp.lt.s32.totalorder %v7405_v62, 2  ;;  %v9858_v62 = vpop.f32.mrf.mxu0 }
 0x63e   : > { %v17018_v0 = vxor.u32 2147483648, %v17015_v55  ;;  %v8647_v35 = vpack.c.bf16 %v15660_v4, %v6952_v11  ;;  %v6472_v28 = vsel %vm6461_vm5, nan, %v6471_v6  ;;  %v6625_v31 = vsel %vm6623_vm13, %v6624_v21, %v15824_v8  ;;  %v11392_v4 = vld [vmem:[%s16522_s12 + $0x330] sm:$0xff]  ;;  %v11409_v6 = vld [vmem:[%s16522_s12 + $0x3b8] sm:$0xff]  ;;  %v10632_v18 = vld [vmem:[#allocation3 + $0x20] sm:$0xf] }
 0x63f   : > { %v4423_v16 = vand.u32 3, %v17019_v12  ;;  %v6622_v22 = vsel %vm6620_vm4, %v15812_v48, %v6621_v36  ;;  %vm17021_vm11 = vweird.f32 %v17020_v19  ;;  %v9840_v32 = vadd.f32 %v9839_v49, %v9821_v37  ;;  %10040 = vmatpush.bf16.msra.mxu1 %v11392_v4  ;;  %10077 = vmatpush.bf16.msra.mxu0 %v11409_v6  ;;  %v11382_v11 = vld [vmem:[%s16522_s12 + $0x2e0] sm:$0xff]  ;;  %v17030_v49 = vld [vmem:[#allocation13_spill] sm:$0xff] }
 0x640   : > { %v7412_v23 = vsel %vm7410_vm7, %v17018_v0, %v17013_v29  ;;  %8655 = vst [vmem:[#allocation3 + $0x30] sm:$0xff] %v8647_v35  ;;  %v4885_v40 = vand.u32 3, %v17022_v58  ;;  %v6626_v56 = vsel %vm6619_vm6, %v6622_v22, %v6625_v31  ;;  %v7867_v5 = vand.u32 3, %v15571_v10  ;;  %10022 = vmatpush.bf16.msrb.mxu2 %v11383_v9  ;;  %v9825_v12 = vpop.f32.mrf.mxu1 }
 0x641   : > { %v7413_v42 = vsel %vm7406_vm3, %v7409_v45, %v7412_v23  ;;  %vm4425_vm13 = vcmp.eq.s32.totalorder %v4423_v16, 0  ;;  %v6627_v20 = vsel %vm6616_vm8, nan, %v6626_v56  ;;  %v15879_v39 = vadd.f32 %v9858_v62, %v9840_v32  ;;  %v17027_v23 = vld [vmem:[#allocation24_spill] sm:$0xff] }
 0x642   : > { %v7414_v14 = vsel %vm17021_vm11, nan, %v7413_v42  ;;  %vm4424_vm4 = vcmp.lt.s32.totalorder %v4423_v16, 2  ;;  %v17024_v15 = vxor.u32 2147483648, %v17023_v60  ;;  %vm8484_vm6 = vcmp.lt.s32.totalorder %v15676_v47, 2  ;;  %v11407_v42 = vld [vmem:[%s16522_s12 + $0x3a8] sm:$0xff] }
 0x643   : > { %v8649_v30 = vpack.c.bf16 %v15702_v44, %v7414_v14  ;;  %v11408_v44 = vld [vmem:[%s16522_s12 + $0x3b0] sm:$0xff]  ;;  %v6789_v29 = vpack.c.bf16 %v6627_v20, %v6472_v28  ;;  %v9823_v10 = vadd.f32 %v15797_v17, %v9822_v51  ;;  %vm4428_vm12 = vcmp.eq.s32.totalorder %v4423_v16, 2  ;;  %v11271_v55 = vld [vmem:[#allocation3 + $0x58] sm:$0xf0]  ;;  %10041 = vmatpush.bf16.msra.mxu1 %v11391_v46 }
 0x644   : > { %v4427_v24 = vsel %vm4425_vm13, %v17025_v34, %v17024_v15  ;;  %v8487_v27 = vsel %vm8485_vm15, %v15812_v48, %v6621_v36  ;;  %v17026_v45 = vxor.u32 2147483648, %v17025_v34  ;;  %vm4886_vm9 = vcmp.lt.s32.totalorder %v4885_v40, 2  ;;  %v11390_v36 = vld [vmem:[%s16522_s12 + $0x320] sm:$0xff]  ;;  %v17029_v28 = vld [vmem:[#allocation56_spill] sm:$0xff]  ;;  %10078 = vmatpush.bf16.msra.mxu0 %v11408_v44  ;;  %v9841_v6 = vpop.f32.mrf.mxu3  ;;  %10023 = vmatpush.bf16.msrb.mxu2 %v11382_v11  ;;  %v11387_v11 = vld [vmem:[%s16522_s12 + $0x308] sm:$0xff] }
 0x645   : > { %8657 = vst [vmem:[#allocation3 + $0x6c] sm:$0xff] %v8649_v30  ;;  %vm4887_vm2 = vcmp.eq.s32.totalorder %v4885_v40, 0  ;;  %vm4890_vm14 = vcmp.eq.s32.totalorder %v4885_v40, 2  ;;  %v10633_v25 = vor.u32 %v11271_v55, %v10632_v18  ;;  %v17028_v35 = vxor.u32 2147483648, %v17027_v23  ;;  %v11278_v16 = vld [vmem:[#allocation3 + $0x94] sm:$0xf]  ;;  %v9860_v58 = vpop.f32.mrf.mxu0 }
 0x646   : > { %v4430_v37 = vsel %vm4428_vm12, %v17026_v45, %v17023_v60  ;;  %6797 = vst [vmem:[#allocation3 + $0xd8] sm:$0xff] %v6789_v29  ;;  %vm17031_vm15 = vweird.f32 %v17030_v49  ;;  %v17032_v51 = vxor.u32 2147483648, %v17029_v28  ;;  %vm7868_vm0 = vcmp.lt.s32.totalorder %v7867_v5, 2  ;;  %v10686_v56 = vld [vmem:[#allocation3 + $0xcc] sm:$0xf0]  ;;  %v11406_v60 = vld [vmem:[%s16522_s12 + $0x3a0] sm:$0xff] }
 0x647   : > { %v4431_v0 = vsel %vm4424_vm4, %v4427_v24, %v4430_v37  ;;  %v4889_v31 = vsel %vm4887_vm2, %v17029_v28, %v17028_v35  ;;  %vm7869_vm7 = vcmp.eq.s32.totalorder %v7867_v5, 0  ;;  %9971 = vmatmul.bf16.vlgmr.msrb.gmra.mxu1 %v10633_v25  ;;  %vm7872_vm3 = vcmp.eq.s32.totalorder %v7867_v5, 2  ;;  %v17033_v30 = vld [vmem:[#allocation12_spill] sm:$0xff]  ;;  %v10700_v44 = vld [vmem:[#allocation3 + $0xa0] sm:$0xf]  ;;  %v11379_v25 = vld [vmem:[%s16522_s12 + $0x2c8] sm:$0xff] }
 0x648   : > { %v4432_v54 = vsel %vm17031_vm15, nan, %v4431_v0  ;;  %v4892_v4 = vsel %vm4890_vm14, %v17032_v51, %v17027_v23  ;;  %v7871_v14 = vsel %vm7869_vm7, %v15592_v57, %v6001_v61  ;;  %v9842_v32 = vadd.f32 %v9841_v6, %v9823_v10  ;;  %10042 = vmatpush.bf16.msra.mxu1 %v11390_v36  ;;  %v11381_v61 = vld [vmem:[%s16522_s12 + $0x2d8] sm:$0xff]  ;;  %10079 = vmatpush.bf16.msra.mxu0 %v11407_v42  ;;  %v11404_v23 = vld [vmem:[%s16522_s12 + $0x390] sm:$0xff]  ;;  %v11378_v42 = vld [vmem:[%s16522_s12 + $0x2c0] sm:$0xff] }
 0x649   : > { %v4893_v22 = vsel %vm4886_vm9, %v4889_v31, %v4892_v4  ;;  %v4900_v19 = vpack.c.bf16 %v4432_v54, %v4432_v54  ;;  %v9826_v62 = vadd.f32 %v15797_v17, %v9825_v12  ;;  %vm17034_vm11 = vweird.f32 %v17033_v30  ;;  %v11389_v17 = vld [vmem:[%s16522_s12 + $0x318] sm:$0xff]  ;;  %10024 = vmatpush.bf16.msrb.mxu2 %v11381_v61  ;;  %v11386_v49 = vld [vmem:[%s16522_s12 + $0x300] sm:$0xff]  ;;  %v11403_v51 = vld [vmem:[%s16522_s12 + $0x388] sm:$0xff] }
 0x64a   : > { %v4894_v9 = vsel %vm17034_vm11, nan, %v4893_v22  ;;  %v7874_v46 = vsel %vm7872_vm3, %v6004_v43, %v15585_v3  ;;  %v8329_v18 = vand.u32 3, %v15628_v50  ;;  %vm8488_vm13 = vcmp.eq.s32.totalorder %v15676_v47, 2  ;;  %v11279_v57 = vld [vmem:[#allocation3 + $0x9c] sm:$0xf] }
 0x64b   : > { %v4902_v40 = vpack.c.bf16 %v4894_v9, %v4894_v9  ;;  %4908 = vst [vmem:[#allocation3 + $0x98] sm:$0xf] %v4900_v19  ;;  %v7875_v20 = vsel %vm7868_vm0, %v7871_v14, %v7874_v46  ;;  %v15932_v3 = vadd.f32 %v9860_v58, %v9842_v32  ;;  %v10689_v43 = vor.u32 %v11278_v16, %v10686_v56  ;;  %v11266_v19 = vld [vmem:[#allocation3 + $0x34] sm:$0xf] }
 0x64c   : > { %v7876_v15 = vsel %vm5996_vm1, nan, %v7875_v20  ;;  %v8490_v5 = vsel %vm8488_vm13, %v6624_v21, %v15824_v8  ;;  %v8030_v50 = vsel %vm6151_vm10, nan, %v15837_v13  ;;  %vm8331_vm4 = vcmp.eq.s32.totalorder %v8329_v18, 0  ;;  %10043 = vmatpush.bf16.msra.mxu1 %v11389_v17  ;;  %10080 = vmatpush.bf16.msra.mxu0 %v11406_v60  ;;  %v10650_v16 = vld [vmem:[#allocation3 + $0x6c] sm:$0xf0] }
 0x64d   : > { %4910 = vst [vmem:[#allocation3 + $0xd4] sm:$0xf] %v4902_v40  ;;  %vm8334_vm12 = vcmp.eq.s32.totalorder %v8329_v18, 2  ;;  %v8491_v34 = vsel %vm8484_vm6, %v8487_v27, %v8490_v5  ;;  %v10694_v24 = vld [vmem:[#allocation3 + $0xd4] sm:$0xf0]  ;;  %9957 = vmatmul.bf16.gmra.mxu2 %v10689_v43  ;;  %vm8330_vm9 = vcmp.lt.s32.totalorder %v8329_v18, 2  ;;  %v8333_v59 = vsel %vm8331_vm4, %v15678_v41, %v6466_v52  ;;  %v9844_v27 = vpop.f32.mrf.mxu3  ;;  %v9863_v37 = vpop.f32.mrf.mxu0 }
 0x64e   : > { %v11287_v29 = vld [vmem:[#allocation3 + $0xd8] sm:$0xf0]  ;;  %v8336_v48 = vsel %vm8334_vm12, %v6469_v1, %v15704_v63  ;;  %v8651_v8 = vpack.c.bf16 %v8030_v50, %v7876_v15  ;;  %v10697_v53 = vor.u32 %v11279_v57, %v10694_v24  ;;  %v8492_v10 = vsel %vm6616_vm8, nan, %v8491_v34  ;;  %v11380_v41 = vld [vmem:[%s16522_s12 + $0x2d0] sm:$0xff] }
 0x64f   : > { %v10701_v21 = vor.u32 %v11287_v29, %v10700_v44  ;;  %v8337_v13 = vsel %vm8330_vm9, %v8333_v59, %v8336_v48  ;;  %v11388_v63 = vld [vmem:[%s16522_s12 + $0x310] sm:$0xff]  ;;  %v9845_v45 = vadd.f32 %v9844_v27, %v9826_v62  ;;  %10025 = vmatpush.bf16.msrb.mxu2 %v11380_v41  ;;  %v10653_v32 = vor.u32 %v11266_v19, %v10650_v16 }
 0x650   : > { %v8338_v47 = vsel %vm6461_vm5, nan, %v8337_v13  ;;  %8659 = vst [vmem:[#allocation3 + $0xa8] sm:$0xff] %v8651_v8  ;;  %9995 = vmatmul.bf16.gmra.mxu3 %v10697_v53  ;;  %v11464_v1 = vld [vmem:[#allocation2 + $0x10] sm:$0xff]  ;;  %10044 = vmatpush.bf16.msra.mxu1 %v11388_v63  ;;  %v17035_v46 = vmov 2131351028  }
 0x651   : > { %10014 = vmatmul.bf16.gmra.mxu0 %v10701_v21  ;;  %v8653_v52 = vpack.c.bf16 %v8492_v10, %v8338_v47  ;;  %v15966_v2 = vmul.f32 2.0, %v11464_v1  ;;  %v15974_v0 = vadd.f32 %v9863_v37, %v9845_v45  ;;  %v17036_v61 = vmov 2102212464  }
 0x652   : > { %v10692_v55 = vld [vmem:[#allocation3 + $0x98] sm:$0xf]  ;;  %10081 = vmatpush.bf16.msra.mxu0 %v11405_v26  ;;  %v17037_v20 = vmov 920167782   ;;  %v17038_v15 = vmov 1326507024  }
 0x653   : > { %8661 = vst [vmem:[#allocation3 + $0xe4] sm:$0xff] %v8653_v52  ;;  %v5236_v35 = vand.u32 2139095040, %v15966_v2  ;;  %10026 = vmatpush.bf16.msrb.mxu2 %v11379_v25  ;;  %v5233_v54 = vand.u32 2147483647, %v15966_v2 }
 0x654   : > { %v11286_v36 = vld [vmem:[#allocation3 + $0xd0] sm:$0xf0]  ;;  %10045 = vmatpush.bf16.msra.mxu1 %v11387_v11  ;;  %v11465_v11 = vld [vmem:[#allocation2 + $0x28] sm:$0xff] }
 0x655   : > { %v10693_v28 = vor.u32 %v11286_v36, %v10692_v55  ;;  %v5237_v31 = vshrl.u32 %v5236_v35, 23  ;;  %v5240_v12 = vand.u32 8388607, %v5233_v54  ;;  %v16029_v36 = vmul.f32 2.0, %v11465_v11 }
 0x656   : > { %10082 = vmatpush.bf16.msra.mxu0 %v11404_v23 }
 0x657   : > { %v10532_v4 = vadd.s32 4294967169, %v5237_v31  ;;  %9976 = vmatmul.bf16.gmra.mxu1 %v10693_v28  ;;  %10027 = vmatpush.bf16.msrb.mxu2 %v11378_v42  ;;  %v5241_v62 = vor.u32 8388608, %v5240_v12  ;;  %v11281_v37 = vld [vmem:[#allocation3 + $0xac] sm:$0xf] }
 0x658   : > { %10046 = vmatpush.bf16.msra.mxu1 %v11386_v49 }
 0x659   : > { %v5243_v6 = vadd.s32 1, %v10532_v4  ;;  %v16005_v50 = vshll.u32 %v5241_v62, 8 }
 0x65a   : > { %10083 = vmatpush.bf16.msra.mxu0 %v11403_v51  ;;  %v10710_v31 = vld [vmem:[#allocation3 + $0xe4] sm:$0xf0] }
 0x65b   : > { %vm5244_vm10 = vcmp.gt.s32.totalorder %v5243_v6, 0  ;;  %v5282_v52 = vand.u32 65535, %v16005_v50  ;;  %v5283_v27 = vshrl.u32 %v16005_v50, 16 }
 0x65c   : > { %v5245_v22 = vsel %vm5244_vm10, %v5243_v6, 0  ;;  %v10713_v6 = vor.u32 %v11281_v37, %v10710_v31  ;;  %vm5235_vm10 = vcmp.lt.s32.totalorder %v15966_v2, 0 }
 0x65d   : > { %v5247_v14 = vand.u32 31, %v5245_v22  ;;  %v15992_v58 = vshrl.u32 %v5245_v22, 5 }
 0x65f   : > { %v5248_v56 = vsub.s32 32, %v5247_v14  ;;  %v5250_v30 = vshll.u32 %v16753_v7, %v5247_v14  ;;  %v5253_v9 = vshll.u32 %v16763_v38, %v5247_v14  ;;  %v5256_v40 = vshll.u32 %v17035_v46, %v5247_v14 }
 0x660   : > { %10066 = vmatmul.bf16.vlgmr.msra.gmra.mxu3 %v10653_v32  ;;  %v5259_v17 = vshll.u32 %v17036_v61, %v5247_v14  ;;  %v5262_v18 = vshll.u32 %v17037_v20, %v5247_v14  ;;  %vm5265_vm1 = vcmp.lt.s32.totalorder %v15992_v58, 1  ;;  %vm5268_vm5 = vcmp.lt.s32.totalorder %v15992_v58, 4 }
 0x661   : > { %v5251_v57 = vshrl.u32 %v16763_v38, %v5248_v56  ;;  %v5254_v43 = vshrl.u32 %v17035_v46, %v5248_v56  ;;  %v5257_v44 = vshrl.u32 %v17036_v61, %v5248_v56  ;;  %v5260_v60 = vshrl.u32 %v17037_v20, %v5248_v56 }
 0x662   : > { %v5263_v5 = vshrl.u32 %v17038_v15, %v5248_v56  ;;  %vm5267_vm8 = vcmp.lt.s32.totalorder %v15992_v58, 3  ;;  %vm5266_vm6 = vcmp.lt.s32.totalorder %v15992_v58, 2  ;;  %v5249_v25 = vshrl.u32 %v16753_v7, %v5248_v56 }
 0x663   : > { %v5252_v34 = vor.u32 %v5251_v57, %v5250_v30  ;;  %v5255_v24 = vor.u32 %v5254_v43, %v5253_v9  ;;  %v5258_v29 = vor.u32 %v5257_v44, %v5256_v40  ;;  %v5261_v59 = vor.u32 %v5260_v60, %v5259_v17 }
 0x664   : > { %v5264_v48 = vor.u32 %v5263_v5, %v5262_v18  ;;  %v5701_v9 = vand.u32 2139095040, %v16029_v36 }
 0x665   : > { %v5273_v8 = vsel %vm5265_vm1, %v5252_v34, %v5255_v24  ;;  %v5277_v53 = vsel %vm5265_vm1, %v5255_v24, %v5258_v29  ;;  %v5274_v21 = vsel %vm5268_vm5, %v5261_v59, 920167782  ;;  %v5270_v42 = vsel %vm5268_vm5, %v5258_v29, 2102212464 }
 0x666   : > { %v5278_v13 = vsel %vm5268_vm5, %v5264_v48, 1326507024  ;;  %v5275_v47 = vsel %vm5267_vm8, %v5258_v29, %v5274_v21  ;;  %v5269_v19 = vsel %vm5265_vm1, %v5249_v25, %v5252_v34  ;;  %v5271_v56 = vsel %vm5267_vm8, %v5255_v24, %v5270_v42 }
 0x667   : > { %v5279_v10 = vsel %vm5267_vm8, %v5261_v59, %v5278_v13  ;;  %v5276_v41 = vsel %vm5266_vm6, %v5273_v8, %v5275_v47  ;;  %v5702_v44 = vshrl.u32 %v5701_v9, 23 }
 0x668   : > { %v5280_v63 = vsel %vm5266_vm6, %v5277_v53, %v5279_v10  ;;  %v5306_v55 = vand.u32 65535, %v5276_v41  ;;  %v5307_v45 = vshrl.u32 %v5276_v41, 16  ;;  %v5272_v10 = vsel %vm5266_vm6, %v5269_v19, %v5271_v56 }
 0x669   : > { %v5284_v26 = vand.u32 65535, %v5280_v63  ;;  %v5285_v1 = vshrl.u32 %v5280_v63, 16  ;;  %v10541_v48 = vadd.s32 4294967169, %v5702_v44  ;;  %vm16122_vm6 = vcmp.le.f32.partialorder %v5233_v54, 0.7853982 }
 0x66a   : > { %v5308_v49 = vmul.u32 %v5306_v55, %v5282_v52  ;;  %v5309_v51 = vmul.u32 %v5307_v45, %v5282_v52  ;;  %v5310_v4 = vmul.u32 %v5306_v55, %v5283_v27  ;;  %v5311_v14 = vmul.u32 %v5307_v45, %v5283_v27 }
 0x66b   : > { %v5286_v23 = vmul.u32 %v5284_v26, %v5282_v52  ;;  %v5287_v35 = vmul.u32 %v5285_v1, %v5282_v52  ;;  %v5288_v28 = vmul.u32 %v5284_v26, %v5283_v27  ;;  %v5289_v12 = vmul.u32 %v5285_v1, %v5283_v27 }
 0x66c   : > { %v5312_v32 = vshll.u32 %v5309_v51, 16  ;;  %v5314_v62 = vshll.u32 %v5310_v4, 16  ;;  %v5313_v5 = vshrl.u32 %v5309_v51, 16  ;;  %v5315_v8 = vshrl.u32 %v5310_v4, 16 }
 0x66d   : > { %v5290_v16 = vshll.u32 %v5287_v35, 16  ;;  %v5292_v22 = vshll.u32 %v5288_v28, 16  ;;  %v5291_v40 = vshrl.u32 %v5287_v35, 16  ;;  %v5293_v24 = vshrl.u32 %v5288_v28, 16 }
 0x66e   : > { %vm5316_vm14 = vc.u32 %v5308_v49, %v5312_v32  ;;  %v5318_v18 = vadd.s32 %v5312_v32, %v5308_v49  ;;  %v5708_v47 = vadd.s32 1, %v10541_v48  ;;  %v5326_v26 = vmul.u32 %v16005_v50, %v5272_v10 }
 0x66f   : > { %vm5294_vm2 = vc.u32 %v5286_v23, %v5290_v16  ;;  %v5296_v30 = vadd.s32 %v5290_v16, %v5286_v23  ;;  %v5317_v43 = vsel %vm5316_vm14, 1, %v16766_v33  ;;  %v5698_v45 = vand.u32 2147483647, %v16029_v36 }
 0x670   : > { %10071 = vmatmul.bf16.gmra.mxu3 %v10713_v6  ;;  %v5295_v17 = vsel %vm5294_vm2, 1, %v16766_v33  ;;  %v5319_v34 = vadd.s32 %v5317_v43, %v5311_v14  ;;  %vm5320_vm0 = vc.u32 %v5318_v18, %v5314_v62  ;;  %v16042_v13 = vadd.s32 %v5318_v18, %v5314_v62 }
 0x671   : > { %v5297_v57 = vadd.s32 %v5295_v17, %v5289_v12  ;;  %vm5298_vm15 = vc.u32 %v5296_v30, %v5292_v22  ;;  %v5321_v59 = vsel %vm5320_vm0, 1, %v16766_v33  ;;  %vm5709_vm7 = vcmp.gt.s32.totalorder %v5708_v47, 0 }
 0x672   : > { %v5299_v60 = vsel %vm5298_vm15, 1, %v16766_v33  ;;  %v5323_v53 = vadd.s32 %v5321_v59, %v5319_v34  ;;  %v5710_v63 = vsel %vm5709_vm7, %v5708_v47, 0  ;;  %v5705_v23 = vand.u32 8388607, %v5698_v45 }
 0x673   : > { %v5301_v29 = vadd.s32 %v5299_v60, %v5297_v57  ;;  %v5712_v1 = vand.u32 31, %v5710_v63  ;;  %v16057_v35 = vshrl.u32 %v5710_v63, 5 }
 0x674   : > { %v5324_v52 = vadd.s32 %v5323_v53, %v5313_v5  ;;  %v5706_v4 = vor.u32 8388608, %v5705_v23 }
 0x675   : > { %v5302_v21 = vadd.s32 %v5301_v29, %v5291_v40  ;;  %v16052_v37 = vsub.s32 32, %v5712_v1  ;;  %v5724_v58 = vshll.u32 %v17036_v61, %v5712_v1  ;;  %v5715_v50 = vshll.u32 %v16753_v7, %v5712_v1 }
 0x676   : > { %v5325_v41 = vadd.s32 %v5324_v52, %v5315_v8  ;;  %v5718_v31 = vshll.u32 %v16763_v38, %v5712_v1  ;;  %v5721_v49 = vshll.u32 %v17035_v46, %v5712_v1  ;;  %v5727_v19 = vshll.u32 %v17037_v20, %v5712_v1 }
 0x677   : > { %v16046_v27 = vadd.s32 %v5302_v21, %v5293_v24  ;;  %v5716_v28 = vshrl.u32 %v16763_v38, %v16052_v37  ;;  %v5719_v42 = vshrl.u32 %v17035_v46, %v16052_v37  ;;  %v5722_v6 = vshrl.u32 %v17036_v61, %v16052_v37 }
 0x678   : > { %v5329_v55 = vadd.s32 1, %v5325_v41  ;;  %v5725_v12 = vshrl.u32 %v17037_v20, %v16052_v37  ;;  %v5728_v14 = vshrl.u32 %v17038_v15, %v16052_v37  ;;  %vm5730_vm11 = vcmp.lt.s32.totalorder %v16057_v35, 1 }
 0x679   : > { %vm5328_vm3 = vc.u32 %v16046_v27, %v16042_v13  ;;  %v16070_v16 = vor.u32 %v5716_v28, %v5715_v50  ;;  %v16072_v22 = vor.u32 %v5719_v42, %v5718_v31  ;;  %v16077_v62 = vor.u32 %v5722_v6, %v5721_v49 }
 0x67a   : > { %v5330_v25 = vsel %vm5328_vm3, %v5329_v55, %v5325_v41  ;;  %v5726_v56 = vor.u32 %v5725_v12, %v5724_v58  ;;  %v5729_v30 = vor.u32 %v5728_v14, %v5727_v19  ;;  %vm5731_vm13 = vcmp.lt.s32.totalorder %v16057_v35, 2 }
 0x67b   : > { %v5331_v11 = vadd.s32 %v5330_v25, %v5326_v26  ;;  %vm5732_vm4 = vcmp.lt.s32.totalorder %v16057_v35, 3  ;;  %vm5733_vm12 = vcmp.lt.s32.totalorder %v16057_v35, 4  ;;  %v5738_v40 = vsel %vm5730_vm11, %v16070_v16, %v16072_v22  ;;  %v11466_v25 = vld [vmem:[#allocation2 + $0x40] sm:$0xff] }
 0x67c   : > { %v5739_v17 = vsel %vm5733_vm12, %v5726_v56, 920167782  ;;  %v5742_v57 = vsel %vm5730_vm11, %v16072_v22, %v16077_v62  ;;  %v5743_v43 = vsel %vm5733_vm12, %v5729_v30, 1326507024  ;;  %v16098_v44 = vshll.u32 %v5706_v4, 8 }
 0x67d   : > { %v5332_v51 = vadd.s32 536870912, %v5331_v11  ;;  %v5740_v18 = vsel %vm5732_vm4, %v16077_v62, %v5739_v17  ;;  %v5744_v34 = vsel %vm5732_vm4, %v5726_v56, %v5743_v43  ;;  %v16110_v58 = vmul.f32 2.0, %v11466_v25 }
 0x67e   : > { %v5741_v5 = vsel %vm5731_vm13, %v5738_v40, %v5740_v18  ;;  %v5745_v24 = vsel %vm5731_vm13, %v5742_v57, %v5744_v34  ;;  %v5747_v29 = vand.u32 65535, %v16098_v44  ;;  %v5748_v59 = vshrl.u32 %v16098_v44, 16 }
 0x67f   : > { %v5333_v32 = vshrl.u32 %v5332_v51, 30  ;;  %v5749_v8 = vand.u32 65535, %v5745_v24  ;;  %v5750_v53 = vshrl.u32 %v5745_v24, 16  ;;  %v5772_v21 = vshrl.u32 %v5741_v5, 16 }
 0x680   : > { %v5771_v55 = vand.u32 65535, %v5741_v5  ;;  %v5327_v42 = vadd.s32 %v16042_v13, %v16046_v27  ;;  %v6166_v12 = vand.u32 2139095040, %v16110_v58  ;;  %v5714_v57 = vshrl.u32 %v16753_v7, %v16052_v37 }
 0x681   : > { %v5334_v9 = vshll.u32 %v5333_v32, 30  ;;  %v5751_v10 = vmul.u32 %v5749_v8, %v5747_v29  ;;  %v5752_v52 = vmul.u32 %v5750_v53, %v5747_v29  ;;  %v16108_v41 = vmul.u32 %v5749_v8, %v5748_v59 }
 0x682   : > { %v5357_v26 = vsub.s32 4, %v5333_v32  ;;  %v5754_v50 = vmul.u32 %v5750_v53, %v5748_v59  ;;  %v5774_v31 = vmul.u32 %v5772_v21, %v5747_v29  ;;  %v5775_v6 = vmul.u32 %v5771_v55, %v5748_v59 }
 0x683   : > { %v5335_v60 = vsub.s32 %v5331_v11, %v5334_v9  ;;  %v5755_v1 = vshll.u32 %v5752_v52, 16  ;;  %v5757_v23 = vshll.u32 %v16108_v41, 16  ;;  %v5773_v27 = vmul.u32 %v5771_v55, %v5747_v29 }
 0x684   : > { %v5358_v49 = vsel %vm5235_vm10, %v5357_v26, %v5333_v32  ;;  %v5777_v9 = vshll.u32 %v5774_v31, 16  ;;  %v5776_v18 = vmul.u32 %v5772_v21, %v5748_v59  ;;  %v5756_v43 = vshrl.u32 %v5752_v52, 16 }
 0x685   : > { %vm5336_vm9 = vcmp.lt.s32.totalorder %v5335_v60, 0  ;;  %v5337_v48 = vsub.s32 0, %v5335_v60  ;;  %vm5759_vm1 = vc.u32 %v5751_v10, %v5755_v1  ;;  %v5761_v28 = vadd.s32 %v5755_v1, %v5751_v10 }
 0x686   : > { %v5760_v4 = vsel %vm5759_vm1, 1, %v16766_v33  ;;  %v16128_v17 = vsel %vm16122_vm6, 0, %v5358_v49  ;;  %v5779_v54 = vshll.u32 %v5775_v6, 16  ;;  %v5778_v24 = vshrl.u32 %v5774_v31, 16 }
 0x687   : > { %v5338_v47 = vsel %vm5336_vm9, %v5337_v48, %v5335_v60  ;;  %vm5763_vm8 = vc.u32 %v5761_v28, %v5757_v23  ;;  %v5762_v13 = vadd.s32 %v5760_v4, %v5754_v50  ;;  %v6167_v48 = vshrl.u32 %v6166_v12, 23  ;;  %v10648_v23 = vld [vmem:[#allocation3 + $0x30] sm:$0xf]  ;;  %v11273_v50 = vld [vmem:[#allocation3 + $0x68] sm:$0xf0]  ;;  %v11467_v4 = vld [vmem:[#allocation2 + $0x58] sm:$0xff] }
 0x688   : > { %v5339_v63 = vclz %v5338_v47  ;;  %v5735_v29 = vsel %vm5733_vm12, %v16077_v62, 2102212464  ;;  %vm5781_vm2 = vc.u32 %v5773_v27, %v5777_v9  ;;  %v5783_v53 = vadd.s32 %v5777_v9, %v5773_v27 }
 0x689   : > { %v5758_v21 = vshrl.u32 %v16108_v41, 16  ;;  %v5782_v37 = vsel %vm5781_vm2, 1, %v16766_v33  ;;  %v5734_v10 = vsel %vm5730_vm11, %v5714_v57, %v16070_v16  ;;  %v5736_v62 = vsel %vm5732_vm4, %v16072_v22, %v5735_v29 }
 0x68a   : > { %v10533_v11 = vadd.s32 4294967294, %v5339_v63  ;;  %v5784_v63 = vadd.s32 %v5782_v37, %v5776_v18  ;;  %vm5785_vm14 = vc.u32 %v5783_v53, %v5779_v54  ;;  %v10550_v55 = vadd.s32 4294967169, %v6167_v48 }
 0x68b   : > { %v5786_v1 = vsel %vm5785_vm14, 1, %v16766_v33  ;;  %v5780_v25 = vshrl.u32 %v5775_v6, 16  ;;  %v10649_v16 = vor.u32 %v11273_v50, %v10648_v23  ;;  %v5377_v49 = vadd.s32 3, %v16128_v17 }
 0x68c   : > { %vm10534_vm5 = vcmp.lt.s32.totalorder %v10533_v11, 0  ;;  %v5788_v41 = vadd.s32 %v5786_v1, %v5784_v63  ;;  %v16152_v12 = vmul.f32 2.0, %v11467_v4  ;;  %vm5376_vm9 = vweird.f32 %v15966_v2 }
 0x68d   : > { %v5342_v51 = vsel %vm10534_vm5, 0, %v10533_v11  ;;  %v16145_v11 = vadd.s32 %v5783_v53, %v5779_v54  ;;  %10047 = vmatmul.bf16.vlgmr.msra.gmra.mxu1 %v10649_v16  ;;  %vm5700_vm5 = vcmp.lt.s32.totalorder %v16029_v36, 0 }
 0x68e   : > { %v5343_v19 = vsub.s32 32, %v5342_v51  ;;  %v5344_v14 = vshll.u32 %v5335_v60, %v5342_v51  ;;  %v5347_v56 = vsub.s32 4294967266, %v5342_v51  ;;  %v5764_v60 = vsel %vm5763_vm8, 1, %v16766_v33 }
 0x68f   : > { %v5766_v8 = vadd.s32 %v5764_v60, %v5762_v13  ;;  %v5737_v51 = vsel %vm5731_vm13, %v5734_v10, %v5736_v62  ;;  %v5789_v22 = vadd.s32 %v5788_v41, %v5778_v24  ;;  %v6631_v18 = vand.u32 2139095040, %v16152_v12 }
 0x690   : > { %v5345_v32 = vshrl.u32 %v5327_v42, %v5343_v19  ;;  %v5348_v40 = vadd.s32 127, %v5347_v56  ;;  %v6173_v42 = vadd.s32 1, %v10550_v55  ;;  %v6163_v19 = vand.u32 2147483647, %v16110_v58 }
 0x691   : > { %v5767_v52 = vadd.s32 %v5766_v8, %v5756_v43  ;;  %v5791_v27 = vmul.u32 %v16098_v44, %v5737_v51  ;;  %v6632_v16 = vshrl.u32 %v6631_v18, 23  ;;  %vm16254_vm8 = vcmp.le.f32.partialorder %v5698_v45, 0.7853982 }
 0x692   : > { %v5346_v5 = vor.u32 %v5345_v32, %v5344_v14  ;;  %v5349_v34 = vshll.u32 %v5348_v40, 23  ;;  %vm6174_vm15 = vcmp.gt.s32.totalorder %v6173_v42, 0  ;;  %v5790_v14 = vadd.s32 %v5789_v22, %v5780_v25 }
 0x693   : > { %v16147_v31 = vadd.s32 %v5767_v52, %v5758_v21  ;;  %v6175_v56 = vsel %vm6174_vm15, %v6173_v42, 0  ;;  %v16165_v32 = vand.u32 3, %v5377_v49  ;;  %v6170_v44 = vand.u32 8388607, %v6163_v19 }
 0x694   : > { %v5350_v47 = vor.u32 4788187, %v5349_v34  ;;  %v5353_v59 = vcvt.s32.f32 %v5346_v5  ;;  %v6177_v35 = vand.u32 31, %v6175_v56  ;;  %v5794_v40 = vadd.s32 1, %v5790_v14 }
 0x695   : > { %vm5793_vm0 = vc.u32 %v16147_v31, %v16145_v11  ;;  %v16172_v43 = vshrl.u32 %v6175_v56, 5  ;;  %v6171_v63 = vor.u32 8388608, %v6170_v44  ;;  %vm5380_vm7 = vcmp.eq.s32.totalorder %v16165_v32, 0 }
 0x696   : > { %v5351_v26 = vand.u32 2147483647, %v5350_v47  ;;  %v16174_v60 = vsub.s32 32, %v6177_v35  ;;  %v5795_v54 = vsel %vm5793_vm0, %v5794_v40, %v5790_v14  ;;  %v6180_v30 = vshll.u32 %v16753_v7, %v6177_v35 }
 0x697   : > { %v6183_v5 = vshll.u32 %v16763_v38, %v6177_v35  ;;  %v6189_v34 = vshll.u32 %v17036_v61, %v6177_v35  ;;  %v5796_v29 = vadd.s32 %v5795_v54, %v5791_v27  ;;  %v6186_v8 = vshll.u32 %v17035_v46, %v6177_v35 }
 0x698   : > { %v5354_v28 = vmul.f32 %v5353_v59, %v5351_v26  ;;  %v6181_v53 = vshrl.u32 %v16763_v38, %v16174_v60  ;;  %v6184_v47 = vshrl.u32 %v17035_v46, %v16174_v60  ;;  %v6187_v59 = vshrl.u32 %v17036_v61, %v16174_v60 }
 0x699   : > { %v6190_v21 = vshrl.u32 %v17037_v20, %v16174_v60  ;;  %v5797_v52 = vadd.s32 536870912, %v5796_v29  ;;  %v6192_v1 = vshll.u32 %v17037_v20, %v6177_v35  ;;  %v6193_v55 = vshrl.u32 %v17038_v15, %v16174_v60 }
 0x69a   : > { %v5355_v6 = vxor.u32 2147483648, %v5354_v28  ;;  %v16188_v26 = vor.u32 %v6181_v53, %v6180_v30  ;;  %v16195_v50 = vor.u32 %v6184_v47, %v6183_v5  ;;  %vm6195_vm3 = vcmp.lt.s32.totalorder %v16172_v43, 1 }
 0x69b   : > { %v6191_v62 = vor.u32 %v6190_v21, %v6189_v34  ;;  %v16193_v23 = vshrl.u32 %v5797_v52, 30  ;;  %vm6198_vm11 = vcmp.lt.s32.totalorder %v16172_v43, 4  ;;  %vm5379_vm13 = vcmp.lt.s32.totalorder %v16165_v32, 2 }
 0x69c   : > { %v5356_v13 = vsel %vm5235_vm10, %v5355_v6, %v5354_v28  ;;  %v6188_v28 = vor.u32 %v6187_v59, %v6186_v8  ;;  %vm6197_vm4 = vcmp.lt.s32.totalorder %v16172_v43, 3  ;;  %v6194_v22 = vor.u32 %v6193_v55, %v6192_v1 }
 0x69d   : > { %v16163_v9 = vsel %vm16122_vm6, %v15966_v2, %v5356_v13  ;;  %v5799_v51 = vshll.u32 %v16193_v23, 30  ;;  %vm6196_vm12 = vcmp.lt.s32.totalorder %v16172_v43, 2  ;;  %v6204_v4 = vsel %vm6198_vm11, %v6191_v62, 920167782 }
 0x69e   : > { %v5361_v57 = vmul.f32 %v16163_v9, %v16163_v9  ;;  %v16206_v6 = vshll.u32 %v6171_v63, 8  ;;  %v6203_v27 = vsel %vm6195_vm3, %v16188_v26, %v16195_v50  ;;  %vm5383_vm10 = vcmp.eq.s32.totalorder %v16165_v32, 2 }
 0x69f   : > { %v5800_v13 = vsub.s32 %v5796_v29, %v5799_v51  ;;  %v6205_v35 = vsel %vm6197_vm4, %v6188_v28, %v6204_v4  ;;  %v6207_v40 = vsel %vm6195_vm3, %v16195_v50, %v6188_v28  ;;  %v10559_v18 = vadd.s32 4294967169, %v6632_v16 }
 0x6a0   : > { %v5362_v24 = vmul.f32 -0.001358992, %v5361_v57  ;;  %v5369_v48 = vmul.f32 -0.00019511016, %v5361_v57  ;;  %v6206_v30 = vsel %vm6196_vm12, %v6203_v27, %v6205_v35  ;;  %v6208_v5 = vsel %vm6198_vm11, %v6194_v22, 1326507024 }
 0x6a1   : > { %vm5801_vm1 = vcmp.lt.s32.totalorder %v5800_v13, 0  ;;  %v5802_v54 = vsub.s32 0, %v5800_v13  ;;  %v6212_v34 = vand.u32 65535, %v16206_v6  ;;  %v6209_v53 = vsel %vm6197_vm4, %v6191_v62, %v6208_v5 }
 0x6a2   : > { %v5363_v37 = vadd.f32 0.041655596, %v5362_v24  ;;  %v5370_v10 = vadd.f32 0.008332121, %v5369_v48  ;;  %v6213_v24 = vshrl.u32 %v16206_v6, 16  ;;  %v6210_v59 = vsel %vm6196_vm12, %v6207_v40, %v6209_v53 }
 0x6a3   : > { %v5803_v8 = vsel %vm5801_vm1, %v5802_v54, %v5800_v13  ;;  %v6237_v21 = vshrl.u32 %v6206_v30, 16  ;;  %v6214_v52 = vand.u32 65535, %v6210_v59  ;;  %v6215_v63 = vshrl.u32 %v6210_v59, 16 }
 0x6a4   : > { %v5364_v25 = vmul.f32 %v5363_v37, %v5361_v57  ;;  %v5371_v41 = vmul.f32 %v5370_v10, %v5361_v57  ;;  %v5804_v47 = vclz %v5803_v8  ;;  %v6628_v37 = vand.u32 2147483647, %v16152_v12 }
 0x6a5   : > { %v5792_v62 = vadd.s32 %v16145_v11, %v16147_v31  ;;  %v6236_v55 = vand.u32 65535, %v6206_v30  ;;  %v6216_v16 = vmul.u32 %v6214_v52, %v6212_v34  ;;  %v5822_v11 = vsub.s32 4, %v16193_v23 }
 0x6a6   : > { %v5365_v42 = vadd.f32 -0.4999988, %v5364_v25  ;;  %v5372_v49 = vadd.f32 -0.16666654, %v5371_v41  ;;  %v10542_v1 = vadd.s32 4294967294, %v5804_v47  ;;  %v6638_v25 = vadd.s32 1, %v10559_v18 }
 0x6a7   : > { %v6179_v31 = vshrl.u32 %v16753_v7, %v16174_v60  ;;  %v6239_v27 = vmul.u32 %v6237_v21, %v6212_v34  ;;  %v6219_v18 = vmul.u32 %v6215_v63, %v6213_v24  ;;  %v6240_v54 = vmul.u32 %v6236_v55, %v6213_v24 }
 0x6a8   : > { %v5366_v14 = vmul.f32 %v5365_v42, %v5361_v57  ;;  %v5373_v56 = vmul.f32 %v5372_v49, %v5361_v57  ;;  %v6217_v42 = vmul.u32 %v6215_v63, %v6212_v34  ;;  %v6218_v49 = vmul.u32 %v6214_v52, %v6213_v24 }
 0x6a9   : > { %vm10543_vm6 = vcmp.lt.s32.totalorder %v10542_v1, 0  ;;  %v5823_v60 = vsel %vm5700_vm5, %v5822_v11, %v16193_v23  ;;  %vm6639_vm14 = vcmp.gt.s32.totalorder %v6638_v25, 0  ;;  %v6241_v63 = vmul.u32 %v6237_v21, %v6213_v24 }
 0x6aa   : > { %v16219_v44 = vadd.f32 1.0, %v5366_v14  ;;  %v5374_v57 = vadd.f32 1.0, %v5373_v56  ;;  %v5807_v4 = vsel %vm10543_vm6, 0, %v10542_v1  ;;  %v6200_v14 = vsel %vm6198_vm11, %v6188_v28, 2102212464 }
 0x6ab   : > { %v6220_v56 = vshll.u32 %v6217_v42, 16  ;;  %v5808_v32 = vsub.s32 32, %v5807_v4  ;;  %v5809_v35 = vshll.u32 %v5800_v13, %v5807_v4  ;;  %v5812_v40 = vsub.s32 4294967266, %v5807_v4 }
 0x6ac   : > { %v16228_v48 = vmul.f32 %v5374_v57, %v16163_v9  ;;  %v5384_v29 = vxor.u32 2147483648, %v16219_v44  ;;  %v6222_v57 = vshll.u32 %v6218_v49, 16  ;;  %v6221_v28 = vshrl.u32 %v6217_v42, 16 }
 0x6ad   : > { %vm6224_vm2 = vc.u32 %v6216_v16, %v6220_v56  ;;  %v5810_v30 = vshrl.u32 %v5792_v62, %v5808_v32  ;;  %v5813_v5 = vadd.s32 127, %v5812_v40  ;;  %v6226_v53 = vadd.s32 %v6220_v56, %v6216_v16 }
 0x6ae   : > { %v5381_v10 = vxor.u32 2147483648, %v16228_v48  ;;  %v5385_v9 = vsel %vm5383_vm10, %v5384_v29, %v16228_v48  ;;  %v6225_v8 = vsel %vm6224_vm2, 1, %v16766_v33  ;;  %v6238_v13 = vmul.u32 %v6236_v55, %v6212_v34 }
 0x6af   : > { %v5811_v47 = vor.u32 %v5810_v30, %v5809_v35  ;;  %v5814_v59 = vshll.u32 %v5813_v5, 23  ;;  %v6227_v52 = vadd.s32 %v6225_v8, %v6219_v18  ;;  %vm6228_vm15 = vc.u32 %v6226_v53, %v6222_v57 }
 0x6b0   : > { %v5382_v41 = vsel %vm5380_vm7, %v16219_v44, %v5381_v10  ;;  %v6242_v1 = vshll.u32 %v6239_v27, 16  ;;  %v6199_v23 = vsel %vm6195_vm3, %v6179_v31, %v16188_v26  ;;  %v6229_v42 = vsel %vm6228_vm15, 1, %v16766_v33 }
 0x6b1   : > { %v5386_v51 = vsel %vm5379_vm13, %v5382_v41, %v5385_v9  ;;  %v6244_v41 = vshll.u32 %v6240_v54, 16  ;;  %v5815_v62 = vor.u32 4788187, %v5814_v59  ;;  %v5825_v34 = vsel %vm16254_vm8, 0, %v5823_v60 }
 0x6b2   : > { %v5387_v45 = vsel %vm5376_vm9, nan, %v5386_v51  ;;  %v5818_v51 = vcvt.s32.f32 %v5811_v47  ;;  %v6231_v55 = vadd.s32 %v6229_v42, %v6227_v52  ;;  %vm6246_vm0 = vc.u32 %v6238_v13, %v6242_v1  ;;  %v11402_v52 = vld [vmem:[%s16522_s12 + $0x380] sm:$0xff] }
 0x6b3   : > { %v6784_v9 = vpack.c.bf16 %v5387_v45, %v5387_v45  ;;  %v6248_v16 = vadd.s32 %v6242_v1, %v6238_v13  ;;  %v5816_v11 = vand.u32 2147483647, %v5815_v62  ;;  %v6223_v4 = vshrl.u32 %v6218_v49, 16  ;;  %10084 = vmatpush.bf16.msra.mxu0 %v11402_v52 }
 0x6b4   : > { %v6247_v24 = vsel %vm6246_vm0, 1, %v16766_v33  ;;  %v6640_v21 = vsel %vm6639_vm14, %v6638_v25, 0  ;;  %v6232_v56 = vadd.s32 %v6231_v55, %v6221_v28  ;;  %v6243_v32 = vshrl.u32 %v6239_v27, 16 }
 0x6b5   : > { %6792 = vst [vmem:[#allocation3 + $0x2c] sm:$0xf] %v6784_v9  ;;  %v6249_v35 = vadd.s32 %v6247_v24, %v6241_v63  ;;  %vm6250_vm7 = vc.u32 %v6248_v16, %v6244_v41  ;;  %v5819_v40 = vmul.f32 %v5818_v51, %v5816_v11  ;;  %v6201_v26 = vsel %vm6197_vm4, %v16195_v50, %v6200_v14 }
 0x6b6   : > { %v6251_v31 = vsel %vm6250_vm7, 1, %v16766_v33  ;;  %v6642_v18 = vand.u32 31, %v6640_v21  ;;  %v5842_v45 = vadd.s32 3, %v5825_v34  ;;  %v6245_v57 = vshrl.u32 %v6240_v54, 16 }
 0x6b7   : > { %v6253_v30 = vadd.s32 %v6251_v31, %v6249_v35  ;;  %v6635_v49 = vand.u32 8388607, %v6628_v37  ;;  %v5820_v5 = vxor.u32 2147483648, %v5819_v40  ;;  %v6202_v25 = vsel %vm6196_vm12, %v6199_v23, %v6201_v26 }
 0x6b8   : > { %v16285_v27 = vadd.s32 %v6232_v56, %v6223_v4  ;;  %v16287_v60 = vadd.s32 %v6248_v16, %v6244_v41  ;;  %v16291_v14 = vsub.s32 32, %v6642_v18  ;;  %v16298_v8 = vand.u32 3, %v5842_v45 }
 0x6b9   : > { %v6254_v28 = vadd.s32 %v6253_v30, %v6243_v32  ;;  %v5821_v50 = vsel %vm5700_vm5, %v5820_v5, %v5819_v40  ;;  %v6636_v43 = vor.u32 8388608, %v6635_v49  ;;  %v6256_v47 = vmul.u32 %v16206_v6, %v6202_v25 }
 0x6ba   : > { %v16296_v54 = vsel %vm16254_vm8, %v16029_v36, %v5821_v50  ;;  %v16303_v59 = vshrl.u32 %v6640_v21, 5  ;;  %v6645_v9 = vshll.u32 %v16753_v7, %v6642_v18  ;;  %v7251_v22 = vand.u32 3, %v16128_v17 }
 0x6bb   : > { %v6255_v53 = vadd.s32 %v6254_v28, %v6245_v57  ;;  %v5826_v13 = vmul.f32 %v16296_v54, %v16296_v54  ;;  %vm6258_vm3 = vc.u32 %v16285_v27, %v16287_v60  ;;  %v6648_v1 = vshll.u32 %v16763_v38, %v6642_v18 }
 0x6bc   : > { %v6649_v6 = vshrl.u32 %v17035_v46, %v16291_v14  ;;  %v6651_v51 = vshll.u32 %v17035_v46, %v6642_v18  ;;  %vm7252_vm11 = vcmp.lt.s32.totalorder %v7251_v22, 2  ;;  %vm7253_vm13 = vcmp.eq.s32.totalorder %v7251_v22, 0 }
 0x6bd   : > { %v6259_v63 = vadd.s32 1, %v6255_v53  ;;  %v5827_v41 = vmul.f32 -0.001358992, %v5826_v13  ;;  %v5834_v62 = vmul.f32 -0.00019511016, %v5826_v13  ;;  %vm7256_vm4 = vcmp.eq.s32.totalorder %v7251_v22, 2 }
 0x6be   : > { %v6652_v17 = vshrl.u32 %v17036_v61, %v16291_v14  ;;  %v7255_v55 = vsel %vm7253_vm13, %v16219_v44, %v5381_v10  ;;  %v7258_v16 = vsel %vm7256_vm4, %v5384_v29, %v16228_v48  ;;  %vm5848_vm12 = vcmp.eq.s32.totalorder %v16298_v8, 2 }
 0x6bf   : > { %v5828_v23 = vadd.f32 0.041655596, %v5827_v41  ;;  %v5835_v42 = vadd.f32 0.008332121, %v5834_v62  ;;  %v7259_v46 = vsel %vm7252_vm11, %v7255_v55, %v7258_v16  ;;  %v6260_v11 = vsel %vm6258_vm3, %v6259_v63, %v6255_v53 }
 0x6c0   : > { %v6654_v4 = vshll.u32 %v17036_v61, %v6642_v18  ;;  %v6655_v24 = vshrl.u32 %v17037_v20, %v16291_v14  ;;  %v7260_v10 = vsel %vm5376_vm9, nan, %v7259_v46  ;;  %v6261_v32 = vadd.s32 %v6260_v11, %v6256_v47 }
 0x6c1   : > { %v5829_v21 = vmul.f32 %v5828_v23, %v5826_v13  ;;  %v5836_v56 = vmul.f32 %v5835_v42, %v5826_v13  ;;  %vm5845_vm10 = vcmp.eq.s32.totalorder %v16298_v8, 0  ;;  %v7713_v44 = vand.u32 3, %v5825_v34 }
 0x6c2   : > { %v8648_v48 = vpack.c.bf16 %v7260_v10, %v7260_v10  ;;  %v6646_v29 = vshrl.u32 %v16763_v38, %v16291_v14  ;;  %v6657_v35 = vshll.u32 %v17037_v20, %v6642_v18  ;;  %vm5844_vm1 = vcmp.lt.s32.totalorder %v16298_v8, 2 }
 0x6c3   : > { %v5830_v40 = vadd.f32 -0.4999988, %v5829_v21  ;;  %v5837_v61 = vadd.f32 -0.16666654, %v5836_v56  ;;  %v6262_v26 = vadd.s32 536870912, %v6261_v32  ;;  %v6658_v31 = vshrl.u32 %v17038_v15, %v16291_v14 }
 0x6c4   : > { %vm5841_vm9 = vweird.f32 %v16029_v36  ;;  %8656 = vst [vmem:[#allocation3 + $0x38] sm:$0xf] %v8648_v48  ;;  %v16341_v2 = vor.u32 %v6649_v6, %v6648_v1  ;;  %v16343_v34 = vor.u32 %v6652_v17, %v6651_v51  ;;  %v6656_v45 = vor.u32 %v6655_v24, %v6654_v4 }
 0x6c5   : > { %v16345_v57 = vshll.u32 %v6636_v43, 8  ;;  %v5831_v38 = vmul.f32 %v5830_v40, %v5826_v13  ;;  %v5838_v20 = vmul.f32 %v5837_v61, %v5826_v13  ;;  %v16347_v18 = vshrl.u32 %v6262_v26, 30 }
 0x6c6   : > { %v6659_v30 = vor.u32 %v6658_v31, %v6657_v35  ;;  %vm7714_vm5 = vcmp.lt.s32.totalorder %v7713_v44, 2  ;;  %v16349_v49 = vor.u32 %v6646_v29, %v6645_v9  ;;  %vm6660_vm8 = vcmp.lt.s32.totalorder %v16303_v59, 1 }
 0x6c7   : > { %vm6663_vm6 = vcmp.lt.s32.totalorder %v16303_v59, 4  ;;  %v5832_v15 = vadd.f32 1.0, %v5831_v38  ;;  %v5839_v5 = vadd.f32 1.0, %v5838_v20  ;;  %v6264_v25 = vshll.u32 %v16347_v18, 30 }
 0x6c8   : > { %vm6662_vm2 = vcmp.lt.s32.totalorder %v16303_v59, 3  ;;  %vm7718_vm14 = vcmp.eq.s32.totalorder %v7713_v44, 2  ;;  %vm6661_vm15 = vcmp.lt.s32.totalorder %v16303_v59, 2  ;;  %v6669_v28 = vsel %vm6663_vm6, %v6656_v45, 920167782 }
 0x6c9   : > { %v6673_v50 = vsel %vm6663_vm6, %v6659_v30, 1326507024  ;;  %v5840_v53 = vmul.f32 %v5839_v5, %v16296_v54  ;;  %v5849_v43 = vxor.u32 2147483648, %v5832_v15  ;;  %v6265_v13 = vsub.s32 %v6261_v32, %v6264_v25 }
 0x6ca   : > { %v6672_v47 = vsel %vm6660_vm8, %v16341_v2, %v16343_v34  ;;  %vm7715_vm0 = vcmp.eq.s32.totalorder %v7713_v44, 0  ;;  %v6668_v9 = vsel %vm6660_vm8, %v16349_v49, %v16341_v2  ;;  %v6670_v52 = vsel %vm6662_vm2, %v16343_v34, %v6669_v28 }
 0x6cb   : > { %v6674_v54 = vsel %vm6662_vm2, %v6656_v45, %v6673_v50  ;;  %v5846_v22 = vxor.u32 2147483648, %v5840_v53  ;;  %v5850_v63 = vsel %vm5848_vm12, %v5849_v43, %v5840_v53  ;;  %v7720_v1 = vsel %vm7718_vm14, %v5849_v43, %v5840_v53  ;;  %v11265_v53 = vld [vmem:[#allocation3 + $0x2c] sm:$0xf] }
 0x6cc   : > { %vm6266_vm7 = vcmp.lt.s32.totalorder %v6265_v13, 0  ;;  %v6267_v41 = vsub.s32 0, %v6265_v13  ;;  %v6675_v62 = vsel %vm6661_vm15, %v6672_v47, %v6674_v54  ;;  %v6677_v6 = vand.u32 65535, %v16345_v57 }
 0x6cd   : > { %v6678_v51 = vshrl.u32 %v16345_v57, 16  ;;  %v5847_v17 = vsel %vm5845_vm10, %v5832_v15, %v5846_v22  ;;  %v7717_v23 = vsel %vm7715_vm0, %v5832_v15, %v5846_v22  ;;  %v6679_v42 = vand.u32 65535, %v6675_v62 }
 0x6ce   : > { %v6680_v55 = vshrl.u32 %v6675_v62, 16  ;;  %v5851_v16 = vsel %vm5844_vm1, %v5847_v17, %v5850_v63  ;;  %v7721_v46 = vsel %vm7714_vm5, %v7717_v23, %v7720_v1  ;;  %v6268_v11 = vsel %vm6266_vm7, %v6267_v41, %v6265_v13 }
 0x6cf   : > { %v6671_v4 = vsel %vm6661_vm15, %v6668_v9, %v6670_v52  ;;  %v5852_v24 = vsel %vm5841_vm9, nan, %v5851_v16  ;;  %v7722_v21 = vsel %vm5841_vm9, nan, %v7721_v46  ;;  %v6269_v56 = vclz %v6268_v11  ;;  %v10708_v11 = vld [vmem:[#allocation3 + $0xa8] sm:$0xf] }
 0x6d0   : > { %v6681_v10 = vmul.u32 %v6679_v42, %v6677_v6  ;;  %v6786_v32 = vpack.c.bf16 %v5852_v24, %v5852_v24  ;;  %v8650_v48 = vpack.c.bf16 %v7722_v21, %v7722_v21  ;;  %v6682_v29 = vmul.u32 %v6680_v55, %v6677_v6 }
 0x6d1   : > { %v16391_v35 = vmul.u32 %v6679_v42, %v6678_v51  ;;  %v10551_v8 = vadd.s32 4294967294, %v6269_v56  ;;  %v6702_v44 = vshrl.u32 %v6671_v4, 16  ;;  %v6684_v40 = vmul.u32 %v6680_v55, %v6678_v51 }
 0x6d2   : > { %6794 = vst [vmem:[#allocation3 + $0x68] sm:$0xf] %v6786_v32  ;;  %v6685_v61 = vshll.u32 %v6682_v29, 16  ;;  %v6701_v26 = vand.u32 65535, %v6671_v4  ;;  %v6257_v31 = vadd.s32 %v16287_v60, %v16285_v27  ;;  %v10656_v27 = vld [vmem:[#allocation3 + $0x38] sm:$0xf]  ;;  %vm6306_vm14 = vweird.f32 %v16110_v58 }
 0x6d3   : > { %8658 = vst [vmem:[#allocation3 + $0x74] sm:$0xf] %v8650_v48  ;;  %vm10552_vm3 = vcmp.lt.s32.totalorder %v10551_v8, 0  ;;  %v6687_v36 = vshll.u32 %v16391_v35, 16  ;;  %v6704_v20 = vmul.u32 %v6702_v44, %v6677_v6  ;;  %v6686_v60 = vshrl.u32 %v6682_v29, 16 }
 0x6d4   : > { %v6272_v45 = vsel %vm10552_vm3, 0, %v10551_v8  ;;  %vm6689_vm11 = vc.u32 %v6681_v10, %v6685_v61  ;;  %v6691_v38 = vadd.s32 %v6685_v61, %v6681_v10  ;;  %v6703_v50 = vmul.u32 %v6701_v26, %v6677_v6  ;;  %v11288_v32 = vld [vmem:[#allocation3 + $0xe0] sm:$0xf0] }
 0x6d5   : > { %v6273_v30 = vsub.s32 32, %v6272_v45  ;;  %v6274_v15 = vshll.u32 %v6265_v13, %v6272_v45  ;;  %v6277_v5 = vsub.s32 4294967266, %v6272_v45  ;;  %v6690_v25 = vsel %vm6689_vm11, 1, %v16766_v33 }
 0x6d6   : > { %v6692_v28 = vadd.s32 %v6690_v25, %v6684_v40  ;;  %vm6693_vm13 = vc.u32 %v6691_v38, %v6687_v36  ;;  %v6705_v9 = vmul.u32 %v6701_v26, %v6678_v51  ;;  %v6706_v54 = vmul.u32 %v6702_v44, %v6678_v51 }
 0x6d7   : > { %v6275_v43 = vshrl.u32 %v6257_v31, %v6273_v30  ;;  %v6278_v47 = vadd.s32 127, %v6277_v5  ;;  %v6694_v52 = vsel %vm6693_vm13, 1, %v16766_v33  ;;  %v6707_v22 = vshll.u32 %v6704_v20, 16 }
 0x6d8   : > { %v6696_v13 = vadd.s32 %v6694_v52, %v6692_v28  ;;  %v6709_v62 = vshll.u32 %v6705_v9, 16  ;;  %v6644_v6 = vshrl.u32 %v16753_v7, %v16291_v14  ;;  %v6665_v51 = vsel %vm6663_vm6, %v16343_v34, 2102212464 }
 0x6d9   : > { %v10642_v63 = vld [vmem:[#allocation3 + $0x64] sm:$0xf0]  ;;  %v6276_v1 = vor.u32 %v6275_v43, %v6274_v15  ;;  %v6279_v41 = vshll.u32 %v6278_v47, 23  ;;  %vm6711_vm4 = vc.u32 %v6703_v50, %v6707_v22  ;;  %v6713_v42 = vadd.s32 %v6707_v22, %v6703_v50 }
 0x6da   : > { %v10645_v17 = vor.u32 %v11265_v53, %v10642_v63  ;;  %v11274_v23 = vld [vmem:[#allocation3 + $0x70] sm:$0xf0]  ;;  %v6688_v4 = vshrl.u32 %v16391_v35, 16  ;;  %v6697_v24 = vadd.s32 %v6696_v13, %v6686_v60  ;;  %v6712_v21 = vsel %vm6711_vm4, 1, %v16766_v33 }
 0x6db   : > { %v10657_v55 = vor.u32 %v11274_v23, %v10656_v27  ;;  %v6280_v16 = vor.u32 4788187, %v6279_v41  ;;  %v6283_v46 = vcvt.s32.f32 %v6276_v1  ;;  %vm6715_vm12 = vc.u32 %v6713_v42, %v6709_v62 }
 0x6dc   : > { %10028 = vmatmul.bf16.vlgmr.msrb.gmra.mxu2 %v10645_v17  ;;  %v6708_v7 = vshrl.u32 %v6704_v20, 16  ;;  %v6714_v14 = vadd.s32 %v6712_v21, %v6706_v54  ;;  %v6716_v10 = vsel %vm6715_vm12, 1, %v16766_v33  ;;  %v6664_v48 = vsel %vm6660_vm8, %v6644_v6, %v16349_v49 }
 0x6dd   : > { %10085 = vmatmul.bf16.vlgmr.msra.gmra.mxu0 %v10657_v55  ;;  %v6281_v56 = vand.u32 2147483647, %v6280_v16  ;;  %v6666_v34 = vsel %vm6662_vm2, %v16341_v2, %v6665_v51  ;;  %v10709_v29 = vor.u32 %v11288_v32, %v10708_v11  ;;  %v6710_v8 = vshrl.u32 %v6705_v9, 16 }
 0x6de   : > { %v6718_v44 = vadd.s32 %v6716_v10, %v6714_v14  ;;  %vm16414_vm10 = vcmp.le.f32.partialorder %v6163_v19, 0.7853982  ;;  %vm6165_vm1 = vcmp.lt.s32.totalorder %v16110_v58, 0  ;;  %v6698_v33 = vadd.s32 %v6697_v24, %v6688_v4 }
 0x6df   : > { %v6284_v35 = vmul.f32 %v6283_v46, %v6281_v56  ;;  %v6717_v61 = vadd.s32 %v6713_v42, %v6709_v62  ;;  %10052 = vmatmul.bf16.gmra.mxu1 %v10709_v29  ;;  %v6287_v26 = vsub.s32 4, %v16347_v18  ;;  %v6667_v2 = vsel %vm6661_vm15, %v6664_v48, %v6666_v34 }
 0x6e0   : > { %v6719_v31 = vadd.s32 %v6718_v44, %v6708_v7  ;;  %v6721_v38 = vmul.u32 %v16345_v57, %v6667_v2  ;;  %vm6630_vm11 = vcmp.lt.s32.totalorder %v16152_v12, 0  ;;  %vm6629_vm13 = vcmp.le.f32.partialorder %v6628_v37, 0.7853982 }
 0x6e1   : > { %v6285_v49 = vxor.u32 2147483648, %v6284_v35  ;;  %vm6723_vm9 = vc.u32 %v6698_v33, %v6717_v61  ;;  %v6288_v20 = vsel %vm6165_vm1, %v6287_v26, %v16347_v18  ;;  %v6722_v24 = vadd.s32 %v6717_v61, %v6698_v33 }
 0x6e2   : > { %v6720_v45 = vadd.s32 %v6719_v31, %v6710_v8  ;;  %v6290_v59 = vsel %vm16414_vm10, 0, %v6288_v20  ;;  %v9827_v31 = vpop.f32.mrf.mxu1  ;;  %v9846_v20 = vpop.f32.mrf.mxu3 }
 0x6e3   : > { %v6286_v36 = vsel %vm6165_vm1, %v6285_v49, %v6284_v35  ;;  %v6307_v60 = vadd.s32 3, %v6290_v59  ;;  %v8175_v34 = vand.u32 3, %v6290_v59 }
 0x6e4   : > { %v6289_v19 = vsel %vm16414_vm10, %v16110_v58, %v6286_v36  ;;  %v6724_v15 = vadd.s32 1, %v6720_v45 }
 0x6e5   : > { %v6291_v30 = vmul.f32 %v6289_v19, %v6289_v19  ;;  %v6308_v1 = vand.u32 3, %v6307_v60  ;;  %vm8177_vm0 = vcmp.eq.s32.totalorder %v8175_v34, 0  ;;  %vm8180_vm7 = vcmp.eq.s32.totalorder %v8175_v34, 2 }
 0x6e6   : > { %v6725_v28 = vsel %vm6723_vm9, %v6724_v15, %v6720_v45  ;;  %vm8176_vm3 = vcmp.lt.s32.totalorder %v8175_v34, 2 }
 0x6e7   : > { %v6292_v5 = vmul.f32 -0.001358992, %v6291_v30  ;;  %v6299_v25 = vmul.f32 -0.00019511016, %v6291_v30  ;;  %v6726_v50 = vadd.s32 %v6725_v28, %v6721_v38  ;;  %vm6313_vm8 = vcmp.eq.s32.totalorder %v6308_v1, 2  ;;  %v9865_v28 = vpop.f32.mrf.mxu0 }
 0x6e8   : > { %vm6310_vm6 = vcmp.eq.s32.totalorder %v6308_v1, 0  ;;  %vm6309_vm2 = vcmp.lt.s32.totalorder %v6308_v1, 2 }
 0x6e9   : > { %v6293_v53 = vadd.f32 0.041655596, %v6292_v5  ;;  %v6300_v43 = vadd.f32 0.008332121, %v6299_v25  ;;  %v6727_v47 = vadd.s32 536870912, %v6726_v50 }
 0x6eb   : > { %v6294_v9 = vmul.f32 %v6293_v53, %v6291_v30  ;;  %v6301_v27 = vmul.f32 %v6300_v43, %v6291_v30  ;;  %v6728_v52 = vshrl.u32 %v6727_v47, 30  ;;  %v16438_v53 = vpop.f32.mrf.mxu1  ;;  %v16440_v43 = vpop.f32.mrf.mxu2 }
 0x6ed   : > { %v6295_v57 = vadd.f32 -0.4999988, %v6294_v9  ;;  %v6302_v54 = vadd.f32 -0.16666654, %v6301_v27  ;;  %v6729_v22 = vshll.u32 %v6728_v52, 30 }
 0x6ef   : > { %v6296_v18 = vmul.f32 %v6295_v57, %v6291_v30  ;;  %v6303_v63 = vmul.f32 %v6302_v54, %v6291_v30  ;;  %v6730_v41 = vsub.s32 %v6726_v50, %v6729_v22  ;;  %v16442_v57 = vpop.f32.mrf.mxu3 }
 0x6f1   : > { %v6297_v13 = vadd.f32 1.0, %v6296_v18  ;;  %v6304_v62 = vadd.f32 1.0, %v6303_v63  ;;  %vm6731_vm5 = vcmp.lt.s32.totalorder %v6730_v41, 0  ;;  %v6732_v17 = vsub.s32 0, %v6730_v41 }
 0x6f3   : > { %v6305_v23 = vmul.f32 %v6304_v62, %v6289_v19  ;;  %v6314_v6 = vxor.u32 2147483648, %v6297_v13  ;;  %v6733_v42 = vsel %vm6731_vm5, %v6732_v17, %v6730_v41  ;;  %v6752_v19 = vsub.s32 4, %v6728_v52  ;;  %v16448_v62 = vpop.f32.mrf.mxu2 }
 0x6f4   : > { %v6734_v16 = vclz %v6733_v42 }
 0x6f5   : > { %v6311_v55 = vxor.u32 2147483648, %v6305_v23  ;;  %v6315_v46 = vsel %vm6313_vm8, %v6314_v6, %v6305_v23  ;;  %v8182_v61 = vsel %vm8180_vm7, %v6314_v6, %v6305_v23  ;;  %v6753_v15 = vsel %vm6630_vm11, %v6752_v19, %v6728_v52 }
 0x6f6   : > { %v10560_v11 = vadd.s32 4294967294, %v6734_v16  ;;  %v6755_v58 = vsel %vm6629_vm13, 0, %v6753_v15  ;;  %vm6771_vm8 = vweird.f32 %v16152_v12 }
 0x6f7   : > { %v6312_v51 = vsel %vm6310_vm6, %v6297_v13, %v6311_v55  ;;  %v8179_v33 = vsel %vm8177_vm0, %v6297_v13, %v6311_v55  ;;  %v6772_v27 = vadd.s32 3, %v6755_v58  ;;  %v8637_v18 = vand.u32 3, %v6755_v58  ;;  %v16446_v13 = vpop.f32.mrf.mxu1 }
 0x6f8   : > { %v6316_v4 = vsel %vm6309_vm2, %v6312_v51, %v6315_v46  ;;  %vm10561_vm15 = vcmp.lt.s32.totalorder %v10560_v11, 0  ;;  %v8183_v26 = vsel %vm8176_vm3, %v8179_v33, %v8182_v61  ;;  %v16450_v51 = vpop.f32.mrf.mxu3  ;;  %vm17045_vm6 = vcmask 523264  }
 0x6f9   : > { %v6737_v21 = vsel %vm10561_vm15, 0, %v10560_v11  ;;  %v6317_v10 = vsel %vm6306_vm14, nan, %v6316_v4  ;;  %v8184_v2 = vsel %vm6306_vm14, nan, %v8183_v26  ;;  %v6773_v22 = vand.u32 3, %v6772_v27  ;;  %v11413_v27 = vld [vmem:[%s16524_s14 + $0x18] sm:$0xff]  ;;  %vm17046_vm2 = vmmov %vm17045_vm6 }
 0x6fa   : > { %v6738_v56 = vsub.s32 32, %v6737_v21  ;;  %v6739_v7 = vshll.u32 %v6730_v41, %v6737_v21  ;;  %v6742_v14 = vsub.s32 4294967266, %v6737_v21  ;;  %v6788_v8 = vpack.c.bf16 %v6317_v10, %v6317_v10  ;;  %v16444_v41 = vpop.f32.mrf.mxu0  ;;  %10148 = vmatpush.bf16.msra.mxu2 %v11413_v27  ;;  %vm17047_vm14 = vmmov %vm17046_vm2 }
 0x6fb   : > { %v8652_v45 = vpack.c.bf16 %v8184_v2, %v8184_v2  ;;  %vm6778_vm4 = vcmp.eq.s32.totalorder %v6773_v22, 2  ;;  %vm8642_vm12 = vcmp.eq.s32.totalorder %v8637_v18, 2  ;;  %vm6774_vm10 = vcmp.lt.s32.totalorder %v6773_v22, 2  ;;  %vm17048_vm15 = vmmov %vm17046_vm2 }
 0x6fc   : > { %v6740_v32 = vshrl.u32 %v6722_v24, %v6738_v56  ;;  %v6743_v48 = vadd.s32 127, %v6742_v14  ;;  %6796 = vst [vmem:[#allocation3 + $0xa4] sm:$0xf] %v6788_v8  ;;  %vm6775_vm1 = vcmp.eq.s32.totalorder %v6773_v22, 0  ;;  %vm8639_vm9 = vcmp.eq.s32.totalorder %v8637_v18, 0 }
 0x6fd   : > { %8660 = vst [vmem:[#allocation3 + $0xb0] sm:$0xf] %v8652_v45  ;;  %vm8638_vm5 = vcmp.lt.s32.totalorder %v8637_v18, 2  ;;  %v11468_v14 = vld [vmem:[%s16523_s13] ss:$0 sm:$0xff] }
 0x6fe   : > { %v6741_v29 = vor.u32 %v6740_v32, %v6739_v7  ;;  %v6744_v35 = vshll.u32 %v6743_v48, 23  ;;  %v9882_v7 = vpop.f32.mrf.mxu2  ;;  %v9828_v10 = vadd.f32 %v11468_v14, %v9827_v31 }
 0x6ff   : > { %v9901_v24 = vpop.f32.mrf.mxu1 }
 0x700   : > { %v6745_v44 = vor.u32 4788187, %v6744_v35  ;;  %v6748_v40 = vcvt.s32.f32 %v6741_v29  ;;  %v9883_v29 = vadd.f32 %v9882_v7, %v15974_v0  ;;  %v9920_v33 = vpop.f32.mrf.mxu3 }
 0x702   : > { %v6746_v49 = vand.u32 2147483647, %v6745_v44  ;;  %v16456_v34 = vpop.f32.mrf.mxu0  ;;  %v9902_v44 = vadd.f32 %v9901_v24, %v9883_v29 }
 0x703   : > { %v11280_v26 = vld [vmem:[#allocation3 + $0xa4] sm:$0xf] }
 0x704   : > { %v6749_v36 = vmul.f32 %v6748_v40, %v6746_v49 }
 0x706   : > { %v6750_v38 = vxor.u32 2147483648, %v6749_v36  ;;  %v9884_v49 = vpop.f32.mrf.mxu2 }
 0x707   : > { %v9903_v61 = vpop.f32.mrf.mxu1 }
 0x708   : > { %v6751_v30 = vsel %vm6630_vm11, %v6750_v38, %v6749_v36  ;;  %v10716_v36 = vld [vmem:[#allocation3 + $0xb0] sm:$0xf] }
 0x709   : > { %v6754_v5 = vsel %vm6629_vm13, %v16152_v12, %v6751_v30  ;;  %v9847_v12 = vadd.f32 %v9846_v20, %v9828_v10 }
 0x70a   : > { %v6756_v25 = vmul.f32 %v6754_v5, %v6754_v5  ;;  %v9939_v45 = vpop.f32.mrf.mxu0 }
 0x70b   : > { %v9866_v40 = vadd.f32 %v9865_v28, %v9847_v12  ;;  %v9921_v28 = vadd.f32 %v9920_v33, %v9902_v44 }
 0x70c   : > { %v6757_v59 = vmul.f32 -0.001358992, %v6756_v25  ;;  %v6764_v50 = vmul.f32 -0.00019511016, %v6756_v25 }
 0x70d   : > { %v9885_v2 = vadd.f32 %v9884_v49, %v9866_v40 }
 0x70e   : > { %v6758_v47 = vadd.f32 0.041655596, %v6757_v59  ;;  %v6765_v9 = vadd.f32 0.008332121, %v6764_v50  ;;  %v9953_v20 = vpop.f32.mrf.mxu2  ;;  %v9940_v50 = vadd.f32 %v9939_v45, %v9921_v28  ;;  %v11417_v28 = vld [vmem:[%s16526_s16 + $0x18] sm:$0xff] }
 0x70f   : > { %v9904_v19 = vadd.f32 %v9903_v61, %v9885_v2  ;;  %v9972_v0 = vpop.f32.mrf.mxu1  ;;  %10215 = vmatpush.bf16.msrb.mxu1 %v11417_v28 }
 0x710   : > { %v6759_v37 = vmul.f32 %v6758_v47, %v6756_v25  ;;  %v6766_v60 = vmul.f32 %v6765_v9, %v6756_v25 }
 0x712   : > { %v6760_v54 = vadd.f32 -0.4999988, %v6759_v37  ;;  %v6767_v52 = vadd.f32 -0.16666654, %v6766_v60 }
 0x714   : > { %v6761_v63 = vmul.f32 %v6760_v54, %v6756_v25  ;;  %v6768_v1 = vmul.f32 %v6767_v52, %v6756_v25  ;;  %v9941_v25 = vpop.f32.mrf.mxu0 }
 0x716   : > { %v6762_v17 = vadd.f32 1.0, %v6761_v63  ;;  %v6769_v23 = vadd.f32 1.0, %v6768_v1  ;;  %v9955_v59 = vpop.f32.mrf.mxu2  ;;  %v9878_v1 = vadd.f32 %v16440_v43, %v15879_v39  ;;  %v9880_v39 = vadd.f32 %v16448_v62, %v15932_v3 }
 0x717   : > { %v9974_v58 = vpop.f32.mrf.mxu1 }
 0x718   : > { %v6770_v6 = vmul.f32 %v6769_v23, %v6754_v5  ;;  %v6779_v42 = vxor.u32 2147483648, %v6762_v17  ;;  %v9922_v5 = vpop.f32.mrf.mxu3  ;;  %v9899_v24 = vadd.f32 %v16446_v13, %v9880_v39  ;;  %v11414_v39 = vld [vmem:[%s16526_s16] sm:$0xff] }
 0x719   : > { %v9923_v37 = vadd.f32 %v9922_v5, %v9904_v19 }
 0x71a   : > { %v6776_v55 = vxor.u32 2147483648, %v6770_v6  ;;  %v6780_v16 = vsel %vm6778_vm4, %v6779_v42, %v6770_v6  ;;  %v8644_v46 = vsel %vm8642_vm12, %v6779_v42, %v6770_v6  ;;  %v9918_v14 = vadd.f32 %v16450_v51, %v9899_v24 }
 0x71b   : > { %v9942_v22 = vadd.f32 %v9941_v25, %v9923_v37 }
 0x71c   : > { %v6777_v11 = vsel %vm6775_vm1, %v6762_v17, %v6776_v55  ;;  %v8641_v4 = vsel %vm8639_vm9, %v6762_v17, %v6776_v55  ;;  %v10010_v9 = vpop.f32.mrf.mxu0  ;;  %v11412_v17 = vld [vmem:[%s16524_s14 + $0x10] sm:$0xff]  ;;  %v9897_v55 = vadd.f32 %v16438_v53, %v9878_v1  ;;  %v11410_v53 = vld [vmem:[%s16524_s14] sm:$0xff]  ;;  %v9937_v3 = vadd.f32 %v16456_v34, %v9918_v14 }
 0x71d   : > { %v6781_v21 = vsel %vm6774_vm10, %v6777_v11, %v6780_v16  ;;  %v8645_v56 = vsel %vm8638_vm5, %v8641_v4, %v8644_v46  ;;  %10149 = vmatpush.bf16.msra.mxu2 %v11412_v17  ;;  %v11411_v46 = vld [vmem:[%s16524_s14 + $0x8] sm:$0xff] }
 0x71e   : > { %v6782_v32 = vsel %vm6771_vm8, nan, %v6781_v21  ;;  %v8646_v48 = vsel %vm6771_vm8, nan, %v8645_v56  ;;  %v9958_v54 = vpop.f32.mrf.mxu2  ;;  %v9916_v43 = vadd.f32 %v16442_v57, %v9897_v55  ;;  %v9956_v62 = vadd.f32 %v9955_v59, %v9937_v3  ;;  %v11416_v59 = vld [vmem:[%s16526_s16 + $0x10] sm:$0xff] }
 0x71f   : > { %v6790_v35 = vpack.c.bf16 %v6782_v32, %v6782_v32  ;;  %v8654_v8 = vpack.c.bf16 %v8646_v48, %v8646_v48  ;;  %v9977_v60 = vpop.f32.mrf.mxu1  ;;  %v9959_v52 = vadd.f32 %v9958_v54, %v9940_v50  ;;  %10216 = vmatpush.bf16.msrb.mxu1 %v11416_v59  ;;  %v11415_v50 = vld [vmem:[%s16526_s16 + $0x8] sm:$0xff] }
 0x720   : > { %v9991_v47 = vpop.f32.mrf.mxu3  ;;  %v9935_v21 = vadd.f32 %v16444_v41, %v9916_v43  ;;  %v9975_v29 = vadd.f32 %v9974_v58, %v9956_v62 }
 0x721   : > { %6798 = vst [vmem:[#allocation3 + $0xe0] sm:$0xf] %v6790_v35  ;;  %v9978_v18 = vadd.f32 %v9977_v60, %v9959_v52  ;;  %10150 = vmatpush.bf16.msra.mxu2 %v11411_v46 }
 0x722   : > { %8662 = vst [vmem:[#allocation3 + $0xec] sm:$0xf] %v8654_v8  ;;  %v9954_v7 = vadd.f32 %v9953_v20, %v9935_v21 }
 0x723   : > { %10217 = vmatpush.bf16.msrb.mxu1 %v11415_v50 }
 0x724   : > { %v10012_v6 = vpop.f32.mrf.mxu0  ;;  %v9973_v10 = vadd.f32 %v9972_v0, %v9954_v7 }
 0x725   : > { %10151 = vmatpush.bf16.msra.mxu2 %v11410_v53 }
 0x726   : > { %v9960_v23 = vpop.f32.mrf.mxu2  ;;  %v9992_v57 = vadd.f32 %v9991_v47, %v9973_v10 }
 0x727   : > { %v9961_v42 = vadd.f32 %v9960_v23, %v9942_v22  ;;  %v9979_v16 = vpop.f32.mrf.mxu1  ;;  %10218 = vmatpush.bf16.msrb.mxu1 %v11414_v39 }
 0x728   : > { %v10702_v31 = vld [vmem:[#allocation3 + $0xdc] sm:$0xf0]  ;;  %v9993_v63 = vpop.f32.mrf.mxu3  ;;  %v10011_v13 = vadd.f32 %v10010_v9, %v9992_v57 }
 0x729   : > { %v10705_v38 = vor.u32 %v11280_v26, %v10702_v31  ;;  %v11289_v30 = vld [vmem:[#allocation3 + $0xe8] sm:$0xf0]  ;;  %v9980_v11 = vadd.f32 %v9979_v16, %v9961_v42  ;;  %v9994_v44 = vadd.f32 %v9993_v63, %v9975_v29 }
 0x72a   : > { %v10717_v15 = vor.u32 %v11289_v30, %v10716_v36 }
 0x72b   : > { %10033 = vmatmul.bf16.gmra.mxu2 %v10705_v38  ;;  %v10013_v61 = vadd.f32 %v10012_v6, %v9994_v44 }
 0x72c   : > { %10090 = vmatmul.bf16.gmra.mxu0 %v10717_v15  ;;  %v10015_v56 = vpop.f32.mrf.mxu0 }
 0x72f   : > { %v10048_v35 = vpop.f32.mrf.mxu1 }
 0x730   : > { %v9996_v4 = vpop.f32.mrf.mxu3 }
 0x731   : > { %v9997_v20 = vadd.f32 %v9996_v4, %v9978_v18  ;;  %v11444_v4 = vld [vmem:[%s16525_s15] ss:$0 sm:$0xff] }
 0x733   : > { %v10016_v5 = vadd.f32 %v10015_v56, %v9997_v20 }
 0x734   : > { %v10017_v48 = vpop.f32.mrf.mxu0 }
 0x737   : > { %v10050_v2 = vpop.f32.mrf.mxu1 }
 0x738   : > { %v9998_v32 = vpop.f32.mrf.mxu3 }
 0x739   : > { %v9999_v25 = vadd.f32 %v9998_v32, %v9980_v11 }
 0x73b   : > { %v10018_v58 = vadd.f32 %v10017_v48, %v9999_v25 }
 0x740   : > { %v10067_v12 = vpop.f32.mrf.mxu3 }
 0x748   : > { %v10069_v31 = vpop.f32.mrf.mxu3 }
 0x750   : > { %v10072_v37 = vpop.f32.mrf.mxu3 }
 0x758   : > { %v10074_v17 = vpop.f32.mrf.mxu3 }
 0x75a   : > { %v10086_v40 = vpop.f32.mrf.mxu0 }
 0x75c   : > { %v10053_v47 = vpop.f32.mrf.mxu1 }
 0x75f   : > { %v10029_v41 = vpop.f32.mrf.mxu2 }
 0x760   : > { %v10030_v8 = vadd.f32 %v10029_v41, %v10011_v13  ;;  %v11445_v13 = vld [vmem:[%s16527_s17] ss:$0 sm:$0xff] }
 0x762   : > { %v10049_v33 = vadd.f32 %v10048_v35, %v10030_v8  ;;  %v10088_v19 = vpop.f32.mrf.mxu0 }
 0x764   : > { %v10068_v51 = vadd.f32 %v10067_v12, %v10049_v33  ;;  %v10055_v63 = vpop.f32.mrf.mxu1 }
 0x766   : > { %v10087_v34 = vadd.f32 %v10086_v40, %v10068_v51 }
 0x767   : > { %v10031_v49 = vpop.f32.mrf.mxu2 }
 0x768   : > { %v10032_v26 = vadd.f32 %v10031_v49, %v10013_v61  ;;  %v10096_v30 = vmax.f32 %v10087_v34, 0.0 }
 0x76a   : > { %v10051_v36 = vadd.f32 %v10050_v2, %v10032_v26 }
 0x76c   : > { %v10070_v45 = vadd.f32 %v10069_v31, %v10051_v36 }
 0x76e   : > { %v10089_v38 = vadd.f32 %v10088_v19, %v10070_v45 }
 0x770   : > { %v10097_v15 = vmax.f32 %v10089_v38, 0.0 }
 0x772   : > { %v10108_v0 = vpack.c.bf16 %v10097_v15, %v10096_v30 }
 0x774   : > { %11214 = vmatmul.msk.bf16.vlgmr.msra.gmra.mxu2 %vm17045_vm6, %v10108_v0 }
 0x7a9   : > { %v10091_v60 = vpop.f32.mrf.mxu0 }
 0x7ae   : > { %v10034_v9 = vpop.f32.mrf.mxu2 }
 0x7af   : > { %v10035_v27 = vadd.f32 %v10034_v9, %v10016_v5 }
 0x7b1   : > { %v10054_v54 = vadd.f32 %v10053_v47, %v10035_v27  ;;  %v10093_v42 = vpop.f32.mrf.mxu0 }
 0x7b3   : > { %v10073_v22 = vadd.f32 %v10072_v37, %v10054_v54 }
 0x7b5   : > { %v10092_v23 = vadd.f32 %v10091_v60, %v10073_v22 }
 0x7b6   : > { %v10036_v52 = vpop.f32.mrf.mxu2 }
 0x7b7   : > { %v10037_v18 = vadd.f32 %v10036_v52, %v10018_v58  ;;  %v10098_v16 = vmax.f32 %v10092_v23, 0.0 }
 0x7b9   : > { %v10056_v1 = vadd.f32 %v10055_v63, %v10037_v18 }
 0x7bb   : > { %v10075_v6 = vadd.f32 %v10074_v17, %v10056_v1 }
 0x7bd   : > { %v10094_v55 = vadd.f32 %v10093_v42, %v10075_v6 }
 0x7bf   : > { %v10099_v46 = vmax.f32 %v10094_v55, 0.0 }
 0x7c1   : > { %v10109_v11 = vpack.c.bf16 %v10099_v46, %v10098_v16 }
 0x7c3   : > { %11215 = vmatmul.msk.bf16.gmra.mxu2 %vm17046_vm2, %v10109_v11 }
 0x7f7   : > { %v10153_v43 = vpop.f32.mrf.mxu2 }
 0x7f8   : > { %v10154_v24 = vadd.f32 %v11444_v4, %v10153_v43 }
 0x7fa   : > { %v10163_v7 = vmax.f32 %v10154_v24, 0.0 }
 0x7ff   : > { %v10155_v21 = vpop.f32.mrf.mxu2 }
 0x800   : > { %v10156_v56 = vadd.f32 %v11444_v4, %v10155_v21 }
 0x802   : > { %v10164_v53 = vmax.f32 %v10156_v56, 0.0 }
 0x804   : > { %v10175_v14 = vpack.c.bf16 %v10164_v53, %v10163_v7 }
 0x806   : > { %11232 = vmatmul.msk.bf16.vlgmr.msrb.gmra.mxu1 %vm17047_vm14, %v10175_v14 }
 0x846   : > { %v10158_v10 = vpop.f32.mrf.mxu2 }
 0x847   : > { %v10159_v32 = vadd.f32 %v11444_v4, %v10158_v10 }
 0x849   : > { %v10165_v57 = vmax.f32 %v10159_v32, 0.0 }
 0x84e   : > { %v10160_v3 = vpop.f32.mrf.mxu2 }
 0x84f   : > { %v10161_v62 = vadd.f32 %v11444_v4, %v10160_v3 }
 0x851   : > { %v10166_v48 = vmax.f32 %v10161_v62, 0.0 }
 0x853   : > { %v10176_v29 = vpack.c.bf16 %v10166_v48, %v10165_v57 }
 0x855   : > { %11233 = vmatmul.msk.bf16.gmra.mxu1 %vm17048_vm15, %v10176_v29 }
 0x883   : > { %v10220_v35 = vpop.f32.mrf.mxu1 }
 0x884   : > { %v10221_v41 = vadd.f32 %v11445_v13, %v10220_v35 }
 0x886   : > { %10230 = vst [vmem:[%s599_s0] sm:$0xff] %v10221_v41 }
 0x88b   : > { %v10222_v8 = vpop.f32.mrf.mxu1 }
 0x88c   : > { %v10223_v12 = vadd.f32 %v11445_v13, %v10222_v8 }
 0x88e   : > { %10231 = vst [vmem:[%s599_s0 + $0x8] sm:$0xff] %v10223_v12 }
 0x8d2   : > { %v10225_v44 = vpop.f32.mrf.mxu1 }
 0x8d3   : > { %v10226_v40 = vadd.f32 %v11445_v13, %v10225_v44 }
 0x8d5   : > { %10232 = vst [vmem:[%s599_s0 + $0x10] sm:$0xff] %v10226_v40 }
 0x8da   : > { %v10227_v33 = vpop.f32.mrf.mxu1 }
 0x8db   : > { %v10228_v61 = vadd.f32 %v11445_v13, %v10227_v33 }
 0x8dd   : > { %10233 = vst [vmem:[%s599_s0 + $0x18] sm:$0xff] %v10228_v61 }
 0x8de PF: > { %s28_s27 = sadd.s32 1, %s11475_s27  }
 0x8df   : > { %p25_p4 = scmp.ge.s32.totalorder %s28_s27, 4  }
 0x8e1   :  { %27 = sbr.rel (!%p25_p4) target bundleno = 4 (0x4), region = 134 }

</bundles_post_ra>
